<compile_context>
chip_gen: v7x
topology: tpu7x:2x2x1
jax: 0.10.0
libtpu: 0.0.40
codegen_flags: <defaults>
</compile_context>

<pallas_src>
from functools import partial

import numpy as np
import jax
import jax.numpy as jnp
from jax.experimental import pallas as pl
from jax.experimental.pallas import tpu as pltpu


def _info_share_kernel(tau_ref, hmats_ref, wmats_ref, img_ref, ksp_ref,
                       mask_ref, sm_ref, oimg_ref, oksp_ref, *, precision):
    cb = pl.program_id(2)
    _, _, _, cblk, H, W = ksp_ref.shape

    # Scalars (1 - tau precomputed on the host).
    tau_k, om_tau_k = tau_ref[0], tau_ref[1]
    tau_i, om_tau_i = tau_ref[2], tau_ref[3]

    img_r = img_ref[0, 0, 0]                          # (H, W)
    img_i = img_ref[0, 0, 1]
    # Hoist the (1, W) -> (H, W) mask broadcast once per grid step.
    m = jnp.broadcast_to(mask_ref[0, 0], (H, W))

    # Constant DFT planes: [real, imag, real+imag].  The inverse transforms are
    # the elementwise conjugates and reuse the same planes (sign flips folded
    # into the Karatsuba formulas below) -- no separate inverse planes in VMEM.
    fh_r, fh_i, fh_s = hmats_ref[0], hmats_ref[1], hmats_ref[2]   # (H, H)
    fw_r, fw_i, fw_s = wmats_ref[0], wmats_ref[1], wmats_ref[2]   # (W, W) = Fc_W^T

    kr = ksp_ref[0, 0, 0]                             # (cblk, H, W)
    ki = ksp_ref[0, 0, 1]
    smr = sm_ref[0, 0]                                # (cblk, H, W)
    smi = sm_ref[0, 1]

    def dot(a, b):
        return jnp.dot(a, b, preferred_element_type=jnp.float32,
                       precision=precision)

    # Gauss/Karatsuba complex matmuls: 3 real MXU matmuls each; the constant
    # side's r+i sum plane is precomputed on the host.
    def right_dft(br, bi):            # (.) @ Fc_W^T
        t1, t2 = dot(br, fw_r), dot(bi, fw_i)
        t3 = dot(br + bi, fw_s)
        return t1 - t2, t3 - t1 - t2

    def right_idft(br, bi):           # (.) @ conj(Fc_W^T) = (.) @ IFc_W^T
        t1, t2 = dot(br, fw_r), dot(bi, fw_i)
        t3 = dot(br - bi, fw_s)
        return t1 + t2, t1 - t2 - t3

    def left_dft(br, bi):             # Fc_H @ (.)
        t1, t2 = dot(fh_r, br), dot(fh_i, bi)
        t3 = dot(fh_s, br + bi)
        return t1 - t2, t3 - t1 - t2

    def left_idft(br, bi):            # conj(Fc_H) @ (.) = IFc_H @ (.)
        t1, t2 = dot(fh_r, br), dot(fh_i, bi)
        t3 = dot(fh_s, br - bi)
        return t1 + t2, t1 - t2 - t3

    # ---- forward op A(x) = mask * FFT2c(smaps * image), all coils at once ---
    pr = smr * img_r[None] - smi * img_i[None]        # (cblk, H, W)
    pi = smr * img_i[None] + smi * img_r[None]
    # Right-side DFT with all coils stacked along the matmul M dim (the
    # (cblk, H, W) -> (cblk*H, W) reshape only collapses leading dims).
    yr, yi = right_dft(pr.reshape(cblk * H, W), pi.reshape(cblk * H, W))
    yr = yr.reshape(cblk, H, W)
    yi = yi.reshape(cblk, H, W)

    # ---- adjoint op A^H(y) = sum_c conj(smaps) * IFFT2c(mask * kspace) ------
    mkr = m[None] * kr
    mki = m[None] * ki
    wr, wi = right_idft(mkr.reshape(cblk * H, W), mki.reshape(cblk * H, W))
    wr = wr.reshape(cblk, H, W)
    wi = wi.reshape(cblk, H, W)

    acc_r = jnp.zeros((H, W), jnp.float32)
    acc_i = jnp.zeros((H, W), jnp.float32)
    # Left-side (H, H) DFTs per coil (N-stacking them would need a
    # (coil,H)->(H,coil) relayout; not worth it without a measured win).
    for c in range(cblk):
        zr, zi = left_dft(yr[c], yi[c])
        # new_kspace = tau_k * kspace + (1 - tau_k) * mask * FFT2c(smaps*img)
        oksp_ref[0, 0, 0, c] = tau_k * kr[c] + om_tau_k * (m * zr)
        oksp_ref[0, 0, 1, c] = tau_k * ki[c] + om_tau_k * (m * zi)

        ur, ui = left_idft(wr[c], wi[c])
        # conj(smaps) * IFFT2c(mask * kspace), coil-combined.
        acc_r = acc_r + (smr[c] * ur + smi[c] * ui)
        acc_i = acc_i + (smr[c] * ui - smi[c] * ur)

    # Adjoint coil-combine goes straight into the resident output image block
    # (same block index across the coil-block axis => it stays in VMEM).
    @pl.when(cb == 0)
    def _():
        oimg_ref[0, 0, 0] = tau_i * img_r
        oimg_ref[0, 0, 1] = tau_i * img_i

    oimg_ref[0, 0, 0] += om_tau_i * acc_r
    oimg_ref[0, 0, 1] += om_tau_i * acc_i


def _centered_dft_matrix(n):
    """Matrix of the 1-D centered, ortho-normalized DFT along axis 0.

    Its inverse is the elementwise conjugate (unitary DFT, real centering
    permutations), so only the forward matrix is shipped to the kernel.
    """
    eye = np.eye(n, dtype=np.complex64)
    f = np.fft.fftshift(np.fft.fft(np.fft.ifftshift(eye, axes=0),
                                   axis=0, norm="ortho"), axes=0)
    return f.astype(np.complex64)


def _pick_coil_block(n_coils, H, W, budget_bytes=40 << 20):
    """Largest divisor of n_coils whose per-step VMEM footprint fits `budget`.

    Budget is sized for v7x's 64 MiB VMEM; v5e/v6e (128 MiB) simply get more
    slack.  Per coil: ksp in + ksp out + smaps (r/i planes, double-buffered)
    plus the stacked-matmul intermediates ~= 16 f32 planes.
    """
    per_coil = 16 * H * W * 4
    fixed = (16 * H * W + 6 * (H * H + W * W)) * 4 * 2 + (2 << 20)
    best = 1
    for cand in range(1, n_coils + 1):
        if n_coils % cand == 0 and fixed + per_coil * cand <= budget_bytes:
            best = cand
    return best


def info_share_layer(image, kspace, mask, smaps, tau_ksp_param, tau_img_param,
                     train_scale=1.0, coil_block=None,
                     precision=jax.lax.Precision.HIGHEST):
    """Pallas implementation of InfoShareLayer.forward.

    image : [B, T, H, W, 2] float32 (simulated complex)
    kspace: [B, T, H, W, C] complex64
    mask  : [B, T, 1, W, 1] bool
    smaps : [B, 1, H, W, C] complex64
    returns (new_image [B,T,H,W,1] complex64, new_kspace [B,T,H,W,C] complex64)

    `precision` controls the MXU contraction precision of the dense DFT
    matmuls (HIGHEST = fp32-accurate multi-pass; DEFAULT = single-pass bf16,
    fastest, recommended on v5e if the accuracy budget allows).
    """
    B, T, H, W, _ = image.shape
    C = kspace.shape[-1]

    # Scalar module: weight = clamp(param, min=0) * train_scale.
    tau_k = jnp.maximum(tau_ksp_param.reshape(()), 0.0) * train_scale
    tau_i = jnp.maximum(tau_img_param.reshape(()), 0.0) * train_scale
    taus = jnp.stack([tau_k, 1.0 - tau_k, tau_i, 1.0 - tau_i]).astype(jnp.float32)

    # Planar real/imag layouts with a stacked leading r/i axis so the kernel
    # sees single f32 streams (9 streams total instead of 14 in v2).
    # TODO(synk): if the caller can keep coil-major planar layouts end-to-end,
    # these interface transposes (extra HBM passes over kspace) disappear.
    img_ri = jnp.transpose(image, (0, 1, 4, 2, 3)).astype(jnp.float32)        # [B,T,2,H,W]
    ksp_t = jnp.transpose(kspace, (0, 1, 4, 2, 3))                            # [B,T,C,H,W]
    ksp_ri = jnp.stack([jnp.real(ksp_t), jnp.imag(ksp_t)],
                       axis=2).astype(jnp.float32)                            # [B,T,2,C,H,W]
    sm_t = jnp.transpose(smaps[:, 0], (0, 3, 1, 2))                           # [B,C,H,W]
    sm_ri = jnp.stack([jnp.real(sm_t), jnp.imag(sm_t)],
                      axis=1).astype(jnp.float32)                             # [B,2,C,H,W]
    mask_f = mask.astype(jnp.float32)[..., 0]                                 # [B,T,1,W]

    # Constant DFT planes: [real, imag, real+imag] (Karatsuba constant-side
    # sum precomputed; inverse == conj handled inside the kernel).
    fH = _centered_dft_matrix(H)
    fWt = _centered_dft_matrix(W).T
    hmats = jnp.asarray(np.stack(
        [fH.real, fH.imag, fH.real + fH.imag]).astype(np.float32))            # [3,H,H]
    wmats = jnp.asarray(np.stack(
        [fWt.real, fWt.imag, fWt.real + fWt.imag]).astype(np.float32))        # [3,W,W]

    if coil_block is None:
        coil_block = _pick_coil_block(C, H, W)
    n_cb = C // coil_block

    # Explicit VMEM plan: fits v7x's 64 MiB; v5e/v6e get more allowed headroom.
    est_bytes = (16 * H * W * 4) * coil_block \
        + (16 * H * W + 6 * (H * H + W * W)) * 8 + (2 << 20)
    vmem_limit = int(min(96 << 20, max(32 << 20, 2 * est_bytes)))

    smem_spec = pl.BlockSpec(memory_space=pltpu.MemorySpace.SMEM)
    in_specs = [
        smem_spec,                                                       # taus
        # Constant index_map => DFT planes are DMA'd once per core.
        pl.BlockSpec((3, H, H), lambda b, t, cb: (0, 0, 0)),             # hmats
        pl.BlockSpec((3, W, W), lambda b, t, cb: (0, 0, 0)),             # wmats
        pl.BlockSpec((1, 1, 2, H, W),
                     lambda b, t, cb: (b, t, 0, 0, 0)),                  # image
        pl.BlockSpec((1, 1, 2, coil_block, H, W),
                     lambda b, t, cb: (b, t, 0, cb, 0, 0)),              # kspace
        pl.BlockSpec((1, 1, 1, W), lambda b, t, cb: (b, t, 0, 0)),       # mask
        # smaps index_map does not depend on t: with the default single coil
        # block they are fetched once per batch and stay resident across T.
        pl.BlockSpec((1, 2, coil_block, H, W),
                     lambda b, t, cb: (b, 0, cb, 0, 0)),                 # smaps
    ]
    out_specs = [
        pl.BlockSpec((1, 1, 2, H, W),
                     lambda b, t, cb: (b, t, 0, 0, 0)),                  # new image
        pl.BlockSpec((1, 1, 2, coil_block, H, W),
                     lambda b, t, cb: (b, t, 0, cb, 0, 0)),              # new kspace
    ]
    out_shape = (
        jax.ShapeDtypeStruct((B, T, 2, H, W), jnp.float32),
        jax.ShapeDtypeStruct((B, T, 2, C, H, W), jnp.float32),
    )

    oimg_ri, oksp_ri = pl.pallas_call(
        partial(_info_share_kernel, precision=precision),
        grid=(B, T, n_cb),
        in_specs=in_specs,
        out_specs=out_specs,
        out_shape=out_shape,
        compiler_params=pltpu.CompilerParams(
            dimension_semantics=("parallel", "parallel", "arbitrary"),
            vmem_limit_bytes=vmem_limit),
    )(taus, hmats, wmats, img_ri, ksp_ri, mask_f, sm_ri)

    new_image = jax.lax.complex(oimg_ri[:, :, 0], oimg_ri[:, :, 1])[..., None]
    new_kspace = jnp.transpose(
        jax.lax.complex(oksp_ri[:, :, 0], oksp_ri[:, :, 1]), (0, 1, 3, 4, 2))
    return new_image, new_kspace


def _reference(image, kspace, mask, smaps, tau_ksp_param, tau_img_param,
               train_scale=1.0):
    """Pure-JAX (jnp.fft) reference with the same assumed op convention."""
    tau_k = jnp.maximum(tau_ksp_param.reshape(()), 0.0) * train_scale
    tau_i = jnp.maximum(tau_img_param.reshape(()), 0.0) * train_scale
    img = jax.lax.complex(image[..., 0], image[..., 1])              # [B,T,H,W]
    m = mask.astype(jnp.float32)                                     # [B,T,1,W,1]
    sm = smaps[:, 0]                                                 # [B,H,W,C]

    def fft2c(x):
        return jnp.fft.fftshift(jnp.fft.fft2(
            jnp.fft.ifftshift(x, axes=(2, 3)), axes=(2, 3), norm="ortho"),
            axes=(2, 3))

    def ifft2c(x):
        return jnp.fft.fftshift(jnp.fft.ifft2(
            jnp.fft.ifftshift(x, axes=(2, 3)), axes=(2, 3), norm="ortho"),
            axes=(2, 3))

    ksp_from_img = m * fft2c(img[..., None] * sm[:, None])
    new_ksp = tau_k * kspace + (1.0 - tau_k) * ksp_from_img
    img_from_ksp = jnp.sum(jnp.conj(sm[:, None]) * ifft2c(m * kspace), axis=-1)
    new_img = (tau_i * img + (1.0 - tau_i) * img_from_ksp)[..., None]
    return new_img, new_ksp


if __name__ == "__main__":
    B, T, H, W, C = 2, 3, 16, 16, 4
    key = jax.random.PRNGKey(0)
    k1, k2, k3, k4, k5, k6 = jax.random.split(key, 6)

    image = jax.random.normal(k1, (B, T, H, W, 2), dtype=jnp.float32)
    kspace = jax.lax.complex(
        jax.random.normal(k2, (B, T, H, W, C), dtype=jnp.float32),
        jax.random.normal(k3, (B, T, H, W, C), dtype=jnp.float32))
    mask = jax.random.bernoulli(k4, 0.5, (B, T, 1, W, 1))
    smaps = jax.lax.complex(
        jax.random.normal(k5, (B, 1, H, W, C), dtype=jnp.float32),
        jax.random.normal(k6, (B, 1, H, W, C), dtype=jnp.float32))

    # Deterministic parameter init matching the module: Scalar(init=0.5) twice.
    tau_ksp_param = jnp.array([0.5], dtype=jnp.float32)
    tau_img_param = jnp.array([0.5], dtype=jnp.float32)

    try:
        new_image, new_kspace = info_share_layer(
            image, kspace, mask, smaps, tau_ksp_param, tau_img_param)
    except Exception:
        # Older Mosaic builds may not accept HIGHEST contraction precision in
        # the Pallas dot lowering; fall back to the (bf16 single-pass) default.
        new_image, new_kspace = info_share_layer(
            image, kspace, mask, smaps, tau_ksp_param, tau_img_param,
            precision=jax.lax.Precision.DEFAULT)
    jax.block_until_ready((new_image, new_kspace))

    assert new_image.shape == (B, T, H, W, 1) and new_image.dtype == jnp.complex64
    assert new_kspace.shape == (B, T, H, W, C) and new_kspace.dtype == jnp.complex64

    # Loose-tolerance self-check against a pure-JAX jnp.fft reference (loose
    # enough to pass under either MXU precision; catches structural bugs).
    ref_img, ref_ksp = _reference(image, kspace, mask, smaps,
                                  tau_ksp_param, tau_img_param)
    scale_i = float(jnp.max(jnp.abs(ref_img))) + 1e-6
    scale_k = float(jnp.max(jnp.abs(ref_ksp))) + 1e-6
    err_i = float(jnp.max(jnp.abs(new_image - ref_img)))
    err_k = float(jnp.max(jnp.abs(new_kspace - ref_ksp)))
    assert err_i <= 5e-2 * scale_i, (err_i, scale_i)
    assert err_k <= 5e-2 * scale_k, (err_k, scale_k)

    print("KERNEL_OK")
</pallas_src>

<mosaic_0001>
module attributes {stable_mosaic.version = 11 : i64} {
  func.func @_info_share_kernel(%arg0: i32, %arg1: i32, %arg2: i32, %arg3: memref<4xf32, #tpu.memory_space<smem>>, %arg4: memref<3x16x16xf32, #tpu.memory_space<vmem>>, %arg5: memref<3x16x16xf32, #tpu.memory_space<vmem>>, %arg6: memref<1x1x2x16x16xf32, #tpu.memory_space<vmem>>, %arg7: memref<1x1x2x4x16x16xf32, #tpu.memory_space<vmem>>, %arg8: memref<1x1x1x16xf32, #tpu.memory_space<vmem>>, %arg9: memref<1x2x4x16x16xf32, #tpu.memory_space<vmem>>, %arg10: memref<1x1x2x16x16xf32, #tpu.memory_space<vmem>>, %arg11: memref<1x1x2x4x16x16xf32, #tpu.memory_space<vmem>>) attributes {dimension_semantics = [#tpu.dimension_semantics<parallel>, #tpu.dimension_semantics<parallel>, #tpu.dimension_semantics<arbitrary>], iteration_bounds = array<i64: 2, 3, 1>, scalar_prefetch = 0 : i64, scratch_operands = 0 : i64, tpu.core_type = #tpu.core_type<tc>, window_params = [{transform_indices = @transform_0, window_bounds = array<i64: 4>}, {pipeline_mode = #tpu.pipeline_mode<synchronous>, transform_indices = @transform_1, window_bounds = array<i64: 3, 16, 16>}, {pipeline_mode = #tpu.pipeline_mode<synchronous>, transform_indices = @transform_2, window_bounds = array<i64: 3, 16, 16>}, {transform_indices = @transform_3, window_bounds = array<i64: 1, 1, 2, 16, 16>}, {transform_indices = @transform_4, window_bounds = array<i64: 1, 1, 2, 4, 16, 16>}, {transform_indices = @transform_5, window_bounds = array<i64: 1, 1, 1, 16>}, {transform_indices = @transform_6, window_bounds = array<i64: 1, 2, 4, 16, 16>}, {transform_indices = @transform_7, window_bounds = array<i64: 1, 1, 2, 16, 16>}, {transform_indices = @transform_8, window_bounds = array<i64: 1, 1, 2, 4, 16, 16>}]} {
    %c0 = arith.constant 0 : index
    %0 = memref.load %arg3[%c0] : memref<4xf32, #tpu.memory_space<smem>>
    %c1 = arith.constant 1 : index
    %1 = memref.load %arg3[%c1] : memref<4xf32, #tpu.memory_space<smem>>
    %c2 = arith.constant 2 : index
    %2 = memref.load %arg3[%c2] : memref<4xf32, #tpu.memory_space<smem>>
    %c3 = arith.constant 3 : index
    %3 = memref.load %arg3[%c3] : memref<4xf32, #tpu.memory_space<smem>>
    %c0_0 = arith.constant 0 : index
    %c0_1 = arith.constant 0 : index
    %c0_2 = arith.constant 0 : index
    %c0_3 = arith.constant 0 : index
    %c0_4 = arith.constant 0 : index
    %4 = vector.load %arg6[%c0_0, %c0_1, %c0_2, %c0_3, %c0_4] : memref<1x1x2x16x16xf32, #tpu.memory_space<vmem>>, vector<1x1x1x16x16xf32>
    %5 = vector.shape_cast %4 : vector<1x1x1x16x16xf32> to vector<16x16xf32>
    %c0_5 = arith.constant 0 : index
    %c0_6 = arith.constant 0 : index
    %c1_7 = arith.constant 1 : index
    %c0_8 = arith.constant 0 : index
    %c0_9 = arith.constant 0 : index
    %6 = vector.load %arg6[%c0_5, %c0_6, %c1_7, %c0_8, %c0_9] : memref<1x1x2x16x16xf32, #tpu.memory_space<vmem>>, vector<1x1x1x16x16xf32>
    %7 = vector.shape_cast %6 : vector<1x1x1x16x16xf32> to vector<16x16xf32>
    %c0_10 = arith.constant 0 : index
    %c0_11 = arith.constant 0 : index
    %c0_12 = arith.constant 0 : index
    %c0_13 = arith.constant 0 : index
    %8 = vector.load %arg8[%c0_10, %c0_11, %c0_12, %c0_13] : memref<1x1x1x16xf32, #tpu.memory_space<vmem>>, vector<1x1x1x16xf32>
    %9 = vector.shape_cast %8 : vector<1x1x1x16xf32> to vector<1x16xf32>
    %10 = vector.shape_cast %9 : vector<1x16xf32> to vector<1x16xf32>
    %11 = vector.broadcast %10 : vector<1x16xf32> to vector<16x16xf32>
    %c0_14 = arith.constant 0 : index
    %c0_15 = arith.constant 0 : index
    %c0_16 = arith.constant 0 : index
    %12 = vector.load %arg4[%c0_14, %c0_15, %c0_16] : memref<3x16x16xf32, #tpu.memory_space<vmem>>, vector<1x16x16xf32>
    %13 = vector.shape_cast %12 : vector<1x16x16xf32> to vector<16x16xf32>
    %c1_17 = arith.constant 1 : index
    %c0_18 = arith.constant 0 : index
    %c0_19 = arith.constant 0 : index
    %14 = vector.load %arg4[%c1_17, %c0_18, %c0_19] : memref<3x16x16xf32, #tpu.memory_space<vmem>>, vector<1x16x16xf32>
    %15 = vector.shape_cast %14 : vector<1x16x16xf32> to vector<16x16xf32>
    %c2_20 = arith.constant 2 : index
    %c0_21 = arith.constant 0 : index
    %c0_22 = arith.constant 0 : index
    %16 = vector.load %arg4[%c2_20, %c0_21, %c0_22] : memref<3x16x16xf32, #tpu.memory_space<vmem>>, vector<1x16x16xf32>
    %17 = vector.shape_cast %16 : vector<1x16x16xf32> to vector<16x16xf32>
    %c0_23 = arith.constant 0 : index
    %c0_24 = arith.constant 0 : index
    %c0_25 = arith.constant 0 : index
    %18 = vector.load %arg5[%c0_23, %c0_24, %c0_25] : memref<3x16x16xf32, #tpu.memory_space<vmem>>, vector<1x16x16xf32>
    %19 = vector.shape_cast %18 : vector<1x16x16xf32> to vector<16x16xf32>
    %c1_26 = arith.constant 1 : index
    %c0_27 = arith.constant 0 : index
    %c0_28 = arith.constant 0 : index
    %20 = vector.load %arg5[%c1_26, %c0_27, %c0_28] : memref<3x16x16xf32, #tpu.memory_space<vmem>>, vector<1x16x16xf32>
    %21 = vector.shape_cast %20 : vector<1x16x16xf32> to vector<16x16xf32>
    %c2_29 = arith.constant 2 : index
    %c0_30 = arith.constant 0 : index
    %c0_31 = arith.constant 0 : index
    %22 = vector.load %arg5[%c2_29, %c0_30, %c0_31] : memref<3x16x16xf32, #tpu.memory_space<vmem>>, vector<1x16x16xf32>
    %23 = vector.shape_cast %22 : vector<1x16x16xf32> to vector<16x16xf32>
    %c0_32 = arith.constant 0 : index
    %c0_33 = arith.constant 0 : index
    %c0_34 = arith.constant 0 : index
    %c0_35 = arith.constant 0 : index
    %c0_36 = arith.constant 0 : index
    %c0_37 = arith.constant 0 : index
    %24 = vector.load %arg7[%c0_32, %c0_33, %c0_34, %c0_35, %c0_36, %c0_37] : memref<1x1x2x4x16x16xf32, #tpu.memory_space<vmem>>, vector<1x1x1x4x16x16xf32>
    %25 = vector.shape_cast %24 : vector<1x1x1x4x16x16xf32> to vector<4x16x16xf32>
    %c0_38 = arith.constant 0 : index
    %c0_39 = arith.constant 0 : index
    %c1_40 = arith.constant 1 : index
    %c0_41 = arith.constant 0 : index
    %c0_42 = arith.constant 0 : index
    %c0_43 = arith.constant 0 : index
    %26 = vector.load %arg7[%c0_38, %c0_39, %c1_40, %c0_41, %c0_42, %c0_43] : memref<1x1x2x4x16x16xf32, #tpu.memory_space<vmem>>, vector<1x1x1x4x16x16xf32>
    %27 = vector.shape_cast %26 : vector<1x1x1x4x16x16xf32> to vector<4x16x16xf32>
    %c0_44 = arith.constant 0 : index
    %c0_45 = arith.constant 0 : index
    %c0_46 = arith.constant 0 : index
    %c0_47 = arith.constant 0 : index
    %c0_48 = arith.constant 0 : index
    %28 = vector.load %arg9[%c0_44, %c0_45, %c0_46, %c0_47, %c0_48] : memref<1x2x4x16x16xf32, #tpu.memory_space<vmem>>, vector<1x1x4x16x16xf32>
    %29 = vector.shape_cast %28 : vector<1x1x4x16x16xf32> to vector<4x16x16xf32>
    %c0_49 = arith.constant 0 : index
    %c1_50 = arith.constant 1 : index
    %c0_51 = arith.constant 0 : index
    %c0_52 = arith.constant 0 : index
    %c0_53 = arith.constant 0 : index
    %30 = vector.load %arg9[%c0_49, %c1_50, %c0_51, %c0_52, %c0_53] : memref<1x2x4x16x16xf32, #tpu.memory_space<vmem>>, vector<1x1x4x16x16xf32>
    %31 = vector.shape_cast %30 : vector<1x1x4x16x16xf32> to vector<4x16x16xf32>
    %32 = vector.shape_cast %5 : vector<16x16xf32> to vector<1x16x16xf32>
    %33 = vector.broadcast %32 : vector<1x16x16xf32> to vector<4x16x16xf32>
    %34 = arith.mulf %29, %33 : vector<4x16x16xf32>
    %35 = vector.shape_cast %7 : vector<16x16xf32> to vector<1x16x16xf32>
    %36 = vector.broadcast %35 : vector<1x16x16xf32> to vector<4x16x16xf32>
    %37 = arith.mulf %31, %36 : vector<4x16x16xf32>
    %38 = arith.subf %34, %37 : vector<4x16x16xf32>
    %39 = vector.shape_cast %7 : vector<16x16xf32> to vector<1x16x16xf32>
    %40 = vector.broadcast %39 : vector<1x16x16xf32> to vector<4x16x16xf32>
    %41 = arith.mulf %29, %40 : vector<4x16x16xf32>
    %42 = vector.shape_cast %5 : vector<16x16xf32> to vector<1x16x16xf32>
    %43 = vector.broadcast %42 : vector<1x16x16xf32> to vector<4x16x16xf32>
    %44 = arith.mulf %31, %43 : vector<4x16x16xf32>
    %45 = arith.addf %41, %44 : vector<4x16x16xf32>
    %46 = vector.shape_cast %38 : vector<4x16x16xf32> to vector<64x16xf32>
    %47 = vector.shape_cast %45 : vector<4x16x16xf32> to vector<64x16xf32>
    %cst = arith.constant dense<0.000000e+00> : vector<64x16xf32>
    %48 = tpu.matmul %46, %19, %cst {dimension_numbers = #tpu.dot_dimension_numbers<[1], [0], [0], [1], [0, 0, 1, 1], [], []>, precision = #tpu.contract_precision<fp32>} : vector<64x16xf32>, vector<16x16xf32>, vector<64x16xf32> -> vector<64x16xf32>
    %cst_54 = arith.constant dense<0.000000e+00> : vector<64x16xf32>
    %49 = tpu.matmul %47, %21, %cst_54 {dimension_numbers = #tpu.dot_dimension_numbers<[1], [0], [0], [1], [0, 0, 1, 1], [], []>, precision = #tpu.contract_precision<fp32>} : vector<64x16xf32>, vector<16x16xf32>, vector<64x16xf32> -> vector<64x16xf32>
    %50 = arith.addf %46, %47 : vector<64x16xf32>
    %cst_55 = arith.constant dense<0.000000e+00> : vector<64x16xf32>
    %51 = tpu.matmul %50, %23, %cst_55 {dimension_numbers = #tpu.dot_dimension_numbers<[1], [0], [0], [1], [0, 0, 1, 1], [], []>, precision = #tpu.contract_precision<fp32>} : vector<64x16xf32>, vector<16x16xf32>, vector<64x16xf32> -> vector<64x16xf32>
    %52 = arith.subf %48, %49 : vector<64x16xf32>
    %53 = arith.subf %51, %48 : vector<64x16xf32>
    %54 = arith.subf %53, %49 : vector<64x16xf32>
    %55 = vector.shape_cast %52 : vector<64x16xf32> to vector<4x16x16xf32>
    %56 = vector.shape_cast %54 : vector<64x16xf32> to vector<4x16x16xf32>
    %57 = vector.shape_cast %11 : vector<16x16xf32> to vector<1x16x16xf32>
    %58 = vector.broadcast %57 : vector<1x16x16xf32> to vector<4x16x16xf32>
    %59 = arith.mulf %58, %25 : vector<4x16x16xf32>
    %60 = vector.shape_cast %11 : vector<16x16xf32> to vector<1x16x16xf32>
    %61 = vector.broadcast %60 : vector<1x16x16xf32> to vector<4x16x16xf32>
    %62 = arith.mulf %61, %27 : vector<4x16x16xf32>
    %63 = vector.shape_cast %59 : vector<4x16x16xf32> to vector<64x16xf32>
    %64 = vector.shape_cast %62 : vector<4x16x16xf32> to vector<64x16xf32>
    %cst_56 = arith.constant dense<0.000000e+00> : vector<64x16xf32>
    %65 = tpu.matmul %63, %19, %cst_56 {dimension_numbers = #tpu.dot_dimension_numbers<[1], [0], [0], [1], [0, 0, 1, 1], [], []>, precision = #tpu.contract_precision<fp32>} : vector<64x16xf32>, vector<16x16xf32>, vector<64x16xf32> -> vector<64x16xf32>
    %cst_57 = arith.constant dense<0.000000e+00> : vector<64x16xf32>
    %66 = tpu.matmul %64, %21, %cst_57 {dimension_numbers = #tpu.dot_dimension_numbers<[1], [0], [0], [1], [0, 0, 1, 1], [], []>, precision = #tpu.contract_precision<fp32>} : vector<64x16xf32>, vector<16x16xf32>, vector<64x16xf32> -> vector<64x16xf32>
    %67 = arith.subf %63, %64 : vector<64x16xf32>
    %cst_58 = arith.constant dense<0.000000e+00> : vector<64x16xf32>
    %68 = tpu.matmul %67, %23, %cst_58 {dimension_numbers = #tpu.dot_dimension_numbers<[1], [0], [0], [1], [0, 0, 1, 1], [], []>, precision = #tpu.contract_precision<fp32>} : vector<64x16xf32>, vector<16x16xf32>, vector<64x16xf32> -> vector<64x16xf32>
    %69 = arith.addf %65, %66 : vector<64x16xf32>
    %70 = arith.subf %65, %66 : vector<64x16xf32>
    %71 = arith.subf %70, %68 : vector<64x16xf32>
    %72 = vector.shape_cast %69 : vector<64x16xf32> to vector<4x16x16xf32>
    %73 = vector.shape_cast %71 : vector<64x16xf32> to vector<4x16x16xf32>
    %cst_59 = arith.constant 0.000000e+00 : f32
    %74 = vector.broadcast %cst_59 : f32 to vector<16x16xf32>
    %cst_60 = arith.constant 0.000000e+00 : f32
    %75 = vector.broadcast %cst_60 : f32 to vector<16x16xf32>
    %76 = vector.extract_strided_slice %55 {offsets = [0, 0, 0], sizes = [1, 16, 16], strides = [1, 1, 1]} : vector<4x16x16xf32> to vector<1x16x16xf32>
    %77 = vector.shape_cast %76 : vector<1x16x16xf32> to vector<16x16xf32>
    %78 = vector.extract_strided_slice %56 {offsets = [0, 0, 0], sizes = [1, 16, 16], strides = [1, 1, 1]} : vector<4x16x16xf32> to vector<1x16x16xf32>
    %79 = vector.shape_cast %78 : vector<1x16x16xf32> to vector<16x16xf32>
    %cst_61 = arith.constant dense<0.000000e+00> : vector<16x16xf32>
    %80 = tpu.matmul %13, %77, %cst_61 {dimension_numbers = #tpu.dot_dimension_numbers<[1], [0], [0], [1], [0, 0, 1, 1], [], []>, precision = #tpu.contract_precision<fp32>} : vector<16x16xf32>, vector<16x16xf32>, vector<16x16xf32> -> vector<16x16xf32>
    %cst_62 = arith.constant dense<0.000000e+00> : vector<16x16xf32>
    %81 = tpu.matmul %15, %79, %cst_62 {dimension_numbers = #tpu.dot_dimension_numbers<[1], [0], [0], [1], [0, 0, 1, 1], [], []>, precision = #tpu.contract_precision<fp32>} : vector<16x16xf32>, vector<16x16xf32>, vector<16x16xf32> -> vector<16x16xf32>
    %82 = arith.addf %77, %79 : vector<16x16xf32>
    %cst_63 = arith.constant dense<0.000000e+00> : vector<16x16xf32>
    %83 = tpu.matmul %17, %82, %cst_63 {dimension_numbers = #tpu.dot_dimension_numbers<[1], [0], [0], [1], [0, 0, 1, 1], [], []>, precision = #tpu.contract_precision<fp32>} : vector<16x16xf32>, vector<16x16xf32>, vector<16x16xf32> -> vector<16x16xf32>
    %84 = arith.subf %80, %81 : vector<16x16xf32>
    %85 = arith.subf %83, %80 : vector<16x16xf32>
    %86 = arith.subf %85, %81 : vector<16x16xf32>
    %87 = vector.extract_strided_slice %25 {offsets = [0, 0, 0], sizes = [1, 16, 16], strides = [1, 1, 1]} : vector<4x16x16xf32> to vector<1x16x16xf32>
    %88 = vector.shape_cast %87 : vector<1x16x16xf32> to vector<16x16xf32>
    %89 = vector.broadcast %0 : f32 to vector<16x16xf32>
    %90 = arith.mulf %89, %88 : vector<16x16xf32>
    %91 = arith.mulf %11, %84 : vector<16x16xf32>
    %92 = vector.broadcast %1 : f32 to vector<16x16xf32>
    %93 = arith.mulf %92, %91 : vector<16x16xf32>
    %94 = arith.addf %90, %93 : vector<16x16xf32>
    %c0_64 = arith.constant 0 : index
    %c0_65 = arith.constant 0 : index
    %c0_66 = arith.constant 0 : index
    %c0_67 = arith.constant 0 : index
    %c0_68 = arith.constant 0 : index
    %c0_69 = arith.constant 0 : index
    %95 = vector.load %arg11[%c0_64, %c0_65, %c0_66, %c0_67, %c0_68, %c0_69] : memref<1x1x2x4x16x16xf32, #tpu.memory_space<vmem>>, vector<1x1x1x1x16x16xf32>
    %96 = vector.shape_cast %95 : vector<1x1x1x1x16x16xf32> to vector<16x16xf32>
    %97 = vector.shape_cast %94 : vector<16x16xf32> to vector<1x1x1x1x16x16xf32>
    tpu.vector_store %arg11[%c0_64, %c0_65, %c0_66, %c0_67, %c0_68, %c0_69], %97 {strides = array<i32>} : memref<1x1x2x4x16x16xf32, #tpu.memory_space<vmem>>, vector<1x1x1x1x16x16xf32>,
    %98 = vector.extract_strided_slice %27 {offsets = [0, 0, 0], sizes = [1, 16, 16], strides = [1, 1, 1]} : vector<4x16x16xf32> to vector<1x16x16xf32>
    %99 = vector.shape_cast %98 : vector<1x16x16xf32> to vector<16x16xf32>
    %100 = vector.broadcast %0 : f32 to vector<16x16xf32>
    %101 = arith.mulf %100, %99 : vector<16x16xf32>
    %102 = arith.mulf %11, %86 : vector<16x16xf32>
    %103 = vector.broadcast %1 : f32 to vector<16x16xf32>
    %104 = arith.mulf %103, %102 : vector<16x16xf32>
    %105 = arith.addf %101, %104 : vector<16x16xf32>
    %c0_70 = arith.constant 0 : index
    %c0_71 = arith.constant 0 : index
    %c1_72 = arith.constant 1 : index
    %c0_73 = arith.constant 0 : index
    %c0_74 = arith.constant 0 : index
    %c0_75 = arith.constant 0 : index
    %106 = vector.load %arg11[%c0_70, %c0_71, %c1_72, %c0_73, %c0_74, %c0_75] : memref<1x1x2x4x16x16xf32, #tpu.memory_space<vmem>>, vector<1x1x1x1x16x16xf32>
    %107 = vector.shape_cast %106 : vector<1x1x1x1x16x16xf32> to vector<16x16xf32>
    %108 = vector.shape_cast %105 : vector<16x16xf32> to vector<1x1x1x1x16x16xf32>
    tpu.vector_store %arg11[%c0_70, %c0_71, %c1_72, %c0_73, %c0_74, %c0_75], %108 {strides = array<i32>} : memref<1x1x2x4x16x16xf32, #tpu.memory_space<vmem>>, vector<1x1x1x1x16x16xf32>,
    %109 = vector.extract_strided_slice %72 {offsets = [0, 0, 0], sizes = [1, 16, 16], strides = [1, 1, 1]} : vector<4x16x16xf32> to vector<1x16x16xf32>
    %110 = vector.shape_cast %109 : vector<1x16x16xf32> to vector<16x16xf32>
    %111 = vector.extract_strided_slice %73 {offsets = [0, 0, 0], sizes = [1, 16, 16], strides = [1, 1, 1]} : vector<4x16x16xf32> to vector<1x16x16xf32>
    %112 = vector.shape_cast %111 : vector<1x16x16xf32> to vector<16x16xf32>
    %cst_76 = arith.constant dense<0.000000e+00> : vector<16x16xf32>
    %113 = tpu.matmul %13, %110, %cst_76 {dimension_numbers = #tpu.dot_dimension_numbers<[1], [0], [0], [1], [0, 0, 1, 1], [], []>, precision = #tpu.contract_precision<fp32>} : vector<16x16xf32>, vector<16x16xf32>, vector<16x16xf32> -> vector<16x16xf32>
    %cst_77 = arith.constant dense<0.000000e+00> : vector<16x16xf32>
    %114 = tpu.matmul %15, %112, %cst_77 {dimension_numbers = #tpu.dot_dimension_numbers<[1], [0], [0], [1], [0, 0, 1, 1], [], []>, precision = #tpu.contract_precision<fp32>} : vector<16x16xf32>, vector<16x16xf32>, vector<16x16xf32> -> vector<16x16xf32>
    %115 = arith.subf %110, %112 : vector<16x16xf32>
    %cst_78 = arith.constant dense<0.000000e+00> : vector<16x16xf32>
    %116 = tpu.matmul %17, %115, %cst_78 {dimension_numbers = #tpu.dot_dimension_numbers<[1], [0], [0], [1], [0, 0, 1, 1], [], []>, precision = #tpu.contract_precision<fp32>} : vector<16x16xf32>, vector<16x16xf32>, vector<16x16xf32> -> vector<16x16xf32>
    %117 = arith.addf %113, %114 : vector<16x16xf32>
    %118 = arith.subf %113, %114 : vector<16x16xf32>
    %119 = arith.subf %118, %116 : vector<16x16xf32>
    %120 = vector.extract_strided_slice %29 {offsets = [0, 0, 0], sizes = [1, 16, 16], strides = [1, 1, 1]} : vector<4x16x16xf32> to vector<1x16x16xf32>
    %121 = vector.shape_cast %120 : vector<1x16x16xf32> to vector<16x16xf32>
    %122 = arith.mulf %121, %117 : vector<16x16xf32>
    %123 = vector.extract_strided_slice %31 {offsets = [0, 0, 0], sizes = [1, 16, 16], strides = [1, 1, 1]} : vector<4x16x16xf32> to vector<1x16x16xf32>
    %124 = vector.shape_cast %123 : vector<1x16x16xf32> to vector<16x16xf32>
    %125 = arith.mulf %124, %119 : vector<16x16xf32>
    %126 = arith.addf %122, %125 : vector<16x16xf32>
    %127 = arith.addf %74, %126 : vector<16x16xf32>
    %128 = vector.extract_strided_slice %29 {offsets = [0, 0, 0], sizes = [1, 16, 16], strides = [1, 1, 1]} : vector<4x16x16xf32> to vector<1x16x16xf32>
    %129 = vector.shape_cast %128 : vector<1x16x16xf32> to vector<16x16xf32>
    %130 = arith.mulf %129, %119 : vector<16x16xf32>
    %131 = vector.extract_strided_slice %31 {offsets = [0, 0, 0], sizes = [1, 16, 16], strides = [1, 1, 1]} : vector<4x16x16xf32> to vector<1x16x16xf32>
    %132 = vector.shape_cast %131 : vector<1x16x16xf32> to vector<16x16xf32>
    %133 = arith.mulf %132, %117 : vector<16x16xf32>
    %134 = arith.subf %130, %133 : vector<16x16xf32>
    %135 = arith.addf %75, %134 : vector<16x16xf32>
    %136 = vector.extract_strided_slice %55 {offsets = [1, 0, 0], sizes = [1, 16, 16], strides = [1, 1, 1]} : vector<4x16x16xf32> to vector<1x16x16xf32>
    %137 = vector.shape_cast %136 : vector<1x16x16xf32> to vector<16x16xf32>
    %138 = vector.extract_strided_slice %56 {offsets = [1, 0, 0], sizes = [1, 16, 16], strides = [1, 1, 1]} : vector<4x16x16xf32> to vector<1x16x16xf32>
    %139 = vector.shape_cast %138 : vector<1x16x16xf32> to vector<16x16xf32>
    %cst_79 = arith.constant dense<0.000000e+00> : vector<16x16xf32>
    %140 = tpu.matmul %13, %137, %cst_79 {dimension_numbers = #tpu.dot_dimension_numbers<[1], [0], [0], [1], [0, 0, 1, 1], [], []>, precision = #tpu.contract_precision<fp32>} : vector<16x16xf32>, vector<16x16xf32>, vector<16x16xf32> -> vector<16x16xf32>
    %cst_80 = arith.constant dense<0.000000e+00> : vector<16x16xf32>
    %141 = tpu.matmul %15, %139, %cst_80 {dimension_numbers = #tpu.dot_dimension_numbers<[1], [0], [0], [1], [0, 0, 1, 1], [], []>, precision = #tpu.contract_precision<fp32>} : vector<16x16xf32>, vector<16x16xf32>, vector<16x16xf32> -> vector<16x16xf32>
    %142 = arith.addf %137, %139 : vector<16x16xf32>
    %cst_81 = arith.constant dense<0.000000e+00> : vector<16x16xf32>
    %143 = tpu.matmul %17, %142, %cst_81 {dimension_numbers = #tpu.dot_dimension_numbers<[1], [0], [0], [1], [0, 0, 1, 1], [], []>, precision = #tpu.contract_precision<fp32>} : vector<16x16xf32>, vector<16x16xf32>, vector<16x16xf32> -> vector<16x16xf32>
    %144 = arith.subf %140, %141 : vector<16x16xf32>
    %145 = arith.subf %143, %140 : vector<16x16xf32>
    %146 = arith.subf %145, %141 : vector<16x16xf32>
    %147 = vector.extract_strided_slice %25 {offsets = [1, 0, 0], sizes = [1, 16, 16], strides = [1, 1, 1]} : vector<4x16x16xf32> to vector<1x16x16xf32>
    %148 = vector.shape_cast %147 : vector<1x16x16xf32> to vector<16x16xf32>
    %149 = vector.broadcast %0 : f32 to vector<16x16xf32>
    %150 = arith.mulf %149, %148 : vector<16x16xf32>
    %151 = arith.mulf %11, %144 : vector<16x16xf32>
    %152 = vector.broadcast %1 : f32 to vector<16x16xf32>
    %153 = arith.mulf %152, %151 : vector<16x16xf32>
    %154 = arith.addf %150, %153 : vector<16x16xf32>
    %c0_82 = arith.constant 0 : index
    %c0_83 = arith.constant 0 : index
    %c0_84 = arith.constant 0 : index
    %c1_85 = arith.constant 1 : index
    %c0_86 = arith.constant 0 : index
    %c0_87 = arith.constant 0 : index
    %155 = vector.load %arg11[%c0_82, %c0_83, %c0_84, %c1_85, %c0_86, %c0_87] : memref<1x1x2x4x16x16xf32, #tpu.memory_space<vmem>>, vector<1x1x1x1x16x16xf32>
    %156 = vector.shape_cast %155 : vector<1x1x1x1x16x16xf32> to vector<16x16xf32>
    %157 = vector.shape_cast %154 : vector<16x16xf32> to vector<1x1x1x1x16x16xf32>
    tpu.vector_store %arg11[%c0_82, %c0_83, %c0_84, %c1_85, %c0_86, %c0_87], %157 {strides = array<i32>} : memref<1x1x2x4x16x16xf32, #tpu.memory_space<vmem>>, vector<1x1x1x1x16x16xf32>,
    %158 = vector.extract_strided_slice %27 {offsets = [1, 0, 0], sizes = [1, 16, 16], strides = [1, 1, 1]} : vector<4x16x16xf32> to vector<1x16x16xf32>
    %159 = vector.shape_cast %158 : vector<1x16x16xf32> to vector<16x16xf32>
    %160 = vector.broadcast %0 : f32 to vector<16x16xf32>
    %161 = arith.mulf %160, %159 : vector<16x16xf32>
    %162 = arith.mulf %11, %146 : vector<16x16xf32>
    %163 = vector.broadcast %1 : f32 to vector<16x16xf32>
    %164 = arith.mulf %163, %162 : vector<16x16xf32>
    %165 = arith.addf %161, %164 : vector<16x16xf32>
    %c0_88 = arith.constant 0 : index
    %c0_89 = arith.constant 0 : index
    %c1_90 = arith.constant 1 : index
    %c1_91 = arith.constant 1 : index
    %c0_92 = arith.constant 0 : index
    %c0_93 = arith.constant 0 : index
    %166 = vector.load %arg11[%c0_88, %c0_89, %c1_90, %c1_91, %c0_92, %c0_93] : memref<1x1x2x4x16x16xf32, #tpu.memory_space<vmem>>, vector<1x1x1x1x16x16xf32>
    %167 = vector.shape_cast %166 : vector<1x1x1x1x16x16xf32> to vector<16x16xf32>
    %168 = vector.shape_cast %165 : vector<16x16xf32> to vector<1x1x1x1x16x16xf32>
    tpu.vector_store %arg11[%c0_88, %c0_89, %c1_90, %c1_91, %c0_92, %c0_93], %168 {strides = array<i32>} : memref<1x1x2x4x16x16xf32, #tpu.memory_space<vmem>>, vector<1x1x1x1x16x16xf32>,
    %169 = vector.extract_strided_slice %72 {offsets = [1, 0, 0], sizes = [1, 16, 16], strides = [1, 1, 1]} : vector<4x16x16xf32> to vector<1x16x16xf32>
    %170 = vector.shape_cast %169 : vector<1x16x16xf32> to vector<16x16xf32>
    %171 = vector.extract_strided_slice %73 {offsets = [1, 0, 0], sizes = [1, 16, 16], strides = [1, 1, 1]} : vector<4x16x16xf32> to vector<1x16x16xf32>
    %172 = vector.shape_cast %171 : vector<1x16x16xf32> to vector<16x16xf32>
    %cst_94 = arith.constant dense<0.000000e+00> : vector<16x16xf32>
    %173 = tpu.matmul %13, %170, %cst_94 {dimension_numbers = #tpu.dot_dimension_numbers<[1], [0], [0], [1], [0, 0, 1, 1], [], []>, precision = #tpu.contract_precision<fp32>} : vector<16x16xf32>, vector<16x16xf32>, vector<16x16xf32> -> vector<16x16xf32>
    %cst_95 = arith.constant dense<0.000000e+00> : vector<16x16xf32>
    %174 = tpu.matmul %15, %172, %cst_95 {dimension_numbers = #tpu.dot_dimension_numbers<[1], [0], [0], [1], [0, 0, 1, 1], [], []>, precision = #tpu.contract_precision<fp32>} : vector<16x16xf32>, vector<16x16xf32>, vector<16x16xf32> -> vector<16x16xf32>
    %175 = arith.subf %170, %172 : vector<16x16xf32>
    %cst_96 = arith.constant dense<0.000000e+00> : vector<16x16xf32>
    %176 = tpu.matmul %17, %175, %cst_96 {dimension_numbers = #tpu.dot_dimension_numbers<[1], [0], [0], [1], [0, 0, 1, 1], [], []>, precision = #tpu.contract_precision<fp32>} : vector<16x16xf32>, vector<16x16xf32>, vector<16x16xf32> -> vector<16x16xf32>
    %177 = arith.addf %173, %174 : vector<16x16xf32>
    %178 = arith.subf %173, %174 : vector<16x16xf32>
    %179 = arith.subf %178, %176 : vector<16x16xf32>
    %180 = vector.extract_strided_slice %29 {offsets = [1, 0, 0], sizes = [1, 16, 16], strides = [1, 1, 1]} : vector<4x16x16xf32> to vector<1x16x16xf32>
    %181 = vector.shape_cast %180 : vector<1x16x16xf32> to vector<16x16xf32>
    %182 = arith.mulf %181, %177 : vector<16x16xf32>
    %183 = vector.extract_strided_slice %31 {offsets = [1, 0, 0], sizes = [1, 16, 16], strides = [1, 1, 1]} : vector<4x16x16xf32> to vector<1x16x16xf32>
    %184 = vector.shape_cast %183 : vector<1x16x16xf32> to vector<16x16xf32>
    %185 = arith.mulf %184, %179 : vector<16x16xf32>
    %186 = arith.addf %182, %185 : vector<16x16xf32>
    %187 = arith.addf %127, %186 : vector<16x16xf32>
    %188 = vector.extract_strided_slice %29 {offsets = [1, 0, 0], sizes = [1, 16, 16], strides = [1, 1, 1]} : vector<4x16x16xf32> to vector<1x16x16xf32>
    %189 = vector.shape_cast %188 : vector<1x16x16xf32> to vector<16x16xf32>
    %190 = arith.mulf %189, %179 : vector<16x16xf32>
    %191 = vector.extract_strided_slice %31 {offsets = [1, 0, 0], sizes = [1, 16, 16], strides = [1, 1, 1]} : vector<4x16x16xf32> to vector<1x16x16xf32>
    %192 = vector.shape_cast %191 : vector<1x16x16xf32> to vector<16x16xf32>
    %193 = arith.mulf %192, %177 : vector<16x16xf32>
    %194 = arith.subf %190, %193 : vector<16x16xf32>
    %195 = arith.addf %135, %194 : vector<16x16xf32>
    %196 = vector.extract_strided_slice %55 {offsets = [2, 0, 0], sizes = [1, 16, 16], strides = [1, 1, 1]} : vector<4x16x16xf32> to vector<1x16x16xf32>
    %197 = vector.shape_cast %196 : vector<1x16x16xf32> to vector<16x16xf32>
    %198 = vector.extract_strided_slice %56 {offsets = [2, 0, 0], sizes = [1, 16, 16], strides = [1, 1, 1]} : vector<4x16x16xf32> to vector<1x16x16xf32>
    %199 = vector.shape_cast %198 : vector<1x16x16xf32> to vector<16x16xf32>
    %cst_97 = arith.constant dense<0.000000e+00> : vector<16x16xf32>
    %200 = tpu.matmul %13, %197, %cst_97 {dimension_numbers = #tpu.dot_dimension_numbers<[1], [0], [0], [1], [0, 0, 1, 1], [], []>, precision = #tpu.contract_precision<fp32>} : vector<16x16xf32>, vector<16x16xf32>, vector<16x16xf32> -> vector<16x16xf32>
    %cst_98 = arith.constant dense<0.000000e+00> : vector<16x16xf32>
    %201 = tpu.matmul %15, %199, %cst_98 {dimension_numbers = #tpu.dot_dimension_numbers<[1], [0], [0], [1], [0, 0, 1, 1], [], []>, precision = #tpu.contract_precision<fp32>} : vector<16x16xf32>, vector<16x16xf32>, vector<16x16xf32> -> vector<16x16xf32>
    %202 = arith.addf %197, %199 : vector<16x16xf32>
    %cst_99 = arith.constant dense<0.000000e+00> : vector<16x16xf32>
    %203 = tpu.matmul %17, %202, %cst_99 {dimension_numbers = #tpu.dot_dimension_numbers<[1], [0], [0], [1], [0, 0, 1, 1], [], []>, precision = #tpu.contract_precision<fp32>} : vector<16x16xf32>, vector<16x16xf32>, vector<16x16xf32> -> vector<16x16xf32>
    %204 = arith.subf %200, %201 : vector<16x16xf32>
    %205 = arith.subf %203, %200 : vector<16x16xf32>
    %206 = arith.subf %205, %201 : vector<16x16xf32>
    %207 = vector.extract_strided_slice %25 {offsets = [2, 0, 0], sizes = [1, 16, 16], strides = [1, 1, 1]} : vector<4x16x16xf32> to vector<1x16x16xf32>
    %208 = vector.shape_cast %207 : vector<1x16x16xf32> to vector<16x16xf32>
    %209 = vector.broadcast %0 : f32 to vector<16x16xf32>
    %210 = arith.mulf %209, %208 : vector<16x16xf32>
    %211 = arith.mulf %11, %204 : vector<16x16xf32>
    %212 = vector.broadcast %1 : f32 to vector<16x16xf32>
    %213 = arith.mulf %212, %211 : vector<16x16xf32>
    %214 = arith.addf %210, %213 : vector<16x16xf32>
    %c0_100 = arith.constant 0 : index
    %c0_101 = arith.constant 0 : index
    %c0_102 = arith.constant 0 : index
    %c2_103 = arith.constant 2 : index
    %c0_104 = arith.constant 0 : index
    %c0_105 = arith.constant 0 : index
    %215 = vector.load %arg11[%c0_100, %c0_101, %c0_102, %c2_103, %c0_104, %c0_105] : memref<1x1x2x4x16x16xf32, #tpu.memory_space<vmem>>, vector<1x1x1x1x16x16xf32>
    %216 = vector.shape_cast %215 : vector<1x1x1x1x16x16xf32> to vector<16x16xf32>
    %217 = vector.shape_cast %214 : vector<16x16xf32> to vector<1x1x1x1x16x16xf32>
    tpu.vector_store %arg11[%c0_100, %c0_101, %c0_102, %c2_103, %c0_104, %c0_105], %217 {strides = array<i32>} : memref<1x1x2x4x16x16xf32, #tpu.memory_space<vmem>>, vector<1x1x1x1x16x16xf32>,
    %218 = vector.extract_strided_slice %27 {offsets = [2, 0, 0], sizes = [1, 16, 16], strides = [1, 1, 1]} : vector<4x16x16xf32> to vector<1x16x16xf32>
    %219 = vector.shape_cast %218 : vector<1x16x16xf32> to vector<16x16xf32>
    %220 = vector.broadcast %0 : f32 to vector<16x16xf32>
    %221 = arith.mulf %220, %219 : vector<16x16xf32>
    %222 = arith.mulf %11, %206 : vector<16x16xf32>
    %223 = vector.broadcast %1 : f32 to vector<16x16xf32>
    %224 = arith.mulf %223, %222 : vector<16x16xf32>
    %225 = arith.addf %221, %224 : vector<16x16xf32>
    %c0_106 = arith.constant 0 : index
    %c0_107 = arith.constant 0 : index
    %c1_108 = arith.constant 1 : index
    %c2_109 = arith.constant 2 : index
    %c0_110 = arith.constant 0 : index
    %c0_111 = arith.constant 0 : index
    %226 = vector.load %arg11[%c0_106, %c0_107, %c1_108, %c2_109, %c0_110, %c0_111] : memref<1x1x2x4x16x16xf32, #tpu.memory_space<vmem>>, vector<1x1x1x1x16x16xf32>
    %227 = vector.shape_cast %226 : vector<1x1x1x1x16x16xf32> to vector<16x16xf32>
    %228 = vector.shape_cast %225 : vector<16x16xf32> to vector<1x1x1x1x16x16xf32>
    tpu.vector_store %arg11[%c0_106, %c0_107, %c1_108, %c2_109, %c0_110, %c0_111], %228 {strides = array<i32>} : memref<1x1x2x4x16x16xf32, #tpu.memory_space<vmem>>, vector<1x1x1x1x16x16xf32>,
    %229 = vector.extract_strided_slice %72 {offsets = [2, 0, 0], sizes = [1, 16, 16], strides = [1, 1, 1]} : vector<4x16x16xf32> to vector<1x16x16xf32>
    %230 = vector.shape_cast %229 : vector<1x16x16xf32> to vector<16x16xf32>
    %231 = vector.extract_strided_slice %73 {offsets = [2, 0, 0], sizes = [1, 16, 16], strides = [1, 1, 1]} : vector<4x16x16xf32> to vector<1x16x16xf32>
    %232 = vector.shape_cast %231 : vector<1x16x16xf32> to vector<16x16xf32>
    %cst_112 = arith.constant dense<0.000000e+00> : vector<16x16xf32>
    %233 = tpu.matmul %13, %230, %cst_112 {dimension_numbers = #tpu.dot_dimension_numbers<[1], [0], [0], [1], [0, 0, 1, 1], [], []>, precision = #tpu.contract_precision<fp32>} : vector<16x16xf32>, vector<16x16xf32>, vector<16x16xf32> -> vector<16x16xf32>
    %cst_113 = arith.constant dense<0.000000e+00> : vector<16x16xf32>
    %234 = tpu.matmul %15, %232, %cst_113 {dimension_numbers = #tpu.dot_dimension_numbers<[1], [0], [0], [1], [0, 0, 1, 1], [], []>, precision = #tpu.contract_precision<fp32>} : vector<16x16xf32>, vector<16x16xf32>, vector<16x16xf32> -> vector<16x16xf32>
    %235 = arith.subf %230, %232 : vector<16x16xf32>
    %cst_114 = arith.constant dense<0.000000e+00> : vector<16x16xf32>
    %236 = tpu.matmul %17, %235, %cst_114 {dimension_numbers = #tpu.dot_dimension_numbers<[1], [0], [0], [1], [0, 0, 1, 1], [], []>, precision = #tpu.contract_precision<fp32>} : vector<16x16xf32>, vector<16x16xf32>, vector<16x16xf32> -> vector<16x16xf32>
    %237 = arith.addf %233, %234 : vector<16x16xf32>
    %238 = arith.subf %233, %234 : vector<16x16xf32>
    %239 = arith.subf %238, %236 : vector<16x16xf32>
    %240 = vector.extract_strided_slice %29 {offsets = [2, 0, 0], sizes = [1, 16, 16], strides = [1, 1, 1]} : vector<4x16x16xf32> to vector<1x16x16xf32>
    %241 = vector.shape_cast %240 : vector<1x16x16xf32> to vector<16x16xf32>
    %242 = arith.mulf %241, %237 : vector<16x16xf32>
    %243 = vector.extract_strided_slice %31 {offsets = [2, 0, 0], sizes = [1, 16, 16], strides = [1, 1, 1]} : vector<4x16x16xf32> to vector<1x16x16xf32>
    %244 = vector.shape_cast %243 : vector<1x16x16xf32> to vector<16x16xf32>
    %245 = arith.mulf %244, %239 : vector<16x16xf32>
    %246 = arith.addf %242, %245 : vector<16x16xf32>
    %247 = arith.addf %187, %246 : vector<16x16xf32>
    %248 = vector.extract_strided_slice %29 {offsets = [2, 0, 0], sizes = [1, 16, 16], strides = [1, 1, 1]} : vector<4x16x16xf32> to vector<1x16x16xf32>
    %249 = vector.shape_cast %248 : vector<1x16x16xf32> to vector<16x16xf32>
    %250 = arith.mulf %249, %239 : vector<16x16xf32>
    %251 = vector.extract_strided_slice %31 {offsets = [2, 0, 0], sizes = [1, 16, 16], strides = [1, 1, 1]} : vector<4x16x16xf32> to vector<1x16x16xf32>
    %252 = vector.shape_cast %251 : vector<1x16x16xf32> to vector<16x16xf32>
    %253 = arith.mulf %252, %237 : vector<16x16xf32>
    %254 = arith.subf %250, %253 : vector<16x16xf32>
    %255 = arith.addf %195, %254 : vector<16x16xf32>
    %256 = vector.extract_strided_slice %55 {offsets = [3, 0, 0], sizes = [1, 16, 16], strides = [1, 1, 1]} : vector<4x16x16xf32> to vector<1x16x16xf32>
    %257 = vector.shape_cast %256 : vector<1x16x16xf32> to vector<16x16xf32>
    %258 = vector.extract_strided_slice %56 {offsets = [3, 0, 0], sizes = [1, 16, 16], strides = [1, 1, 1]} : vector<4x16x16xf32> to vector<1x16x16xf32>
    %259 = vector.shape_cast %258 : vector<1x16x16xf32> to vector<16x16xf32>
    %cst_115 = arith.constant dense<0.000000e+00> : vector<16x16xf32>
    %260 = tpu.matmul %13, %257, %cst_115 {dimension_numbers = #tpu.dot_dimension_numbers<[1], [0], [0], [1], [0, 0, 1, 1], [], []>, precision = #tpu.contract_precision<fp32>} : vector<16x16xf32>, vector<16x16xf32>, vector<16x16xf32> -> vector<16x16xf32>
    %cst_116 = arith.constant dense<0.000000e+00> : vector<16x16xf32>
    %261 = tpu.matmul %15, %259, %cst_116 {dimension_numbers = #tpu.dot_dimension_numbers<[1], [0], [0], [1], [0, 0, 1, 1], [], []>, precision = #tpu.contract_precision<fp32>} : vector<16x16xf32>, vector<16x16xf32>, vector<16x16xf32> -> vector<16x16xf32>
    %262 = arith.addf %257, %259 : vector<16x16xf32>
    %cst_117 = arith.constant dense<0.000000e+00> : vector<16x16xf32>
    %263 = tpu.matmul %17, %262, %cst_117 {dimension_numbers = #tpu.dot_dimension_numbers<[1], [0], [0], [1], [0, 0, 1, 1], [], []>, precision = #tpu.contract_precision<fp32>} : vector<16x16xf32>, vector<16x16xf32>, vector<16x16xf32> -> vector<16x16xf32>
    %264 = arith.subf %260, %261 : vector<16x16xf32>
    %265 = arith.subf %263, %260 : vector<16x16xf32>
    %266 = arith.subf %265, %261 : vector<16x16xf32>
    %267 = vector.extract_strided_slice %25 {offsets = [3, 0, 0], sizes = [1, 16, 16], strides = [1, 1, 1]} : vector<4x16x16xf32> to vector<1x16x16xf32>
    %268 = vector.shape_cast %267 : vector<1x16x16xf32> to vector<16x16xf32>
    %269 = vector.broadcast %0 : f32 to vector<16x16xf32>
    %270 = arith.mulf %269, %268 : vector<16x16xf32>
    %271 = arith.mulf %11, %264 : vector<16x16xf32>
    %272 = vector.broadcast %1 : f32 to vector<16x16xf32>
    %273 = arith.mulf %272, %271 : vector<16x16xf32>
    %274 = arith.addf %270, %273 : vector<16x16xf32>
    %c0_118 = arith.constant 0 : index
    %c0_119 = arith.constant 0 : index
    %c0_120 = arith.constant 0 : index
    %c3_121 = arith.constant 3 : index
    %c0_122 = arith.constant 0 : index
    %c0_123 = arith.constant 0 : index
    %275 = vector.load %arg11[%c0_118, %c0_119, %c0_120, %c3_121, %c0_122, %c0_123] : memref<1x1x2x4x16x16xf32, #tpu.memory_space<vmem>>, vector<1x1x1x1x16x16xf32>
    %276 = vector.shape_cast %275 : vector<1x1x1x1x16x16xf32> to vector<16x16xf32>
    %277 = vector.shape_cast %274 : vector<16x16xf32> to vector<1x1x1x1x16x16xf32>
    tpu.vector_store %arg11[%c0_118, %c0_119, %c0_120, %c3_121, %c0_122, %c0_123], %277 {strides = array<i32>} : memref<1x1x2x4x16x16xf32, #tpu.memory_space<vmem>>, vector<1x1x1x1x16x16xf32>,
    %278 = vector.extract_strided_slice %27 {offsets = [3, 0, 0], sizes = [1, 16, 16], strides = [1, 1, 1]} : vector<4x16x16xf32> to vector<1x16x16xf32>
    %279 = vector.shape_cast %278 : vector<1x16x16xf32> to vector<16x16xf32>
    %280 = vector.broadcast %0 : f32 to vector<16x16xf32>
    %281 = arith.mulf %280, %279 : vector<16x16xf32>
    %282 = arith.mulf %11, %266 : vector<16x16xf32>
    %283 = vector.broadcast %1 : f32 to vector<16x16xf32>
    %284 = arith.mulf %283, %282 : vector<16x16xf32>
    %285 = arith.addf %281, %284 : vector<16x16xf32>
    %c0_124 = arith.constant 0 : index
    %c0_125 = arith.constant 0 : index
    %c1_126 = arith.constant 1 : index
    %c3_127 = arith.constant 3 : index
    %c0_128 = arith.constant 0 : index
    %c0_129 = arith.constant 0 : index
    %286 = vector.load %arg11[%c0_124, %c0_125, %c1_126, %c3_127, %c0_128, %c0_129] : memref<1x1x2x4x16x16xf32, #tpu.memory_space<vmem>>, vector<1x1x1x1x16x16xf32>
    %287 = vector.shape_cast %286 : vector<1x1x1x1x16x16xf32> to vector<16x16xf32>
    %288 = vector.shape_cast %285 : vector<16x16xf32> to vector<1x1x1x1x16x16xf32>
    tpu.vector_store %arg11[%c0_124, %c0_125, %c1_126, %c3_127, %c0_128, %c0_129], %288 {strides = array<i32>} : memref<1x1x2x4x16x16xf32, #tpu.memory_space<vmem>>, vector<1x1x1x1x16x16xf32>,
    %289 = vector.extract_strided_slice %72 {offsets = [3, 0, 0], sizes = [1, 16, 16], strides = [1, 1, 1]} : vector<4x16x16xf32> to vector<1x16x16xf32>
    %290 = vector.shape_cast %289 : vector<1x16x16xf32> to vector<16x16xf32>
    %291 = vector.extract_strided_slice %73 {offsets = [3, 0, 0], sizes = [1, 16, 16], strides = [1, 1, 1]} : vector<4x16x16xf32> to vector<1x16x16xf32>
    %292 = vector.shape_cast %291 : vector<1x16x16xf32> to vector<16x16xf32>
    %cst_130 = arith.constant dense<0.000000e+00> : vector<16x16xf32>
    %293 = tpu.matmul %13, %290, %cst_130 {dimension_numbers = #tpu.dot_dimension_numbers<[1], [0], [0], [1], [0, 0, 1, 1], [], []>, precision = #tpu.contract_precision<fp32>} : vector<16x16xf32>, vector<16x16xf32>, vector<16x16xf32> -> vector<16x16xf32>
    %cst_131 = arith.constant dense<0.000000e+00> : vector<16x16xf32>
    %294 = tpu.matmul %15, %292, %cst_131 {dimension_numbers = #tpu.dot_dimension_numbers<[1], [0], [0], [1], [0, 0, 1, 1], [], []>, precision = #tpu.contract_precision<fp32>} : vector<16x16xf32>, vector<16x16xf32>, vector<16x16xf32> -> vector<16x16xf32>
    %295 = arith.subf %290, %292 : vector<16x16xf32>
    %cst_132 = arith.constant dense<0.000000e+00> : vector<16x16xf32>
    %296 = tpu.matmul %17, %295, %cst_132 {dimension_numbers = #tpu.dot_dimension_numbers<[1], [0], [0], [1], [0, 0, 1, 1], [], []>, precision = #tpu.contract_precision<fp32>} : vector<16x16xf32>, vector<16x16xf32>, vector<16x16xf32> -> vector<16x16xf32>
    %297 = arith.addf %293, %294 : vector<16x16xf32>
    %298 = arith.subf %293, %294 : vector<16x16xf32>
    %299 = arith.subf %298, %296 : vector<16x16xf32>
    %300 = vector.extract_strided_slice %29 {offsets = [3, 0, 0], sizes = [1, 16, 16], strides = [1, 1, 1]} : vector<4x16x16xf32> to vector<1x16x16xf32>
    %301 = vector.shape_cast %300 : vector<1x16x16xf32> to vector<16x16xf32>
    %302 = arith.mulf %301, %297 : vector<16x16xf32>
    %303 = vector.extract_strided_slice %31 {offsets = [3, 0, 0], sizes = [1, 16, 16], strides = [1, 1, 1]} : vector<4x16x16xf32> to vector<1x16x16xf32>
    %304 = vector.shape_cast %303 : vector<1x16x16xf32> to vector<16x16xf32>
    %305 = arith.mulf %304, %299 : vector<16x16xf32>
    %306 = arith.addf %302, %305 : vector<16x16xf32>
    %307 = arith.addf %247, %306 : vector<16x16xf32>
    %308 = vector.extract_strided_slice %29 {offsets = [3, 0, 0], sizes = [1, 16, 16], strides = [1, 1, 1]} : vector<4x16x16xf32> to vector<1x16x16xf32>
    %309 = vector.shape_cast %308 : vector<1x16x16xf32> to vector<16x16xf32>
    %310 = arith.mulf %309, %299 : vector<16x16xf32>
    %311 = vector.extract_strided_slice %31 {offsets = [3, 0, 0], sizes = [1, 16, 16], strides = [1, 1, 1]} : vector<4x16x16xf32> to vector<1x16x16xf32>
    %312 = vector.shape_cast %311 : vector<1x16x16xf32> to vector<16x16xf32>
    %313 = arith.mulf %312, %297 : vector<16x16xf32>
    %314 = arith.subf %310, %313 : vector<16x16xf32>
    %315 = arith.addf %255, %314 : vector<16x16xf32>
    %c0_i32 = arith.constant 0 : i32
    %316 = arith.cmpi eq, %arg2, %c0_i32 : i32
    %317 = arith.extui %316 : i1 to i32
    %c0_i32_133 = arith.constant 0 : i32
    %318 = arith.cmpi ne, %317, %c0_i32_133 : i32
    scf.if %318 {
      %335 = vector.broadcast %2 : f32 to vector<16x16xf32>
      %336 = arith.mulf %335, %5 : vector<16x16xf32>
      %c0_154 = arith.constant 0 : index
      %c0_155 = arith.constant 0 : index
      %c0_156 = arith.constant 0 : index
      %c0_157 = arith.constant 0 : index
      %c0_158 = arith.constant 0 : index
      %337 = vector.load %arg10[%c0_154, %c0_155, %c0_156, %c0_157, %c0_158] : memref<1x1x2x16x16xf32, #tpu.memory_space<vmem>>, vector<1x1x1x16x16xf32>
      %338 = vector.shape_cast %337 : vector<1x1x1x16x16xf32> to vector<16x16xf32>
      %339 = vector.shape_cast %336 : vector<16x16xf32> to vector<1x1x1x16x16xf32>
      tpu.vector_store %arg10[%c0_154, %c0_155, %c0_156, %c0_157, %c0_158], %339 {strides = array<i32>} : memref<1x1x2x16x16xf32, #tpu.memory_space<vmem>>, vector<1x1x1x16x16xf32>,
      %340 = vector.broadcast %2 : f32 to vector<16x16xf32>
      %341 = arith.mulf %340, %7 : vector<16x16xf32>
      %c0_159 = arith.constant 0 : index
      %c0_160 = arith.constant 0 : index
      %c1_161 = arith.constant 1 : index
      %c0_162 = arith.constant 0 : index
      %c0_163 = arith.constant 0 : index
      %342 = vector.load %arg10[%c0_159, %c0_160, %c1_161, %c0_162, %c0_163] : memref<1x1x2x16x16xf32, #tpu.memory_space<vmem>>, vector<1x1x1x16x16xf32>
      %343 = vector.shape_cast %342 : vector<1x1x1x16x16xf32> to vector<16x16xf32>
      %344 = vector.shape_cast %341 : vector<16x16xf32> to vector<1x1x1x16x16xf32>
      tpu.vector_store %arg10[%c0_159, %c0_160, %c1_161, %c0_162, %c0_163], %344 {strides = array<i32>} : memref<1x1x2x16x16xf32, #tpu.memory_space<vmem>>, vector<1x1x1x16x16xf32>,
    } else {
    }
    %c0_134 = arith.constant 0 : index
    %c0_135 = arith.constant 0 : index
    %c0_136 = arith.constant 0 : index
    %c0_137 = arith.constant 0 : index
    %c0_138 = arith.constant 0 : index
    %319 = vector.load %arg10[%c0_134, %c0_135, %c0_136, %c0_137, %c0_138] : memref<1x1x2x16x16xf32, #tpu.memory_space<vmem>>, vector<1x1x1x16x16xf32>
    %320 = vector.shape_cast %319 : vector<1x1x1x16x16xf32> to vector<16x16xf32>
    %321 = vector.broadcast %3 : f32 to vector<16x16xf32>
    %322 = arith.mulf %321, %307 : vector<16x16xf32>
    %323 = arith.addf %320, %322 : vector<16x16xf32>
    %c0_139 = arith.constant 0 : index
    %c0_140 = arith.constant 0 : index
    %c0_141 = arith.constant 0 : index
    %c0_142 = arith.constant 0 : index
    %c0_143 = arith.constant 0 : index
    %324 = vector.load %arg10[%c0_139, %c0_140, %c0_141, %c0_142, %c0_143] : memref<1x1x2x16x16xf32, #tpu.memory_space<vmem>>, vector<1x1x1x16x16xf32>
    %325 = vector.shape_cast %324 : vector<1x1x1x16x16xf32> to vector<16x16xf32>
    %326 = vector.shape_cast %323 : vector<16x16xf32> to vector<1x1x1x16x16xf32>
    tpu.vector_store %arg10[%c0_139, %c0_140, %c0_141, %c0_142, %c0_143], %326 {strides = array<i32>} : memref<1x1x2x16x16xf32, #tpu.memory_space<vmem>>, vector<1x1x1x16x16xf32>,
    %c0_144 = arith.constant 0 : index
    %c0_145 = arith.constant 0 : index
    %c1_146 = arith.constant 1 : index
    %c0_147 = arith.constant 0 : index
    %c0_148 = arith.constant 0 : index
    %327 = vector.load %arg10[%c0_144, %c0_145, %c1_146, %c0_147, %c0_148] : memref<1x1x2x16x16xf32, #tpu.memory_space<vmem>>, vector<1x1x1x16x16xf32>
    %328 = vector.shape_cast %327 : vector<1x1x1x16x16xf32> to vector<16x16xf32>
    %329 = vector.broadcast %3 : f32 to vector<16x16xf32>
    %330 = arith.mulf %329, %315 : vector<16x16xf32>
    %331 = arith.addf %328, %330 : vector<16x16xf32>
    %c0_149 = arith.constant 0 : index
    %c0_150 = arith.constant 0 : index
    %c1_151 = arith.constant 1 : index
    %c0_152 = arith.constant 0 : index
    %c0_153 = arith.constant 0 : index
    %332 = vector.load %arg10[%c0_149, %c0_150, %c1_151, %c0_152, %c0_153] : memref<1x1x2x16x16xf32, #tpu.memory_space<vmem>>, vector<1x1x1x16x16xf32>
    %333 = vector.shape_cast %332 : vector<1x1x1x16x16xf32> to vector<16x16xf32>
    %334 = vector.shape_cast %331 : vector<16x16xf32> to vector<1x1x1x16x16xf32>
    tpu.vector_store %arg10[%c0_149, %c0_150, %c1_151, %c0_152, %c0_153], %334 {strides = array<i32>} : memref<1x1x2x16x16xf32, #tpu.memory_space<vmem>>, vector<1x1x1x16x16xf32>,
    return
  }
  func.func @transform_0(%arg0: i32, %arg1: i32, %arg2: i32) -> i32 {
    %c0_i32 = arith.constant 0 : i32
    %c0_i32_0 = arith.constant 0 : i32
    return %c0_i32 : i32
  }
  func.func @transform_1(%arg0: i32, %arg1: i32, %arg2: i32) -> (i32, i32, i32) {
    %c0_i32 = arith.constant 0 : i32
    %c0_i32_0 = arith.constant 0 : i32
    %c0_i32_1 = arith.constant 0 : i32
    %c0_i32_2 = arith.constant 0 : i32
    return %c0_i32, %c0_i32_0, %c0_i32_1 : i32, i32, i32
  }
  func.func @transform_2(%arg0: i32, %arg1: i32, %arg2: i32) -> (i32, i32, i32) {
    %c0_i32 = arith.constant 0 : i32
    %c0_i32_0 = arith.constant 0 : i32
    %c0_i32_1 = arith.constant 0 : i32
    %c0_i32_2 = arith.constant 0 : i32
    return %c0_i32, %c0_i32_0, %c0_i32_1 : i32, i32, i32
  }
  func.func @transform_3(%arg0: i32, %arg1: i32, %arg2: i32) -> (i32, i32, i32, i32, i32) {
    %c0_i32 = arith.constant 0 : i32
    %c0_i32_0 = arith.constant 0 : i32
    %c0_i32_1 = arith.constant 0 : i32
    %c0_i32_2 = arith.constant 0 : i32
    return %arg0, %arg1, %c0_i32, %c0_i32_0, %c0_i32_1 : i32, i32, i32, i32, i32
  }
  func.func @transform_4(%arg0: i32, %arg1: i32, %arg2: i32) -> (i32, i32, i32, i32, i32, i32) {
    %c0_i32 = arith.constant 0 : i32
    %c0_i32_0 = arith.constant 0 : i32
    %c0_i32_1 = arith.constant 0 : i32
    %c0_i32_2 = arith.constant 0 : i32
    return %arg0, %arg1, %c0_i32, %arg2, %c0_i32_0, %c0_i32_1 : i32, i32, i32, i32, i32, i32
  }
  func.func @transform_5(%arg0: i32, %arg1: i32, %arg2: i32) -> (i32, i32, i32, i32) {
    %c0_i32 = arith.constant 0 : i32
    %c0_i32_0 = arith.constant 0 : i32
    %c0_i32_1 = arith.constant 0 : i32
    return %arg0, %arg1, %c0_i32, %c0_i32_0 : i32, i32, i32, i32
  }
  func.func @transform_6(%arg0: i32, %arg1: i32, %arg2: i32) -> (i32, i32, i32, i32, i32) {
    %c0_i32 = arith.constant 0 : i32
    %c0_i32_0 = arith.constant 0 : i32
    %c0_i32_1 = arith.constant 0 : i32
    %c0_i32_2 = arith.constant 0 : i32
    return %arg0, %c0_i32, %arg2, %c0_i32_0, %c0_i32_1 : i32, i32, i32, i32, i32
  }
  func.func @transform_7(%arg0: i32, %arg1: i32, %arg2: i32) -> (i32, i32, i32, i32, i32) {
    %c0_i32 = arith.constant 0 : i32
    %c0_i32_0 = arith.constant 0 : i32
    %c0_i32_1 = arith.constant 0 : i32
    %c0_i32_2 = arith.constant 0 : i32
    return %arg0, %arg1, %c0_i32, %c0_i32_0, %c0_i32_1 : i32, i32, i32, i32, i32
  }
  func.func @transform_8(%arg0: i32, %arg1: i32, %arg2: i32) -> (i32, i32, i32, i32, i32, i32) {
    %c0_i32 = arith.constant 0 : i32
    %c0_i32_0 = arith.constant 0 : i32
    %c0_i32_1 = arith.constant 0 : i32
    %c0_i32_2 = arith.constant 0 : i32
    return %arg0, %arg1, %c0_i32, %arg2, %c0_i32_0, %c0_i32_1 : i32, i32, i32, i32, i32, i32
  }
}

module attributes {stable_mosaic.version = 11 : i64} {
  func.func @_info_share_kernel(%arg0: i32, %arg1: i32, %arg2: i32, %arg3: memref<4xf32, #tpu.memory_space<smem>>, %arg4: memref<3x16x16xf32, #tpu.memory_space<vmem>>, %arg5: memref<3x16x16xf32, #tpu.memory_space<vmem>>, %arg6: memref<1x1x2x16x16xf32, #tpu.memory_space<vmem>>, %arg7: memref<1x1x2x4x16x16xf32, #tpu.memory_space<vmem>>, %arg8: memref<1x1x1x16xf32, #tpu.memory_space<vmem>>, %arg9: memref<1x2x4x16x16xf32, #tpu.memory_space<vmem>>, %arg10: memref<1x1x2x16x16xf32, #tpu.memory_space<vmem>>, %arg11: memref<1x1x2x4x16x16xf32, #tpu.memory_space<vmem>>) attributes {dimension_semantics = [#tpu.dimension_semantics<parallel>, #tpu.dimension_semantics<parallel>, #tpu.dimension_semantics<arbitrary>], iteration_bounds = array<i64: 2, 3, 1>, scalar_prefetch = 0 : i64, scratch_operands = 0 : i64, tpu.core_type = #tpu.core_type<tc>, window_params = [{transform_indices = @transform_0, window_bounds = array<i64: 4>}, {pipeline_mode = #tpu.pipeline_mode<synchronous>, transform_indices = @transform_1, window_bounds = array<i64: 3, 16, 16>}, {pipeline_mode = #tpu.pipeline_mode<synchronous>, transform_indices = @transform_2, window_bounds = array<i64: 3, 16, 16>}, {transform_indices = @transform_3, window_bounds = array<i64: 1, 1, 2, 16, 16>}, {transform_indices = @transform_4, window_bounds = array<i64: 1, 1, 2, 4, 16, 16>}, {transform_indices = @transform_5, window_bounds = array<i64: 1, 1, 1, 16>}, {transform_indices = @transform_6, window_bounds = array<i64: 1, 2, 4, 16, 16>}, {transform_indices = @transform_7, window_bounds = array<i64: 1, 1, 2, 16, 16>}, {transform_indices = @transform_8, window_bounds = array<i64: 1, 1, 2, 4, 16, 16>}]} {
    %c0 = arith.constant 0 : index
    %0 = memref.load %arg3[%c0] : memref<4xf32, #tpu.memory_space<smem>>
    %c1 = arith.constant 1 : index
    %1 = memref.load %arg3[%c1] : memref<4xf32, #tpu.memory_space<smem>>
    %c2 = arith.constant 2 : index
    %2 = memref.load %arg3[%c2] : memref<4xf32, #tpu.memory_space<smem>>
    %c3 = arith.constant 3 : index
    %3 = memref.load %arg3[%c3] : memref<4xf32, #tpu.memory_space<smem>>
    %c0_0 = arith.constant 0 : index
    %c0_1 = arith.constant 0 : index
    %c0_2 = arith.constant 0 : index
    %c0_3 = arith.constant 0 : index
    %c0_4 = arith.constant 0 : index
    %4 = vector.load %arg6[%c0_0, %c0_1, %c0_2, %c0_3, %c0_4] : memref<1x1x2x16x16xf32, #tpu.memory_space<vmem>>, vector<1x1x1x16x16xf32>
    %5 = vector.shape_cast %4 : vector<1x1x1x16x16xf32> to vector<16x16xf32>
    %c0_5 = arith.constant 0 : index
    %c0_6 = arith.constant 0 : index
    %c1_7 = arith.constant 1 : index
    %c0_8 = arith.constant 0 : index
    %c0_9 = arith.constant 0 : index
    %6 = vector.load %arg6[%c0_5, %c0_6, %c1_7, %c0_8, %c0_9] : memref<1x1x2x16x16xf32, #tpu.memory_space<vmem>>, vector<1x1x1x16x16xf32>
    %7 = vector.shape_cast %6 : vector<1x1x1x16x16xf32> to vector<16x16xf32>
    %c0_10 = arith.constant 0 : index
    %c0_11 = arith.constant 0 : index
    %c0_12 = arith.constant 0 : index
    %c0_13 = arith.constant 0 : index
    %8 = vector.load %arg8[%c0_10, %c0_11, %c0_12, %c0_13] : memref<1x1x1x16xf32, #tpu.memory_space<vmem>>, vector<1x1x1x16xf32>
    %9 = vector.shape_cast %8 : vector<1x1x1x16xf32> to vector<1x16xf32>
    %10 = vector.shape_cast %9 : vector<1x16xf32> to vector<1x16xf32>
    %11 = vector.broadcast %10 : vector<1x16xf32> to vector<16x16xf32>
    %c0_14 = arith.constant 0 : index
    %c0_15 = arith.constant 0 : index
    %c0_16 = arith.constant 0 : index
    %12 = vector.load %arg4[%c0_14, %c0_15, %c0_16] : memref<3x16x16xf32, #tpu.memory_space<vmem>>, vector<1x16x16xf32>
    %13 = vector.shape_cast %12 : vector<1x16x16xf32> to vector<16x16xf32>
    %c1_17 = arith.constant 1 : index
    %c0_18 = arith.constant 0 : index
    %c0_19 = arith.constant 0 : index
    %14 = vector.load %arg4[%c1_17, %c0_18, %c0_19] : memref<3x16x16xf32, #tpu.memory_space<vmem>>, vector<1x16x16xf32>
    %15 = vector.shape_cast %14 : vector<1x16x16xf32> to vector<16x16xf32>
    %c2_20 = arith.constant 2 : index
    %c0_21 = arith.constant 0 : index
    %c0_22 = arith.constant 0 : index
    %16 = vector.load %arg4[%c2_20, %c0_21, %c0_22] : memref<3x16x16xf32, #tpu.memory_space<vmem>>, vector<1x16x16xf32>
    %17 = vector.shape_cast %16 : vector<1x16x16xf32> to vector<16x16xf32>
    %c0_23 = arith.constant 0 : index
    %c0_24 = arith.constant 0 : index
    %c0_25 = arith.constant 0 : index
    %18 = vector.load %arg5[%c0_23, %c0_24, %c0_25] : memref<3x16x16xf32, #tpu.memory_space<vmem>>, vector<1x16x16xf32>
    %19 = vector.shape_cast %18 : vector<1x16x16xf32> to vector<16x16xf32>
    %c1_26 = arith.constant 1 : index
    %c0_27 = arith.constant 0 : index
    %c0_28 = arith.constant 0 : index
    %20 = vector.load %arg5[%c1_26, %c0_27, %c0_28] : memref<3x16x16xf32, #tpu.memory_space<vmem>>, vector<1x16x16xf32>
    %21 = vector.shape_cast %20 : vector<1x16x16xf32> to vector<16x16xf32>
    %c2_29 = arith.constant 2 : index
    %c0_30 = arith.constant 0 : index
    %c0_31 = arith.constant 0 : index
    %22 = vector.load %arg5[%c2_29, %c0_30, %c0_31] : memref<3x16x16xf32, #tpu.memory_space<vmem>>, vector<1x16x16xf32>
    %23 = vector.shape_cast %22 : vector<1x16x16xf32> to vector<16x16xf32>
    %c0_32 = arith.constant 0 : index
    %c0_33 = arith.constant 0 : index
    %c0_34 = arith.constant 0 : index
    %c0_35 = arith.constant 0 : index
    %c0_36 = arith.constant 0 : index
    %c0_37 = arith.constant 0 : index
    %24 = vector.load %arg7[%c0_32, %c0_33, %c0_34, %c0_35, %c0_36, %c0_37] : memref<1x1x2x4x16x16xf32, #tpu.memory_space<vmem>>, vector<1x1x1x4x16x16xf32>
    %25 = vector.shape_cast %24 : vector<1x1x1x4x16x16xf32> to vector<4x16x16xf32>
    %c0_38 = arith.constant 0 : index
    %c0_39 = arith.constant 0 : index
    %c1_40 = arith.constant 1 : index
    %c0_41 = arith.constant 0 : index
    %c0_42 = arith.constant 0 : index
    %c0_43 = arith.constant 0 : index
    %26 = vector.load %arg7[%c0_38, %c0_39, %c1_40, %c0_41, %c0_42, %c0_43] : memref<1x1x2x4x16x16xf32, #tpu.memory_space<vmem>>, vector<1x1x1x4x16x16xf32>
    %27 = vector.shape_cast %26 : vector<1x1x1x4x16x16xf32> to vector<4x16x16xf32>
    %c0_44 = arith.constant 0 : index
    %c0_45 = arith.constant 0 : index
    %c0_46 = arith.constant 0 : index
    %c0_47 = arith.constant 0 : index
    %c0_48 = arith.constant 0 : index
    %28 = vector.load %arg9[%c0_44, %c0_45, %c0_46, %c0_47, %c0_48] : memref<1x2x4x16x16xf32, #tpu.memory_space<vmem>>, vector<1x1x4x16x16xf32>
    %29 = vector.shape_cast %28 : vector<1x1x4x16x16xf32> to vector<4x16x16xf32>
    %c0_49 = arith.constant 0 : index
    %c1_50 = arith.constant 1 : index
    %c0_51 = arith.constant 0 : index
    %c0_52 = arith.constant 0 : index
    %c0_53 = arith.constant 0 : index
    %30 = vector.load %arg9[%c0_49, %c1_50, %c0_51, %c0_52, %c0_53] : memref<1x2x4x16x16xf32, #tpu.memory_space<vmem>>, vector<1x1x4x16x16xf32>
    %31 = vector.shape_cast %30 : vector<1x1x4x16x16xf32> to vector<4x16x16xf32>
    %32 = vector.shape_cast %5 : vector<16x16xf32> to vector<1x16x16xf32>
    %33 = vector.broadcast %32 : vector<1x16x16xf32> to vector<4x16x16xf32>
    %34 = arith.mulf %29, %33 : vector<4x16x16xf32>
    %35 = vector.shape_cast %7 : vector<16x16xf32> to vector<1x16x16xf32>
    %36 = vector.broadcast %35 : vector<1x16x16xf32> to vector<4x16x16xf32>
    %37 = arith.mulf %31, %36 : vector<4x16x16xf32>
    %38 = arith.subf %34, %37 : vector<4x16x16xf32>
    %39 = vector.shape_cast %7 : vector<16x16xf32> to vector<1x16x16xf32>
    %40 = vector.broadcast %39 : vector<1x16x16xf32> to vector<4x16x16xf32>
    %41 = arith.mulf %29, %40 : vector<4x16x16xf32>
    %42 = vector.shape_cast %5 : vector<16x16xf32> to vector<1x16x16xf32>
    %43 = vector.broadcast %42 : vector<1x16x16xf32> to vector<4x16x16xf32>
    %44 = arith.mulf %31, %43 : vector<4x16x16xf32>
    %45 = arith.addf %41, %44 : vector<4x16x16xf32>
    %46 = vector.shape_cast %38 : vector<4x16x16xf32> to vector<64x16xf32>
    %47 = vector.shape_cast %45 : vector<4x16x16xf32> to vector<64x16xf32>
    %cst = arith.constant dense<0.000000e+00> : vector<64x16xf32>
    %48 = tpu.matmul %46, %19, %cst {dimension_numbers = #tpu.dot_dimension_numbers<[1], [0], [0], [1], [0, 0, 1, 1], [], []>} : vector<64x16xf32>, vector<16x16xf32>, vector<64x16xf32> -> vector<64x16xf32>
    %cst_54 = arith.constant dense<0.000000e+00> : vector<64x16xf32>
    %49 = tpu.matmul %47, %21, %cst_54 {dimension_numbers = #tpu.dot_dimension_numbers<[1], [0], [0], [1], [0, 0, 1, 1], [], []>} : vector<64x16xf32>, vector<16x16xf32>, vector<64x16xf32> -> vector<64x16xf32>
    %50 = arith.addf %46, %47 : vector<64x16xf32>
    %cst_55 = arith.constant dense<0.000000e+00> : vector<64x16xf32>
    %51 = tpu.matmul %50, %23, %cst_55 {dimension_numbers = #tpu.dot_dimension_numbers<[1], [0], [0], [1], [0, 0, 1, 1], [], []>} : vector<64x16xf32>, vector<16x16xf32>, vector<64x16xf32> -> vector<64x16xf32>
    %52 = arith.subf %48, %49 : vector<64x16xf32>
    %53 = arith.subf %51, %48 : vector<64x16xf32>
    %54 = arith.subf %53, %49 : vector<64x16xf32>
    %55 = vector.shape_cast %52 : vector<64x16xf32> to vector<4x16x16xf32>
    %56 = vector.shape_cast %54 : vector<64x16xf32> to vector<4x16x16xf32>
    %57 = vector.shape_cast %11 : vector<16x16xf32> to vector<1x16x16xf32>
    %58 = vector.broadcast %57 : vector<1x16x16xf32> to vector<4x16x16xf32>
    %59 = arith.mulf %58, %25 : vector<4x16x16xf32>
    %60 = vector.shape_cast %11 : vector<16x16xf32> to vector<1x16x16xf32>
    %61 = vector.broadcast %60 : vector<1x16x16xf32> to vector<4x16x16xf32>
    %62 = arith.mulf %61, %27 : vector<4x16x16xf32>
    %63 = vector.shape_cast %59 : vector<4x16x16xf32> to vector<64x16xf32>
    %64 = vector.shape_cast %62 : vector<4x16x16xf32> to vector<64x16xf32>
    %cst_56 = arith.constant dense<0.000000e+00> : vector<64x16xf32>
    %65 = tpu.matmul %63, %19, %cst_56 {dimension_numbers = #tpu.dot_dimension_numbers<[1], [0], [0], [1], [0, 0, 1, 1], [], []>} : vector<64x16xf32>, vector<16x16xf32>, vector<64x16xf32> -> vector<64x16xf32>
    %cst_57 = arith.constant dense<0.000000e+00> : vector<64x16xf32>
    %66 = tpu.matmul %64, %21, %cst_57 {dimension_numbers = #tpu.dot_dimension_numbers<[1], [0], [0], [1], [0, 0, 1, 1], [], []>} : vector<64x16xf32>, vector<16x16xf32>, vector<64x16xf32> -> vector<64x16xf32>
    %67 = arith.subf %63, %64 : vector<64x16xf32>
    %cst_58 = arith.constant dense<0.000000e+00> : vector<64x16xf32>
    %68 = tpu.matmul %67, %23, %cst_58 {dimension_numbers = #tpu.dot_dimension_numbers<[1], [0], [0], [1], [0, 0, 1, 1], [], []>} : vector<64x16xf32>, vector<16x16xf32>, vector<64x16xf32> -> vector<64x16xf32>
    %69 = arith.addf %65, %66 : vector<64x16xf32>
    %70 = arith.subf %65, %66 : vector<64x16xf32>
    %71 = arith.subf %70, %68 : vector<64x16xf32>
    %72 = vector.shape_cast %69 : vector<64x16xf32> to vector<4x16x16xf32>
    %73 = vector.shape_cast %71 : vector<64x16xf32> to vector<4x16x16xf32>
    %cst_59 = arith.constant 0.000000e+00 : f32
    %74 = vector.broadcast %cst_59 : f32 to vector<16x16xf32>
    %cst_60 = arith.constant 0.000000e+00 : f32
    %75 = vector.broadcast %cst_60 : f32 to vector<16x16xf32>
    %76 = vector.extract_strided_slice %55 {offsets = [0, 0, 0], sizes = [1, 16, 16], strides = [1, 1, 1]} : vector<4x16x16xf32> to vector<1x16x16xf32>
    %77 = vector.shape_cast %76 : vector<1x16x16xf32> to vector<16x16xf32>
    %78 = vector.extract_strided_slice %56 {offsets = [0, 0, 0], sizes = [1, 16, 16], strides = [1, 1, 1]} : vector<4x16x16xf32> to vector<1x16x16xf32>
    %79 = vector.shape_cast %78 : vector<1x16x16xf32> to vector<16x16xf32>
    %cst_61 = arith.constant dense<0.000000e+00> : vector<16x16xf32>
    %80 = tpu.matmul %13, %77, %cst_61 {dimension_numbers = #tpu.dot_dimension_numbers<[1], [0], [0], [1], [0, 0, 1, 1], [], []>} : vector<16x16xf32>, vector<16x16xf32>, vector<16x16xf32> -> vector<16x16xf32>
    %cst_62 = arith.constant dense<0.000000e+00> : vector<16x16xf32>
    %81 = tpu.matmul %15, %79, %cst_62 {dimension_numbers = #tpu.dot_dimension_numbers<[1], [0], [0], [1], [0, 0, 1, 1], [], []>} : vector<16x16xf32>, vector<16x16xf32>, vector<16x16xf32> -> vector<16x16xf32>
    %82 = arith.addf %77, %79 : vector<16x16xf32>
    %cst_63 = arith.constant dense<0.000000e+00> : vector<16x16xf32>
    %83 = tpu.matmul %17, %82, %cst_63 {dimension_numbers = #tpu.dot_dimension_numbers<[1], [0], [0], [1], [0, 0, 1, 1], [], []>} : vector<16x16xf32>, vector<16x16xf32>, vector<16x16xf32> -> vector<16x16xf32>
    %84 = arith.subf %80, %81 : vector<16x16xf32>
    %85 = arith.subf %83, %80 : vector<16x16xf32>
    %86 = arith.subf %85, %81 : vector<16x16xf32>
    %87 = vector.extract_strided_slice %25 {offsets = [0, 0, 0], sizes = [1, 16, 16], strides = [1, 1, 1]} : vector<4x16x16xf32> to vector<1x16x16xf32>
    %88 = vector.shape_cast %87 : vector<1x16x16xf32> to vector<16x16xf32>
    %89 = vector.broadcast %0 : f32 to vector<16x16xf32>
    %90 = arith.mulf %89, %88 : vector<16x16xf32>
    %91 = arith.mulf %11, %84 : vector<16x16xf32>
    %92 = vector.broadcast %1 : f32 to vector<16x16xf32>
    %93 = arith.mulf %92, %91 : vector<16x16xf32>
    %94 = arith.addf %90, %93 : vector<16x16xf32>
    %c0_64 = arith.constant 0 : index
    %c0_65 = arith.constant 0 : index
    %c0_66 = arith.constant 0 : index
    %c0_67 = arith.constant 0 : index
    %c0_68 = arith.constant 0 : index
    %c0_69 = arith.constant 0 : index
    %95 = vector.load %arg11[%c0_64, %c0_65, %c0_66, %c0_67, %c0_68, %c0_69] : memref<1x1x2x4x16x16xf32, #tpu.memory_space<vmem>>, vector<1x1x1x1x16x16xf32>
    %96 = vector.shape_cast %95 : vector<1x1x1x1x16x16xf32> to vector<16x16xf32>
    %97 = vector.shape_cast %94 : vector<16x16xf32> to vector<1x1x1x1x16x16xf32>
    tpu.vector_store %arg11[%c0_64, %c0_65, %c0_66, %c0_67, %c0_68, %c0_69], %97 {strides = array<i32>} : memref<1x1x2x4x16x16xf32, #tpu.memory_space<vmem>>, vector<1x1x1x1x16x16xf32>,
    %98 = vector.extract_strided_slice %27 {offsets = [0, 0, 0], sizes = [1, 16, 16], strides = [1, 1, 1]} : vector<4x16x16xf32> to vector<1x16x16xf32>
    %99 = vector.shape_cast %98 : vector<1x16x16xf32> to vector<16x16xf32>
    %100 = vector.broadcast %0 : f32 to vector<16x16xf32>
    %101 = arith.mulf %100, %99 : vector<16x16xf32>
    %102 = arith.mulf %11, %86 : vector<16x16xf32>
    %103 = vector.broadcast %1 : f32 to vector<16x16xf32>
    %104 = arith.mulf %103, %102 : vector<16x16xf32>
    %105 = arith.addf %101, %104 : vector<16x16xf32>
    %c0_70 = arith.constant 0 : index
    %c0_71 = arith.constant 0 : index
    %c1_72 = arith.constant 1 : index
    %c0_73 = arith.constant 0 : index
    %c0_74 = arith.constant 0 : index
    %c0_75 = arith.constant 0 : index
    %106 = vector.load %arg11[%c0_70, %c0_71, %c1_72, %c0_73, %c0_74, %c0_75] : memref<1x1x2x4x16x16xf32, #tpu.memory_space<vmem>>, vector<1x1x1x1x16x16xf32>
    %107 = vector.shape_cast %106 : vector<1x1x1x1x16x16xf32> to vector<16x16xf32>
    %108 = vector.shape_cast %105 : vector<16x16xf32> to vector<1x1x1x1x16x16xf32>
    tpu.vector_store %arg11[%c0_70, %c0_71, %c1_72, %c0_73, %c0_74, %c0_75], %108 {strides = array<i32>} : memref<1x1x2x4x16x16xf32, #tpu.memory_space<vmem>>, vector<1x1x1x1x16x16xf32>,
    %109 = vector.extract_strided_slice %72 {offsets = [0, 0, 0], sizes = [1, 16, 16], strides = [1, 1, 1]} : vector<4x16x16xf32> to vector<1x16x16xf32>
    %110 = vector.shape_cast %109 : vector<1x16x16xf32> to vector<16x16xf32>
    %111 = vector.extract_strided_slice %73 {offsets = [0, 0, 0], sizes = [1, 16, 16], strides = [1, 1, 1]} : vector<4x16x16xf32> to vector<1x16x16xf32>
    %112 = vector.shape_cast %111 : vector<1x16x16xf32> to vector<16x16xf32>
    %cst_76 = arith.constant dense<0.000000e+00> : vector<16x16xf32>
    %113 = tpu.matmul %13, %110, %cst_76 {dimension_numbers = #tpu.dot_dimension_numbers<[1], [0], [0], [1], [0, 0, 1, 1], [], []>} : vector<16x16xf32>, vector<16x16xf32>, vector<16x16xf32> -> vector<16x16xf32>
    %cst_77 = arith.constant dense<0.000000e+00> : vector<16x16xf32>
    %114 = tpu.matmul %15, %112, %cst_77 {dimension_numbers = #tpu.dot_dimension_numbers<[1], [0], [0], [1], [0, 0, 1, 1], [], []>} : vector<16x16xf32>, vector<16x16xf32>, vector<16x16xf32> -> vector<16x16xf32>
    %115 = arith.subf %110, %112 : vector<16x16xf32>
    %cst_78 = arith.constant dense<0.000000e+00> : vector<16x16xf32>
    %116 = tpu.matmul %17, %115, %cst_78 {dimension_numbers = #tpu.dot_dimension_numbers<[1], [0], [0], [1], [0, 0, 1, 1], [], []>} : vector<16x16xf32>, vector<16x16xf32>, vector<16x16xf32> -> vector<16x16xf32>
    %117 = arith.addf %113, %114 : vector<16x16xf32>
    %118 = arith.subf %113, %114 : vector<16x16xf32>
    %119 = arith.subf %118, %116 : vector<16x16xf32>
    %120 = vector.extract_strided_slice %29 {offsets = [0, 0, 0], sizes = [1, 16, 16], strides = [1, 1, 1]} : vector<4x16x16xf32> to vector<1x16x16xf32>
    %121 = vector.shape_cast %120 : vector<1x16x16xf32> to vector<16x16xf32>
    %122 = arith.mulf %121, %117 : vector<16x16xf32>
    %123 = vector.extract_strided_slice %31 {offsets = [0, 0, 0], sizes = [1, 16, 16], strides = [1, 1, 1]} : vector<4x16x16xf32> to vector<1x16x16xf32>
    %124 = vector.shape_cast %123 : vector<1x16x16xf32> to vector<16x16xf32>
    %125 = arith.mulf %124, %119 : vector<16x16xf32>
    %126 = arith.addf %122, %125 : vector<16x16xf32>
    %127 = arith.addf %74, %126 : vector<16x16xf32>
    %128 = vector.extract_strided_slice %29 {offsets = [0, 0, 0], sizes = [1, 16, 16], strides = [1, 1, 1]} : vector<4x16x16xf32> to vector<1x16x16xf32>
    %129 = vector.shape_cast %128 : vector<1x16x16xf32> to vector<16x16xf32>
    %130 = arith.mulf %129, %119 : vector<16x16xf32>
    %131 = vector.extract_strided_slice %31 {offsets = [0, 0, 0], sizes = [1, 16, 16], strides = [1, 1, 1]} : vector<4x16x16xf32> to vector<1x16x16xf32>
    %132 = vector.shape_cast %131 : vector<1x16x16xf32> to vector<16x16xf32>
    %133 = arith.mulf %132, %117 : vector<16x16xf32>
    %134 = arith.subf %130, %133 : vector<16x16xf32>
    %135 = arith.addf %75, %134 : vector<16x16xf32>
    %136 = vector.extract_strided_slice %55 {offsets = [1, 0, 0], sizes = [1, 16, 16], strides = [1, 1, 1]} : vector<4x16x16xf32> to vector<1x16x16xf32>
    %137 = vector.shape_cast %136 : vector<1x16x16xf32> to vector<16x16xf32>
    %138 = vector.extract_strided_slice %56 {offsets = [1, 0, 0], sizes = [1, 16, 16], strides = [1, 1, 1]} : vector<4x16x16xf32> to vector<1x16x16xf32>
    %139 = vector.shape_cast %138 : vector<1x16x16xf32> to vector<16x16xf32>
    %cst_79 = arith.constant dense<0.000000e+00> : vector<16x16xf32>
    %140 = tpu.matmul %13, %137, %cst_79 {dimension_numbers = #tpu.dot_dimension_numbers<[1], [0], [0], [1], [0, 0, 1, 1], [], []>} : vector<16x16xf32>, vector<16x16xf32>, vector<16x16xf32> -> vector<16x16xf32>
    %cst_80 = arith.constant dense<0.000000e+00> : vector<16x16xf32>
    %141 = tpu.matmul %15, %139, %cst_80 {dimension_numbers = #tpu.dot_dimension_numbers<[1], [0], [0], [1], [0, 0, 1, 1], [], []>} : vector<16x16xf32>, vector<16x16xf32>, vector<16x16xf32> -> vector<16x16xf32>
    %142 = arith.addf %137, %139 : vector<16x16xf32>
    %cst_81 = arith.constant dense<0.000000e+00> : vector<16x16xf32>
    %143 = tpu.matmul %17, %142, %cst_81 {dimension_numbers = #tpu.dot_dimension_numbers<[1], [0], [0], [1], [0, 0, 1, 1], [], []>} : vector<16x16xf32>, vector<16x16xf32>, vector<16x16xf32> -> vector<16x16xf32>
    %144 = arith.subf %140, %141 : vector<16x16xf32>
    %145 = arith.subf %143, %140 : vector<16x16xf32>
    %146 = arith.subf %145, %141 : vector<16x16xf32>
    %147 = vector.extract_strided_slice %25 {offsets = [1, 0, 0], sizes = [1, 16, 16], strides = [1, 1, 1]} : vector<4x16x16xf32> to vector<1x16x16xf32>
    %148 = vector.shape_cast %147 : vector<1x16x16xf32> to vector<16x16xf32>
    %149 = vector.broadcast %0 : f32 to vector<16x16xf32>
    %150 = arith.mulf %149, %148 : vector<16x16xf32>
    %151 = arith.mulf %11, %144 : vector<16x16xf32>
    %152 = vector.broadcast %1 : f32 to vector<16x16xf32>
    %153 = arith.mulf %152, %151 : vector<16x16xf32>
    %154 = arith.addf %150, %153 : vector<16x16xf32>
    %c0_82 = arith.constant 0 : index
    %c0_83 = arith.constant 0 : index
    %c0_84 = arith.constant 0 : index
    %c1_85 = arith.constant 1 : index
    %c0_86 = arith.constant 0 : index
    %c0_87 = arith.constant 0 : index
    %155 = vector.load %arg11[%c0_82, %c0_83, %c0_84, %c1_85, %c0_86, %c0_87] : memref<1x1x2x4x16x16xf32, #tpu.memory_space<vmem>>, vector<1x1x1x1x16x16xf32>
    %156 = vector.shape_cast %155 : vector<1x1x1x1x16x16xf32> to vector<16x16xf32>
    %157 = vector.shape_cast %154 : vector<16x16xf32> to vector<1x1x1x1x16x16xf32>
    tpu.vector_store %arg11[%c0_82, %c0_83, %c0_84, %c1_85, %c0_86, %c0_87], %157 {strides = array<i32>} : memref<1x1x2x4x16x16xf32, #tpu.memory_space<vmem>>, vector<1x1x1x1x16x16xf32>,
    %158 = vector.extract_strided_slice %27 {offsets = [1, 0, 0], sizes = [1, 16, 16], strides = [1, 1, 1]} : vector<4x16x16xf32> to vector<1x16x16xf32>
    %159 = vector.shape_cast %158 : vector<1x16x16xf32> to vector<16x16xf32>
    %160 = vector.broadcast %0 : f32 to vector<16x16xf32>
    %161 = arith.mulf %160, %159 : vector<16x16xf32>
    %162 = arith.mulf %11, %146 : vector<16x16xf32>
    %163 = vector.broadcast %1 : f32 to vector<16x16xf32>
    %164 = arith.mulf %163, %162 : vector<16x16xf32>
    %165 = arith.addf %161, %164 : vector<16x16xf32>
    %c0_88 = arith.constant 0 : index
    %c0_89 = arith.constant 0 : index
    %c1_90 = arith.constant 1 : index
    %c1_91 = arith.constant 1 : index
    %c0_92 = arith.constant 0 : index
    %c0_93 = arith.constant 0 : index
    %166 = vector.load %arg11[%c0_88, %c0_89, %c1_90, %c1_91, %c0_92, %c0_93] : memref<1x1x2x4x16x16xf32, #tpu.memory_space<vmem>>, vector<1x1x1x1x16x16xf32>
    %167 = vector.shape_cast %166 : vector<1x1x1x1x16x16xf32> to vector<16x16xf32>
    %168 = vector.shape_cast %165 : vector<16x16xf32> to vector<1x1x1x1x16x16xf32>
    tpu.vector_store %arg11[%c0_88, %c0_89, %c1_90, %c1_91, %c0_92, %c0_93], %168 {strides = array<i32>} : memref<1x1x2x4x16x16xf32, #tpu.memory_space<vmem>>, vector<1x1x1x1x16x16xf32>,
    %169 = vector.extract_strided_slice %72 {offsets = [1, 0, 0], sizes = [1, 16, 16], strides = [1, 1, 1]} : vector<4x16x16xf32> to vector<1x16x16xf32>
    %170 = vector.shape_cast %169 : vector<1x16x16xf32> to vector<16x16xf32>
    %171 = vector.extract_strided_slice %73 {offsets = [1, 0, 0], sizes = [1, 16, 16], strides = [1, 1, 1]} : vector<4x16x16xf32> to vector<1x16x16xf32>
    %172 = vector.shape_cast %171 : vector<1x16x16xf32> to vector<16x16xf32>
    %cst_94 = arith.constant dense<0.000000e+00> : vector<16x16xf32>
    %173 = tpu.matmul %13, %170, %cst_94 {dimension_numbers = #tpu.dot_dimension_numbers<[1], [0], [0], [1], [0, 0, 1, 1], [], []>} : vector<16x16xf32>, vector<16x16xf32>, vector<16x16xf32> -> vector<16x16xf32>
    %cst_95 = arith.constant dense<0.000000e+00> : vector<16x16xf32>
    %174 = tpu.matmul %15, %172, %cst_95 {dimension_numbers = #tpu.dot_dimension_numbers<[1], [0], [0], [1], [0, 0, 1, 1], [], []>} : vector<16x16xf32>, vector<16x16xf32>, vector<16x16xf32> -> vector<16x16xf32>
    %175 = arith.subf %170, %172 : vector<16x16xf32>
    %cst_96 = arith.constant dense<0.000000e+00> : vector<16x16xf32>
    %176 = tpu.matmul %17, %175, %cst_96 {dimension_numbers = #tpu.dot_dimension_numbers<[1], [0], [0], [1], [0, 0, 1, 1], [], []>} : vector<16x16xf32>, vector<16x16xf32>, vector<16x16xf32> -> vector<16x16xf32>
    %177 = arith.addf %173, %174 : vector<16x16xf32>
    %178 = arith.subf %173, %174 : vector<16x16xf32>
    %179 = arith.subf %178, %176 : vector<16x16xf32>
    %180 = vector.extract_strided_slice %29 {offsets = [1, 0, 0], sizes = [1, 16, 16], strides = [1, 1, 1]} : vector<4x16x16xf32> to vector<1x16x16xf32>
    %181 = vector.shape_cast %180 : vector<1x16x16xf32> to vector<16x16xf32>
    %182 = arith.mulf %181, %177 : vector<16x16xf32>
    %183 = vector.extract_strided_slice %31 {offsets = [1, 0, 0], sizes = [1, 16, 16], strides = [1, 1, 1]} : vector<4x16x16xf32> to vector<1x16x16xf32>
    %184 = vector.shape_cast %183 : vector<1x16x16xf32> to vector<16x16xf32>
    %185 = arith.mulf %184, %179 : vector<16x16xf32>
    %186 = arith.addf %182, %185 : vector<16x16xf32>
    %187 = arith.addf %127, %186 : vector<16x16xf32>
    %188 = vector.extract_strided_slice %29 {offsets = [1, 0, 0], sizes = [1, 16, 16], strides = [1, 1, 1]} : vector<4x16x16xf32> to vector<1x16x16xf32>
    %189 = vector.shape_cast %188 : vector<1x16x16xf32> to vector<16x16xf32>
    %190 = arith.mulf %189, %179 : vector<16x16xf32>
    %191 = vector.extract_strided_slice %31 {offsets = [1, 0, 0], sizes = [1, 16, 16], strides = [1, 1, 1]} : vector<4x16x16xf32> to vector<1x16x16xf32>
    %192 = vector.shape_cast %191 : vector<1x16x16xf32> to vector<16x16xf32>
    %193 = arith.mulf %192, %177 : vector<16x16xf32>
    %194 = arith.subf %190, %193 : vector<16x16xf32>
    %195 = arith.addf %135, %194 : vector<16x16xf32>
    %196 = vector.extract_strided_slice %55 {offsets = [2, 0, 0], sizes = [1, 16, 16], strides = [1, 1, 1]} : vector<4x16x16xf32> to vector<1x16x16xf32>
    %197 = vector.shape_cast %196 : vector<1x16x16xf32> to vector<16x16xf32>
    %198 = vector.extract_strided_slice %56 {offsets = [2, 0, 0], sizes = [1, 16, 16], strides = [1, 1, 1]} : vector<4x16x16xf32> to vector<1x16x16xf32>
    %199 = vector.shape_cast %198 : vector<1x16x16xf32> to vector<16x16xf32>
    %cst_97 = arith.constant dense<0.000000e+00> : vector<16x16xf32>
    %200 = tpu.matmul %13, %197, %cst_97 {dimension_numbers = #tpu.dot_dimension_numbers<[1], [0], [0], [1], [0, 0, 1, 1], [], []>} : vector<16x16xf32>, vector<16x16xf32>, vector<16x16xf32> -> vector<16x16xf32>
    %cst_98 = arith.constant dense<0.000000e+00> : vector<16x16xf32>
    %201 = tpu.matmul %15, %199, %cst_98 {dimension_numbers = #tpu.dot_dimension_numbers<[1], [0], [0], [1], [0, 0, 1, 1], [], []>} : vector<16x16xf32>, vector<16x16xf32>, vector<16x16xf32> -> vector<16x16xf32>
    %202 = arith.addf %197, %199 : vector<16x16xf32>
    %cst_99 = arith.constant dense<0.000000e+00> : vector<16x16xf32>
    %203 = tpu.matmul %17, %202, %cst_99 {dimension_numbers = #tpu.dot_dimension_numbers<[1], [0], [0], [1], [0, 0, 1, 1], [], []>} : vector<16x16xf32>, vector<16x16xf32>, vector<16x16xf32> -> vector<16x16xf32>
    %204 = arith.subf %200, %201 : vector<16x16xf32>
    %205 = arith.subf %203, %200 : vector<16x16xf32>
    %206 = arith.subf %205, %201 : vector<16x16xf32>
    %207 = vector.extract_strided_slice %25 {offsets = [2, 0, 0], sizes = [1, 16, 16], strides = [1, 1, 1]} : vector<4x16x16xf32> to vector<1x16x16xf32>
    %208 = vector.shape_cast %207 : vector<1x16x16xf32> to vector<16x16xf32>
    %209 = vector.broadcast %0 : f32 to vector<16x16xf32>
    %210 = arith.mulf %209, %208 : vector<16x16xf32>
    %211 = arith.mulf %11, %204 : vector<16x16xf32>
    %212 = vector.broadcast %1 : f32 to vector<16x16xf32>
    %213 = arith.mulf %212, %211 : vector<16x16xf32>
    %214 = arith.addf %210, %213 : vector<16x16xf32>
    %c0_100 = arith.constant 0 : index
    %c0_101 = arith.constant 0 : index
    %c0_102 = arith.constant 0 : index
    %c2_103 = arith.constant 2 : index
    %c0_104 = arith.constant 0 : index
    %c0_105 = arith.constant 0 : index
    %215 = vector.load %arg11[%c0_100, %c0_101, %c0_102, %c2_103, %c0_104, %c0_105] : memref<1x1x2x4x16x16xf32, #tpu.memory_space<vmem>>, vector<1x1x1x1x16x16xf32>
    %216 = vector.shape_cast %215 : vector<1x1x1x1x16x16xf32> to vector<16x16xf32>
    %217 = vector.shape_cast %214 : vector<16x16xf32> to vector<1x1x1x1x16x16xf32>
    tpu.vector_store %arg11[%c0_100, %c0_101, %c0_102, %c2_103, %c0_104, %c0_105], %217 {strides = array<i32>} : memref<1x1x2x4x16x16xf32, #tpu.memory_space<vmem>>, vector<1x1x1x1x16x16xf32>,
    %218 = vector.extract_strided_slice %27 {offsets = [2, 0, 0], sizes = [1, 16, 16], strides = [1, 1, 1]} : vector<4x16x16xf32> to vector<1x16x16xf32>
    %219 = vector.shape_cast %218 : vector<1x16x16xf32> to vector<16x16xf32>
    %220 = vector.broadcast %0 : f32 to vector<16x16xf32>
    %221 = arith.mulf %220, %219 : vector<16x16xf32>
    %222 = arith.mulf %11, %206 : vector<16x16xf32>
    %223 = vector.broadcast %1 : f32 to vector<16x16xf32>
    %224 = arith.mulf %223, %222 : vector<16x16xf32>
    %225 = arith.addf %221, %224 : vector<16x16xf32>
    %c0_106 = arith.constant 0 : index
    %c0_107 = arith.constant 0 : index
    %c1_108 = arith.constant 1 : index
    %c2_109 = arith.constant 2 : index
    %c0_110 = arith.constant 0 : index
    %c0_111 = arith.constant 0 : index
    %226 = vector.load %arg11[%c0_106, %c0_107, %c1_108, %c2_109, %c0_110, %c0_111] : memref<1x1x2x4x16x16xf32, #tpu.memory_space<vmem>>, vector<1x1x1x1x16x16xf32>
    %227 = vector.shape_cast %226 : vector<1x1x1x1x16x16xf32> to vector<16x16xf32>
    %228 = vector.shape_cast %225 : vector<16x16xf32> to vector<1x1x1x1x16x16xf32>
    tpu.vector_store %arg11[%c0_106, %c0_107, %c1_108, %c2_109, %c0_110, %c0_111], %228 {strides = array<i32>} : memref<1x1x2x4x16x16xf32, #tpu.memory_space<vmem>>, vector<1x1x1x1x16x16xf32>,
    %229 = vector.extract_strided_slice %72 {offsets = [2, 0, 0], sizes = [1, 16, 16], strides = [1, 1, 1]} : vector<4x16x16xf32> to vector<1x16x16xf32>
    %230 = vector.shape_cast %229 : vector<1x16x16xf32> to vector<16x16xf32>
    %231 = vector.extract_strided_slice %73 {offsets = [2, 0, 0], sizes = [1, 16, 16], strides = [1, 1, 1]} : vector<4x16x16xf32> to vector<1x16x16xf32>
    %232 = vector.shape_cast %231 : vector<1x16x16xf32> to vector<16x16xf32>
    %cst_112 = arith.constant dense<0.000000e+00> : vector<16x16xf32>
    %233 = tpu.matmul %13, %230, %cst_112 {dimension_numbers = #tpu.dot_dimension_numbers<[1], [0], [0], [1], [0, 0, 1, 1], [], []>} : vector<16x16xf32>, vector<16x16xf32>, vector<16x16xf32> -> vector<16x16xf32>
    %cst_113 = arith.constant dense<0.000000e+00> : vector<16x16xf32>
    %234 = tpu.matmul %15, %232, %cst_113 {dimension_numbers = #tpu.dot_dimension_numbers<[1], [0], [0], [1], [0, 0, 1, 1], [], []>} : vector<16x16xf32>, vector<16x16xf32>, vector<16x16xf32> -> vector<16x16xf32>
    %235 = arith.subf %230, %232 : vector<16x16xf32>
    %cst_114 = arith.constant dense<0.000000e+00> : vector<16x16xf32>
    %236 = tpu.matmul %17, %235, %cst_114 {dimension_numbers = #tpu.dot_dimension_numbers<[1], [0], [0], [1], [0, 0, 1, 1], [], []>} : vector<16x16xf32>, vector<16x16xf32>, vector<16x16xf32> -> vector<16x16xf32>
    %237 = arith.addf %233, %234 : vector<16x16xf32>
    %238 = arith.subf %233, %234 : vector<16x16xf32>
    %239 = arith.subf %238, %236 : vector<16x16xf32>
    %240 = vector.extract_strided_slice %29 {offsets = [2, 0, 0], sizes = [1, 16, 16], strides = [1, 1, 1]} : vector<4x16x16xf32> to vector<1x16x16xf32>
    %241 = vector.shape_cast %240 : vector<1x16x16xf32> to vector<16x16xf32>
    %242 = arith.mulf %241, %237 : vector<16x16xf32>
    %243 = vector.extract_strided_slice %31 {offsets = [2, 0, 0], sizes = [1, 16, 16], strides = [1, 1, 1]} : vector<4x16x16xf32> to vector<1x16x16xf32>
    %244 = vector.shape_cast %243 : vector<1x16x16xf32> to vector<16x16xf32>
    %245 = arith.mulf %244, %239 : vector<16x16xf32>
    %246 = arith.addf %242, %245 : vector<16x16xf32>
    %247 = arith.addf %187, %246 : vector<16x16xf32>
    %248 = vector.extract_strided_slice %29 {offsets = [2, 0, 0], sizes = [1, 16, 16], strides = [1, 1, 1]} : vector<4x16x16xf32> to vector<1x16x16xf32>
    %249 = vector.shape_cast %248 : vector<1x16x16xf32> to vector<16x16xf32>
    %250 = arith.mulf %249, %239 : vector<16x16xf32>
    %251 = vector.extract_strided_slice %31 {offsets = [2, 0, 0], sizes = [1, 16, 16], strides = [1, 1, 1]} : vector<4x16x16xf32> to vector<1x16x16xf32>
    %252 = vector.shape_cast %251 : vector<1x16x16xf32> to vector<16x16xf32>
    %253 = arith.mulf %252, %237 : vector<16x16xf32>
    %254 = arith.subf %250, %253 : vector<16x16xf32>
    %255 = arith.addf %195, %254 : vector<16x16xf32>
    %256 = vector.extract_strided_slice %55 {offsets = [3, 0, 0], sizes = [1, 16, 16], strides = [1, 1, 1]} : vector<4x16x16xf32> to vector<1x16x16xf32>
    %257 = vector.shape_cast %256 : vector<1x16x16xf32> to vector<16x16xf32>
    %258 = vector.extract_strided_slice %56 {offsets = [3, 0, 0], sizes = [1, 16, 16], strides = [1, 1, 1]} : vector<4x16x16xf32> to vector<1x16x16xf32>
    %259 = vector.shape_cast %258 : vector<1x16x16xf32> to vector<16x16xf32>
    %cst_115 = arith.constant dense<0.000000e+00> : vector<16x16xf32>
    %260 = tpu.matmul %13, %257, %cst_115 {dimension_numbers = #tpu.dot_dimension_numbers<[1], [0], [0], [1], [0, 0, 1, 1], [], []>} : vector<16x16xf32>, vector<16x16xf32>, vector<16x16xf32> -> vector<16x16xf32>
    %cst_116 = arith.constant dense<0.000000e+00> : vector<16x16xf32>
    %261 = tpu.matmul %15, %259, %cst_116 {dimension_numbers = #tpu.dot_dimension_numbers<[1], [0], [0], [1], [0, 0, 1, 1], [], []>} : vector<16x16xf32>, vector<16x16xf32>, vector<16x16xf32> -> vector<16x16xf32>
    %262 = arith.addf %257, %259 : vector<16x16xf32>
    %cst_117 = arith.constant dense<0.000000e+00> : vector<16x16xf32>
    %263 = tpu.matmul %17, %262, %cst_117 {dimension_numbers = #tpu.dot_dimension_numbers<[1], [0], [0], [1], [0, 0, 1, 1], [], []>} : vector<16x16xf32>, vector<16x16xf32>, vector<16x16xf32> -> vector<16x16xf32>
    %264 = arith.subf %260, %261 : vector<16x16xf32>
    %265 = arith.subf %263, %260 : vector<16x16xf32>
    %266 = arith.subf %265, %261 : vector<16x16xf32>
    %267 = vector.extract_strided_slice %25 {offsets = [3, 0, 0], sizes = [1, 16, 16], strides = [1, 1, 1]} : vector<4x16x16xf32> to vector<1x16x16xf32>
    %268 = vector.shape_cast %267 : vector<1x16x16xf32> to vector<16x16xf32>
    %269 = vector.broadcast %0 : f32 to vector<16x16xf32>
    %270 = arith.mulf %269, %268 : vector<16x16xf32>
    %271 = arith.mulf %11, %264 : vector<16x16xf32>
    %272 = vector.broadcast %1 : f32 to vector<16x16xf32>
    %273 = arith.mulf %272, %271 : vector<16x16xf32>
    %274 = arith.addf %270, %273 : vector<16x16xf32>
    %c0_118 = arith.constant 0 : index
    %c0_119 = arith.constant 0 : index
    %c0_120 = arith.constant 0 : index
    %c3_121 = arith.constant 3 : index
    %c0_122 = arith.constant 0 : index
    %c0_123 = arith.constant 0 : index
    %275 = vector.load %arg11[%c0_118, %c0_119, %c0_120, %c3_121, %c0_122, %c0_123] : memref<1x1x2x4x16x16xf32, #tpu.memory_space<vmem>>, vector<1x1x1x1x16x16xf32>
    %276 = vector.shape_cast %275 : vector<1x1x1x1x16x16xf32> to vector<16x16xf32>
    %277 = vector.shape_cast %274 : vector<16x16xf32> to vector<1x1x1x1x16x16xf32>
    tpu.vector_store %arg11[%c0_118, %c0_119, %c0_120, %c3_121, %c0_122, %c0_123], %277 {strides = array<i32>} : memref<1x1x2x4x16x16xf32, #tpu.memory_space<vmem>>, vector<1x1x1x1x16x16xf32>,
    %278 = vector.extract_strided_slice %27 {offsets = [3, 0, 0], sizes = [1, 16, 16], strides = [1, 1, 1]} : vector<4x16x16xf32> to vector<1x16x16xf32>
    %279 = vector.shape_cast %278 : vector<1x16x16xf32> to vector<16x16xf32>
    %280 = vector.broadcast %0 : f32 to vector<16x16xf32>
    %281 = arith.mulf %280, %279 : vector<16x16xf32>
    %282 = arith.mulf %11, %266 : vector<16x16xf32>
    %283 = vector.broadcast %1 : f32 to vector<16x16xf32>
    %284 = arith.mulf %283, %282 : vector<16x16xf32>
    %285 = arith.addf %281, %284 : vector<16x16xf32>
    %c0_124 = arith.constant 0 : index
    %c0_125 = arith.constant 0 : index
    %c1_126 = arith.constant 1 : index
    %c3_127 = arith.constant 3 : index
    %c0_128 = arith.constant 0 : index
    %c0_129 = arith.constant 0 : index
    %286 = vector.load %arg11[%c0_124, %c0_125, %c1_126, %c3_127, %c0_128, %c0_129] : memref<1x1x2x4x16x16xf32, #tpu.memory_space<vmem>>, vector<1x1x1x1x16x16xf32>
    %287 = vector.shape_cast %286 : vector<1x1x1x1x16x16xf32> to vector<16x16xf32>
    %288 = vector.shape_cast %285 : vector<16x16xf32> to vector<1x1x1x1x16x16xf32>
    tpu.vector_store %arg11[%c0_124, %c0_125, %c1_126, %c3_127, %c0_128, %c0_129], %288 {strides = array<i32>} : memref<1x1x2x4x16x16xf32, #tpu.memory_space<vmem>>, vector<1x1x1x1x16x16xf32>,
    %289 = vector.extract_strided_slice %72 {offsets = [3, 0, 0], sizes = [1, 16, 16], strides = [1, 1, 1]} : vector<4x16x16xf32> to vector<1x16x16xf32>
    %290 = vector.shape_cast %289 : vector<1x16x16xf32> to vector<16x16xf32>
    %291 = vector.extract_strided_slice %73 {offsets = [3, 0, 0], sizes = [1, 16, 16], strides = [1, 1, 1]} : vector<4x16x16xf32> to vector<1x16x16xf32>
    %292 = vector.shape_cast %291 : vector<1x16x16xf32> to vector<16x16xf32>
    %cst_130 = arith.constant dense<0.000000e+00> : vector<16x16xf32>
    %293 = tpu.matmul %13, %290, %cst_130 {dimension_numbers = #tpu.dot_dimension_numbers<[1], [0], [0], [1], [0, 0, 1, 1], [], []>} : vector<16x16xf32>, vector<16x16xf32>, vector<16x16xf32> -> vector<16x16xf32>
    %cst_131 = arith.constant dense<0.000000e+00> : vector<16x16xf32>
    %294 = tpu.matmul %15, %292, %cst_131 {dimension_numbers = #tpu.dot_dimension_numbers<[1], [0], [0], [1], [0, 0, 1, 1], [], []>} : vector<16x16xf32>, vector<16x16xf32>, vector<16x16xf32> -> vector<16x16xf32>
    %295 = arith.subf %290, %292 : vector<16x16xf32>
    %cst_132 = arith.constant dense<0.000000e+00> : vector<16x16xf32>
    %296 = tpu.matmul %17, %295, %cst_132 {dimension_numbers = #tpu.dot_dimension_numbers<[1], [0], [0], [1], [0, 0, 1, 1], [], []>} : vector<16x16xf32>, vector<16x16xf32>, vector<16x16xf32> -> vector<16x16xf32>
    %297 = arith.addf %293, %294 : vector<16x16xf32>
    %298 = arith.subf %293, %294 : vector<16x16xf32>
    %299 = arith.subf %298, %296 : vector<16x16xf32>
    %300 = vector.extract_strided_slice %29 {offsets = [3, 0, 0], sizes = [1, 16, 16], strides = [1, 1, 1]} : vector<4x16x16xf32> to vector<1x16x16xf32>
    %301 = vector.shape_cast %300 : vector<1x16x16xf32> to vector<16x16xf32>
    %302 = arith.mulf %301, %297 : vector<16x16xf32>
    %303 = vector.extract_strided_slice %31 {offsets = [3, 0, 0], sizes = [1, 16, 16], strides = [1, 1, 1]} : vector<4x16x16xf32> to vector<1x16x16xf32>
    %304 = vector.shape_cast %303 : vector<1x16x16xf32> to vector<16x16xf32>
    %305 = arith.mulf %304, %299 : vector<16x16xf32>
    %306 = arith.addf %302, %305 : vector<16x16xf32>
    %307 = arith.addf %247, %306 : vector<16x16xf32>
    %308 = vector.extract_strided_slice %29 {offsets = [3, 0, 0], sizes = [1, 16, 16], strides = [1, 1, 1]} : vector<4x16x16xf32> to vector<1x16x16xf32>
    %309 = vector.shape_cast %308 : vector<1x16x16xf32> to vector<16x16xf32>
    %310 = arith.mulf %309, %299 : vector<16x16xf32>
    %311 = vector.extract_strided_slice %31 {offsets = [3, 0, 0], sizes = [1, 16, 16], strides = [1, 1, 1]} : vector<4x16x16xf32> to vector<1x16x16xf32>
    %312 = vector.shape_cast %311 : vector<1x16x16xf32> to vector<16x16xf32>
    %313 = arith.mulf %312, %297 : vector<16x16xf32>
    %314 = arith.subf %310, %313 : vector<16x16xf32>
    %315 = arith.addf %255, %314 : vector<16x16xf32>
    %c0_i32 = arith.constant 0 : i32
    %316 = arith.cmpi eq, %arg2, %c0_i32 : i32
    %317 = arith.extui %316 : i1 to i32
    %c0_i32_133 = arith.constant 0 : i32
    %318 = arith.cmpi ne, %317, %c0_i32_133 : i32
    scf.if %318 {
      %335 = vector.broadcast %2 : f32 to vector<16x16xf32>
      %336 = arith.mulf %335, %5 : vector<16x16xf32>
      %c0_154 = arith.constant 0 : index
      %c0_155 = arith.constant 0 : index
      %c0_156 = arith.constant 0 : index
      %c0_157 = arith.constant 0 : index
      %c0_158 = arith.constant 0 : index
      %337 = vector.load %arg10[%c0_154, %c0_155, %c0_156, %c0_157, %c0_158] : memref<1x1x2x16x16xf32, #tpu.memory_space<vmem>>, vector<1x1x1x16x16xf32>
      %338 = vector.shape_cast %337 : vector<1x1x1x16x16xf32> to vector<16x16xf32>
      %339 = vector.shape_cast %336 : vector<16x16xf32> to vector<1x1x1x16x16xf32>
      tpu.vector_store %arg10[%c0_154, %c0_155, %c0_156, %c0_157, %c0_158], %339 {strides = array<i32>} : memref<1x1x2x16x16xf32, #tpu.memory_space<vmem>>, vector<1x1x1x16x16xf32>,
      %340 = vector.broadcast %2 : f32 to vector<16x16xf32>
      %341 = arith.mulf %340, %7 : vector<16x16xf32>
      %c0_159 = arith.constant 0 : index
      %c0_160 = arith.constant 0 : index
      %c1_161 = arith.constant 1 : index
      %c0_162 = arith.constant 0 : index
      %c0_163 = arith.constant 0 : index
      %342 = vector.load %arg10[%c0_159, %c0_160, %c1_161, %c0_162, %c0_163] : memref<1x1x2x16x16xf32, #tpu.memory_space<vmem>>, vector<1x1x1x16x16xf32>
      %343 = vector.shape_cast %342 : vector<1x1x1x16x16xf32> to vector<16x16xf32>
      %344 = vector.shape_cast %341 : vector<16x16xf32> to vector<1x1x1x16x16xf32>
      tpu.vector_store %arg10[%c0_159, %c0_160, %c1_161, %c0_162, %c0_163], %344 {strides = array<i32>} : memref<1x1x2x16x16xf32, #tpu.memory_space<vmem>>, vector<1x1x1x16x16xf32>,
    } else {
    }
    %c0_134 = arith.constant 0 : index
    %c0_135 = arith.constant 0 : index
    %c0_136 = arith.constant 0 : index
    %c0_137 = arith.constant 0 : index
    %c0_138 = arith.constant 0 : index
    %319 = vector.load %arg10[%c0_134, %c0_135, %c0_136, %c0_137, %c0_138] : memref<1x1x2x16x16xf32, #tpu.memory_space<vmem>>, vector<1x1x1x16x16xf32>
    %320 = vector.shape_cast %319 : vector<1x1x1x16x16xf32> to vector<16x16xf32>
    %321 = vector.broadcast %3 : f32 to vector<16x16xf32>
    %322 = arith.mulf %321, %307 : vector<16x16xf32>
    %323 = arith.addf %320, %322 : vector<16x16xf32>
    %c0_139 = arith.constant 0 : index
    %c0_140 = arith.constant 0 : index
    %c0_141 = arith.constant 0 : index
    %c0_142 = arith.constant 0 : index
    %c0_143 = arith.constant 0 : index
    %324 = vector.load %arg10[%c0_139, %c0_140, %c0_141, %c0_142, %c0_143] : memref<1x1x2x16x16xf32, #tpu.memory_space<vmem>>, vector<1x1x1x16x16xf32>
    %325 = vector.shape_cast %324 : vector<1x1x1x16x16xf32> to vector<16x16xf32>
    %326 = vector.shape_cast %323 : vector<16x16xf32> to vector<1x1x1x16x16xf32>
    tpu.vector_store %arg10[%c0_139, %c0_140, %c0_141, %c0_142, %c0_143], %326 {strides = array<i32>} : memref<1x1x2x16x16xf32, #tpu.memory_space<vmem>>, vector<1x1x1x16x16xf32>,
    %c0_144 = arith.constant 0 : index
    %c0_145 = arith.constant 0 : index
    %c1_146 = arith.constant 1 : index
    %c0_147 = arith.constant 0 : index
    %c0_148 = arith.constant 0 : index
    %327 = vector.load %arg10[%c0_144, %c0_145, %c1_146, %c0_147, %c0_148] : memref<1x1x2x16x16xf32, #tpu.memory_space<vmem>>, vector<1x1x1x16x16xf32>
    %328 = vector.shape_cast %327 : vector<1x1x1x16x16xf32> to vector<16x16xf32>
    %329 = vector.broadcast %3 : f32 to vector<16x16xf32>
    %330 = arith.mulf %329, %315 : vector<16x16xf32>
    %331 = arith.addf %328, %330 : vector<16x16xf32>
    %c0_149 = arith.constant 0 : index
    %c0_150 = arith.constant 0 : index
    %c1_151 = arith.constant 1 : index
    %c0_152 = arith.constant 0 : index
    %c0_153 = arith.constant 0 : index
    %332 = vector.load %arg10[%c0_149, %c0_150, %c1_151, %c0_152, %c0_153] : memref<1x1x2x16x16xf32, #tpu.memory_space<vmem>>, vector<1x1x1x16x16xf32>
    %333 = vector.shape_cast %332 : vector<1x1x1x16x16xf32> to vector<16x16xf32>
    %334 = vector.shape_cast %331 : vector<16x16xf32> to vector<1x1x1x16x16xf32>
    tpu.vector_store %arg10[%c0_149, %c0_150, %c1_151, %c0_152, %c0_153], %334 {strides = array<i32>} : memref<1x1x2x16x16xf32, #tpu.memory_space<vmem>>, vector<1x1x1x16x16xf32>,
    return
  }
  func.func @transform_0(%arg0: i32, %arg1: i32, %arg2: i32) -> i32 {
    %c0_i32 = arith.constant 0 : i32
    %c0_i32_0 = arith.constant 0 : i32
    return %c0_i32 : i32
  }
  func.func @transform_1(%arg0: i32, %arg1: i32, %arg2: i32) -> (i32, i32, i32) {
    %c0_i32 = arith.constant 0 : i32
    %c0_i32_0 = arith.constant 0 : i32
    %c0_i32_1 = arith.constant 0 : i32
    %c0_i32_2 = arith.constant 0 : i32
    return %c0_i32, %c0_i32_0, %c0_i32_1 : i32, i32, i32
  }
  func.func @transform_2(%arg0: i32, %arg1: i32, %arg2: i32) -> (i32, i32, i32) {
    %c0_i32 = arith.constant 0 : i32
    %c0_i32_0 = arith.constant 0 : i32
    %c0_i32_1 = arith.constant 0 : i32
    %c0_i32_2 = arith.constant 0 : i32
    return %c0_i32, %c0_i32_0, %c0_i32_1 : i32, i32, i32
  }
  func.func @transform_3(%arg0: i32, %arg1: i32, %arg2: i32) -> (i32, i32, i32, i32, i32) {
    %c0_i32 = arith.constant 0 : i32
    %c0_i32_0 = arith.constant 0 : i32
    %c0_i32_1 = arith.constant 0 : i32
    %c0_i32_2 = arith.constant 0 : i32
    return %arg0, %arg1, %c0_i32, %c0_i32_0, %c0_i32_1 : i32, i32, i32, i32, i32
  }
  func.func @transform_4(%arg0: i32, %arg1: i32, %arg2: i32) -> (i32, i32, i32, i32, i32, i32) {
    %c0_i32 = arith.constant 0 : i32
    %c0_i32_0 = arith.constant 0 : i32
    %c0_i32_1 = arith.constant 0 : i32
    %c0_i32_2 = arith.constant 0 : i32
    return %arg0, %arg1, %c0_i32, %arg2, %c0_i32_0, %c0_i32_1 : i32, i32, i32, i32, i32, i32
  }
  func.func @transform_5(%arg0: i32, %arg1: i32, %arg2: i32) -> (i32, i32, i32, i32) {
    %c0_i32 = arith.constant 0 : i32
    %c0_i32_0 = arith.constant 0 : i32
    %c0_i32_1 = arith.constant 0 : i32
    return %arg0, %arg1, %c0_i32, %c0_i32_0 : i32, i32, i32, i32
  }
  func.func @transform_6(%arg0: i32, %arg1: i32, %arg2: i32) -> (i32, i32, i32, i32, i32) {
    %c0_i32 = arith.constant 0 : i32
    %c0_i32_0 = arith.constant 0 : i32
    %c0_i32_1 = arith.constant 0 : i32
    %c0_i32_2 = arith.constant 0 : i32
    return %arg0, %c0_i32, %arg2, %c0_i32_0, %c0_i32_1 : i32, i32, i32, i32, i32
  }
  func.func @transform_7(%arg0: i32, %arg1: i32, %arg2: i32) -> (i32, i32, i32, i32, i32) {
    %c0_i32 = arith.constant 0 : i32
    %c0_i32_0 = arith.constant 0 : i32
    %c0_i32_1 = arith.constant 0 : i32
    %c0_i32_2 = arith.constant 0 : i32
    return %arg0, %arg1, %c0_i32, %c0_i32_0, %c0_i32_1 : i32, i32, i32, i32, i32
  }
  func.func @transform_8(%arg0: i32, %arg1: i32, %arg2: i32) -> (i32, i32, i32, i32, i32, i32) {
    %c0_i32 = arith.constant 0 : i32
    %c0_i32_0 = arith.constant 0 : i32
    %c0_i32_1 = arith.constant 0 : i32
    %c0_i32_2 = arith.constant 0 : i32
    return %arg0, %arg1, %c0_i32, %arg2, %c0_i32_0, %c0_i32_1 : i32, i32, i32, i32, i32, i32
  }
}

</mosaic_0001>

<bundles_post_ra>
// kernel: tpu_custom_call.1
= control target key start
LH: loop header
LB: loop body
LE: loop exit
PB: predicated region body
PF: predicated region fallthrough
CT: control target
= control target key end

     0   :  { %s25403_s0 = inlined_call_operand.hbm [shape: f32[4], index: 0, kind: input, shape index: {}]   ;;  %s25404_s1 = inlined_call_operand.hbm [shape: f32[3,16,16], index: 1, kind: input, shape index: {}]   ;;  %s25405_s2 = inlined_call_operand.hbm [shape: f32[3,16,16], index: 2, kind: input, shape index: {}]   ;;  %s25406_s3 = inlined_call_operand.hbm [shape: f32[2,3,2,16,16], index: 3, kind: input, shape index: {}]   ;;  %s25407_s4 = inlined_call_operand.hbm [shape: f32[2,3,2,4,16,16], index: 4, kind: input, shape index: {}]   ;;  %s25408_s5 = inlined_call_operand.vmem [shape: f32[2,3,1,16], index: 5, kind: input, shape index: {}]   ;;  %s25409_s6 = inlined_call_operand.hbm [shape: f32[2,2,4,16,16], index: 6, kind: input, shape index: {}]   ;;  %s25410_s7 = inlined_call_operand.hbm [shape: f32[2,3,2,16,16], index: 7, kind: output, shape index: {0}]   ;;  %s25411_s8 = inlined_call_operand.hbm [shape: f32[2,3,2,4,16,16], index: 8, kind: output, shape index: {1}]  }
   0x1   :  { %25550 = sst [smem:[#allocation90_spill]] %s25404_s1 }
   0x2   :  { %25551 = sst [smem:[#allocation91_spill]] %s25406_s3 }
   0x3   :  { %25552 = sst [smem:[#allocation92_spill]] %s25408_s5 }
   0x4   :  { %25553 = sst [smem:[#allocation93_spill]] %s25410_s7 }
   0x5   :  { %25554 = sst [smem:[#allocation94_spill]] %s25411_s8 }
   0x6   :  { %14 = vsyncpa [#allocation5], 0 }
   0x7   :  { %15 = vsyncpa [#allocation3], 0 }
   0x8   :  { %16 = vsyncpa [#allocation8], 0 }
   0x9   :  { %17 = vsyncpa [#allocation4], 0 }
   0xa   :  { %19 = vsyncpa [#allocation4 + $0x1], 0 }
   0xb   :  { %20 = vsyncpa [#allocation14], 0 }
   0xc   :  { %22 = vsyncpa [#allocation14 + $0x1], 0  ;;  %s22381_s27 = smov 0   ;;  %s22383_s28 = smov 0  }
   0xd   :  { %s22385_s29 = smov 0   ;;  %s22387_s30 = smov 0  }
   0xe   :  { %s22389_s9 = smov 0   ;;  %s22391_s10 = smov 0  }
   0xf   :  { %s22393_s11 = smov 0   ;;  %s22395_s12 = smov 0  }
  0x10   :  { %s22397_s13 = smov 0   ;;  %s22399_s14 = smov 0  }
  0x11   :  { %s22401_s15 = smov 0  }
  0x12 LB: > { %25555 = sst [smem:[#allocation22_spill]] %s22294_s30  ;;  %s22435_s16 = sadd.s32 4294967295, %s22322_s15   ;;  %s22322_s15 = sphi %s22401_s15, %s28_s15   ;;  %s22318_s14 = sphi %s22399_s14, %s25809_s14   ;;  %s22314_s13 = sphi %s22397_s13, %s25808_s13   ;;  %s22310_s12 = sphi %s22395_s12, %s25807_s12   ;;  %s22306_s11 = sphi %s22393_s11, %s25806_s11   ;;  %s22302_s10 = sphi %s22391_s10, %s25800_s10   ;;  %s22298_s9 = sphi %s22389_s9, %s25799_s9   ;;  %s22294_s30 = sphi %s22387_s30, %s25798_s30   ;;  %s22290_s29 = sphi %s22385_s29, %s25805_s29   ;;  %s22286_s28 = sphi %s22383_s28, %s25804_s28   ;;  %s22282_s27 = sphi %s22381_s27, %s25803_s27  }
  0x13   : > { %25556 = sst [smem:[#allocation23_spill]] %s22298_s9  ;;  %s18003_s17 = sadd.s32 4294967294, %s22322_s15  }
  0x14   : > { %25557 = sst [smem:[#allocation24_spill]] %s22302_s10  ;;  %p132_p0 = scmp.ne.s32.totalorder %s22298_s9, %s22294_s30 }
  0x15   : > { %25558 = sst [smem:[#allocation25_spill]] %s22306_s11  ;;  %p25415_p1 = scmp.eq.s32.totalorder %s22435_s16, 0 }
  0x16   : > { %25559 = sst [smem:[#allocation26_spill]] %s22310_s12  ;;  %p218_p2 = scmp.ne.s32.totalorder %s22286_s28, %s22282_s27 }
  0x17   : > { %p22445_p4 = por %p25415_p1, %p132_p0  ;;  %p250_p5 = scmp.eq.s32.totalorder %s18003_s17, 5 }
  0x18   : > { %p22451_p6 = por %p218_p2, %p25415_p1  ;;  %p18004_p7 = scmp.ge.s32.totalorder %s22322_s15, 1 }
  0x19   : > { %s25560_s18 = scalar_select %p22445_p4, 1, 0 }
  0x1a   : > { %s25562_s19 = scalar_select %p22451_p6, 1, 0 }
  0x1b   : > { %25561 = sst [smem:[#allocation27_spill]] %s25560_s18  ;;  %p22456_p8 = por %p250_p5, %p132_p0 }
  0x1c   : > { %25563 = sst [smem:[#allocation28_spill]] %s25562_s19  ;;  %p287_p9 = scmp.lt.s32.totalorder %s22322_s15, 7 }
  0x1d   : > { %s25564_s20 = scalar_select %p22456_p8, 1, 0 }
  0x1e   : > { %p22461_p10 = pnand %p18004_p7, %p287_p9  ;;  %s22324_s22 = smov [#allocation6]  }
  0x1f   : > { %25565 = sst [smem:[#allocation29_spill]] %s25564_s20  ;;  %s308_s23 = sshll.u32 %s22324_s22, 4  ;;  %s309_s23 = int_to_ptr.vmem [resolvable:$true] %s308_s23 }
  0x20   : > { %s25566_s21 = scalar_select %p22461_p10, 1, 0 }
  0x21   : > { %p21825_p11 = pneg %p22461_p10  ;;  %s25568_s1 = sld [smem:[#allocation90_spill]] }
  0x23   : > { %p22469_p12 = pnand %p21825_p11, %p25415_p1 }
  0x25   : > { %s25567_s24 = scalar_select %p22469_p12, 1, 0 }
  0x26   : > { %p22481_p0 = pneg %p22469_p12 }
  0x27   : > { %s21993_s27 = scalar_lea.hbm %s25568_s1, 768 }
  0x28   : > { %p21994_p13 = scmp.ne.s32.totalorder %s25568_s1, %s21993_s27  ;;  %p22000_p7 = scmp.lt.u32.totalorder %s21993_s27, %s25568_s1 }
  0x2a   : > { %p21996_p2 = pnand %p22481_p0, %p21994_p13 }
  0x2c   : > { %p21997_p5 = pneg %p21996_p2 }
  0x2e   : > { %p22002_p9 = pnand %p22000_p7, %p21997_p5 }
  0x30   : > { %22005 = shalt.err (!%p22002_p9)
}
  0x31   : > { %s22006_s25 = scalar_lea.vmem %s309_s23, 768  ;;  %p22014_p8 = scmp.lt.s32.totalorder %s309_s23, %s309_s23 }
  0x32   : > { %p22007_p11 = scmp.ne.s32.totalorder %s309_s23, %s22006_s25  ;;  %p22015_p6 = scmp.lt.s32.totalorder %s22006_s25, %s22006_s25 }
  0x34   : > { %p22009_p1 = pnand %p22007_p11, %p22481_p0  ;;  %p22016_p4 = por %p22015_p6, %p22014_p8 }
  0x36   : > { %p22010_p3 = pneg %p22009_p1 }
  0x38   : > { %p22017_p10 = pnand %p22016_p4, %p22010_p3 }
  0x3a   : > { %22020 = shalt.err (!%p22017_p10)
}
  0x3b   : > { %s25420_s20 = smov 128   ;;  %s25422_s7 = smov 8  }
  0x3c   : > { %21831 = dma.hbm_to_vmem [thread:$0]  (!%p22469_p12), %s25568_s1, 768, %s309_s23, [#allocation3], %s25420_s20, %s25420_s20, %s25422_s7  }
  0x3d   : > { %s43_s27 = sadd.s32 1, %s22314_s13  ;;  %s47_s17 = sadd.s32 1, %s22318_s14 }
  0x3e   : > { %p45_p1 = scmp.ge.s32.totalorder %s43_s27, 3  ;;  %s119_s25 = sadd.s32 1, %s22302_s10 }
  0x3f   : > { %p126_p3 = scmp.ne.s32.totalorder %s22302_s10, %s22298_s9  ;;  %p25436_p4 = scmp.eq.s32.totalorder %s22322_s15, 0 }
  0x40   : > { %s25811_s27 = smov (%p45_p1, %s43_s27), 0  ;;  %s25813_s17 = smov (!%p45_p1, %s47_s17), %s22318_s14 }
  0x41   : > { %25570 = sst [smem:[#allocation30_spill]] %s25811_s27  ;;  %s115_s8 = ssub.s32 %s22314_s13, %s25811_s27 }
  0x42   : > { %p49_p6 = scmp.ge.s32.totalorder %s25813_s17, 2  ;;  %p25571_p8 = scmp.eq.s32.totalorder %s22435_s16, 5 }
  0x43   : > { %p22519_p13 = por %p25436_p4, %p126_p3  ;;  %p25435_p2 = scmp.lt.s32.totalorder %s22322_s15, 6 }
  0x44   : > { %p22513_p10 = por %p25571_p8, %p126_p3  ;;  %s25815_s17 = smov (%p49_p6, %s25813_s17), 0 }
  0x45   : > { %25575 = sst [smem:[#allocation32_spill]] %s25815_s17  ;;  %s335_s26 = sand.u32 1, %s22322_s15  }
  0x46   : > { %s25572_s23 = scalar_select %p22513_p10, 1, 0 }
  0x47   : > { %s337_s20 = sand.u32 1, %s22302_s10   ;;  %s22530_s7 = ssub.s32 %s22318_s14, %s25815_s17 }
  0x48   : > { %25573 = sst [smem:[#allocation31_spill]] %s25572_s23  ;;  %s116_s1 = sor.u32 %s115_s8, %s22530_s7 }
  0x49   : > { %p117_p7 = scmp.eq.s32.totalorder %s116_s1, 0  ;;  %s18009_s27 = sshll.u32 %s337_s20, 5 }
  0x4a   : > { %s18010_s23 = sshll.u32 %s22314_s13, 2  ;;  %s21798_s11 = smul.u32 12, %s22318_s14 }
  0x4b   : > { %s22536_s5 = scalar_select %p117_p7, %s22302_s10, %s119_s25  }
  0x4c   : > { %s339_s12 = scalar_lea.vmem [#allocation9], %s18009_s27  ;;  %p22545_p9 = pnand %p25435_p2, %p22519_p13 }
  0x4d   : > { %25576 = sst [smem:[#allocation33_spill]] %s22536_s5  ;;  %s348_s19 = sshll.u32 %s339_s12, 4  ;;  %s22539_s19 = int_to_ptr.vmem [resolvable:$true] %s348_s19 }
  0x4e   : > { %s345_s8 = sadd.s32 %s21798_s11, %s18010_s23  ;;  %s22549_s17 = sshll.u32 %s337_s20, 7 }
  0x4f   : > { %s18011_s1 = sshll.u32 %s345_s8, 7  ;;  %s25578_s3 = sld [smem:[#allocation91_spill]] }
  0x50   : > { %s22556_s12 = scalar_lea.sflag [#allocation3], %s335_s26  ;;  %p22023_p1 = pneg %p22545_p9 }
  0x55   : > { %s22554_s5 = scalar_lea.hbm %s25578_s3, %s18011_s1  ;;  %s22026_s9 = scalar_lea.hbm %s25578_s3, 3072 }
  0x56   : > { %s22021_s27 = scalar_lea.hbm %s22554_s5, 512  ;;  %p22027_p8 = scmp.lt.u32.totalorder %s22554_s5, %s25578_s3 }
  0x57   : > { %p22022_p11 = scmp.ne.s32.totalorder %s22554_s5, %s22021_s27  ;;  %p22028_p13 = scmp.lt.u32.totalorder %s22026_s9, %s22021_s27 }
  0x58   : > { %p22030_p2 = scmp.lt.u32.totalorder %s22021_s27, %s22554_s5 }
  0x59   : > { %p22024_p3 = pnand %p22023_p1, %p22022_p11  ;;  %p22029_p7 = por %p22028_p13, %p22027_p8 }
  0x5b   : > { %p22025_p6 = pneg %p22024_p3  ;;  %p22031_p4 = por %p22030_p2, %p22029_p7 }
  0x5d   : > { %p22032_p5 = pnand %p22031_p4, %p22025_p6 }
  0x5f   : > { %22035 = shalt.err (!%p22032_p5)
}
  0x60   : > { %s22036_s26 = scalar_lea.vmem %s22539_s19, 512  ;;  %s22327_s8 = smov [#allocation9]  }
  0x61   : > { %p22037_p11 = scmp.ne.s32.totalorder %s22539_s19, %s22036_s26  ;;  %s22041_s1 = sshll.u32 %s22327_s8, 4  ;;  %s22042_s1 = int_to_ptr.vmem [resolvable:$false] %s22041_s1 }
  0x62   : > { %s22043_s25 = scalar_lea.vmem %s22042_s1, 1024  ;;  %p22044_p12 = scmp.lt.s32.totalorder %s22539_s19, %s22042_s1 }
  0x63   : > { %p22039_p3 = pnand %p22037_p11, %p22023_p1  ;;  %p22045_p8 = scmp.lt.s32.totalorder %s22043_s25, %s22036_s26 }
  0x65   : > { %p22040_p10 = pneg %p22039_p3  ;;  %p22046_p13 = por %p22045_p8, %p22044_p12 }
  0x67   : > { %p22047_p2 = pnand %p22046_p13, %p22040_p10 }
  0x69   : > { %22050 = shalt.err (!%p22047_p2)
}
  0x6a   : > { %s25579_s27 = smov 8   ;;  %s25580_s11 = smov 128  }
  0x6b   : > { %21838 = dma.hbm_to_vmem [thread:$0]  (!%p22545_p9), %s22554_s5, 512, %s22539_s19, %s22556_s12, %s25580_s11, %s25580_s11, %s25579_s27  }
  0x6c   : > { %s18013_s20 = sshll.u32 %s22314_s13, 4  ;;  %s21799_s9 = smul.u32 48, %s22318_s14 }
  0x6d   : > { %s362_s23 = scalar_lea.vmem [#allocation10], %s22549_s17  ;;  %s22056_s17 = scalar_lea.hbm %s25407_s4, 12288 }
  0x6e   : > { %s374_s30 = sshll.u32 %s362_s23, 4  ;;  %s371_s26 = sadd.s32 %s21799_s9, %s18013_s20  ;;  %s22590_s30 = int_to_ptr.vmem [resolvable:$true] %s374_s30 }
  0x6f   : > { %s18014_s8 = sshll.u32 %s371_s26, 7 }
  0x70   : > { %s22595_s3 = scalar_lea.hbm %s25407_s4, %s18014_s8 }
  0x71   : > { %s22051_s10 = scalar_lea.hbm %s22595_s3, 2048  ;;  %p22057_p5 = scmp.lt.u32.totalorder %s22595_s3, %s25407_s4 }
  0x72   : > { %p22052_p12 = scmp.ne.s32.totalorder %s22595_s3, %s22051_s10  ;;  %p22058_p6 = scmp.lt.u32.totalorder %s22056_s17, %s22051_s10 }
  0x73   : > { %p22060_p11 = scmp.lt.u32.totalorder %s22051_s10, %s22595_s3 }
  0x74   : > { %p22054_p4 = pnand %p22052_p12, %p22023_p1  ;;  %p22059_p7 = por %p22058_p6, %p22057_p5 }
  0x76   : > { %p22055_p10 = pneg %p22054_p4  ;;  %p22061_p3 = por %p22060_p11, %p22059_p7 }
  0x78   : > { %p22062_p8 = pnand %p22061_p3, %p22055_p10 }
  0x7a   : > { %22065 = shalt.err (!%p22062_p8)
}
  0x7b   : > { %s22066_s23 = scalar_lea.vmem %s22590_s30, 2048  ;;  %s22328_s26 = smov [#allocation10]  }
  0x7c   : > { %p22067_p13 = scmp.ne.s32.totalorder %s22590_s30, %s22066_s23  ;;  %s22071_s8 = sshll.u32 %s22328_s26, 4  ;;  %s22072_s8 = int_to_ptr.vmem [resolvable:$false] %s22071_s8 }
  0x7d   : > { %s22073_s1 = scalar_lea.vmem %s22072_s8, 4096  ;;  %p22074_p4 = scmp.lt.s32.totalorder %s22590_s30, %s22072_s8 }
  0x7e   : > { %p22069_p2 = pnand %p22067_p13, %p22023_p1  ;;  %p22075_p5 = scmp.lt.s32.totalorder %s22073_s1, %s22066_s23 }
  0x80   : > { %p22070_p12 = pneg %p22069_p2  ;;  %p22076_p6 = por %p22075_p5, %p22074_p4 }
  0x82   : > { %p22077_p7 = pnand %p22076_p6, %p22070_p12 }
  0x84   : > { %22080 = shalt.err (!%p22077_p7)
}
  0x85   : > { %21841 = dma.hbm_to_vmem [thread:$0]  (!%p22545_p9), %s22595_s3, 2048, %s22590_s30, %s22556_s12, %s25580_s11, %s25580_s11, %s25579_s27  }
  0x86   : > { %s22081_s5 = scalar_lea.hbm %s25403_s0, 16 }
  0x87   : > { %p22082_p1 = scmp.ne.s32.totalorder %s25403_s0, %s22081_s5  ;;  %p22088_p3 = scmp.lt.u32.totalorder %s22081_s5, %s25403_s0 }
  0x89   : > { %p22084_p10 = pnand %p22082_p1, %p22481_p0 }
  0x8b   : > { %p22085_p11 = pneg %p22084_p10 }
  0x8d   : > { %p22090_p8 = pnand %p22088_p3, %p22085_p11 }
  0x8f   : > { %22093 = shalt.err (!%p22090_p8)
}
  0x90   : > { %s22329_s9 = smov [#allocation2]   ;;  %p25581_p9 = scmp.ne.s32.totalorder %s25567_s24, 0 }
  0x91   : > { %s22330_s23 = smov [#allocation7]   ;;  %s205_s8 = sadd.s32 1, %s22290_s29 }
  0x92   : > { %21828 = dma.hbm_to_smem (!%p25581_p9), %s25403_s0, 16, %s22329_s9, [#allocation5]  }
  0x93   : > { %s321_s26 = sshll.u32 %s22330_s23, 4  ;;  %s22094_s25 = scalar_lea.hbm %s25405_s2, 768  ;;  %s322_s26 = int_to_ptr.vmem [resolvable:$true] %s321_s26 }
  0x94   : > { %p22095_p13 = scmp.ne.s32.totalorder %s25405_s2, %s22094_s25  ;;  %p22101_p4 = scmp.lt.u32.totalorder %s22094_s25, %s25405_s2 }
  0x96   : > { %p22097_p2 = pnand %p22095_p13, %p22481_p0 }
  0x98   : > { %p22098_p12 = pneg %p22097_p2 }
  0x9a   : > { %p22103_p5 = pnand %p22101_p4, %p22098_p12 }
  0x9c   : > { %22106 = shalt.err (!%p22103_p5)
}
  0x9d   : > { %s22107_s20 = scalar_lea.vmem %s322_s26, 768  ;;  %p22115_p10 = scmp.lt.s32.totalorder %s322_s26, %s322_s26 }
  0x9e   : > { %p22108_p6 = scmp.ne.s32.totalorder %s322_s26, %s22107_s20  ;;  %p22116_p11 = scmp.lt.s32.totalorder %s22107_s20, %s22107_s20 }
  0xa0   : > { %p22110_p7 = pnand %p22108_p6, %p22481_p0  ;;  %p22117_p3 = por %p22116_p11, %p22115_p10 }
  0xa2   : > { %p22111_p1 = pneg %p22110_p7 }
  0xa4   : > { %p22118_p8 = pnand %p22117_p3, %p22111_p1 }
  0xa6   : > { %22121 = shalt.err (!%p22118_p8)
}
  0xa7   : > { %21834 = dma.hbm_to_vmem [thread:$0]  (!%p25581_p9), %s25405_s2, 768, %s322_s26, [#allocation8], %s25580_s11, %s25580_s11, %s25579_s27  }
  0xa8   : > { %p25582_p0 = scmp.eq.s32.totalorder %s22530_s7, 0  ;;  %p212_p13 = scmp.ne.s32.totalorder %s22290_s29, %s22286_s28 }
  0xa9   : > { %s396_s24 = sand.u32 1, %s22290_s29   ;;  %s18077_s23 = sshll.u32 %s22318_s14, 11 }
  0xaa   : > { %s22665_s22 = scalar_select %p25582_p0, %s22290_s29, %s205_s8  }
  0xab   : > { %s18015_s30 = sshll.u32 %s396_s24, 7  ;;  %p25583_p2 = scmp.eq.s32.totalorder %s22322_s15, 0 }
  0xac   : > { %s22676_s25 = scalar_lea.hbm %s25409_s6, %s18077_s23  ;;  %s398_s5 = scalar_lea.vmem [#allocation11], %s18015_s30 }
  0xad   : > { %p214_p12 = por %p212_p13, %p25583_p2  ;;  %s408_s26 = sshll.u32 %s398_s5, 4  ;;  %s22678_s26 = int_to_ptr.vmem [resolvable:$true] %s408_s26 }
  0xae   : > { %p25584_p9 = scmp.lt.s32.totalorder %s22322_s15, 6  ;;  %s22122_s8 = scalar_lea.hbm %s22676_s25, 2048 }
  0xaf   : > { %p22123_p5 = scmp.ne.s32.totalorder %s22676_s25, %s22122_s8  ;;  %s22127_s18 = scalar_lea.hbm %s25409_s6, 4096 }
  0xb0   : > { %p22682_p4 = pnand %p25584_p9, %p214_p12  ;;  %p22128_p10 = scmp.lt.u32.totalorder %s22676_s25, %s25409_s6 }
  0xb1   : > { %p22129_p11 = scmp.lt.u32.totalorder %s22127_s18, %s22122_s8  ;;  %p22131_p8 = scmp.lt.u32.totalorder %s22122_s8, %s22676_s25 }
  0xb2   : > { %p22124_p6 = pneg %p22682_p4 }
  0xb3   : > { %p22130_p3 = por %p22129_p11, %p22128_p10 }
  0xb4   : > { %p22125_p7 = pnand %p22124_p6, %p22123_p5 }
  0xb5   : > { %p22132_p0 = por %p22131_p8, %p22130_p3 }
  0xb6   : > { %p22126_p1 = pneg %p22125_p7 }
  0xb8   : > { %p22133_p13 = pnand %p22132_p0, %p22126_p1 }
  0xba   : > { %22136 = shalt.err (!%p22133_p13)
}
  0xbb   : > { %s22137_s3 = scalar_lea.vmem %s22678_s26, 2048  ;;  %s22331_s24 = smov [#allocation11]  }
  0xbc   : > { %p22138_p2 = scmp.ne.s32.totalorder %s22678_s26, %s22137_s3  ;;  %s22142_s30 = sshll.u32 %s22331_s24, 4  ;;  %s22143_s30 = int_to_ptr.vmem [resolvable:$false] %s22142_s30 }
  0xbd   : > { %s22144_s23 = scalar_lea.vmem %s22143_s30, 4096  ;;  %p22145_p5 = scmp.lt.s32.totalorder %s22678_s26, %s22143_s30 }
  0xbe   : > { %p22140_p12 = pnand %p22138_p2, %p22124_p6  ;;  %p22146_p7 = scmp.lt.s32.totalorder %s22144_s23, %s22137_s3 }
  0xc0   : > { %p22141_p9 = pneg %p22140_p12  ;;  %p22147_p10 = por %p22146_p7, %p22145_p5 }
  0xc2   : > { %p22148_p11 = pnand %p22147_p10, %p22141_p9 }
  0xc4   : > { %22151 = shalt.err (!%p22148_p11)
}
  0xc5   : > { %21844 = dma.hbm_to_vmem [thread:$0]  (!%p22682_p4), %s22676_s25, 2048, %s22678_s26, %s22556_s12, %s25580_s11, %s25580_s11, %s25579_s27  }
  0xc6   : > { %p25586_p6 = scmp.ne.s32.totalorder %s25566_s21, 0 }
  0xc8   : > { %420 = sbr.rel (%p25586_p6) target bundleno = 1506 (0x5e2), region = 48 }
  0xcf   : > { %p25587_p1 = scmp.eq.s32.totalorder %s22435_s16, 0 }
  0xd1   : > { %22253 = dma.done.wait (%p25587_p1), [#allocation5], 16   ;;  %p25588_p3 = pmov %p25587_p1 }
  0xd2   : > { %p25589_p8 = pmov %p25587_p1 }
  0xd3   : > { %22255 = vsyncadd (%p25588_p3), [#allocation5], 4294967280 }
  0xd4   : > { %22257 = dma.done.wait (%p25589_p8), [#allocation3], 768   ;;  %p25590_p0 = pmov %p25587_p1 }
  0xd6   : > { %22259 = vsyncadd (%p25590_p0), [#allocation3], 4294966528  ;;  %p25591_p13 = pmov %p25590_p0 }
  0xd7   : > { %p25592_p4 = pmov %p25590_p0 }
  0xd8   : > { %22261 = dma.done.wait (%p25591_p13), [#allocation8], 768  }
  0xd9   : > { %22263 = vsyncadd (%p25592_p4), [#allocation8], 4294966528  ;;  %s25593_s21 = sld [smem:[#allocation23_spill]]  ;;  %s434_s27 = sand.u32 1, %s22435_s16  }
  0xda   : > { %s25594_s12 = sld [smem:[#allocation27_spill]]  ;;  %s435_s10 = scalar_lea.sflag [#allocation3], %s434_s27 }
  0xdf   : > { %s22731_s11 = sand.u32 1, %s25593_s21  }
  0xe0   : > { %s18022_s1 = sshll.u32 %s22731_s11, 5  ;;  %p25595_p2 = scmp.ne.s32.totalorder %s25594_s12, 0 }
  0xe1   : > { %s22736_s25 = scalar_lea.vmem [#allocation9], %s18022_s1 }
  0xe2   : > { %22265 = dma.done.wait (%p25595_p2), %s435_s10, 2560  }
  0xe3   : > { %22267 = vsyncadd (%p25595_p2), %s435_s10, 4294964736  ;;  %s25596_s5 = sld [smem:[#allocation28_spill]]  ;;  %s18023_s26 = sshll.u32 %s22731_s11, 7 }
  0xe4   : > { %s454_s16 = sand.u32 1, %s22286_s28   ;;  %s22746_s8 = scalar_lea.vmem [#allocation10], %s18023_s26 }
  0xe5   : > { %s18024_s7 = sshll.u32 %s454_s16, 7 }
  0xe6   : > { %s22748_s19 = scalar_lea.vmem [#allocation11], %s18024_s7 }
  0xe9   : > { %p25597_p12 = scmp.ne.s32.totalorder %s25596_s5, 0 }
  0xeb   : > { %22269 = dma.done.wait (%p25597_p12), %s435_s10, 2048  }
  0xec   : > { %22271 = vsyncadd (%p25597_p12), %s435_s10, 4294965248 }
  0xed   : > { %461 = sfence }
  0xee   : > { %v22754_v0 = vld [vmem:[#allocation7] sm:$0xff]  ;;  %v22756_v1 = vld [vmem:[#allocation7 + $0x8] sm:$0xff]  ;;  %v22758_v2 = vld [vmem:[#allocation7 + $0x10] sm:$0xff]  ;;  %vm636_vm0 = vcmask 130048   ;;  %s25609_s17 = sld [smem:[#allocation26_spill]]  ;;  %s25610_s18 = sld [smem:[#allocation25_spill]] }
  0xef   : > { %v662_v3 = vand.u32 4294901760, %v22754_v0  ;;  %v665_v4 = vand.u32 4294901760, %v22756_v1  ;;  %v22762_v5 = vld [vmem:[#allocation7 + $0x18] sm:$0xff]  ;;  %v25455_v6 = vand.u32 4294901760, %v22758_v2  ;;  %v22766_v7 = vld [vmem:[%s22736_s25] sm:$0xff]  ;;  %v22769_v8 = vld [vmem:[%s22736_s25 + $0x10] sm:$0xff] }
  0xf0   : > { %v25453_v9 = vand.u32 4294901760, %v22762_v5  ;;  %v571_v10 = vld [vmem:[%s22748_s19] sm:$0xff]  ;;  %v22775_v12 = vld [vmem:[%s22736_s25 + $0x8] sm:$0xff]  ;;  %v22787_v17 = vld [vmem:[%s22736_s25 + $0x18] sm:$0xff]  ;;  %s25626_s21 = sld [smem:[#allocation92_spill]]  ;;  %s522_s27 = sld [smem:[#allocation2]] }
  0xf1   : > { %v18041_v11 = vld [vmem:[%s22748_s19 + $0x40] sm:$0xff]  ;;  %v22781_v13 = vpack.c.bf16 %v665_v4, %v662_v3  ;;  %v588_v14 = vmul.f32 %v571_v10, %v22766_v7  ;;  %v612_v16 = vmul.f32 %v22769_v8, %v571_v10  ;;  %v572_v18 = vld [vmem:[%s22748_s19 + $0x8] sm:$0xff]  ;;  %v573_v24 = vld [vmem:[%s22748_s19 + $0x10] sm:$0xff]  ;;  %s18027_s10 = sld [smem:[#allocation2 + $0x1]]  ;;  %s24760_s5 = scalar_lea.vmem [#allocation13], %s18023_s26 }
  0xf2   : > { %v596_v15 = vmul.f32 %v18041_v11, %v22769_v8  ;;  %v18042_v19 = vld [vmem:[%s22748_s19 + $0x48] sm:$0xff]  ;;  %v22795_v20 = vpack.c.bf16 %v25453_v9, %v25455_v6  ;;  %v620_v21 = vmul.f32 %v18041_v11, %v22766_v7  ;;  %v589_v22 = vmul.f32 %v572_v18, %v22775_v12  ;;  %v18043_v25 = vld [vmem:[%s22748_s19 + $0x50] sm:$0xff]  ;;  %v574_v45 = vld [vmem:[%s22748_s19 + $0x18] sm:$0xff]  ;;  %s18028_s26 = sld [smem:[#allocation2 + $0x2]]  ;;  %s25239_s16 = scalar_lea.vmem [#allocation12], %s18022_s1 }
  0xf3   : > { %v597_v23 = vmul.f32 %v18042_v19, %v22787_v17  ;;  %20599 = vmatprep.subr.bf16.mxu0 %v22781_v13  ;;  %v613_v27 = vmul.f32 %v22787_v17, %v572_v18  ;;  %v621_v28 = vmul.f32 %v18042_v19, %v22775_v12  ;;  %v590_v29 = vmul.f32 %v573_v24, %v22766_v7  ;;  %v18044_v52 = vld [vmem:[%s22748_s19 + $0x58] sm:$0xff]  ;;  %s25792_s23 = sld [smem:[#allocation94_spill]] }
  0xf4   : > { %v604_v26 = vsub.f32 %v588_v14, %v596_v15  ;;  %20623 = vmatprep.subr.bf16.mxu1 %v22795_v20  ;;  %20601 = vmatpush3.bf16.msra.mxu0 %v22781_v13  ;;  %v628_v30 = vadd.f32 %v620_v21, %v612_v16  ;;  %v598_v32 = vmul.f32 %v18043_v25, %v22769_v8  ;;  %p513_p9 = scmp.lt.s32.totalorder %s25609_s17, 1  ;;  %p515_p5 = scmp.lt.s32.totalorder %s25610_s18, 2 }
  0xf5   : > { %v605_v31 = vsub.f32 %v589_v22, %v597_v23  ;;  %20625 = vmatpush3.bf16.msra.mxu1 %v22795_v20  ;;  %v629_v34 = vadd.f32 %v621_v28, %v613_v27  ;;  %v614_v35 = vmul.f32 %v22769_v8, %v573_v24  ;;  %v622_v36 = vmul.f32 %v18043_v25, %v22766_v7  ;;  %v575_v27 = vld [vmem:[%s22748_s19 + $0x20] sm:$0xff]  ;;  %s21802_s1 = smul.u32 48, %s25609_s17 }
  0xf6   : > { %v638_v33 = vsel %vm636_vm0, %v604_v26, 0  ;;  %v1422_v38 = vsel %vm636_vm0, %v628_v30, 0  ;;  %v22816_v39 = vadd.f32 %v628_v30, %v604_v26  ;;  %v22832_v48 = vsub.f32 %v590_v29, %v598_v32  ;;  %v18045_v30 = vld [vmem:[%s22748_s19 + $0x60] sm:$0xff]  ;;  %s514_s20 = scalar_select %p513_p9, %s25609_s17, 1 }
  0xf7   : > { %v22813_v37 = vand.u32 4294901760, %v638_v33  ;;  %v641_v40 = vsel %vm636_vm0, %v605_v31, 0  ;;  %v22819_v41 = vand.u32 4294901760, %v1422_v38  ;;  %v1425_v43 = vsel %vm636_vm0, %v629_v34, 0  ;;  %s516_s9 = scalar_select %p515_p5, %s25610_s18, 2 }
  0xf8   : > { %25598 = vst [vmem:[#allocation34_spill] sm:$0xff] %v22816_v39  ;;  %v22821_v42 = vand.u32 4294901760, %v641_v40  ;;  %v22824_v44 = vadd.f32 %v629_v34, %v605_v31  ;;  %v22830_v47 = vand.u32 4294901760, %v1425_v43  ;;  %v22834_v49 = vadd.f32 %v622_v36, %v614_v35  ;;  %s21800_s3 = smul.u32 3, %s514_s20  ;;  %s25791_s20 = sld [smem:[#allocation31_spill]] }
  0xf9   : > { %v22828_v46 = vsub.f32 %v638_v33, %v22813_v37  ;;  %v22837_v50 = vsub.f32 %v1422_v38, %v22819_v41  ;;  %v644_v55 = vsel %vm636_vm0, %v22832_v48, 0  ;;  %v591_v56 = vmul.f32 %v574_v45, %v22775_v12  ;;  %v576_v38 = vld [vmem:[%s22748_s19 + $0x28] sm:$0xff] }
  0xfa   : > { %25599 = vst [vmem:[#allocation35_spill] sm:$0xff] %v22824_v44  ;;  %v22840_v51 = vsub.f32 %v641_v40, %v22821_v42  ;;  %v22845_v54 = vsub.f32 %v1425_v43, %v22830_v47  ;;  %v22852_v59 = vand.u32 4294901760, %v644_v55  ;;  %v1428_v60 = vsel %vm636_vm0, %v22834_v49, 0  ;;  %s518_s24 = sadd.s32 %s21800_s3, %s516_s9  ;;  %s17778_s3 = sshll.u32 %s24760_s5, 4  ;;  %s25276_s3 = int_to_ptr.vmem [resolvable:$true] %s17778_s3 }
  0xfb   : > { %v25449_v53 = vand.u32 4294901760, %v22828_v46  ;;  %v25446_v57 = vand.u32 4294901760, %v22837_v50  ;;  %v22860_v63 = vand.u32 4294901760, %v1428_v60  ;;  %v599_v10 = vmul.f32 %v18044_v52, %v22787_v17  ;;  %s23203_s12 = scalar_lea.vmem %s25626_s21, %s518_s24  ;;  %s17742_s21 = scalar_lea.sflag [#allocation14], %s22731_s11 }
  0xfc   : > { %v25445_v58 = vand.u32 4294901760, %v22840_v51  ;;  %v25444_v62 = vand.u32 4294901760, %v22845_v54  ;;  %v22870_v15 = vsub.f32 %v644_v55, %v22852_v59  ;;  %v22875_v16 = vsub.f32 %v22754_v0, %v662_v3 }
  0xfd   : > { %v731_v61 = vsub.f32 %v22828_v46, %v25449_v53  ;;  %v1515_v11 = vsub.f32 %v22837_v50, %v25446_v57  ;;  %v22881_v21 = vsub.f32 %v1428_v60, %v22860_v63  ;;  %v22883_v22 = vsub.f32 %v591_v56, %v599_v10 }
  0xfe   : > { %v741_v14 = vsub.f32 %v22840_v51, %v25445_v58  ;;  %v1525_v19 = vsub.f32 %v22845_v54, %v25444_v62  ;;  %v25443_v25 = vand.u32 4294901760, %v22870_v15  ;;  %v25452_v26 = vand.u32 4294901760, %v22875_v16  ;;  %p25793_p10 = scmp.ne.s32.totalorder %s25791_s20, 0 }
  0xff   : > { %v732_v18 = vand.u32 4294901760, %v731_v61  ;;  %v1516_v23 = vand.u32 4294901760, %v1515_v11  ;;  %v25442_v3 = vand.u32 4294901760, %v22881_v21  ;;  %v647_v28 = vsel %vm636_vm0, %v22883_v22, 0 }
 0x100   : > { %v742_v24 = vand.u32 4294901760, %v741_v14  ;;  %v1526_v0 = vand.u32 4294901760, %v1525_v19  ;;  %v22894_v29 = vsub.f32 %v22756_v1, %v665_v4  ;;  %v751_v31 = vsub.f32 %v22870_v15, %v25443_v25 }
 0x101   : > { %19018 = vmatprep.mubr.f32.mxu0 %v732_v18  ;;  %19114 = vmatprep.mubr.f32.mxu1 %v1516_v23  ;;  %v22900_v32 = vand.u32 4294901760, %v647_v28  ;;  %v812_v33 = vsub.f32 %v22875_v16, %v25452_v26  ;;  %v615_v34 = vmul.f32 %v22787_v17, %v574_v45  ;;  %v1535_v1 = vsub.f32 %v22881_v21, %v25442_v3  ;;  %v18046_v45 = vld [vmem:[%s22748_s19 + $0x68] sm:$0xff] }
 0x102   : > { %19019 = vmatmul.mubr.f32.vlgmr.msra.gmra.mrb[0].mxu0 %v742_v24  ;;  %19115 = vmatmul.mubr.f32.vlgmr.msra.gmra.mrb[0].mxu1 %v1526_v0  ;;  %v25450_v4 = vand.u32 4294901760, %v22894_v29  ;;  %v623_v35 = vmul.f32 %v18044_v52, %v22775_v12  ;;  %v592_v36 = vmul.f32 %v575_v27, %v22766_v7  ;;  %v752_v40 = vand.u32 4294901760, %v751_v31 }
 0x103   : > { %v22914_v43 = vsub.f32 %v647_v28, %v22900_v32  ;;  %v813_v55 = vand.u32 4294901760, %v812_v33  ;;  %v600_v56 = vmul.f32 %v18045_v30, %v22769_v8  ;;  %v1536_v60 = vand.u32 4294901760, %v1535_v1 }
 0x104   : > { %v819_v61 = vsub.f32 %v22894_v29, %v25450_v4  ;;  %v22921_v10 = vadd.f32 %v623_v35, %v615_v34  ;;  %v616_v52 = vmul.f32 %v22769_v8, %v575_v27  ;;  %19021 = vmatprep.mubr.f32.mxu0 %v752_v40  ;;  %v624_v18 = vmul.f32 %v18045_v30, %v22766_v7  ;;  %v577_v27 = vld [vmem:[%s22748_s19 + $0x30] sm:$0xff] }
 0x105   : > { %v25441_v11 = vand.u32 4294901760, %v22914_v43  ;;  %v22925_v14 = vsub.f32 %v592_v36, %v600_v56  ;;  %v593_v19 = vmul.f32 %v576_v38, %v22775_v12  ;;  %19117 = vmatprep.mubr.f32.mxu1 %v1536_v60  ;;  %v601_v0 = vmul.f32 %v18046_v45, %v22787_v17  ;;  %v18047_v40 = vld [vmem:[%s22748_s19 + $0x70] sm:$0xff] }
 0x106   : > { %v820_v23 = vand.u32 4294901760, %v819_v61  ;;  %v1431_v24 = vsel %vm636_vm0, %v22921_v10, 0  ;;  %v617_v28 = vmul.f32 %v22787_v17, %v576_v38  ;;  %v22941_v34 = vadd.f32 %v624_v18, %v616_v52 }
 0x107   : > { %v761_v31 = vsub.f32 %v22914_v43, %v25441_v11  ;;  %v22937_v33 = vand.u32 4294901760, %v1431_v24  ;;  %v650_v30 = vsel %vm636_vm0, %v22925_v14, 0  ;;  %v22947_v36 = vsub.f32 %v593_v19, %v601_v0  ;;  %v578_v11 = vld [vmem:[%s22748_s19 + $0x38] sm:$0xff] }
 0x108   : > { %v22943_v1 = vpack.c.bf16 %v820_v23, %v813_v55  ;;  %v22945_v35 = vand.u32 4294901760, %v650_v30  ;;  %v625_v38 = vmul.f32 %v18046_v45, %v22775_v12  ;;  %v1434_v61 = vsel %vm636_vm0, %v22941_v34, 0 }
 0x109   : > { %v762_v56 = vand.u32 4294901760, %v761_v31  ;;  %v22952_v60 = vsub.f32 %v1431_v24, %v22937_v33  ;;  %v594_v52 = vmul.f32 %v577_v27, %v22766_v7  ;;  %v22961_v18 = vand.u32 4294901760, %v1434_v61 }
 0x10a   : > { %25600 = vst [vmem:[#allocation36_spill] sm:$0xff] %v22943_v1  ;;  %20603 = vmatprep.subr.bf16.mxu0 %v22943_v1  ;;  %v22959_v55 = vsub.f32 %v650_v30, %v22945_v35  ;;  %v653_v45 = vsel %vm636_vm0, %v22947_v36, 0  ;;  %v22965_v19 = vadd.f32 %v625_v38, %v617_v28  ;;  %v602_v0 = vmul.f32 %v18047_v40, %v22769_v8 }
 0x10b   : > { %19022 = vmatmul.mubr.f32.gmra.mrb[2].mxu0 %v762_v56  ;;  %v25447_v23 = vand.u32 4294901760, %v22952_v60  ;;  %v22968_v24 = vand.u32 4294901760, %v653_v45  ;;  %v618_v31 = vmul.f32 %v22769_v8, %v577_v27  ;;  %v22976_v3 = vsub.f32 %v1434_v61, %v22961_v18 }
 0x10c   : > { %20605 = vmatpush3.bf16.msra.mxu0 %v22943_v1  ;;  %v25448_v30 = vand.u32 4294901760, %v22959_v55  ;;  %v1437_v28 = vsel %vm636_vm0, %v22965_v19, 0  ;;  %v626_v38 = vmul.f32 %v18047_v40, %v22766_v7  ;;  %v22989_v27 = vsub.f32 %v594_v52, %v602_v0  ;;  %v18048_v7 = vld [vmem:[%s22748_s19 + $0x78] sm:$0xff] }
 0x10d   : > { %v1545_v56 = vsub.f32 %v22952_v60, %v25447_v23  ;;  %v22985_v25 = vsub.f32 %v653_v45, %v22968_v24  ;;  %v22987_v8 = vand.u32 4294901760, %v1437_v28  ;;  %v25451_v62 = vand.u32 4294901760, %v22976_v3 }
 0x10e   : > { %v771_v61 = vsub.f32 %v22959_v55, %v25448_v30  ;;  %v22995_v58 = vadd.f32 %v626_v38, %v618_v31  ;;  %v595_v40 = vmul.f32 %v578_v11, %v22775_v12  ;;  %v656_v52 = vsel %vm636_vm0, %v22989_v27, 0 }
 0x10f   : > { %v1546_v57 = vand.u32 4294901760, %v1545_v56  ;;  %v25454_v23 = vand.u32 4294901760, %v22985_v25  ;;  %v23001_v45 = vsub.f32 %v1437_v28, %v22987_v8  ;;  %v1555_v30 = vsub.f32 %v22976_v3, %v25451_v62 }
 0x110   : > { %v772_v0 = vand.u32 4294901760, %v771_v61  ;;  %v23008_v53 = vand.u32 4294901760, %v656_v52  ;;  %v1440_v31 = vsel %vm636_vm0, %v22995_v58, 0  ;;  %v603_v61 = vmul.f32 %v18048_v7, %v22787_v17 }
 0x111   : > { %19118 = vmatmul.mubr.f32.gmra.mrb[2].mxu1 %v1546_v57  ;;  %v781_v38 = vsub.f32 %v22985_v25, %v25454_v23  ;;  %v25459_v28 = vand.u32 4294901760, %v23001_v45  ;;  %v23016_v56 = vand.u32 4294901760, %v1440_v31  ;;  %v1556_v4 = vand.u32 4294901760, %v1555_v30 }
 0x112   : > { %19024 = vmatprep.mubr.f32.mxu0 %v772_v0  ;;  %v23020_v62 = vsub.f32 %v656_v52, %v23008_v53  ;;  %v619_v26 = vmul.f32 %v22787_v17, %v578_v11  ;;  %v627_v9 = vmul.f32 %v18048_v7, %v22775_v12  ;;  %v23030_v1 = vsub.f32 %v595_v40, %v603_v61 }
 0x113   : > { %v782_v57 = vand.u32 4294901760, %v781_v38  ;;  %v1565_v23 = vsub.f32 %v23001_v45, %v25459_v28  ;;  %v23028_v6 = vsub.f32 %v1440_v31, %v23016_v56  ;;  %19120 = vmatprep.mubr.f32.mxu1 %v1556_v4  ;;  %v25602_v52 = vand.u32 4294901760, %v22758_v2 }
 0x114   : > { %v25458_v30 = vand.u32 4294901760, %v23020_v62  ;;  %v23033_v0 = vadd.f32 %v627_v9, %v619_v26  ;;  %v25603_v12 = vand.u32 4294901760, %v22762_v5  ;;  %v659_v4 = vsel %vm636_vm0, %v23030_v1, 0 }
 0x115   : > { %25601 = vst [vmem:[#allocation37_spill] sm:$0xff] %v23028_v6  ;;  %v23038_v17 = vsub.f32 %v22758_v2, %v25602_v52  ;;  %19025 = vmatmul.mubr.f32.gmra.mrb[4].mxu0 %v782_v57  ;;  %v1566_v7 = vand.u32 4294901760, %v1565_v23  ;;  %v25460_v40 = vand.u32 4294901760, %v23028_v6  ;;  %v23050_v9 = vpack.c.bf16 %v22894_v29, %v22875_v16 }
 0x116   : > { %v23043_v11 = vsub.f32 %v22762_v5, %v25603_v12  ;;  %v791_v2 = vsub.f32 %v23020_v62, %v25458_v30  ;;  %v23055_v26 = vand.u32 4294901760, %v659_v4  ;;  %v1443_v5 = vsel %vm636_vm0, %v23033_v0, 0 }
 0x117   : > { %v1595_v23 = vand.u32 4294901760, %v23038_v17  ;;  %19121 = vmatmul.mubr.f32.gmra.mrb[4].mxu1 %v1566_v7  ;;  %v1575_v31 = vsub.f32 %v23028_v6, %v25460_v40  ;;  %v23063_v38 = vand.u32 4294901760, %v1443_v5  ;;  %20607 = vmatprep.subr.bf16.mxu0 %v23050_v9 }
 0x118   : > { %v1602_v61 = vand.u32 4294901760, %v23043_v11  ;;  %v792_v57 = vand.u32 4294901760, %v791_v2  ;;  %v23068_v52 = vsub.f32 %v659_v4, %v23055_v26 }
 0x119   : > { %v1596_v12 = vsub.f32 %v23038_v17, %v1595_v23  ;;  %v1576_v30 = vand.u32 4294901760, %v1575_v31  ;;  %v23072_v28 = vsub.f32 %v1443_v5, %v23063_v38 }
 0x11a   : > { %v1603_v7 = vsub.f32 %v23043_v11, %v1602_v61  ;;  %19027 = vmatprep.mubr.f32.mxu0 %v792_v57  ;;  %v800_v40 = vand.u32 4294901760, %v23068_v52  ;;  %v23087_v57 = vpack.c.bf16 %v23043_v11, %v23038_v17  ;;  %v553_v17 = vld [vmem:[#allocation7 + $0x28] sm:$0xff]  ;;  %v25624_v11 = vand.u32 4294901760, %v23020_v62 }
 0x11b   : > { %v1597_v44 = vand.u32 4294901760, %v1596_v12  ;;  %19123 = vmatprep.mubr.f32.mxu1 %v1576_v30  ;;  %v1584_v39 = vand.u32 4294901760, %v23072_v28  ;;  %v23092_v30 = vadd.f32 %v22834_v49, %v22832_v48  ;;  %v23123_v48 = vadd.f32 %v22965_v19, %v22947_v36 }
 0x11c   : > { %v1604_v6 = vand.u32 4294901760, %v1603_v7  ;;  %v801_v4 = vsub.f32 %v23068_v52, %v800_v40  ;;  %25605 = vst [vmem:[#allocation39_spill] sm:$0xff] %v23087_v57  ;;  %v23128_v49 = vadd.f32 %v22995_v58, %v22989_v27  ;;  %v23145_v58 = vpack.c.bf16 %v1602_v61, %v1595_v23 }
 0x11d   : > { %v1585_v2 = vsub.f32 %v23072_v28, %v1584_v39  ;;  %v25614_v36 = vand.u32 4294901760, %v22840_v51  ;;  %v25615_v19 = vand.u32 4294901760, %v22845_v54  ;;  %v25616_v27 = vand.u32 4294901760, %v22870_v15 }
 0x11e   : > { %v23083_v5 = vpack.c.bf16 %v1604_v6, %v1597_v44  ;;  %v802_v31 = vand.u32 4294901760, %v801_v4  ;;  %v23098_v6 = vadd.f32 %v22921_v10, %v22883_v22  ;;  %v23113_v44 = vadd.f32 %v22941_v34, %v22925_v14  ;;  %25608 = vst [vmem:[#allocation40_spill] sm:$0xff] %v23145_v58  ;;  %v556_v4 = vld [vmem:[%s22746_s8 + $0x10] sm:$0xff] }
 0x11f   : > { %v1586_v12 = vand.u32 4294901760, %v1585_v2  ;;  %v23135_v22 = vadd.f32 %v23033_v0, %v23030_v1  ;;  %v25606_v10 = vand.u32 4294901760, %v22875_v16  ;;  %v25607_v14 = vand.u32 4294901760, %v22894_v29  ;;  %v25611_v16 = vld [vmem:[#allocation37_spill] sm:$0xff] }
 0x120   : > { %25604 = vst [vmem:[#allocation38_spill] sm:$0xff] %v23083_v5  ;;  %20627 = vmatprep.subr.bf16.mxu1 %v23083_v5  ;;  %19028 = vmatmul.mubr.f32.gmra.mrb[6].mxu0 %v802_v31  ;;  %v25612_v29 = vand.u32 4294901760, %v22828_v46  ;;  %v25613_v1 = vand.u32 4294901760, %v22837_v50  ;;  %v25617_v0 = vand.u32 4294901760, %v22881_v21 }
 0x121   : > { %20629 = vmatpush3.bf16.msra.mxu1 %v23083_v5  ;;  %19034 = vmatprep.mubr.f32.mxu0 %v22813_v37  ;;  %v23142_v34 = vpack.c.bf16 %v25607_v14, %v25606_v10  ;;  %v25628_v10 = vld [vmem:[#allocation35_spill] sm:$0xff] }
 0x122   : > { %19124 = vmatmul.mubr.f32.gmra.mrb[6].mxu1 %v1586_v12  ;;  %20631 = vmatprep.subr.bf16.mxu1 %v23087_v57  ;;  %v2217_v14 = vsel %vm636_vm0, %v25628_v10, 0  ;;  %v2226_v10 = vsel %vm636_vm0, %v23113_v44, 0 }
 0x123   : > { %19130 = vmatprep.mubr.f32.mxu1 %v22819_v41 }
 0x124   : > { %19035 = vmatmul.mubr.f32.vlgmr.msra.gmra.mrb[0].mxu0 %v22821_v42 }
 0x125   : > { %19037 = vmatprep.mubr.f32.mxu0 %v22852_v59  ;;  %20609 = vmatpush3.bf16.msra.mxu0 %v23050_v9 }
 0x126   : > { %19131 = vmatmul.mubr.f32.vlgmr.msra.gmra.mrb[0].mxu1 %v22830_v47  ;;  %20611 = vmatprep.subr.bf16.mxu0 %v22781_v13 }
 0x127   : > { %19133 = vmatprep.mubr.f32.mxu1 %v22860_v63  ;;  %20633 = vmatpush3.bf16.msra.mxu1 %v23087_v57 }
 0x128   : > { %19038 = vmatmul.mubr.f32.gmra.mrb[2].mxu0 %v22900_v32  ;;  %20635 = vmatprep.subr.bf16.mxu1 %v22795_v20 }
 0x129   : > { %19040 = vmatprep.mubr.f32.mxu0 %v22945_v35 }
 0x12a   : > { %19134 = vmatmul.mubr.f32.gmra.mrb[2].mxu1 %v22937_v33 }
 0x12b   : > { %19136 = vmatprep.mubr.f32.mxu1 %v22961_v18 }
 0x12c   : > { %19041 = vmatmul.mubr.f32.gmra.mrb[4].mxu0 %v22968_v24 }
 0x12d   : > { %19043 = vmatprep.mubr.f32.mxu0 %v23008_v53 }
 0x12e   : > { %19137 = vmatmul.mubr.f32.gmra.mrb[4].mxu1 %v22987_v8 }
 0x12f   : > { %19139 = vmatprep.mubr.f32.mxu1 %v23016_v56 }
 0x130   : > { %19044 = vmatmul.mubr.f32.gmra.mrb[6].mxu0 %v23055_v26 }
 0x131   : > { %19050 = vmatprep.mubr.f32.mxu0 %v22828_v46  ;;  %v25618_v46 = vand.u32 4294901760, %v22914_v43 }
 0x132   : > { %19140 = vmatmul.mubr.f32.gmra.mrb[6].mxu1 %v23063_v38 }
 0x133   : > { %19146 = vmatprep.mubr.f32.mxu1 %v22837_v50  ;;  %v25619_v50 = vand.u32 4294901760, %v22952_v60 }
 0x134   : > { %19051 = vmatmul.mubr.f32.vlgmr.msra.gmra.mrb[0].mxu0 %v22840_v51  ;;  %v25620_v51 = vand.u32 4294901760, %v22959_v55 }
 0x135   : > { %19053 = vmatprep.mubr.f32.mxu0 %v22870_v15  ;;  %20613 = vmatpush3.bf16.msra.mxu0 %v22781_v13  ;;  %v25622_v15 = vand.u32 4294901760, %v22985_v25 }
 0x136   : > { %19147 = vmatmul.mubr.f32.vlgmr.msra.gmra.mrb[0].mxu1 %v22845_v54  ;;  %20615 = vmatprep.subr.bf16.mxu0 %v23142_v34  ;;  %v25621_v54 = vand.u32 4294901760, %v22976_v3 }
 0x137   : > { %19149 = vmatprep.mubr.f32.mxu1 %v22881_v21  ;;  %20637 = vmatpush3.bf16.msra.mxu1 %v22795_v20  ;;  %v552_v21 = vld [vmem:[#allocation7 + $0x20] sm:$0xff] }
 0x138   : > { %19054 = vmatmul.mubr.f32.gmra.mrb[2].mxu0 %v22914_v43  ;;  %20639 = vmatprep.subr.bf16.mxu1 %v23145_v58  ;;  %v25623_v43 = vand.u32 4294901760, %v23001_v45 }
 0x139   : > { %19056 = vmatprep.mubr.f32.mxu0 %v22959_v55  ;;  %v2238_v55 = vand.u32 4294901760, %v552_v21 }
 0x13a   : > { %19150 = vmatmul.mubr.f32.gmra.mrb[2].mxu1 %v22952_v60  ;;  %v25625_v60 = vand.u32 4294901760, %v25611_v16 }
 0x13b   : > { %19152 = vmatprep.mubr.f32.mxu1 %v22976_v3  ;;  %v2241_v3 = vand.u32 4294901760, %v553_v17  ;;  %v23217_v23 = vsub.f32 %v552_v21, %v2238_v55 }
 0x13c   : > { %19057 = vmatmul.mubr.f32.gmra.mrb[4].mxu0 %v22985_v25  ;;  %v554_v25 = vld [vmem:[%s22746_s8] sm:$0xff] }
 0x13d   : > { %19059 = vmatprep.mubr.f32.mxu0 %v23020_v62  ;;  %v23212_v62 = vld [vmem:[%s23203_s12] ss:$0 sm:$0xff]  ;;  %v23219_v61 = vsub.f32 %v553_v17, %v2241_v3  ;;  %v25465_v2 = vand.u32 4294901760, %v23217_v23 }
 0x13e   : > { %19153 = vmatmul.mubr.f32.gmra.mrb[4].mxu1 %v23001_v45  ;;  %v23215_v45 = vpack.c.bf16 %v2241_v3, %v2238_v55  ;;  %v559_v55 = vld [vmem:[%s22746_s8 + $0x28] sm:$0xff] }
 0x13f   : > { %19155 = vmatprep.mubr.f32.mxu1 %v25611_v16  ;;  %v25463_v31 = vand.u32 4294901760, %v23219_v61 }
 0x140   : > { %19060 = vmatmul.mubr.f32.gmra.mrb[6].mxu0 %v23068_v52 }
 0x141   : > { %19066 = vmatprep.mubr.f32.mxu0 %v25612_v29  ;;  %v23252_v29 = vmul.f32 %v23212_v62, %v556_v4 }
 0x142   : > { %19156 = vmatmul.mubr.f32.gmra.mrb[6].mxu1 %v23072_v28  ;;  %v25627_v28 = vld [vmem:[#allocation34_spill] sm:$0xff] }
 0x143   : > { %19162 = vmatprep.mubr.f32.mxu1 %v25613_v1  ;;  %v2214_v52 = vsel %vm636_vm0, %v25627_v28, 0  ;;  %v557_v1 = vld [vmem:[%s22746_s8 + $0x18] sm:$0xff]  ;;  %v3044_v17 = vsel %vm636_vm0, %v23252_v29, 0 }
 0x144   : > { %19067 = vmatmul.mubr.f32.vlgmr.msra.gmra.mrb[0].mxu0 %v25614_v36  ;;  %v23249_v16 = vand.u32 4294901760, %v2214_v52 }
 0x145   : > { %19069 = vmatprep.mubr.f32.mxu0 %v25616_v27  ;;  %20617 = vmatpush3.bf16.msra.mxu0 %v23142_v34  ;;  %v2395_v27 = vsub.f32 %v23219_v61, %v25463_v31 }
 0x146   : > { %19163 = vmatmul.mubr.f32.vlgmr.msra.gmra.mrb[0].mxu1 %v25615_v19  ;;  %20619 = vmatprep.subr.bf16.mxu0 %v22781_v13  ;;  %v2388_v19 = vsub.f32 %v23217_v23, %v25465_v2 }
 0x147   : > { %19165 = vmatprep.mubr.f32.mxu1 %v25617_v0  ;;  %20641 = vmatpush3.bf16.msra.mxu1 %v23145_v58 }
 0x148   : > { %19070 = vmatmul.mubr.f32.gmra.mrb[2].mxu0 %v25618_v46  ;;  %20643 = vmatprep.subr.bf16.mxu1 %v22795_v20  ;;  %v558_v46 = vld [vmem:[%s22746_s8 + $0x20] sm:$0xff] }
 0x149   : > { %19072 = vmatprep.mubr.f32.mxu0 %v25620_v51  ;;  %v2220_v51 = vsel %vm636_vm0, %v23092_v30, 0 }
 0x14a   : > { %19166 = vmatmul.mubr.f32.gmra.mrb[2].mxu1 %v25619_v50  ;;  %v23267_v50 = vand.u32 4294901760, %v2217_v14  ;;  %v23292_v3 = vand.u32 4294901760, %v2220_v51 }
 0x14b   : > { %19168 = vmatprep.mubr.f32.mxu1 %v25621_v54  ;;  %v23274_v54 = vmul.f32 %v23212_v62, %v557_v1 }
 0x14c   : > { %19073 = vmatmul.mubr.f32.gmra.mrb[4].mxu0 %v25622_v15  ;;  %v23278_v15 = vsub.f32 %v2214_v52, %v23249_v16  ;;  %v23300_v28 = vsub.f32 %v2217_v14, %v23267_v50  ;;  %v23302_v52 = vand.u32 4294901760, %v3044_v17  ;;  %v23329_v44 = vsub.f32 %v2220_v51, %v23292_v3 }
 0x14d   : > { %19075 = vmatprep.mubr.f32.mxu0 %v25624_v11  ;;  %25629 = vst [vmem:[#allocation37_spill] sm:$0xff] %v23274_v54  ;;  %v2396_v11 = vand.u32 4294901760, %v2395_v27  ;;  %v3047_v4 = vsel %vm636_vm0, %v23274_v54, 0  ;;  %v561_v27 = vld [vmem:[%s22746_s8 + $0x38] sm:$0xff] }
 0x14e   : > { %19169 = vmatmul.mubr.f32.gmra.mrb[4].mxu1 %v25623_v43  ;;  %v2389_v43 = vand.u32 4294901760, %v2388_v19  ;;  %v25635_v58 = vand.u32 4294901760, %v23300_v28 }
 0x14f   : > { %19171 = vmatprep.mubr.f32.mxu1 %v25625_v60  ;;  %v23285_v60 = vmul.f32 %v23212_v62, %v558_v46  ;;  %v23331_v46 = vand.u32 4294901760, %v3047_v4 }
 0x150   : > { %19076 = vmatmul.mubr.f32.gmra.mrb[6].mxu0 %v800_v40  ;;  %v555_v40 = vld [vmem:[%s22746_s8 + $0x8] sm:$0xff]  ;;  %v23318_v1 = vpack.c.bf16 %v2396_v11, %v2389_v43  ;;  %v23337_v11 = vsub.f32 %v3044_v17, %v23302_v52  ;;  %v23352_v17 = vmul.f32 %v23212_v62, %v561_v27  ;;  %v2317_v57 = vsub.f32 %v23300_v28, %v25635_v58 }
 0x151   : > { %19082 = vmatprep.mubr.f32.mxu0 %v22813_v37  ;;  %v23235_v7 = vmul.f32 %v23212_v62, %v555_v40  ;;  %25630 = vst [vmem:[#allocation34_spill] sm:$0xff] %v23285_v60  ;;  %v560_v40 = vld [vmem:[%s22746_s8 + $0x30] sm:$0xff]  ;;  %v3050_v19 = vsel %vm636_vm0, %v23285_v60, 0 }
 0x152   : > { %19172 = vmatmul.mubr.f32.gmra.mrb[6].mxu1 %v1584_v39  ;;  %v23226_v39 = vmul.f32 %v23212_v62, %v554_v25  ;;  %v2223_v25 = vsel %vm636_vm0, %v23098_v6, 0  ;;  %v23345_v51 = vand.u32 4294901760, %v3050_v19  ;;  %25633 = vst [vmem:[#allocation42_spill] sm:$0xff] %v23352_v17 }
 0x153   : > { %19178 = vmatprep.mubr.f32.mxu1 %v22819_v41  ;;  %v3041_v36 = vsel %vm636_vm0, %v23235_v7, 0  ;;  %v23316_v14 = vand.u32 4294901760, %v2223_v25 }
 0x154   : > { %19083 = vmatmul.mubr.f32.vlgmr.msra.gmra.mrb[0].mxu0 %v22821_v42  ;;  %v3038_v12 = vsel %vm636_vm0, %v23226_v39, 0  ;;  %v23280_v21 = vand.u32 4294901760, %v3041_v36  ;;  %v23390_v27 = vsub.f32 %v3050_v19, %v23345_v51  ;;  %v25637_v19 = vand.u32 4294901760, %v23329_v44 }
 0x155   : > { %19085 = vmatprep.mubr.f32.mxu0 %v22852_v59  ;;  %20621 = vmatpush3.bf16.msra.mxu0 %v22781_v13  ;;  %v23264_v0 = vand.u32 4294901760, %v3038_v12 }
 0x156   : > { %19179 = vmatmul.mubr.f32.vlgmr.msra.gmra.mrb[0].mxu1 %v22830_v47  ;;  %20647 = vmatprep.subr.bf16.mxu0 %v23215_v45  ;;  %v23309_v6 = vsub.f32 %v3041_v36, %v23280_v21 }
 0x157   : > { %19181 = vmatprep.mubr.f32.mxu1 %v22860_v63  ;;  %20645 = vmatpush3.bf16.msra.mxu1 %v22795_v20  ;;  %v23290_v30 = vsub.f32 %v3038_v12, %v23264_v0  ;;  %v25464_v12 = vand.u32 4294901760, %v23278_v15 }
 0x158   : > { %19086 = vmatmul.mubr.f32.gmra.mrb[2].mxu0 %v22900_v32  ;;  %20671 = vmatprep.subr.bf16.mxu1 %v22781_v13  ;;  %v25636_v5 = vand.u32 4294901760, %v23309_v6 }
 0x159   : > { %19088 = vmatprep.mubr.f32.mxu0 %v22945_v35  ;;  %v25466_v36 = vand.u32 4294901760, %v23290_v30 }
 0x15a   : > { %19182 = vmatmul.mubr.f32.gmra.mrb[2].mxu1 %v22937_v33 }
 0x15b   : > { %19184 = vmatprep.mubr.f32.mxu1 %v22961_v18 }
 0x15c   : > { %19089 = vmatmul.mubr.f32.gmra.mrb[4].mxu0 %v22968_v24 }
 0x15d   : > { %19091 = vmatprep.mubr.f32.mxu0 %v23008_v53 }
 0x15e   : > { %19185 = vmatmul.mubr.f32.gmra.mrb[4].mxu1 %v22987_v8 }
 0x15f   : > { %19187 = vmatprep.mubr.f32.mxu1 %v23016_v56 }
 0x160   : > { %19092 = vmatmul.mubr.f32.gmra.mrb[6].mxu0 %v23055_v26 }
 0x161   : > { %19098 = vmatprep.mubr.f32.mxu0 %v22813_v37  ;;  %v23314_v37 = vmul.f32 %v23212_v62, %v559_v55  ;;  %v23339_v55 = vand.u32 4294901760, %v2226_v10 }
 0x162   : > { %19188 = vmatmul.mubr.f32.gmra.mrb[6].mxu1 %v23063_v38 }
 0x163   : > { %19194 = vmatprep.mubr.f32.mxu1 %v22819_v41  ;;  %25631 = vst [vmem:[#allocation35_spill] sm:$0xff] %v23314_v37  ;;  %v23323_v41 = vmul.f32 %v23212_v62, %v560_v40  ;;  %v23360_v40 = vsub.f32 %v2223_v25, %v23316_v14  ;;  %v25634_v25 = vld [vmem:[#allocation36_spill] sm:$0xff] }
 0x164   : > { %19099 = vmatmul.mubr.f32.vlgmr.msra.gmra.mrb[0].mxu0 %v22821_v42  ;;  %v2229_v42 = vsel %vm636_vm0, %v23123_v48, 0  ;;  %v2307_v48 = vsub.f32 %v23278_v15, %v25464_v12  ;;  %v23371_v12 = vsub.f32 %v3047_v4, %v23331_v46  ;;  %v2327_v4 = vsub.f32 %v23329_v44, %v25637_v19 }
 0x165   : > { %25632 = vst [vmem:[#allocation41_spill] sm:$0xff] %v23323_v41  ;;  %19101 = vmatprep.mubr.f32.mxu0 %v22852_v59  ;;  %20649 = vmatpush3.bf16.msra.mxu0 %v23215_v45  ;;  %v2232_v59 = vsel %vm636_vm0, %v23128_v49, 0  ;;  %v3056_v31 = vsel %vm636_vm0, %v23323_v41, 0  ;;  %v3131_v49 = vsub.f32 %v23290_v30, %v25466_v36  ;;  %v23373_v2 = vand.u32 4294901760, %v2229_v42 }
 0x166   : > { %19195 = vmatmul.mubr.f32.vlgmr.msra.gmra.mrb[0].mxu1 %v22830_v47  ;;  %v3053_v47 = vsel %vm636_vm0, %v23314_v37, 0  ;;  %20651 = vmatprep.subr.bf16.mxu0 %v23318_v1  ;;  %v23383_v43 = vand.u32 4294901760, %v2232_v59  ;;  %v2235_v36 = vsel %vm636_vm0, %v23135_v22, 0  ;;  %v3141_v22 = vsub.f32 %v23309_v6, %v25636_v5 }
 0x167   : > { %19197 = vmatprep.mubr.f32.mxu1 %v22860_v63  ;;  %20673 = vmatpush3.bf16.msra.mxu1 %v22781_v13  ;;  %v23379_v63 = vsub.f32 %v2226_v10, %v23339_v55  ;;  %v2308_v10 = vand.u32 4294901760, %v2307_v48  ;;  %v23409_v48 = vsub.f32 %v2229_v42, %v23373_v2  ;;  %v3132_v42 = vand.u32 4294901760, %v3131_v49 }
 0x168   : > { %19102 = vmatmul.mubr.f32.gmra.mrb[2].mxu0 %v22900_v32  ;;  %20675 = vmatprep.subr.bf16.mxu1 %v25634_v25  ;;  %v23381_v32 = vand.u32 4294901760, %v3053_v47  ;;  %v25638_v41 = vand.u32 4294901760, %v23337_v11  ;;  %v2318_v5 = vand.u32 4294901760, %v2317_v57  ;;  %v25639_v37 = vand.u32 4294901760, %v23360_v40 }
 0x169   : > { %19104 = vmatprep.mubr.f32.mxu0 %v22945_v35  ;;  %v3059_v35 = vsel %vm636_vm0, %v23352_v17, 0  ;;  %v23411_v17 = vand.u32 4294901760, %v2235_v36  ;;  %v2328_v60 = vand.u32 4294901760, %v2327_v4  ;;  %v25641_v57 = vand.u32 4294901760, %v23379_v63 }
 0x16a   : > { %19198 = vmatmul.mubr.f32.gmra.mrb[2].mxu1 %v22937_v33  ;;  %v23392_v33 = vand.u32 4294901760, %v3056_v31  ;;  %v23417_v58 = vsub.f32 %v3053_v47, %v23381_v32  ;;  %v23422_v19 = vand.u32 4294901760, %v3059_v35  ;;  %v3142_v47 = vand.u32 4294901760, %v3141_v22 }
 0x16b   : > { %19200 = vmatprep.mubr.f32.mxu1 %v22961_v18  ;;  %v3151_v18 = vsub.f32 %v23337_v11, %v25638_v41  ;;  %v2356_v41 = vand.u32 4294901760, %v23409_v48 }
 0x16c   : > { %19105 = vmatmul.mubr.f32.gmra.mrb[4].mxu0 %v22968_v24  ;;  %v23420_v24 = vsub.f32 %v2232_v59, %v23383_v43  ;;  %v2337_v59 = vsub.f32 %v23360_v40, %v25639_v37  ;;  %v23450_v4 = vsub.f32 %v3059_v35, %v23422_v19 }
 0x16d   : > { %19107 = vmatprep.mubr.f32.mxu0 %v23008_v53  ;;  %v23430_v53 = vsub.f32 %v3056_v31, %v23392_v33  ;;  %v2347_v31 = vsub.f32 %v23379_v63, %v25641_v57  ;;  %v3152_v22 = vand.u32 4294901760, %v3151_v18  ;;  %v2357_v35 = vsub.f32 %v23409_v48, %v2356_v41 }
 0x16e   : > { %19201 = vmatmul.mubr.f32.gmra.mrb[4].mxu1 %v22987_v8  ;;  %v23441_v8 = vsub.f32 %v2235_v36, %v23411_v17  ;;  %v2338_v57 = vand.u32 4294901760, %v2337_v59 }
 0x16f   : > { %19203 = vmatprep.mubr.f32.mxu1 %v23016_v56  ;;  %v25640_v56 = vand.u32 4294901760, %v23371_v12  ;;  %v2348_v18 = vand.u32 4294901760, %v2347_v31 }
 0x170   : > { %19108 = vmatmul.mubr.f32.gmra.mrb[6].mxu0 %v23055_v26  ;;  %v2366_v26 = vand.u32 4294901760, %v23420_v24 }
 0x171   : > { %v3161_v49 = vsub.f32 %v23371_v12, %v25640_v56  ;;  %19210 = vmatprep.mubr.f32.mxu0 %v2308_v10  ;;  %v25642_v56 = vand.u32 4294901760, %v23390_v27  ;;  %v23458_v10 = vpack.c.bf16 %v23219_v61, %v23217_v23 }
 0x172   : > { %19204 = vmatmul.mubr.f32.gmra.mrb[6].mxu1 %v23063_v38  ;;  %v2367_v54 = vsub.f32 %v23420_v24, %v2366_v26 }
 0x173   : > { %19306 = vmatprep.mubr.f32.mxu1 %v3132_v42  ;;  %v3171_v36 = vsub.f32 %v23390_v27, %v25642_v56  ;;  %v3162_v37 = vand.u32 4294901760, %v3161_v49  ;;  %v2376_v42 = vand.u32 4294901760, %v23441_v8  ;;  %v25643_v56 = vand.u32 4294901760, %v23417_v58 }
 0x174   : > { %19211 = vmatmul.mubr.f32.vlgmr.msra.gmra.mrb[8].mxu0 %v2318_v5  ;;  %v3200_v5 = vand.u32 4294901760, %v23450_v4  ;;  %v25644_v49 = vand.u32 4294901760, %v23430_v53 }
 0x175   : > { %19213 = vmatprep.mubr.f32.mxu0 %v2328_v60  ;;  %v3181_v38 = vsub.f32 %v23417_v58, %v25643_v56  ;;  %20653 = vmatpush3.bf16.msra.mxu0 %v23318_v1  ;;  %v3172_v59 = vand.u32 4294901760, %v3171_v36  ;;  %v2358_v60 = vand.u32 4294901760, %v2357_v35  ;;  %v2377_v31 = vsub.f32 %v23441_v8, %v2376_v42 }
 0x176   : > { %19307 = vmatmul.mubr.f32.vlgmr.msra.gmra.mrb[8].mxu1 %v3142_v47  ;;  %v3191_v47 = vsub.f32 %v23430_v53, %v25644_v49  ;;  %20655 = vmatprep.subr.bf16.mxu0 %v23458_v10  ;;  %v2368_v36 = vand.u32 4294901760, %v2367_v54  ;;  %v3201_v56 = vsub.f32 %v23450_v4, %v3200_v5  ;;  %v25646_v54 = vand.u32 4294901760, %v23219_v61 }
 0x177   : > { %19309 = vmatprep.mubr.f32.mxu1 %v3152_v22  ;;  %20677 = vmatpush3.bf16.msra.mxu1 %v25634_v25  ;;  %v3182_v22 = vand.u32 4294901760, %v3181_v38  ;;  %v2378_v49 = vand.u32 4294901760, %v2377_v31  ;;  %v25648_v61 = vand.u32 4294901760, %v23290_v30  ;;  %v25649_v38 = vand.u32 4294901760, %v23300_v28 }
 0x178   : > { %19214 = vmatmul.mubr.f32.gmra.mrb[10].mxu0 %v2338_v57  ;;  %20679 = vmatprep.subr.bf16.mxu1 %v23050_v9  ;;  %v3192_v25 = vand.u32 4294901760, %v3191_v47  ;;  %v3202_v57 = vand.u32 4294901760, %v3201_v56  ;;  %v25650_v35 = vand.u32 4294901760, %v23309_v6  ;;  %v18038_v47 = vld [vmem:[%s22746_s8 + $0x68] sm:$0xff] }
 0x179   : > { %19216 = vmatprep.mubr.f32.mxu0 %v2348_v18  ;;  %v25651_v18 = vand.u32 4294901760, %v23329_v44 }
 0x17a   : > { %19310 = vmatmul.mubr.f32.gmra.mrb[10].mxu1 %v3162_v37 }
 0x17b   : > { %19312 = vmatprep.mubr.f32.mxu1 %v3172_v59  ;;  %v25652_v59 = vand.u32 4294901760, %v23337_v11 }
 0x17c   : > { %19217 = vmatmul.mubr.f32.gmra.mrb[12].mxu0 %v2358_v60 }
 0x17d   : > { %19219 = vmatprep.mubr.f32.mxu0 %v2368_v36  ;;  %v25659_v36 = vld [vmem:[#allocation37_spill] sm:$0xff] }
 0x17e   : > { %19313 = vmatmul.mubr.f32.gmra.mrb[12].mxu1 %v3182_v22  ;;  %v18039_v22 = vld [vmem:[%s22746_s8 + $0x70] sm:$0xff] }
 0x17f   : > { %19315 = vmatprep.mubr.f32.mxu1 %v3192_v25 }
 0x180   : > { %19220 = vmatmul.mubr.f32.gmra.mrb[14].mxu0 %v2378_v49 }
 0x181   : > { %19226 = vmatprep.mubr.f32.mxu0 %v23249_v16 }
 0x182   : > { %19316 = vmatmul.mubr.f32.gmra.mrb[14].mxu1 %v3202_v57  ;;  %v3034_v57 = vmul.f32 %v18038_v47, %v23212_v62 }
 0x183   : > { %19322 = vmatprep.mubr.f32.mxu1 %v23264_v0 }
 0x184   : > { %19227 = vmatmul.mubr.f32.vlgmr.msra.gmra.mrb[8].mxu0 %v23267_v50 }
 0x185   : > { %19229 = vmatprep.mubr.f32.mxu0 %v23292_v3  ;;  %20657 = vmatpush3.bf16.msra.mxu0 %v23458_v10 }
 0x186   : > { %19323 = vmatmul.mubr.f32.vlgmr.msra.gmra.mrb[8].mxu1 %v23280_v21  ;;  %20659 = vmatprep.subr.bf16.mxu0 %v23215_v45 }
 0x187   : > { %19325 = vmatprep.mubr.f32.mxu1 %v23302_v52  ;;  %20681 = vmatpush3.bf16.msra.mxu1 %v23050_v9  ;;  %v25645_v9 = vand.u32 4294901760, %v23217_v23  ;;  %v25647_v23 = vand.u32 4294901760, %v23278_v15 }
 0x188   : > { %19230 = vmatmul.mubr.f32.gmra.mrb[10].mxu0 %v23316_v14  ;;  %20683 = vmatprep.subr.bf16.mxu1 %v22781_v13 }
 0x189   : > { %19232 = vmatprep.mubr.f32.mxu0 %v23339_v55  ;;  %v23510_v37 = vpack.c.bf16 %v25646_v54, %v25645_v9 }
 0x18a   : > { %19326 = vmatmul.mubr.f32.gmra.mrb[10].mxu1 %v23331_v46 }
 0x18b   : > { %19328 = vmatprep.mubr.f32.mxu1 %v23345_v51 }
 0x18c   : > { %19233 = vmatmul.mubr.f32.gmra.mrb[12].mxu0 %v23373_v2 }
 0x18d   : > { %19235 = vmatprep.mubr.f32.mxu0 %v23383_v43 }
 0x18e   : > { %19329 = vmatmul.mubr.f32.gmra.mrb[12].mxu1 %v23381_v32 }
 0x18f   : > { %19331 = vmatprep.mubr.f32.mxu1 %v23392_v33 }
 0x190   : > { %19236 = vmatmul.mubr.f32.gmra.mrb[14].mxu0 %v23411_v17 }
 0x191   : > { %19242 = vmatprep.mubr.f32.mxu0 %v23278_v15  ;;  %v25653_v15 = vand.u32 4294901760, %v23360_v40 }
 0x192   : > { %19332 = vmatmul.mubr.f32.gmra.mrb[14].mxu1 %v23422_v19 }
 0x193   : > { %19338 = vmatprep.mubr.f32.mxu1 %v23290_v30  ;;  %v25654_v30 = vand.u32 4294901760, %v23371_v12 }
 0x194   : > { %19243 = vmatmul.mubr.f32.vlgmr.msra.gmra.mrb[8].mxu0 %v23300_v28  ;;  %v25655_v28 = vand.u32 4294901760, %v23379_v63 }
 0x195   : > { %19245 = vmatprep.mubr.f32.mxu0 %v23329_v44  ;;  %20661 = vmatpush3.bf16.msra.mxu0 %v23215_v45  ;;  %v25658_v44 = vand.u32 4294901760, %v23430_v53 }
 0x196   : > { %19339 = vmatmul.mubr.f32.vlgmr.msra.gmra.mrb[8].mxu1 %v23309_v6  ;;  %20663 = vmatprep.subr.bf16.mxu0 %v23510_v37  ;;  %v25656_v6 = vand.u32 4294901760, %v23390_v27 }
 0x197   : > { %19341 = vmatprep.mubr.f32.mxu1 %v23337_v11  ;;  %20685 = vmatpush3.bf16.msra.mxu1 %v22781_v13  ;;  %v18034_v11 = vld [vmem:[%s22746_s8 + $0x48] sm:$0xff] }
 0x198   : > { %19246 = vmatmul.mubr.f32.gmra.mrb[10].mxu0 %v23360_v40  ;;  %20687 = vmatprep.subr.bf16.mxu1 %v23142_v34  ;;  %v3030_v40 = vmul.f32 %v18034_v11, %v23212_v62 }
 0x199   : > { %19248 = vmatprep.mubr.f32.mxu0 %v23379_v63 }
 0x19a   : > { %19342 = vmatmul.mubr.f32.gmra.mrb[10].mxu1 %v23371_v12  ;;  %v18033_v12 = vld [vmem:[%s22746_s8 + $0x40] sm:$0xff] }
 0x19b   : > { %19344 = vmatprep.mubr.f32.mxu1 %v23390_v27  ;;  %v3029_v63 = vmul.f32 %v18033_v12, %v23212_v62  ;;  %v18035_v27 = vld [vmem:[%s22746_s8 + $0x50] sm:$0xff] }
 0x19c   : > { %19249 = vmatmul.mubr.f32.gmra.mrb[12].mxu0 %v23409_v48 }
 0x19d   : > { %19251 = vmatprep.mubr.f32.mxu0 %v23420_v24  ;;  %v4605_v48 = vsub.f32 %v23226_v39, %v3029_v63  ;;  %v18036_v24 = vld [vmem:[%s22746_s8 + $0x58] sm:$0xff]  ;;  %v3822_v39 = vsel %vm636_vm0, %v3029_v63, 0 }
 0x19e   : > { %19345 = vmatmul.mubr.f32.gmra.mrb[12].mxu1 %v23417_v58 }
 0x19f   : > { %19347 = vmatprep.mubr.f32.mxu1 %v23430_v53  ;;  %v18037_v53 = vld [vmem:[%s22746_s8 + $0x60] sm:$0xff] }
 0x1a0   : > { %19252 = vmatmul.mubr.f32.gmra.mrb[14].mxu0 %v23441_v8  ;;  %v4606_v8 = vsub.f32 %v23235_v7, %v3030_v40  ;;  %v3825_v7 = vsel %vm636_vm0, %v3030_v40, 0 }
 0x1a1   : > { %19258 = vmatprep.mubr.f32.mxu0 %v25647_v23  ;;  %v25660_v23 = vld [vmem:[#allocation34_spill] sm:$0xff] }
 0x1a2   : > { %19348 = vmatmul.mubr.f32.gmra.mrb[14].mxu1 %v23450_v4  ;;  %v23595_v4 = vand.u32 4294901760, %v3822_v39 }
 0x1a3   : > { %19354 = vmatprep.mubr.f32.mxu1 %v25648_v61 }
 0x1a4   : > { %19259 = vmatmul.mubr.f32.vlgmr.msra.gmra.mrb[8].mxu0 %v25649_v38  ;;  %v23616_v9 = vsub.f32 %v3822_v39, %v23595_v4  ;;  %v3035_v38 = vmul.f32 %v18039_v22, %v23212_v62 }
 0x1a5   : > { %19261 = vmatprep.mubr.f32.mxu0 %v25651_v18  ;;  %20665 = vmatpush3.bf16.msra.mxu0 %v23510_v37 }
 0x1a6   : > { %19355 = vmatmul.mubr.f32.vlgmr.msra.gmra.mrb[8].mxu1 %v25650_v35  ;;  %20667 = vmatprep.subr.bf16.mxu0 %v23215_v45  ;;  %v18040_v35 = vld [vmem:[%s22746_s8 + $0x78] sm:$0xff]  ;;  %v3914_v11 = vand.u32 4294901760, %v23616_v9 }
 0x1a7   : > { %19357 = vmatprep.mubr.f32.mxu1 %v25652_v59  ;;  %20689 = vmatpush3.bf16.msra.mxu1 %v23142_v34  ;;  %v25657_v34 = vand.u32 4294901760, %v23417_v58  ;;  %v3031_v58 = vmul.f32 %v18035_v27, %v23212_v62  ;;  %v25662_v27 = vld [vmem:[#allocation41_spill] sm:$0xff] }
 0x1a8   : > { %19262 = vmatmul.mubr.f32.gmra.mrb[10].mxu0 %v25653_v15  ;;  %20691 = vmatprep.subr.bf16.mxu1 %v22781_v13 }
 0x1a9   : > { %19264 = vmatprep.mubr.f32.mxu0 %v25655_v28  ;;  %v3828_v31 = vsel %vm636_vm0, %v3031_v58, 0 }
 0x1aa   : > { %19358 = vmatmul.mubr.f32.gmra.mrb[10].mxu1 %v25654_v30  ;;  %v23618_v54 = vand.u32 4294901760, %v3828_v31 }
 0x1ab   : > { %19360 = vmatprep.mubr.f32.mxu1 %v25656_v6 }
 0x1ac   : > { %19265 = vmatmul.mubr.f32.gmra.mrb[12].mxu0 %v2356_v41  ;;  %v4614_v41 = vsel %vm636_vm0, %v4605_v48, 0  ;;  %v23645_v63 = vsub.f32 %v3828_v31, %v23618_v54  ;;  %v4611_v48 = vsub.f32 %v25662_v27, %v3035_v38 }
 0x1ad   : > { %19267 = vmatprep.mubr.f32.mxu0 %v2366_v26  ;;  %v4607_v26 = vsub.f32 %v23252_v29, %v3031_v58  ;;  %v23601_v60 = vand.u32 4294901760, %v4614_v41  ;;  %v23607_v29 = vand.u32 4294901760, %v3825_v7 }
 0x1ae   : > { %19361 = vmatmul.mubr.f32.gmra.mrb[12].mxu1 %v25657_v34 }
 0x1af   : > { %19363 = vmatprep.mubr.f32.mxu1 %v25658_v44  ;;  %v4620_v49 = vsel %vm636_vm0, %v4607_v26, 0  ;;  %v23625_v18 = vsub.f32 %v4614_v41, %v23601_v60  ;;  %v23630_v59 = vsub.f32 %v3825_v7, %v23607_v29  ;;  %v25661_v44 = vld [vmem:[#allocation35_spill] sm:$0xff]  ;;  %v3915_v7 = vsub.f32 %v23616_v9, %v3914_v11 }
 0x1b0   : > { %19268 = vmatmul.mubr.f32.gmra.mrb[14].mxu0 %v2376_v42  ;;  %v4617_v42 = vsel %vm636_vm0, %v4606_v8, 0  ;;  %v23632_v15 = vand.u32 4294901760, %v4620_v49  ;;  %v4610_v12 = vsub.f32 %v25661_v44, %v3034_v57 }
 0x1b1   : > { %19274 = vmatprep.mubr.f32.mxu0 %v23249_v16  ;;  %v23611_v25 = vand.u32 4294901760, %v4617_v42 }
 0x1b2   : > { %19364 = vmatmul.mubr.f32.gmra.mrb[14].mxu1 %v3200_v5  ;;  %v3033_v5 = vmul.f32 %v18037_v53, %v23212_v62  ;;  %v23659_v8 = vsub.f32 %v4620_v49, %v23632_v15  ;;  %v3837_v53 = vsel %vm636_vm0, %v3034_v57, 0  ;;  %v4629_v41 = vsel %vm636_vm0, %v4610_v12, 0 }
 0x1b3   : > { %19370 = vmatprep.mubr.f32.mxu1 %v23264_v0  ;;  %v23638_v6 = vsub.f32 %v4617_v42, %v23611_v25  ;;  %v25664_v42 = vld [vmem:[#allocation38_spill] sm:$0xff] }
 0x1b4   : > { %19275 = vmatmul.mubr.f32.vlgmr.msra.gmra.mrb[8].mxu0 %v23267_v50  ;;  %v4609_v61 = vsub.f32 %v25660_v23, %v3033_v5  ;;  %v3834_v34 = vsel %vm636_vm0, %v3033_v5, 0  ;;  %v4632_v5 = vsel %vm636_vm0, %v4611_v48, 0  ;;  %v4726_v23 = vand.u32 4294901760, %v23659_v8 }
 0x1b5   : > { %19277 = vmatprep.mubr.f32.mxu0 %v23292_v3  ;;  %20669 = vmatpush3.bf16.msra.mxu0 %v23215_v45  ;;  %v23661_v39 = vand.u32 4294901760, %v3834_v34  ;;  %v4716_v26 = vand.u32 4294901760, %v23638_v6 }
 0x1b6   : > { %19371 = vmatmul.mubr.f32.vlgmr.msra.gmra.mrb[8].mxu1 %v23280_v21  ;;  %20695 = vmatprep.subr.bf16.mxu0 %v22795_v20  ;;  %v4626_v40 = vsel %vm636_vm0, %v4609_v61, 0 }
 0x1b7   : > { %19373 = vmatprep.mubr.f32.mxu1 %v23302_v52  ;;  %20693 = vmatpush3.bf16.msra.mxu1 %v22781_v13  ;;  %v3032_v13 = vmul.f32 %v18036_v24, %v23212_v62 }
 0x1b8   : > { %19278 = vmatmul.mubr.f32.gmra.mrb[10].mxu0 %v23316_v14  ;;  %20719 = vmatprep.subr.bf16.mxu1 %v23215_v45 }
 0x1b9   : > { %19280 = vmatprep.mubr.f32.mxu0 %v23339_v55  ;;  %v4608_v56 = vsub.f32 %v25659_v36, %v3032_v13  ;;  %v3831_v30 = vsel %vm636_vm0, %v3032_v13, 0  ;;  %v23689_v36 = vand.u32 4294901760, %v3837_v53 }
 0x1ba   : > { %19374 = vmatmul.mubr.f32.gmra.mrb[10].mxu1 %v23331_v46  ;;  %v23651_v58 = vand.u32 4294901760, %v3831_v30 }
 0x1bb   : > { %19376 = vmatprep.mubr.f32.mxu1 %v23345_v51  ;;  %v4623_v28 = vsel %vm636_vm0, %v4608_v56, 0  ;;  %v23697_v56 = vand.u32 4294901760, %v4629_v41  ;;  %v23723_v44 = vsub.f32 %v3837_v53, %v23689_v36  ;;  %v4727_v53 = vsub.f32 %v23659_v8, %v4726_v23 }
 0x1bc   : > { %19281 = vmatmul.mubr.f32.gmra.mrb[12].mxu0 %v23373_v2  ;;  %v23653_v24 = vand.u32 4294901760, %v4623_v28  ;;  %v23684_v31 = vsub.f32 %v3831_v30, %v23651_v58  ;;  %v4717_v30 = vsub.f32 %v23638_v6, %v4716_v26 }
 0x1bd   : > { %19283 = vmatprep.mubr.f32.mxu0 %v23383_v43 }
 0x1be   : > { %19377 = vmatmul.mubr.f32.gmra.mrb[12].mxu1 %v23381_v32  ;;  %v23687_v22 = vsub.f32 %v4623_v28, %v23653_v24  ;;  %v25480_v28 = vand.u32 4294901760, %v23684_v31 }
 0x1bf   : > { %19379 = vmatprep.mubr.f32.mxu1 %v23392_v33 }
 0x1c0   : > { %19284 = vmatmul.mubr.f32.gmra.mrb[14].mxu0 %v23411_v17 }
 0x1c1   : > { %19290 = vmatprep.mubr.f32.mxu0 %v23249_v16  ;;  %v3036_v16 = vmul.f32 %v18040_v35, %v23212_v62  ;;  %v3924_v62 = vand.u32 4294901760, %v23630_v59 }
 0x1c2   : > { %19380 = vmatmul.mubr.f32.gmra.mrb[14].mxu1 %v23422_v19 }
 0x1c3   : > { %19386 = vmatprep.mubr.f32.mxu1 %v23264_v0  ;;  %v4706_v0 = vand.u32 4294901760, %v23625_v18  ;;  %v3843_v57 = vsel %vm636_vm0, %v3036_v16, 0  ;;  %v3925_v35 = vsub.f32 %v23630_v59, %v3924_v62 }
 0x1c4   : > { %19291 = vmatmul.mubr.f32.vlgmr.msra.gmra.mrb[8].mxu0 %v23267_v50  ;;  %v23666_v50 = vand.u32 4294901760, %v4626_v40  ;;  %v23725_v12 = vand.u32 4294901760, %v3843_v57 }
 0x1c5   : > { %19293 = vmatprep.mubr.f32.mxu0 %v23292_v3  ;;  %20697 = vmatpush3.bf16.msra.mxu0 %v22795_v20  ;;  %v25663_v3 = vld [vmem:[#allocation42_spill] sm:$0xff]  ;;  %v4707_v47 = vsub.f32 %v23625_v18, %v4706_v0 }
 0x1c6   : > { %19387 = vmatmul.mubr.f32.vlgmr.msra.gmra.mrb[8].mxu1 %v23280_v21  ;;  %v3840_v21 = vsel %vm636_vm0, %v3035_v38, 0  ;;  %v4612_v13 = vsub.f32 %v25663_v3, %v3036_v16  ;;  %20699 = vmatprep.subr.bf16.mxu0 %v25664_v42  ;;  %v23705_v61 = vsub.f32 %v4626_v40, %v23666_v50  ;;  %v23707_v38 = vand.u32 4294901760, %v4632_v5 }
 0x1c7   : > { %19389 = vmatprep.mubr.f32.mxu1 %v23302_v52  ;;  %20721 = vmatpush3.bf16.msra.mxu1 %v23215_v45  ;;  %v3934_v52 = vand.u32 4294901760, %v23645_v63  ;;  %v23699_v49 = vand.u32 4294901760, %v3840_v21  ;;  %v23731_v40 = vsub.f32 %v4629_v41, %v23697_v56  ;;  %v4708_v48 = vand.u32 4294901760, %v4707_v47 }
 0x1c8   : > { %19294 = vmatmul.mubr.f32.gmra.mrb[10].mxu0 %v23316_v14  ;;  %20723 = vmatprep.subr.bf16.mxu1 %v23318_v1  ;;  %v23695_v14 = vsub.f32 %v3834_v34, %v23661_v39  ;;  %v25478_v34 = vand.u32 4294901760, %v23687_v22  ;;  %v3926_v3 = vand.u32 4294901760, %v3925_v35  ;;  %v4718_v41 = vand.u32 4294901760, %v4717_v30 }
 0x1c9   : > { %19296 = vmatprep.mubr.f32.mxu0 %v23339_v55  ;;  %v3916_v55 = vand.u32 4294901760, %v3915_v7  ;;  %v3964_v7 = vand.u32 4294901760, %v23723_v44  ;;  %v23755_v47 = vsub.f32 %v3843_v57, %v23725_v12 }
 0x1ca   : > { %19390 = vmatmul.mubr.f32.gmra.mrb[10].mxu1 %v23331_v46  ;;  %v4635_v46 = vsel %vm636_vm0, %v4612_v13, 0  ;;  %v25479_v16 = vand.u32 4294901760, %v23695_v14 }
 0x1cb   : > { %19392 = vmatprep.mubr.f32.mxu1 %v23345_v51  ;;  %v3935_v51 = vsub.f32 %v23645_v63, %v3934_v52  ;;  %v23736_v27 = vand.u32 4294901760, %v4635_v46 }
 0x1cc   : > { %19297 = vmatmul.mubr.f32.gmra.mrb[12].mxu0 %v23373_v2  ;;  %v23734_v2 = vsub.f32 %v3840_v21, %v23699_v49  ;;  %v3945_v21 = vsub.f32 %v23684_v31, %v25480_v28  ;;  %v3984_v28 = vand.u32 4294901760, %v23755_v47 }
 0x1cd   : > { %19299 = vmatprep.mubr.f32.mxu0 %v23383_v43  ;;  %v23744_v43 = vsub.f32 %v4632_v5, %v23707_v38  ;;  %v3936_v13 = vand.u32 4294901760, %v3935_v51  ;;  %v4756_v5 = vand.u32 4294901760, %v23731_v40  ;;  %v23764_v30 = vsub.f32 %v4635_v46, %v23736_v27 }
 0x1ce   : > { %19393 = vmatmul.mubr.f32.gmra.mrb[12].mxu1 %v23381_v32  ;;  %v4746_v32 = vand.u32 4294901760, %v23705_v61  ;;  %v3974_v35 = vand.u32 4294901760, %v23734_v2  ;;  %v4728_v51 = vand.u32 4294901760, %v4727_v53 }
 0x1cf   : > { %19395 = vmatprep.mubr.f32.mxu1 %v23392_v33  ;;  %v4737_v33 = vsub.f32 %v23687_v22, %v25478_v34 }
 0x1d0   : > { %19300 = vmatmul.mubr.f32.gmra.mrb[14].mxu0 %v23411_v17  ;;  %v3955_v17 = vsub.f32 %v23695_v14, %v25479_v16  ;;  %v4747_v57 = vsub.f32 %v23705_v61, %v4746_v32  ;;  %v3965_v16 = vsub.f32 %v23723_v44, %v3964_v7  ;;  %v3975_v53 = vsub.f32 %v23734_v2, %v3974_v35 }
 0x1d1   : > { %19402 = vmatprep.mubr.f32.mxu0 %v3916_v55  ;;  %v3946_v55 = vand.u32 4294901760, %v3945_v21  ;;  %v4738_v34 = vand.u32 4294901760, %v4737_v33 }
 0x1d2   : > { %19396 = vmatmul.mubr.f32.gmra.mrb[14].mxu1 %v23422_v19  ;;  %v25481_v19 = vand.u32 4294901760, %v23744_v43  ;;  %v3956_v46 = vand.u32 4294901760, %v3955_v17  ;;  %v4748_v21 = vand.u32 4294901760, %v4747_v57  ;;  %v3966_v33 = vand.u32 4294901760, %v3965_v16 }
 0x1d3   : > { %19498 = vmatprep.mubr.f32.mxu1 %v4708_v48  ;;  %v4757_v48 = vsub.f32 %v23731_v40, %v4756_v5  ;;  %v3985_v17 = vsub.f32 %v23755_v47, %v3984_v28 }
 0x1d4   : > { %19403 = vmatmul.mubr.f32.vlgmr.msra.gmra.mrb[16].mxu0 %v3926_v3  ;;  %v4776_v3 = vand.u32 4294901760, %v23764_v30 }
 0x1d5   : > { %19405 = vmatprep.mubr.f32.mxu0 %v3936_v13  ;;  %20701 = vmatpush3.bf16.msra.mxu0 %v25664_v42  ;;  %v25665_v13 = vld [vmem:[#allocation39_spill] sm:$0xff]  ;;  %v4758_v42 = vand.u32 4294901760, %v4757_v48 }
 0x1d6   : > { %19499 = vmatmul.mubr.f32.vlgmr.msra.gmra.mrb[16].mxu1 %v4718_v41  ;;  %v4767_v41 = vsub.f32 %v23744_v43, %v25481_v19  ;;  %20703 = vmatprep.subr.bf16.mxu0 %v25665_v13  ;;  %v4777_v57 = vsub.f32 %v23764_v30, %v4776_v3  ;;  %v3986_v19 = vand.u32 4294901760, %v3985_v17 }
 0x1d7   : > { %19501 = vmatprep.mubr.f32.mxu1 %v4728_v51  ;;  %20725 = vmatpush3.bf16.msra.mxu1 %v23318_v1  ;;  %v3976_v51 = vand.u32 4294901760, %v3975_v53 }
 0x1d8   : > { %19406 = vmatmul.mubr.f32.gmra.mrb[18].mxu0 %v3946_v55  ;;  %20727 = vmatprep.subr.bf16.mxu1 %v23458_v10  ;;  %v4768_v1 = vand.u32 4294901760, %v4767_v41  ;;  %v4778_v16 = vand.u32 4294901760, %v4777_v57 }
 0x1d9   : > { %19408 = vmatprep.mubr.f32.mxu0 %v3956_v46 }
 0x1da   : > { %19502 = vmatmul.mubr.f32.gmra.mrb[18].mxu1 %v4738_v34 }
 0x1db   : > { %19504 = vmatprep.mubr.f32.mxu1 %v4748_v21 }
 0x1dc   : > { %19409 = vmatmul.mubr.f32.gmra.mrb[20].mxu0 %v3966_v33 }
 0x1dd   : > { %19411 = vmatprep.mubr.f32.mxu0 %v3976_v51 }
 0x1de   : > { %19505 = vmatmul.mubr.f32.gmra.mrb[20].mxu1 %v4758_v42 }
 0x1df   : > { %19507 = vmatprep.mubr.f32.mxu1 %v4768_v1 }
 0x1e0   : > { %19412 = vmatmul.mubr.f32.gmra.mrb[22].mxu0 %v3986_v19 }
 0x1e1   : > { %19418 = vmatprep.mubr.f32.mxu0 %v23595_v4 }
 0x1e2   : > { %19508 = vmatmul.mubr.f32.gmra.mrb[22].mxu1 %v4778_v16 }
 0x1e3   : > { %19514 = vmatprep.mubr.f32.mxu1 %v23601_v60 }
 0x1e4   : > { %19419 = vmatmul.mubr.f32.vlgmr.msra.gmra.mrb[16].mxu0 %v23607_v29 }
 0x1e5   : > { %19421 = vmatprep.mubr.f32.mxu0 %v23618_v54  ;;  %20705 = vmatpush3.bf16.msra.mxu0 %v25665_v13 }
 0x1e6   : > { %19515 = vmatmul.mubr.f32.vlgmr.msra.gmra.mrb[16].mxu1 %v23611_v25  ;;  %20707 = vmatprep.subr.bf16.mxu0 %v22795_v20 }
 0x1e7   : > { %19517 = vmatprep.mubr.f32.mxu1 %v23632_v15  ;;  %20729 = vmatpush3.bf16.msra.mxu1 %v23458_v10  ;;  %v25666_v10 = vld [vmem:[#allocation40_spill] sm:$0xff] }
 0x1e8   : > { %19422 = vmatmul.mubr.f32.gmra.mrb[18].mxu0 %v23651_v58  ;;  %20731 = vmatprep.subr.bf16.mxu1 %v23215_v45 }
 0x1e9   : > { %19424 = vmatprep.mubr.f32.mxu0 %v23661_v39 }
 0x1ea   : > { %19518 = vmatmul.mubr.f32.gmra.mrb[18].mxu1 %v23653_v24 }
 0x1eb   : > { %19520 = vmatprep.mubr.f32.mxu1 %v23666_v50 }
 0x1ec   : > { %19425 = vmatmul.mubr.f32.gmra.mrb[20].mxu0 %v23689_v36 }
 0x1ed   : > { %19427 = vmatprep.mubr.f32.mxu0 %v23699_v49 }
 0x1ee   : > { %19521 = vmatmul.mubr.f32.gmra.mrb[20].mxu1 %v23697_v56 }
 0x1ef   : > { %19523 = vmatprep.mubr.f32.mxu1 %v23707_v38 }
 0x1f0   : > { %19428 = vmatmul.mubr.f32.gmra.mrb[22].mxu0 %v23725_v12 }
 0x1f1   : > { %19434 = vmatprep.mubr.f32.mxu0 %v23616_v9  ;;  %v25667_v9 = vand.u32 4294901760, %v23684_v31 }
 0x1f2   : > { %19524 = vmatmul.mubr.f32.gmra.mrb[22].mxu1 %v23736_v27 }
 0x1f3   : > { %19530 = vmatprep.mubr.f32.mxu1 %v23625_v18  ;;  %v25668_v18 = vand.u32 4294901760, %v23687_v22 }
 0x1f4   : > { %19435 = vmatmul.mubr.f32.vlgmr.msra.gmra.mrb[16].mxu0 %v23630_v59  ;;  %v25669_v59 = vand.u32 4294901760, %v23695_v14 }
 0x1f5   : > { %19437 = vmatprep.mubr.f32.mxu0 %v23645_v63  ;;  %20709 = vmatpush3.bf16.msra.mxu0 %v22795_v20  ;;  %v541_v63 = vld [vmem:[#allocation6 + $0x10] sm:$0xff] }
 0x1f6   : > { %19531 = vmatmul.mubr.f32.vlgmr.msra.gmra.mrb[16].mxu1 %v23638_v6  ;;  %20711 = vmatprep.subr.bf16.mxu0 %v25666_v10  ;;  %v538_v6 = vld [vmem:[#allocation6] sm:$0xff] }
 0x1f7   : > { %19533 = vmatprep.mubr.f32.mxu1 %v23659_v8  ;;  %20733 = vmatpush3.bf16.msra.mxu1 %v23215_v45 }
 0x1f8   : > { %19438 = vmatmul.mubr.f32.gmra.mrb[18].mxu0 %v23684_v31  ;;  %20735 = vmatprep.subr.bf16.mxu1 %v23510_v37 }
 0x1f9   : > { %19440 = vmatprep.mubr.f32.mxu0 %v23695_v14 }
 0x1fa   : > { %19534 = vmatmul.mubr.f32.gmra.mrb[18].mxu1 %v23687_v22 }
 0x1fb   : > { %19536 = vmatprep.mubr.f32.mxu1 %v23705_v61 }
 0x1fc   : > { %19441 = vmatmul.mubr.f32.gmra.mrb[20].mxu0 %v23723_v44 }
 0x1fd   : > { %19443 = vmatprep.mubr.f32.mxu0 %v23734_v2 }
 0x1fe   : > { %19537 = vmatmul.mubr.f32.gmra.mrb[20].mxu1 %v23731_v40 }
 0x1ff   : > { %19539 = vmatprep.mubr.f32.mxu1 %v23744_v43 }
 0x200   : > { %19444 = vmatmul.mubr.f32.gmra.mrb[22].mxu0 %v23755_v47 }
 0x201   : > { %19450 = vmatprep.mubr.f32.mxu0 %v3914_v11  ;;  %v5422_v11 = vsel %vm636_vm0, %v538_v6, 0 }
 0x202   : > { %19540 = vmatmul.mubr.f32.gmra.mrb[22].mxu1 %v23764_v30 }
 0x203   : > { %19546 = vmatprep.mubr.f32.mxu1 %v4706_v0  ;;  %v5930_v0 = vsel %vm636_vm0, %v541_v63, 0 }
 0x204   : > { %19451 = vmatmul.mubr.f32.vlgmr.msra.gmra.mrb[16].mxu0 %v3924_v62 }
 0x205   : > { %19453 = vmatprep.mubr.f32.mxu0 %v3934_v52  ;;  %20713 = vmatpush3.bf16.msra.mxu0 %v25666_v10 }
 0x206   : > { %19547 = vmatmul.mubr.f32.vlgmr.msra.gmra.mrb[16].mxu1 %v4716_v26  ;;  %20715 = vmatprep.subr.bf16.mxu0 %v22795_v20 }
 0x207   : > { %19549 = vmatprep.mubr.f32.mxu1 %v4726_v23  ;;  %20737 = vmatpush3.bf16.msra.mxu1 %v23510_v37  ;;  %v25670_v37 = vand.u32 4294901760, %v23744_v43 }
 0x208   : > { %19454 = vmatmul.mubr.f32.gmra.mrb[18].mxu0 %v25667_v9  ;;  %20739 = vmatprep.subr.bf16.mxu1 %v23215_v45 }
 0x209   : > { %19456 = vmatprep.mubr.f32.mxu0 %v25669_v59 }
 0x20a   : > { %19550 = vmatmul.mubr.f32.gmra.mrb[18].mxu1 %v25668_v18 }
 0x20b   : > { %19552 = vmatprep.mubr.f32.mxu1 %v4746_v32 }
 0x20c   : > { %19457 = vmatmul.mubr.f32.gmra.mrb[20].mxu0 %v3964_v7 }
 0x20d   : > { %19459 = vmatprep.mubr.f32.mxu0 %v3974_v35 }
 0x20e   : > { %19553 = vmatmul.mubr.f32.gmra.mrb[20].mxu1 %v4756_v5 }
 0x20f   : > { %19555 = vmatprep.mubr.f32.mxu1 %v25670_v37 }
 0x210   : > { %19460 = vmatmul.mubr.f32.gmra.mrb[22].mxu0 %v3984_v28 }
 0x211   : > { %19466 = vmatprep.mubr.f32.mxu0 %v23595_v4 }
 0x212   : > { %19556 = vmatmul.mubr.f32.gmra.mrb[22].mxu1 %v4776_v3 }
 0x213   : > { %19562 = vmatprep.mubr.f32.mxu1 %v23601_v60 }
 0x214   : > { %19467 = vmatmul.mubr.f32.vlgmr.msra.gmra.mrb[16].mxu0 %v23607_v29 }
 0x215   : > { %19469 = vmatprep.mubr.f32.mxu0 %v23618_v54  ;;  %20717 = vmatpush3.bf16.msra.mxu0 %v22795_v20  ;;  %v23887_v20 = vand.u32 4294901760, %v5422_v11 }
 0x216   : > { %19563 = vmatmul.mubr.f32.vlgmr.msra.gmra.mrb[16].mxu1 %v23611_v25 }
 0x217   : > { %19565 = vmatprep.mubr.f32.mxu1 %v23632_v15  ;;  %20741 = vmatpush3.bf16.msra.mxu1 %v23215_v45  ;;  %v23890_v45 = vand.u32 4294901760, %v5930_v0  ;;  %v23896_v62 = vsub.f32 %v5422_v11, %v23887_v20 }
 0x218   : > { %19470 = vmatmul.mubr.f32.gmra.mrb[18].mxu0 %v23651_v58 }
 0x219   : > { %19472 = vmatprep.mubr.f32.mxu0 %v23661_v39  ;;  %v23900_v8 = vsub.f32 %v5930_v0, %v23890_v45  ;;  %v23906_v26 = vand.u32 4294901760, %v23896_v62 }
 0x21a   : > { %19566 = vmatmul.mubr.f32.gmra.mrb[18].mxu1 %v23653_v24 }
 0x21b   : > { %19568 = vmatprep.mubr.f32.mxu1 %v23666_v50  ;;  %25671 = vst [vmem:[#allocation36_spill] sm:$0xff] %v23906_v26 }
 0x21c   : > { %19473 = vmatmul.mubr.f32.gmra.mrb[20].mxu0 %v23689_v36 }
 0x21d   : > { %19475 = vmatprep.mubr.f32.mxu0 %v23699_v49 }
 0x21e   : > { %19569 = vmatmul.mubr.f32.gmra.mrb[20].mxu1 %v23697_v56 }
 0x21f   : > { %19571 = vmatprep.mubr.f32.mxu1 %v23707_v38 }
 0x220   : > { %19476 = vmatmul.mubr.f32.gmra.mrb[22].mxu0 %v23725_v12 }
 0x221   : > { %19482 = vmatprep.mubr.f32.mxu0 %v23595_v4  ;;  %v23910_v4 = vand.u32 4294901760, %v23900_v8 }
 0x222   : > { %19572 = vmatmul.mubr.f32.gmra.mrb[22].mxu1 %v23736_v27 }
 0x223   : > { %19578 = vmatprep.mubr.f32.mxu1 %v23601_v60  ;;  %v5497_v60 = vsub.f32 %v23896_v62, %v23906_v26 }
 0x224   : > { %19483 = vmatmul.mubr.f32.vlgmr.msra.gmra.mrb[16].mxu0 %v23607_v29  ;;  %v539_v29 = vld [vmem:[#allocation6 + $0x8] sm:$0xff] }
 0x225   : > { %19485 = vmatprep.mubr.f32.mxu0 %v23618_v54  ;;  %v23923_v54 = vand.u32 4294901760, %v5497_v60 }
 0x226   : > { %19579 = vmatmul.mubr.f32.vlgmr.msra.gmra.mrb[16].mxu1 %v23611_v25  ;;  %v6005_v25 = vsub.f32 %v23900_v8, %v23910_v4 }
 0x227   : > { %19581 = vmatprep.mubr.f32.mxu1 %v23632_v15  ;;  %v5425_v15 = vsel %vm636_vm0, %v539_v29, 0 }
 0x228   : > { %19486 = vmatmul.mubr.f32.gmra.mrb[18].mxu0 %v23651_v58  ;;  %v23927_v58 = vand.u32 4294901760, %v6005_v25 }
 0x229   : > { %19488 = vmatprep.mubr.f32.mxu0 %v23661_v39 }
 0x22a   : > { %19582 = vmatmul.mubr.f32.gmra.mrb[18].mxu1 %v23653_v24  ;;  %25672 = vst [vmem:[#allocation37_spill] sm:$0xff] %v23927_v58  ;;  %v23930_v24 = vand.u32 4294901760, %v5425_v15 }
 0x22b   : > { %19584 = vmatprep.mubr.f32.mxu1 %v23666_v50 }
 0x22c   : > { %19489 = vmatmul.mubr.f32.gmra.mrb[20].mxu0 %v23689_v36  ;;  %v23936_v39 = vsub.f32 %v5425_v15, %v23930_v24 }
 0x22d   : > { %19491 = vmatprep.mubr.f32.mxu0 %v23699_v49 }
 0x22e   : > { %19585 = vmatmul.mubr.f32.gmra.mrb[20].mxu1 %v23697_v56  ;;  %25673 = vst [vmem:[#allocation34_spill] sm:$0xff] %v23936_v39  ;;  %v23945_v22 = vand.u32 4294901760, %v23936_v39 }
 0x22f   : > { %19587 = vmatprep.mubr.f32.mxu1 %v23707_v38 }
 0x230   : > { %19492 = vmatmul.mubr.f32.gmra.mrb[22].mxu0 %v23725_v12  ;;  %25674 = vst [vmem:[#allocation35_spill] sm:$0xff] %v23945_v22  ;;  %v5507_v34 = vsub.f32 %v23936_v39, %v23945_v22 }
 0x231   : > { %19594 = vmatprep.mubr.f32.mxu0 %v23923_v54 }
 0x232   : > { %19588 = vmatmul.mubr.f32.gmra.mrb[22].mxu1 %v23736_v27  ;;  %v23995_v19 = vand.u32 4294901760, %v5507_v34 }
 0x233   : > { %19636 = vmatprep.mubr.f32.mxu1 %v23927_v58 }
 0x237   : > { %v23938_v50 = vpop.f32.mrb[0].mxu0 }
 0x238   : > { %v23942_v31 = vpop.f32.mrb[1].mxu0 }
 0x239   : > { %v23940_v52 = vpop.f32.mrb[0].mxu1 }
 0x23a   : > { %v23949_v36 = vsub.f32 %v23938_v50, %v23940_v52  ;;  %v23951_v14 = vpop.f32.mrb[1].mxu1 }
 0x23b   : > { %v23955_v56 = vsub.f32 %v23942_v31, %v23951_v14  ;;  %v23958_v23 = vpop.f32.mrb[2].mxu0 }
 0x23c   : > { %v5431_v49 = vand.u32 4294901760, %v23949_v36  ;;  %v23963_v28 = vpop.f32.mrb[3].mxu0 }
 0x23d   : > { %v5428_v61 = vand.u32 4294901760, %v23955_v56  ;;  %v23961_v38 = vpop.f32.mrb[2].mxu1 }
 0x23e   : > { %v23968_v44 = vsub.f32 %v23949_v36, %v5431_v49  ;;  %v23972_v12 = vsub.f32 %v23958_v23, %v23961_v38  ;;  %v23974_v40 = vpop.f32.mrb[3].mxu1 }
 0x23f   : > { %v23976_v2 = vpack.c.bf16 %v5431_v49, %v5428_v61  ;;  %v23979_v27 = vsub.f32 %v23955_v56, %v5428_v61  ;;  %v23983_v32 = vsub.f32 %v23963_v28, %v23974_v40  ;;  %v23986_v7 = vpop.f32.mrb[4].mxu0 }
 0x240   : > { %v8510_v43 = vand.u32 4294901760, %v23972_v12  ;;  %v25482_v47 = vand.u32 4294901760, %v23968_v44  ;;  %v23993_v30 = vpop.f32.mrb[5].mxu0 }
 0x241   : > { %v8507_v5 = vand.u32 4294901760, %v23983_v32  ;;  %v23990_v35 = vpop.f32.mrb[4].mxu1  ;;  %20743 = vmatprep.subr.bf16.mxu0 %v23976_v2  ;;  %v25483_v55 = vand.u32 4294901760, %v23979_v27  ;;  %v20750_v63 = vpack.c.bf16 %v23968_v44, %v23979_v27 }
 0x242   : > { %v8602_v46 = vsub.f32 %v23972_v12, %v8510_v43  ;;  %v24001_v48 = vsub.f32 %v23986_v7, %v23990_v35  ;;  %v24003_v53 = vpop.f32.mrb[5].mxu1  ;;  %20745 = vmatpush3.bf16.msra.mxu0 %v23976_v2  ;;  %v5525_v3 = vsub.f32 %v23968_v44, %v25482_v47 }
 0x243   : > { %v24009_v21 = vpack.c.bf16 %v8510_v43, %v8507_v5  ;;  %v8595_v41 = vsub.f32 %v23983_v32, %v8507_v5  ;;  %v24014_v13 = vsub.f32 %v23993_v30, %v24003_v53  ;;  %v5518_v33 = vsub.f32 %v23979_v27, %v25483_v55  ;;  %v24020_v42 = vpop.f32.mrb[6].mxu0 }
 0x244   : > { %v11576_v17 = vand.u32 4294901760, %v24001_v48  ;;  %v5526_v51 = vand.u32 4294901760, %v5525_v3  ;;  %v8603_v57 = vand.u32 4294901760, %v8602_v46  ;;  %v24026_v10 = vpop.f32.mrb[7].mxu0 }
 0x245   : > { %25675 = vst [vmem:[#allocation41_spill] sm:$0xff] %v24009_v21  ;;  %v11573_v1 = vand.u32 4294901760, %v24014_v13  ;;  %v24023_v16 = vpop.f32.mrb[6].mxu1  ;;  %19595 = vmatmul.mubr.f32.vlgmr.msra.gmra.mrb[24].mxu0 %v23995_v19  ;;  %v5519_v9 = vand.u32 4294901760, %v5518_v33  ;;  %v8596_v18 = vand.u32 4294901760, %v8595_v41  ;;  %v24028_v59 = vpack.c.bf16 %v8602_v46, %v8595_v41 }
 0x246   : > { %v11668_v37 = vsub.f32 %v24001_v48, %v11576_v17  ;;  %v24033_v6 = vsub.f32 %v24020_v42, %v24023_v16  ;;  %v24035_v11 = vpop.f32.mrb[7].mxu1  ;;  %19601 = vmatprep.mubr.f32.mxu0 %v23887_v20  ;;  %v8604_v0 = vsub.f32 %v8602_v46, %v8603_v57 }
 0x247   : > { %25676 = vst [vmem:[#allocation42_spill] sm:$0xff] %v24028_v59  ;;  %v24040_v60 = vpack.c.bf16 %v11576_v17, %v11573_v1  ;;  %v11661_v29 = vsub.f32 %v24014_v13, %v11573_v1  ;;  %v24045_v25 = vsub.f32 %v24026_v10, %v24035_v11  ;;  %v20746_v15 = vpack.c.bf16 %v5526_v51, %v5519_v9 }
 0x248   : > { %v14642_v49 = vand.u32 4294901760, %v24033_v6  ;;  %v8597_v61 = vsub.f32 %v8595_v41, %v8596_v18  ;;  %v8605_v34 = vand.u32 4294901760, %v8604_v0  ;;  %v24048_v43 = vpack.c.bf16 %v8603_v57, %v8596_v18 }
 0x249   : > { %25677 = vst [vmem:[#allocation38_spill] sm:$0xff] %v24040_v60  ;;  %v14639_v5 = vand.u32 4294901760, %v24045_v25  ;;  %20747 = vmatprep.subr.bf16.mxu0 %v20746_v15  ;;  %v11662_v3 = vand.u32 4294901760, %v11661_v29  ;;  %v11669_v46 = vand.u32 4294901760, %v11668_v37  ;;  %v24051_v33 = vpack.c.bf16 %v11668_v37, %v11661_v29 }
 0x24a   : > { %25678 = vst [vmem:[#allocation39_spill] sm:$0xff] %v24048_v43  ;;  %v14734_v17 = vsub.f32 %v24033_v6, %v14642_v49  ;;  %20749 = vmatpush3.bf16.msra.mxu0 %v20746_v15  ;;  %v8598_v1 = vand.u32 4294901760, %v8597_v61 }
 0x24b   : > { %25679 = vst [vmem:[#allocation40_spill] sm:$0xff] %v24051_v33  ;;  %v24054_v47 = vpack.c.bf16 %v14642_v49, %v14639_v5  ;;  %v14727_v51 = vsub.f32 %v24045_v25, %v14639_v5  ;;  %20751 = vmatprep.subr.bf16.mxu0 %v20750_v63  ;;  %v11663_v41 = vsub.f32 %v11661_v29, %v11662_v3 }
 0x24c   : > { %v11670_v9 = vsub.f32 %v11668_v37, %v11669_v46  ;;  %v24057_v57 = vpack.c.bf16 %v8605_v34, %v8598_v1  ;;  %v24059_v18 = vpack.c.bf16 %v11669_v46, %v11662_v3  ;;  %v14735_v0 = vand.u32 4294901760, %v14734_v17  ;;  %v544_v3 = vld [vmem:[#allocation6 + $0x20] sm:$0xff] }
 0x24d   : > { %25680 = vst [vmem:[#allocation43_spill] sm:$0xff] %v24054_v47  ;;  %19602 = vmatmul.mubr.f32.vlgmr.msra.gmra.mrb[24].mxu0 %v23930_v24  ;;  %v11664_v55 = vand.u32 4294901760, %v11663_v41  ;;  %v14728_v60 = vand.u32 4294901760, %v14727_v51  ;;  %v24062_v43 = vpack.c.bf16 %v14734_v17, %v14727_v51  ;;  %v25687_v46 = vand.u32 4294901760, %v23979_v27  ;;  %v545_v41 = vld [vmem:[#allocation6 + $0x28] sm:$0xff] }
 0x24e   : > { %25681 = vst [vmem:[#allocation44_spill] sm:$0xff] %v24057_v57  ;;  %25682 = vst [vmem:[#allocation45_spill] sm:$0xff] %v24059_v18  ;;  %v11671_v33 = vand.u32 4294901760, %v11670_v9  ;;  %20753 = vmatpush3.bf16.msra.mxu0 %v20750_v63  ;;  %19608 = vmatprep.mubr.f32.mxu0 %v23896_v62  ;;  %v14736_v15 = vsub.f32 %v14734_v17, %v14735_v0  ;;  %v25688_v63 = vand.u32 4294901760, %v23968_v44 }
 0x24f   : > { %25683 = vst [vmem:[#allocation46_spill] sm:$0xff] %v24062_v43  ;;  %20755 = vmatprep.subr.bf16.mxu0 %v23976_v2  ;;  %v14729_v37 = vsub.f32 %v14727_v51, %v14728_v60  ;;  %v24068_v49 = vpack.c.bf16 %v14735_v0, %v14728_v60  ;;  %v542_v51 = vld [vmem:[#allocation6 + $0x18] sm:$0xff]  ;;  %v6443_v0 = vsel %vm636_vm0, %v545_v41, 0 }
 0x250   : > { %v24066_v29 = vpack.c.bf16 %v11671_v33, %v11664_v55  ;;  %v14737_v61 = vand.u32 4294901760, %v14736_v15  ;;  %v20758_v1 = vpack.c.bf16 %v25688_v63, %v25687_v46  ;;  %v6440_v55 = vsel %vm636_vm0, %v544_v3, 0 }
 0x251   : > { %25685 = vst [vmem:[#allocation48_spill] sm:$0xff] %v24068_v49  ;;  %v14730_v34 = vand.u32 4294901760, %v14729_v37  ;;  %v24080_v60 = vand.u32 4294901760, %v6440_v55  ;;  %v5933_v9 = vsel %vm636_vm0, %v542_v51, 0 }
 0x252   : > { %25684 = vst [vmem:[#allocation47_spill] sm:$0xff] %v24066_v29  ;;  %v24102_v15 = vand.u32 4294901760, %v5933_v9 }
 0x253   : > { %v24070_v5 = vpack.c.bf16 %v14737_v61, %v14730_v34  ;;  %v24085_v33 = vsub.f32 %v6440_v55, %v24080_v60 }
 0x254   : > { %v24107_v37 = vsub.f32 %v5933_v9, %v24102_v15 }
 0x255   : > { %25686 = vst [vmem:[#allocation49_spill] sm:$0xff] %v24070_v5  ;;  %19609 = vmatmul.mubr.f32.vlgmr.msra.gmra.mrb[24].mxu0 %v23936_v39  ;;  %v24089_v44 = vand.u32 4294901760, %v24085_v33 }
 0x256   : > { %20757 = vmatpush3.bf16.msra.mxu0 %v23976_v2  ;;  %19615 = vmatprep.mubr.f32.mxu0 %v23906_v26  ;;  %v24113_v34 = vand.u32 4294901760, %v24107_v37 }
 0x257   : > { %20759 = vmatprep.subr.bf16.mxu0 %v20758_v1  ;;  %v6515_v27 = vsub.f32 %v24085_v33, %v24089_v44 }
 0x258   : > { %v6015_v41 = vsub.f32 %v24107_v37, %v24113_v34 }
 0x259   : > { %v24096_v17 = vand.u32 4294901760, %v6515_v27 }
 0x25b   : > { %25689 = vst [vmem:[#allocation50_spill] sm:$0xff] %v24096_v17 }
 0x25d   : > { %19616 = vmatmul.mubr.f32.vlgmr.msra.gmra.mrb[24].mxu0 %v23945_v22 }
 0x25e   : > { %20761 = vmatpush3.bf16.msra.mxu0 %v20758_v1  ;;  %19622 = vmatprep.mubr.f32.mxu0 %v23887_v20 }
 0x25f   : > { %20763 = vmatprep.subr.bf16.mxu0 %v23976_v2 }
 0x265   : > { %19623 = vmatmul.mubr.f32.vlgmr.msra.gmra.mrb[24].mxu0 %v23930_v24 }
 0x266   : > { %20765 = vmatpush3.bf16.msra.mxu0 %v23976_v2  ;;  %19629 = vmatprep.mubr.f32.mxu0 %v23887_v20  ;;  %v24104_v2 = vand.u32 4294901760, %v6443_v0 }
 0x268   : > { %v24110_v61 = vsub.f32 %v6443_v0, %v24104_v2 }
 0x26a   : > { %v24116_v3 = vand.u32 4294901760, %v24110_v61 }
 0x26c   : > { %v6525_v0 = vsub.f32 %v24110_v61, %v24116_v3 }
 0x26d   : > { %19630 = vmatmul.mubr.f32.vlgmr.msra.gmra.mrb[24].mxu0 %v23930_v24 }
 0x26e   : > { %19678 = vmatprep.mubr.f32.mxu0 %v24096_v17 }
 0x297   : > { %v19292_v46 = vpop.f32.mrb[8].mxu0 }
 0x298   : > { %v3006_v63 = vsub.f32 %v19292_v46, %v23938_v50  ;;  %v2951_v55 = vpop.f32.mrb[9].mxu0 }
 0x299   : > { %v24119_v1 = vpop.f32.mrb[8].mxu1  ;;  %v3005_v27 = vsub.f32 %v2951_v55, %v23942_v31 }
 0x29a   : > { %v24122_v51 = vpop.f32.mrb[9].mxu1  ;;  %v3014_v9 = vsub.f32 %v3006_v63, %v23940_v52  ;;  %v24138_v63 = vand.u32 4294901760, %v6015_v41 }
 0x29b   : > { %v3013_v49 = vsub.f32 %v3005_v27, %v23951_v14  ;;  %v19295_v43 = vpop.f32.mrb[10].mxu0 }
 0x29c   : > { %v5939_v5 = vand.u32 4294901760, %v3014_v9  ;;  %v6438_v50 = vadd.f32 %v3014_v9, %v23949_v36  ;;  %v3008_v46 = vsub.f32 %v19295_v43, %v23958_v23  ;;  %v2963_v31 = vpop.f32.mrb[11].mxu0  ;;  %25690 = vst [vmem:[#allocation51_spill] sm:$0xff] %v24138_v63  ;;  %v24143_v36 = vand.u32 4294901760, %v6525_v0 }
 0x29d   : > { %v24132_v47 = vpop.f32.mrb[10].mxu1  ;;  %v5936_v55 = vand.u32 4294901760, %v3013_v49  ;;  %v6437_v18 = vadd.f32 %v3013_v49, %v23955_v56  ;;  %v3007_v29 = vsub.f32 %v2963_v31, %v23963_v28 }
 0x29e   : > { %v24136_v52 = vpop.f32.mrb[11].mxu1  ;;  %v24140_v59 = vsub.f32 %v3014_v9, %v5939_v5  ;;  %v6449_v14 = vand.u32 4294901760, %v6438_v50  ;;  %v3016_v27 = vsub.f32 %v3008_v46, %v23961_v38  ;;  %25691 = vst [vmem:[#allocation52_spill] sm:$0xff] %v24143_v36 }
 0x29f   : > { %v24145_v23 = vpack.c.bf16 %v5939_v5, %v5936_v55  ;;  %v24147_v43 = vsub.f32 %v3013_v49, %v5936_v55  ;;  %v6446_v57 = vand.u32 4294901760, %v6437_v18  ;;  %v3015_v56 = vsub.f32 %v3007_v29, %v23974_v40  ;;  %v19298_v17 = vpop.f32.mrb[12].mxu0 }
 0x2a0   : > { %v24150_v28 = vsub.f32 %v6438_v50, %v6449_v14  ;;  %v9012_v31 = vand.u32 4294901760, %v3016_v27  ;;  %v9511_v41 = vadd.f32 %v3016_v27, %v23972_v12  ;;  %v3010_v9 = vsub.f32 %v19298_v17, %v23986_v7  ;;  %v2975_v38 = vpop.f32.mrb[13].mxu0 }
 0x2a1   : > { %v24154_v21 = vpop.f32.mrb[12].mxu1  ;;  %v24156_v0 = vpack.c.bf16 %v6449_v14, %v6446_v57  ;;  %v24158_v5 = vsub.f32 %v6437_v18, %v6446_v57  ;;  %v9009_v49 = vand.u32 4294901760, %v3015_v56  ;;  %v9510_v46 = vadd.f32 %v3015_v56, %v23983_v32  ;;  %20767 = vmatprep.subr.bf16.mxu1 %v24145_v23 }
 0x2a2   : > { %v24161_v55 = vpop.f32.mrb[13].mxu1  ;;  %v24164_v40 = vsub.f32 %v3016_v27, %v9012_v31  ;;  %v9516_v29 = vand.u32 4294901760, %v9511_v41  ;;  %v3018_v12 = vsub.f32 %v3010_v9, %v23990_v35  ;;  %v3009_v7 = vsub.f32 %v2975_v38, %v23993_v30  ;;  %20769 = vmatpush3.bf16.msra.mxu1 %v24145_v23 }
 0x2a3   : > { %v24169_v17 = vpack.c.bf16 %v9012_v31, %v9009_v49  ;;  %v24171_v57 = vsub.f32 %v3015_v56, %v9009_v49  ;;  %v9513_v18 = vand.u32 4294901760, %v9510_v46  ;;  %v19301_v50 = vpop.f32.mrb[14].mxu0  ;;  %20791 = vmatprep.subr.bf16.mxu0 %v24156_v0  ;;  %v6025_v32 = vand.u32 4294901760, %v24147_v43 }
 0x2a4   : > { %v24175_v14 = vsub.f32 %v9511_v41, %v9516_v29  ;;  %v12078_v27 = vand.u32 4294901760, %v3018_v12  ;;  %v12577_v22 = vadd.f32 %v3018_v12, %v24001_v48  ;;  %v3017_v35 = vsub.f32 %v3009_v7, %v24003_v53  ;;  %v2987_v9 = vpop.f32.mrb[15].mxu0  ;;  %20793 = vmatpush3.bf16.msra.mxu0 %v24156_v0 }
 0x2a5   : > { %25692 = vst [vmem:[#allocation53_spill] sm:$0xff] %v24169_v17  ;;  %v24179_v30 = vpop.f32.mrb[14].mxu1  ;;  %v24182_v56 = vpack.c.bf16 %v9516_v29, %v9513_v18  ;;  %v24184_v31 = vsub.f32 %v9510_v46, %v9513_v18  ;;  %v3012_v38 = vsub.f32 %v19301_v50, %v24020_v42  ;;  %v3011_v49 = vsub.f32 %v2987_v9, %v24026_v10 }
 0x2a6   : > { %v24188_v41 = vpop.f32.mrb[15].mxu1  ;;  %19637 = vmatmul.mubr.f32.vlgmr.msra.gmra.mrb[24].mxu1 %v24138_v63  ;;  %v24191_v48 = vsub.f32 %v3018_v12, %v12078_v27  ;;  %v12582_v53 = vand.u32 4294901760, %v12577_v22  ;;  %v12075_v7 = vand.u32 4294901760, %v3017_v35  ;;  %v12576_v17 = vadd.f32 %v3017_v35, %v24014_v13 }
 0x2a7   : > { %25693 = vst [vmem:[#allocation54_spill] sm:$0xff] %v24182_v56  ;;  %19643 = vmatprep.mubr.f32.mxu1 %v23890_v45  ;;  %v3020_v29 = vsub.f32 %v3012_v38, %v24023_v16  ;;  %v3019_v46 = vsub.f32 %v3011_v49, %v24035_v11  ;;  %19679 = vmatmul.mubr.f32.vlgmr.msra.gmra.mrb[26].mxu0 %v24143_v36  ;;  %v6032_v10 = vand.u32 4294901760, %v24140_v59 }
 0x2a8   : > { %v6026_v42 = vsub.f32 %v24147_v43, %v6025_v32  ;;  %v24200_v18 = vsub.f32 %v12577_v22, %v12582_v53  ;;  %v24202_v12 = vpack.c.bf16 %v12078_v27, %v12075_v7  ;;  %v24204_v50 = vsub.f32 %v3017_v35, %v12075_v7  ;;  %19685 = vmatprep.mubr.f32.mxu0 %v24080_v60 }
 0x2a9   : > { %v12579_v9 = vand.u32 4294901760, %v12576_v17  ;;  %v15144_v13 = vand.u32 4294901760, %v3020_v29  ;;  %v15643_v16 = vadd.f32 %v3020_v29, %v24033_v6  ;;  %v15141_v38 = vand.u32 4294901760, %v3019_v46 }
 0x2aa   : > { %25694 = vst [vmem:[#allocation55_spill] sm:$0xff] %v24202_v12  ;;  %v15642_v11 = vadd.f32 %v3019_v46, %v24045_v25  ;;  %v6027_v36 = vand.u32 4294901760, %v6026_v42  ;;  %v6033_v22 = vsub.f32 %v24140_v59, %v6032_v10  ;;  %v20774_v6 = vpack.c.bf16 %v24140_v59, %v24147_v43 }
 0x2ab   : > { %v24209_v49 = vpack.c.bf16 %v12582_v53, %v12579_v9  ;;  %v24211_v56 = vsub.f32 %v12576_v17, %v12579_v9  ;;  %v24214_v27 = vsub.f32 %v3020_v29, %v15144_v13  ;;  %v15648_v35 = vand.u32 4294901760, %v15643_v16 }
 0x2ac   : > { %v24216_v7 = vpack.c.bf16 %v15144_v13, %v15141_v38  ;;  %v24218_v12 = vsub.f32 %v3019_v46, %v15141_v38  ;;  %v15645_v26 = vand.u32 4294901760, %v15642_v11  ;;  %v6034_v39 = vand.u32 4294901760, %v6033_v22 }
 0x2ad   : > { %25695 = vst [vmem:[#allocation56_spill] sm:$0xff] %v24209_v49  ;;  %v6535_v25 = vand.u32 4294901760, %v24158_v5  ;;  %v24223_v53 = vsub.f32 %v15643_v16, %v15648_v35  ;;  %v6542_v17 = vand.u32 4294901760, %v24150_v28  ;;  %v20798_v29 = vpack.c.bf16 %v24150_v28, %v24158_v5 }
 0x2ae   : > { %25696 = vst [vmem:[#allocation57_spill] sm:$0xff] %v24216_v7  ;;  %v24228_v42 = vpack.c.bf16 %v6032_v10, %v6025_v32  ;;  %v24230_v9 = vpack.c.bf16 %v15648_v35, %v15645_v26  ;;  %v24232_v46 = vsub.f32 %v15642_v11, %v15645_v26  ;;  %v20770_v13 = vpack.c.bf16 %v6034_v39, %v6027_v36 }
 0x2af   : > { %v6536_v38 = vsub.f32 %v24158_v5, %v6535_v25  ;;  %v6543_v59 = vsub.f32 %v24150_v28, %v6542_v17  ;;  %v24236_v43 = vpack.c.bf16 %v6542_v17, %v6535_v25  ;;  %v9098_v16 = vand.u32 4294901760, %v24171_v57 }
 0x2b0   : > { %25697 = vst [vmem:[#allocation58_spill] sm:$0xff] %v24230_v9  ;;  %v9105_v22 = vand.u32 4294901760, %v24164_v40  ;;  %20771 = vmatprep.subr.bf16.mxu1 %v20770_v13  ;;  %v9602_v32 = vand.u32 4294901760, %v24184_v31  ;;  %v9609_v10 = vand.u32 4294901760, %v24175_v14  ;;  %v24244_v26 = vpack.c.bf16 %v24164_v40, %v24171_v57 }
 0x2b1   : > { %v6537_v7 = vand.u32 4294901760, %v6536_v38  ;;  %20773 = vmatpush3.bf16.msra.mxu1 %v20770_v13  ;;  %v6544_v39 = vand.u32 4294901760, %v6543_v59  ;;  %v9099_v36 = vsub.f32 %v24171_v57, %v9098_v16  ;;  %v24250_v5 = vpack.c.bf16 %v24175_v14, %v24184_v31 }
 0x2b2   : > { %25698 = vst [vmem:[#allocation59_spill] sm:$0xff] %v24244_v26  ;;  %v9106_v28 = vsub.f32 %v24164_v40, %v9105_v22  ;;  %20775 = vmatprep.subr.bf16.mxu1 %v20774_v6  ;;  %v9603_v11 = vsub.f32 %v24184_v31, %v9602_v32  ;;  %v9610_v35 = vsub.f32 %v24175_v14, %v9609_v10  ;;  %v12164_v57 = vand.u32 4294901760, %v24204_v50 }
 0x2b3   : > { %25699 = vst [vmem:[#allocation60_spill] sm:$0xff] %v24250_v5  ;;  %v24254_v25 = vpack.c.bf16 %v9105_v22, %v9098_v16  ;;  %v24256_v17 = vpack.c.bf16 %v9609_v10, %v9602_v32  ;;  %v20794_v38 = vpack.c.bf16 %v6544_v39, %v6537_v7  ;;  %v9100_v13 = vand.u32 4294901760, %v9099_v36 }
 0x2b4   : > { %v9107_v59 = vand.u32 4294901760, %v9106_v28  ;;  %19644 = vmatmul.mubr.f32.vlgmr.msra.gmra.mrb[24].mxu1 %v24102_v15  ;;  %v9604_v40 = vand.u32 4294901760, %v9603_v11  ;;  %v9611_v9 = vand.u32 4294901760, %v9610_v35  ;;  %v12171_v49 = vand.u32 4294901760, %v24191_v48 }
 0x2b5   : > { %25700 = vst [vmem:[#allocation61_spill] sm:$0xff] %v24254_v25  ;;  %25701 = vst [vmem:[#allocation62_spill] sm:$0xff] %v24256_v17  ;;  %v12668_v5 = vand.u32 4294901760, %v24211_v56  ;;  %20795 = vmatprep.subr.bf16.mxu0 %v20794_v38  ;;  %20777 = vmatpush3.bf16.msra.mxu1 %v20774_v6  ;;  %v12165_v31 = vsub.f32 %v24204_v50, %v12164_v57  ;;  %v12675_v7 = vand.u32 4294901760, %v24200_v18  ;;  %v15230_v6 = vand.u32 4294901760, %v24218_v12 }
 0x2b6   : > { %v24262_v14 = vpack.c.bf16 %v9107_v59, %v9100_v13  ;;  %v24268_v16 = vpack.c.bf16 %v24191_v48, %v24204_v50  ;;  %20797 = vmatpush3.bf16.msra.mxu0 %v20794_v38  ;;  %20779 = vmatprep.subr.bf16.mxu1 %v24145_v23  ;;  %v24271_v22 = vpack.c.bf16 %v9611_v9, %v9604_v40  ;;  %v15237_v13 = vand.u32 4294901760, %v24214_v27 }
 0x2b7   : > { %v12172_v32 = vsub.f32 %v24191_v48, %v12171_v49  ;;  %v12669_v10 = vsub.f32 %v24211_v56, %v12668_v5  ;;  %20799 = vmatprep.subr.bf16.mxu0 %v20798_v29  ;;  %19650 = vmatprep.mubr.f32.mxu1 %v23900_v8  ;;  %v12166_v39 = vand.u32 4294901760, %v12165_v31  ;;  %v12676_v36 = vsub.f32 %v24200_v18, %v12675_v7 }
 0x2b8   : > { %25702 = vst [vmem:[#allocation63_spill] sm:$0xff] %v24262_v14  ;;  %25703 = vst [vmem:[#allocation64_spill] sm:$0xff] %v24268_v16  ;;  %v24280_v50 = vpack.c.bf16 %v24200_v18, %v24211_v56  ;;  %v24282_v28 = vpack.c.bf16 %v12171_v49, %v12164_v57  ;;  %v24284_v35 = vpack.c.bf16 %v12675_v7, %v12668_v5  ;;  %v15734_v59 = vand.u32 4294901760, %v24232_v46 }
 0x2b9   : > { %25704 = vst [vmem:[#allocation65_spill] sm:$0xff] %v24271_v22  ;;  %v12173_v9 = vand.u32 4294901760, %v12172_v32  ;;  %v12670_v11 = vand.u32 4294901760, %v12669_v10  ;;  %v15231_v48 = vsub.f32 %v24218_v12, %v15230_v6  ;;  %19686 = vmatmul.mubr.f32.vlgmr.msra.gmra.mrb[26].mxu0 %v24104_v2  ;;  %v12677_v38 = vand.u32 4294901760, %v12676_v36 }
 0x2ba   : > { %25705 = vst [vmem:[#allocation66_spill] sm:$0xff] %v24280_v50  ;;  %25706 = vst [vmem:[#allocation67_spill] sm:$0xff] %v24282_v28  ;;  %v15741_v40 = vand.u32 4294901760, %v24223_v53  ;;  %20801 = vmatpush3.bf16.msra.mxu0 %v20798_v29  ;;  %19692 = vmatprep.mubr.f32.mxu0 %v24085_v33  ;;  %v24296_v49 = vpack.c.bf16 %v24214_v27, %v24218_v12  ;;  %v24300_v5 = vpack.c.bf16 %v24223_v53, %v24232_v46 }
 0x2bb   : > { %25707 = vst [vmem:[#allocation68_spill] sm:$0xff] %v24284_v35  ;;  %v24292_v56 = vpack.c.bf16 %v12173_v9, %v12166_v39  ;;  %v15232_v18 = vand.u32 4294901760, %v15231_v48  ;;  %20803 = vmatprep.subr.bf16.mxu0 %v24156_v0  ;;  %v24303_v57 = vpack.c.bf16 %v12677_v38, %v12670_v11  ;;  %v15238_v31 = vsub.f32 %v24214_v27, %v15237_v13 }
 0x2bc   : > { %25709 = vst [vmem:[#allocation70_spill] sm:$0xff] %v24296_v49  ;;  %25710 = vst [vmem:[#allocation71_spill] sm:$0xff] %v24300_v5  ;;  %v15735_v29 = vsub.f32 %v24232_v46, %v15734_v59  ;;  %v15742_v7 = vsub.f32 %v24223_v53, %v15741_v40  ;;  %19651 = vmatmul.mubr.f32.vlgmr.msra.gmra.mrb[24].mxu1 %v24107_v37  ;;  %v24309_v32 = vpack.c.bf16 %v15237_v13, %v15230_v6 }
 0x2bd   : > { %25708 = vst [vmem:[#allocation69_spill] sm:$0xff] %v24292_v56  ;;  %25711 = vst [vmem:[#allocation72_spill] sm:$0xff] %v24303_v57  ;;  %v24311_v12 = vpack.c.bf16 %v15741_v40, %v15734_v59  ;;  %20781 = vmatpush3.bf16.msra.mxu1 %v24145_v23  ;;  %19657 = vmatprep.mubr.f32.mxu1 %v23910_v4  ;;  %v15239_v10 = vand.u32 4294901760, %v15238_v31 }
 0x2be   : > { %25712 = vst [vmem:[#allocation73_spill] sm:$0xff] %v24309_v32  ;;  %v15736_v39 = vand.u32 4294901760, %v15735_v29  ;;  %v15743_v36 = vand.u32 4294901760, %v15742_v7  ;;  %20783 = vmatprep.subr.bf16.mxu1 %v24228_v42 }
 0x2bf   : > { %25713 = vst [vmem:[#allocation74_spill] sm:$0xff] %v24311_v12  ;;  %v24316_v27 = vpack.c.bf16 %v15239_v10, %v15232_v18 }
 0x2c0   : > { %v24318_v46 = vpack.c.bf16 %v15743_v36, %v15736_v39 }
 0x2c1   : > { %25714 = vst [vmem:[#allocation75_spill] sm:$0xff] %v24316_v27  ;;  %19693 = vmatmul.mubr.f32.vlgmr.msra.gmra.mrb[26].mxu0 %v24110_v61 }
 0x2c2   : > { %25715 = vst [vmem:[#allocation76_spill] sm:$0xff] %v24318_v46  ;;  %20805 = vmatpush3.bf16.msra.mxu0 %v24156_v0  ;;  %19699 = vmatprep.mubr.f32.mxu0 %v24089_v44 }
 0x2c3   : > { %20807 = vmatprep.subr.bf16.mxu0 %v24236_v43 }
 0x2c4   : > { %19658 = vmatmul.mubr.f32.vlgmr.msra.gmra.mrb[24].mxu1 %v24113_v34 }
 0x2c5   : > { %20785 = vmatpush3.bf16.msra.mxu1 %v24228_v42  ;;  %19664 = vmatprep.mubr.f32.mxu1 %v23890_v45 }
 0x2c6   : > { %20787 = vmatprep.subr.bf16.mxu1 %v24145_v23 }
 0x2c9   : > { %19700 = vmatmul.mubr.f32.vlgmr.msra.gmra.mrb[26].mxu0 %v24116_v3 }
 0x2ca   : > { %20809 = vmatpush3.bf16.msra.mxu0 %v24236_v43  ;;  %19706 = vmatprep.mubr.f32.mxu0 %v24080_v60 }
 0x2cb   : > { %20811 = vmatprep.subr.bf16.mxu0 %v24156_v0 }
 0x2cc   : > { %19665 = vmatmul.mubr.f32.vlgmr.msra.gmra.mrb[24].mxu1 %v24102_v15 }
 0x2cd   : > { %20789 = vmatpush3.bf16.msra.mxu1 %v24145_v23  ;;  %19671 = vmatprep.mubr.f32.mxu1 %v23890_v45 }
 0x2d1   : > { %19707 = vmatmul.mubr.f32.vlgmr.msra.gmra.mrb[26].mxu0 %v24104_v2 }
 0x2d2   : > { %20813 = vmatpush3.bf16.msra.mxu0 %v24156_v0  ;;  %19713 = vmatprep.mubr.f32.mxu0 %v24080_v60 }
 0x2d4   : > { %19672 = vmatmul.mubr.f32.vlgmr.msra.gmra.mrb[24].mxu1 %v24102_v15 }
 0x2d5   : > { %19720 = vmatprep.mubr.f32.mxu1 %v23923_v54 }
 0x2d9   : > { %19714 = vmatmul.mubr.f32.vlgmr.msra.gmra.mrb[26].mxu0 %v24104_v2 }
 0x2da   : > { %19762 = vmatprep.mubr.f32.mxu0 %v23927_v58 }
 0x2f7   : > { %v19484_v53 = vpop.f32.mrb[16].mxu0 }
 0x2f8   : > { %v5398_v42 = vadd.f32 %v19484_v53, %v24119_v1  ;;  %v5406_v23 = vsub.f32 %v24119_v1, %v19484_v53  ;;  %v4559_v6 = vpop.f32.mrb[17].mxu0 }
 0x2f9   : > { %v19580_v43 = vpop.f32.mrb[16].mxu1  ;;  %v5397_v9 = vadd.f32 %v4559_v6, %v24122_v51  ;;  %v5405_v0 = vsub.f32 %v24122_v51, %v4559_v6 }
 0x2fa   : > { %v5351_v11 = vpop.f32.mrb[17].mxu1  ;;  %v6980_v48 = vand.u32 4294901760, %v5398_v42  ;;  %v5414_v38 = vsub.f32 %v5406_v23, %v19580_v43 }
 0x2fb   : > { %v6977_v13 = vand.u32 4294901760, %v5397_v9  ;;  %v5413_v59 = vsub.f32 %v5405_v0, %v5351_v11  ;;  %v19487_v40 = vpop.f32.mrb[18].mxu0 }
 0x2fc   : > { %v24346_v18 = vsub.f32 %v5398_v42, %v6980_v48  ;;  %v7482_v31 = vand.u32 4294901760, %v5414_v38  ;;  %v7981_v29 = vsub.f32 %v5398_v42, %v5414_v38  ;;  %v5400_v7 = vadd.f32 %v19487_v40, %v24132_v47  ;;  %v4571_v1 = vpop.f32.mrb[19].mxu0 }
 0x2fd   : > { %v19583_v10 = vpop.f32.mrb[18].mxu1  ;;  %v24349_v39 = vpack.c.bf16 %v6980_v48, %v6977_v13  ;;  %v24351_v36 = vsub.f32 %v5397_v9, %v6977_v13  ;;  %v7479_v53 = vand.u32 4294901760, %v5413_v59  ;;  %v7980_v51 = vsub.f32 %v5397_v9, %v5413_v59 }
 0x2fe   : > { %v5363_v6 = vpop.f32.mrb[19].mxu1  ;;  %v24353_v12 = vsub.f32 %v5414_v38, %v7482_v31  ;;  %v7986_v23 = vand.u32 4294901760, %v7981_v29  ;;  %v5408_v43 = vsub.f32 %v24132_v47, %v19487_v40  ;;  %v10046_v0 = vand.u32 4294901760, %v5400_v7 }
 0x2ff   : > { %v24356_v11 = vpack.c.bf16 %v7482_v31, %v7479_v53  ;;  %v24358_v42 = vsub.f32 %v5413_v59, %v7479_v53  ;;  %v7983_v32 = vand.u32 4294901760, %v7980_v51  ;;  %v5399_v5 = vadd.f32 %v4571_v1, %v24136_v52  ;;  %v19490_v48 = vpop.f32.mrb[20].mxu0  ;;  %20815 = vmatprep.subr.bf16.mxu1 %v24349_v39 }
 0x300   : > { %v24362_v13 = vsub.f32 %v7981_v29, %v7986_v23  ;;  %v24364_v9 = vsub.f32 %v5400_v7, %v10046_v0  ;;  %v5416_v38 = vsub.f32 %v5408_v43, %v19583_v10  ;;  %v5407_v49 = vsub.f32 %v24136_v52, %v4571_v1  ;;  %v4583_v47 = vpop.f32.mrb[21].mxu0  ;;  %20817 = vmatpush3.bf16.msra.mxu1 %v24349_v39 }
 0x301   : > { %v19586_v46 = vpop.f32.mrb[20].mxu1  ;;  %v24368_v40 = vpack.c.bf16 %v7986_v23, %v7983_v32  ;;  %v24370_v59 = vsub.f32 %v7980_v51, %v7983_v32  ;;  %v10043_v31 = vand.u32 4294901760, %v5399_v5  ;;  %v5402_v53 = vadd.f32 %v19490_v48, %v24154_v21  ;;  %20839 = vmatprep.subr.bf16.mxu0 %v24356_v11 }
 0x302   : > { %v5375_v27 = vpop.f32.mrb[21].mxu1  ;;  %v10548_v29 = vand.u32 4294901760, %v5416_v38  ;;  %v11047_v35 = vsub.f32 %v5400_v7, %v5416_v38  ;;  %v5415_v28 = vsub.f32 %v5407_v49, %v5363_v6  ;;  %v5410_v10 = vsub.f32 %v24154_v21, %v19490_v48  ;;  %20841 = vmatpush3.bf16.msra.mxu0 %v24356_v11 }
 0x303   : > { %v24376_v52 = vpack.c.bf16 %v10046_v0, %v10043_v31  ;;  %v24378_v1 = vsub.f32 %v5399_v5, %v10043_v31  ;;  %v13112_v23 = vand.u32 4294901760, %v5402_v53  ;;  %v5401_v32 = vadd.f32 %v4583_v47, %v24161_v55  ;;  %v19493_v51 = vpop.f32.mrb[22].mxu0  ;;  %19721 = vmatmul.mubr.f32.vlgmr.msra.gmra.mrb[26].mxu1 %v23995_v19 }
 0x304   : > { %v24382_v43 = vsub.f32 %v5416_v38, %v10548_v29  ;;  %v11052_v50 = vand.u32 4294901760, %v11047_v35  ;;  %v10545_v16 = vand.u32 4294901760, %v5415_v28  ;;  %v11046_v7 = vsub.f32 %v5399_v5, %v5415_v28  ;;  %v4595_v6 = vpop.f32.mrb[23].mxu0  ;;  %19727 = vmatprep.mubr.f32.mxu1 %v23887_v20 }
 0x305   : > { %25716 = vst [vmem:[#allocation77_spill] sm:$0xff] %v24376_v52  ;;  %v19589_v49 = vpop.f32.mrb[22].mxu1  ;;  %v24385_v21 = vsub.f32 %v5402_v53, %v13112_v23  ;;  %v5418_v0 = vsub.f32 %v5410_v10, %v19586_v46  ;;  %v5409_v48 = vsub.f32 %v24161_v55, %v4583_v47  ;;  %v13109_v31 = vand.u32 4294901760, %v5401_v32  ;;  %19763 = vmatmul.mubr.f32.vlgmr.msra.gmra.mrb[28].mxu0 %v24138_v63 }
 0x306   : > { %v5387_v57 = vpop.f32.mrb[23].mxu1  ;;  %v24389_v56 = vsub.f32 %v11047_v35, %v11052_v50  ;;  %v24391_v38 = vpack.c.bf16 %v10548_v29, %v10545_v16  ;;  %v24393_v52 = vsub.f32 %v5415_v28, %v10545_v16  ;;  %v11049_v5 = vand.u32 4294901760, %v11046_v7  ;;  %19769 = vmatprep.mubr.f32.mxu0 %v23890_v45 }
 0x307   : > { %v13614_v17 = vand.u32 4294901760, %v5418_v0  ;;  %v14113_v25 = vsub.f32 %v5402_v53, %v5418_v0  ;;  %v24396_v26 = vpack.c.bf16 %v13112_v23, %v13109_v31  ;;  %v24398_v46 = vsub.f32 %v5401_v32, %v13109_v31 }
 0x308   : > { %25717 = vst [vmem:[#allocation78_spill] sm:$0xff] %v24391_v38  ;;  %v24400_v55 = vpack.c.bf16 %v11052_v50, %v11049_v5  ;;  %v24402_v47 = vsub.f32 %v11046_v7, %v11049_v5  ;;  %v5417_v10 = vsub.f32 %v5409_v48, %v5375_v27  ;;  %v5404_v35 = vadd.f32 %v19493_v51, %v24179_v30 }
 0x309   : > { %25718 = vst [vmem:[#allocation79_spill] sm:$0xff] %v24396_v26  ;;  %v24405_v29 = vsub.f32 %v5418_v0, %v13614_v17  ;;  %v14118_v16 = vand.u32 4294901760, %v14113_v25  ;;  %v5412_v28 = vsub.f32 %v24179_v30, %v19493_v51  ;;  %v5403_v38 = vadd.f32 %v4595_v6, %v24188_v41 }
 0x30a   : > { %25719 = vst [vmem:[#allocation80_spill] sm:$0xff] %v24400_v55  ;;  %v13611_v63 = vand.u32 4294901760, %v5417_v10  ;;  %v14112_v53 = vsub.f32 %v5401_v32, %v5417_v10  ;;  %v16178_v23 = vand.u32 4294901760, %v5404_v35  ;;  %v5411_v31 = vsub.f32 %v24188_v41, %v4595_v6 }
 0x30b   : > { %v24410_v26 = vsub.f32 %v14113_v25, %v14118_v16  ;;  %v5420_v50 = vsub.f32 %v5412_v28, %v19589_v49  ;;  %v16175_v7 = vand.u32 4294901760, %v5403_v38  ;;  %v7066_v27 = vand.u32 4294901760, %v24351_v36 }
 0x30c   : > { %v24413_v48 = vpack.c.bf16 %v13614_v17, %v13611_v63  ;;  %v24415_v0 = vsub.f32 %v5417_v10, %v13611_v63  ;;  %v14115_v5 = vand.u32 4294901760, %v14112_v53  ;;  %v24417_v55 = vsub.f32 %v5404_v35, %v16178_v23 }
 0x30d   : > { %v16680_v30 = vand.u32 4294901760, %v5420_v50  ;;  %v17179_v51 = vsub.f32 %v5404_v35, %v5420_v50  ;;  %v24419_v22 = vpack.c.bf16 %v16178_v23, %v16175_v7  ;;  %v24421_v32 = vsub.f32 %v5403_v38, %v16175_v7 }
 0x30e   : > { %25720 = vst [vmem:[#allocation81_spill] sm:$0xff] %v24413_v48  ;;  %v24423_v41 = vpack.c.bf16 %v14118_v16, %v14115_v5  ;;  %v24425_v25 = vsub.f32 %v14112_v53, %v14115_v5  ;;  %v5419_v49 = vsub.f32 %v5411_v31, %v5387_v57  ;;  %v7067_v6 = vsub.f32 %v24351_v36, %v7066_v27 }
 0x30f   : > { %25721 = vst [vmem:[#allocation82_spill] sm:$0xff] %v24419_v22  ;;  %v24428_v17 = vsub.f32 %v5420_v50, %v16680_v30  ;;  %v17184_v63 = vand.u32 4294901760, %v17179_v51  ;;  %v7073_v10 = vand.u32 4294901760, %v24346_v18  ;;  %v20822_v28 = vpack.c.bf16 %v24346_v18, %v24351_v36 }
 0x310   : > { %25722 = vst [vmem:[#allocation83_spill] sm:$0xff] %v24423_v41  ;;  %v16677_v35 = vand.u32 4294901760, %v5419_v49  ;;  %v17178_v23 = vsub.f32 %v5403_v38, %v5419_v49  ;;  %v7068_v22 = vand.u32 4294901760, %v7067_v6  ;;  %v7568_v7 = vand.u32 4294901760, %v24358_v42 }
 0x311   : > { %v24434_v16 = vsub.f32 %v17179_v51, %v17184_v63  ;;  %v7074_v53 = vsub.f32 %v24346_v18, %v7073_v10  ;;  %v7575_v57 = vand.u32 4294901760, %v24353_v12  ;;  %v20846_v31 = vpack.c.bf16 %v24353_v12, %v24358_v42 }
 0x312   : > { %v24440_v50 = vpack.c.bf16 %v16680_v30, %v16677_v35  ;;  %v24442_v5 = vsub.f32 %v5419_v49, %v16677_v35  ;;  %v17181_v41 = vand.u32 4294901760, %v17178_v23  ;;  %v7569_v36 = vsub.f32 %v24358_v42, %v7568_v7 }
 0x313   : > { %v7075_v38 = vand.u32 4294901760, %v7074_v53  ;;  %v7576_v6 = vsub.f32 %v24353_v12, %v7575_v57  ;;  %v24446_v48 = vpack.c.bf16 %v7073_v10, %v7066_v27  ;;  %v24448_v51 = vpack.c.bf16 %v7575_v57, %v7568_v7 }
 0x314   : > { %25723 = vst [vmem:[#allocation84_spill] sm:$0xff] %v24440_v50  ;;  %v24450_v18 = vpack.c.bf16 %v17184_v63, %v17181_v41  ;;  %v24452_v14 = vsub.f32 %v17178_v23, %v17181_v41  ;;  %v7570_v58 = vand.u32 4294901760, %v7569_v36  ;;  %v8072_v30 = vand.u32 4294901760, %v24370_v59 }
 0x315   : > { %v20818_v50 = vpack.c.bf16 %v7075_v38, %v7068_v22  ;;  %v7577_v49 = vand.u32 4294901760, %v7576_v6  ;;  %v8079_v35 = vand.u32 4294901760, %v24362_v13  ;;  %v24458_v42 = vpack.c.bf16 %v24362_v13, %v24370_v59 }
 0x316   : > { %25724 = vst [vmem:[#allocation85_spill] sm:$0xff] %v24450_v18  ;;  %v8073_v12 = vsub.f32 %v24370_v59, %v8072_v30  ;;  %v10132_v27 = vand.u32 4294901760, %v24378_v1  ;;  %v10139_v63 = vand.u32 4294901760, %v24364_v9  ;;  %v10634_v41 = vand.u32 4294901760, %v24393_v52 }
 0x317   : > { %20819 = vmatprep.subr.bf16.mxu1 %v20818_v50  ;;  %v20842_v10 = vpack.c.bf16 %v7577_v49, %v7570_v58  ;;  %v8080_v23 = vsub.f32 %v24362_v13, %v8079_v35  ;;  %v24465_v22 = vpack.c.bf16 %v8079_v35, %v8072_v30  ;;  %v10641_v7 = vand.u32 4294901760, %v24382_v43 }
 0x318   : > { %20821 = vmatpush3.bf16.msra.mxu1 %v20818_v50  ;;  %v8074_v53 = vand.u32 4294901760, %v8073_v12  ;;  %v10133_v57 = vsub.f32 %v24378_v1, %v10132_v27  ;;  %v10140_v59 = vsub.f32 %v24364_v9, %v10139_v63  ;;  %v10635_v36 = vsub.f32 %v24393_v52, %v10634_v41 }
 0x319   : > { %20823 = vmatprep.subr.bf16.mxu1 %v20822_v28  ;;  %20843 = vmatprep.subr.bf16.mxu0 %v20842_v10  ;;  %v8081_v38 = vand.u32 4294901760, %v8080_v23  ;;  %v10642_v6 = vsub.f32 %v24382_v43, %v10641_v7  ;;  %v24474_v58 = vpack.c.bf16 %v24364_v9, %v24378_v1  ;;  %v24478_v13 = vpack.c.bf16 %v24382_v43, %v24393_v52 }
 0x31a   : > { %20845 = vmatpush3.bf16.msra.mxu0 %v20842_v10  ;;  %v10134_v50 = vand.u32 4294901760, %v10133_v57  ;;  %v10141_v30 = vand.u32 4294901760, %v10140_v59  ;;  %v10636_v49 = vand.u32 4294901760, %v10635_v36  ;;  %v24480_v35 = vpack.c.bf16 %v10139_v63, %v10132_v27 }
 0x31b   : > { %19728 = vmatmul.mubr.f32.vlgmr.msra.gmra.mrb[26].mxu1 %v23930_v24  ;;  %20847 = vmatprep.subr.bf16.mxu0 %v20846_v31  ;;  %v24483_v12 = vpack.c.bf16 %v8081_v38, %v8074_v53  ;;  %v10643_v23 = vand.u32 4294901760, %v10642_v6  ;;  %v24485_v18 = vpack.c.bf16 %v10641_v7, %v10634_v41  ;;  %v11138_v9 = vand.u32 4294901760, %v24402_v47 }
 0x31c   : > { %20825 = vmatpush3.bf16.msra.mxu1 %v20822_v28  ;;  %19734 = vmatprep.mubr.f32.mxu1 %v23896_v62  ;;  %v24489_v52 = vpack.c.bf16 %v10141_v30, %v10134_v50  ;;  %v11145_v1 = vand.u32 4294901760, %v24389_v56  ;;  %v24494_v43 = vpack.c.bf16 %v24389_v56, %v24402_v47  ;;  %v13198_v27 = vand.u32 4294901760, %v24398_v46 }
 0x31d   : > { %20827 = vmatprep.subr.bf16.mxu1 %v24349_v39  ;;  %19770 = vmatmul.mubr.f32.vlgmr.msra.gmra.mrb[28].mxu0 %v24102_v15  ;;  %v24499_v63 = vpack.c.bf16 %v10643_v23, %v10636_v49  ;;  %v11139_v28 = vsub.f32 %v24402_v47, %v11138_v9  ;;  %v13205_v41 = vand.u32 4294901760, %v24385_v21  ;;  %v13700_v10 = vand.u32 4294901760, %v24415_v0 }
 0x31e   : > { %20849 = vmatpush3.bf16.msra.mxu0 %v20846_v31  ;;  %19776 = vmatprep.mubr.f32.mxu0 %v23900_v8  ;;  %v11146_v7 = vsub.f32 %v24389_v56, %v11145_v1  ;;  %v24506_v53 = vpack.c.bf16 %v11145_v1, %v11138_v9  ;;  %v13199_v57 = vsub.f32 %v24398_v46, %v13198_v27  ;;  %v13707_v59 = vand.u32 4294901760, %v24405_v29 }
 0x31f   : > { %20851 = vmatprep.subr.bf16.mxu0 %v24356_v11  ;;  %v11140_v36 = vand.u32 4294901760, %v11139_v28  ;;  %v13206_v47 = vsub.f32 %v24385_v21, %v13205_v41  ;;  %v13701_v38 = vsub.f32 %v24415_v0, %v13700_v10  ;;  %v24515_v31 = vpack.c.bf16 %v24385_v21, %v24398_v46 }
 0x320   : > { %25725 = vst [vmem:[#allocation86_spill] sm:$0xff] %v24506_v53  ;;  %v11147_v6 = vand.u32 4294901760, %v11146_v7  ;;  %v13200_v50 = vand.u32 4294901760, %v13199_v57  ;;  %v13708_v56 = vsub.f32 %v24405_v29, %v13707_v59  ;;  %v24520_v30 = vpack.c.bf16 %v24405_v29, %v24415_v0  ;;  %v25728_v7 = vld [vmem:[#allocation34_spill] sm:$0xff] }
 0x321   : > { %v13207_v49 = vand.u32 4294901760, %v13206_v47  ;;  %v13702_v23 = vand.u32 4294901760, %v13701_v38  ;;  %v24522_v9 = vpack.c.bf16 %v13205_v41, %v13198_v27  ;;  %v24524_v1 = vpack.c.bf16 %v13707_v59, %v13700_v10  ;;  %v25730_v41 = vld [vmem:[#allocation36_spill] sm:$0xff] }
 0x322   : > { %v24526_v28 = vpack.c.bf16 %v11147_v6, %v11140_v36  ;;  %v13709_v53 = vand.u32 4294901760, %v13708_v56  ;;  %v14204_v21 = vand.u32 4294901760, %v24425_v25  ;;  %v14211_v46 = vand.u32 4294901760, %v24410_v26 }
 0x323   : > { %25726 = vst [vmem:[#allocation87_spill] sm:$0xff] %v24522_v9  ;;  %25727 = vst [vmem:[#allocation88_spill] sm:$0xff] %v24524_v1  ;;  %19735 = vmatmul.mubr.f32.vlgmr.msra.gmra.mrb[26].mxu1 %v25728_v7  ;;  %v24531_v57 = vpack.c.bf16 %v13207_v49, %v13200_v50  ;;  %v24535_v29 = vpack.c.bf16 %v24410_v26, %v24425_v25  ;;  %v16264_v0 = vand.u32 4294901760, %v24421_v32  ;;  %v16271_v27 = vand.u32 4294901760, %v24417_v55 }
 0x324   : > { %20829 = vmatpush3.bf16.msra.mxu1 %v24349_v39  ;;  %19741 = vmatprep.mubr.f32.mxu1 %v25730_v41  ;;  %v24541_v10 = vpack.c.bf16 %v13709_v53, %v13702_v23  ;;  %v14205_v59 = vsub.f32 %v24425_v25, %v14204_v21  ;;  %v14212_v36 = vsub.f32 %v24410_v26, %v14211_v46  ;;  %v16766_v47 = vand.u32 4294901760, %v24442_v5 }
 0x325   : > { %25729 = vst [vmem:[#allocation34_spill] sm:$0xff] %v24535_v29  ;;  %20831 = vmatprep.subr.bf16.mxu1 %v24446_v48  ;;  %19777 = vmatmul.mubr.f32.vlgmr.msra.gmra.mrb[28].mxu0 %v24107_v37  ;;  %v24548_v38 = vpack.c.bf16 %v14211_v46, %v14204_v21  ;;  %v16265_v6 = vsub.f32 %v24421_v32, %v16264_v0  ;;  %v16773_v56 = vand.u32 4294901760, %v24428_v17 }
 0x326   : > { %v16272_v50 = vsub.f32 %v24417_v55, %v16271_v27  ;;  %20853 = vmatpush3.bf16.msra.mxu0 %v24356_v11  ;;  %19783 = vmatprep.mubr.f32.mxu0 %v23910_v4  ;;  %v14206_v25 = vand.u32 4294901760, %v14205_v59  ;;  %v14213_v26 = vand.u32 4294901760, %v14212_v36  ;;  %v16767_v53 = vsub.f32 %v24442_v5, %v16766_v47 }
 0x327   : > { %25731 = vst [vmem:[#allocation36_spill] sm:$0xff] %v24548_v38  ;;  %v24558_v49 = vpack.c.bf16 %v24417_v55, %v24421_v32  ;;  %20855 = vmatprep.subr.bf16.mxu0 %v24448_v51  ;;  %v16266_v23 = vand.u32 4294901760, %v16265_v6  ;;  %v16774_v46 = vsub.f32 %v24428_v17, %v16773_v56  ;;  %v24564_v38 = vpack.c.bf16 %v24428_v17, %v24442_v5  ;;  %v25733_v17 = vld [vmem:[#allocation35_spill] sm:$0xff] }
 0x328   : > { %v16273_v21 = vand.u32 4294901760, %v16272_v50  ;;  %v24566_v29 = vpack.c.bf16 %v14213_v26, %v14206_v25  ;;  %v16768_v59 = vand.u32 4294901760, %v16767_v53  ;;  %v24568_v36 = vpack.c.bf16 %v16271_v27, %v16264_v0  ;;  %v25739_v53 = vld [vmem:[#allocation42_spill] sm:$0xff] }
 0x329   : > { %v24570_v1 = vpack.c.bf16 %v16773_v56, %v16766_v47  ;;  %v16775_v55 = vand.u32 4294901760, %v16774_v46  ;;  %v17270_v32 = vand.u32 4294901760, %v24452_v14  ;;  %v17277_v6 = vand.u32 4294901760, %v24434_v16  ;;  %v25746_v46 = vld [vmem:[#allocation51_spill] sm:$0xff] }
 0x32a   : > { %v24572_v9 = vpack.c.bf16 %v16273_v21, %v16266_v23  ;;  %v24578_v50 = vpack.c.bf16 %v24434_v16, %v24452_v14  ;;  %v25743_v23 = vld [vmem:[#allocation37_spill] sm:$0xff]  ;;  %v25744_v21 = vld [vmem:[#allocation63_spill] sm:$0xff] }
 0x32b   : > { %19742 = vmatmul.mubr.f32.vlgmr.msra.gmra.mrb[26].mxu1 %v25733_v17  ;;  %v24581_v5 = vpack.c.bf16 %v16775_v55, %v16768_v59  ;;  %v17271_v0 = vsub.f32 %v24452_v14, %v17270_v32  ;;  %v17278_v27 = vsub.f32 %v24434_v16, %v17277_v6  ;;  %v24585_v47 = vpack.c.bf16 %v17277_v6, %v17270_v32  ;;  %v25736_v16 = vld [vmem:[#allocation50_spill] sm:$0xff]  ;;  %v25747_v59 = vld [vmem:[#allocation59_spill] sm:$0xff]  ;;  %v25748_v55 = vld [vmem:[#allocation60_spill] sm:$0xff] }
 0x32c   : > { %25732 = vst [vmem:[#allocation89_spill] sm:$0xff] %v24578_v50  ;;  %20833 = vmatpush3.bf16.msra.mxu1 %v24446_v48  ;;  %19748 = vmatprep.mubr.f32.mxu1 %v23887_v20  ;;  %v25735_v48 = vld [vmem:[#allocation41_spill] sm:$0xff]  ;;  %v25750_v6 = vld [vmem:[#allocation62_spill] sm:$0xff] }
 0x32d   : > { %25734 = vst [vmem:[#allocation35_spill] sm:$0xff] %v24585_v47  ;;  %20835 = vmatprep.subr.bf16.mxu1 %v24349_v39  ;;  %19784 = vmatmul.mubr.f32.vlgmr.msra.gmra.mrb[28].mxu0 %v24113_v34  ;;  %v17272_v56 = vand.u32 4294901760, %v17271_v0  ;;  %v17279_v25 = vand.u32 4294901760, %v17278_v27  ;;  %v25749_v32 = vld [vmem:[#allocation61_spill] sm:$0xff]  ;;  %v25752_v27 = vld [vmem:[#allocation78_spill] sm:$0xff] }
 0x32e   : > { %20857 = vmatpush3.bf16.msra.mxu0 %v24448_v51  ;;  %19790 = vmatprep.mubr.f32.mxu0 %v23890_v45  ;;  %v25751_v0 = vld [vmem:[#allocation77_spill] sm:$0xff] }
 0x32f   : > { %20859 = vmatprep.subr.bf16.mxu0 %v24356_v11  ;;  %v24594_v14 = vpack.c.bf16 %v17279_v25, %v17272_v56 }
 0x333   : > { %19749 = vmatmul.mubr.f32.vlgmr.msra.gmra.mrb[26].mxu1 %v23930_v24 }
 0x334   : > { %20837 = vmatpush3.bf16.msra.mxu1 %v24349_v39  ;;  %19755 = vmatprep.mubr.f32.mxu1 %v23887_v20  ;;  %v25737_v39 = vld [vmem:[#allocation44_spill] sm:$0xff] }
 0x335   : > { %20863 = vmatprep.subr.bf16.mxu1 %v24368_v40  ;;  %19791 = vmatmul.mubr.f32.vlgmr.msra.gmra.mrb[28].mxu0 %v24102_v15 }
 0x336   : > { %20861 = vmatpush3.bf16.msra.mxu0 %v24356_v11  ;;  %19797 = vmatprep.mubr.f32.mxu0 %v23890_v45  ;;  %v25738_v11 = vld [vmem:[#allocation52_spill] sm:$0xff] }
 0x337   : > { %20887 = vmatprep.subr.bf16.mxu0 %v25735_v48 }
 0x33b   : > { %19756 = vmatmul.mubr.f32.vlgmr.msra.gmra.mrb[26].mxu1 %v23930_v24 }
 0x33c   : > { %20865 = vmatpush3.bf16.msra.mxu1 %v24368_v40  ;;  %19804 = vmatprep.mubr.f32.mxu1 %v25736_v16 }
 0x33d   : > { %20867 = vmatprep.subr.bf16.mxu1 %v24483_v12  ;;  %19798 = vmatmul.mubr.f32.vlgmr.msra.gmra.mrb[28].mxu0 %v24102_v15 }
 0x33e   : > { %20889 = vmatpush3.bf16.msra.mxu0 %v25735_v48  ;;  %19846 = vmatprep.mubr.f32.mxu0 %v23923_v54 }
 0x33f   : > { %20891 = vmatprep.subr.bf16.mxu0 %v25737_v39  ;;  %19805 = vmatmul.mubr.f32.vlgmr.msra.gmra.mrb[28].mxu1 %v25738_v11 }
 0x340   : > { %v24613_v51 = vpop.f32.mrb[24].mxu0  ;;  %20869 = vmatpush3.bf16.msra.mxu1 %v24483_v12  ;;  %19811 = vmatprep.mubr.f32.mxu1 %v24080_v60  ;;  %v25741_v12 = vld [vmem:[#allocation53_spill] sm:$0xff] }
 0x341   : > { %v24617_v26 = vpop.f32.mrb[25].mxu0  ;;  %20871 = vmatprep.subr.bf16.mxu1 %v24458_v42  ;;  %19847 = vmatmul.mubr.f32.vlgmr.msra.gmra.mrb[30].mxu0 %v23995_v19 }
 0x342   : > { %20893 = vmatpush3.bf16.msra.mxu0 %v25737_v39  ;;  %19853 = vmatprep.mubr.f32.mxu0 %v23887_v20 }
 0x343   : > { %20895 = vmatprep.subr.bf16.mxu0 %v25739_v53 }
 0x347   : > { %19812 = vmatmul.mubr.f32.vlgmr.msra.gmra.mrb[28].mxu1 %v24104_v2 }
 0x348   : > { %20873 = vmatpush3.bf16.msra.mxu1 %v24458_v42  ;;  %19818 = vmatprep.mubr.f32.mxu1 %v24085_v33  ;;  %v25740_v42 = vld [vmem:[#allocation39_spill] sm:$0xff] }
 0x349   : > { %20875 = vmatprep.subr.bf16.mxu1 %v24368_v40  ;;  %19854 = vmatmul.mubr.f32.vlgmr.msra.gmra.mrb[30].mxu0 %v23930_v24 }
 0x34a   : > { %20897 = vmatpush3.bf16.msra.mxu0 %v25739_v53  ;;  %19860 = vmatprep.mubr.f32.mxu0 %v23896_v62  ;;  %v24744_v53 = vld [vmem:[%s23203_s12] ss:$0 sm:$0xff] }
 0x34b   : > { %20899 = vmatprep.subr.bf16.mxu0 %v25735_v48 }
 0x34f   : > { %19819 = vmatmul.mubr.f32.vlgmr.msra.gmra.mrb[28].mxu1 %v24110_v61 }
 0x350   : > { %20877 = vmatpush3.bf16.msra.mxu1 %v24368_v40  ;;  %19825 = vmatprep.mubr.f32.mxu1 %v24089_v44 }
 0x351   : > { %20879 = vmatprep.subr.bf16.mxu1 %v24465_v22  ;;  %19861 = vmatmul.mubr.f32.vlgmr.msra.gmra.mrb[30].mxu0 %v25728_v7 }
 0x352   : > { %20901 = vmatpush3.bf16.msra.mxu0 %v25735_v48  ;;  %19867 = vmatprep.mubr.f32.mxu0 %v25730_v41 }
 0x353   : > { %20903 = vmatprep.subr.bf16.mxu0 %v25740_v42 }
 0x357   : > { %19826 = vmatmul.mubr.f32.vlgmr.msra.gmra.mrb[28].mxu1 %v24116_v3 }
 0x358   : > { %20881 = vmatpush3.bf16.msra.mxu1 %v24465_v22  ;;  %19832 = vmatprep.mubr.f32.mxu1 %v24080_v60  ;;  %v25742_v22 = vld [vmem:[#allocation54_spill] sm:$0xff] }
 0x359   : > { %20883 = vmatprep.subr.bf16.mxu1 %v24368_v40  ;;  %19868 = vmatmul.mubr.f32.vlgmr.msra.gmra.mrb[30].mxu0 %v25733_v17 }
 0x35a   : > { %20905 = vmatpush3.bf16.msra.mxu0 %v25740_v42  ;;  %19874 = vmatprep.mubr.f32.mxu0 %v23887_v20 }
 0x35b   : > { %20907 = vmatprep.subr.bf16.mxu0 %v25735_v48 }
 0x35f   : > { %19833 = vmatmul.mubr.f32.vlgmr.msra.gmra.mrb[28].mxu1 %v24104_v2 }
 0x360   : > { %20885 = vmatpush3.bf16.msra.mxu1 %v24368_v40  ;;  %19839 = vmatprep.mubr.f32.mxu1 %v24080_v60  ;;  %v25745_v40 = vld [vmem:[#allocation65_spill] sm:$0xff] }
 0x361   : > { %20911 = vmatprep.subr.bf16.mxu1 %v25741_v12  ;;  %19875 = vmatmul.mubr.f32.vlgmr.msra.gmra.mrb[30].mxu0 %v23930_v24 }
 0x362   : > { %20909 = vmatpush3.bf16.msra.mxu0 %v25735_v48  ;;  %19881 = vmatprep.mubr.f32.mxu0 %v23887_v20  ;;  %v21955_v48 = vld [vmem:[%s22746_s8 + $0x8] sm:$0xff] }
 0x363   : > { %20935 = vmatprep.subr.bf16.mxu0 %v25742_v22 }
 0x367   : > { %19840 = vmatmul.mubr.f32.vlgmr.msra.gmra.mrb[28].mxu1 %v24104_v2 }
 0x368   : > { %20913 = vmatpush3.bf16.msra.mxu1 %v25741_v12  ;;  %19888 = vmatprep.mubr.f32.mxu1 %v25743_v23 }
 0x369   : > { %20915 = vmatprep.subr.bf16.mxu1 %v25744_v21  ;;  %19882 = vmatmul.mubr.f32.vlgmr.msra.gmra.mrb[30].mxu0 %v23930_v24 }
 0x36a   : > { %20937 = vmatpush3.bf16.msra.mxu0 %v25742_v22  ;;  %19930 = vmatprep.mubr.f32.mxu0 %v25736_v16 }
 0x36b   : > { %20939 = vmatprep.subr.bf16.mxu0 %v25745_v40  ;;  %19889 = vmatmul.mubr.f32.vlgmr.msra.gmra.mrb[30].mxu1 %v25746_v46 }
 0x36c   : > { %20917 = vmatpush3.bf16.msra.mxu1 %v25744_v21  ;;  %19895 = vmatprep.mubr.f32.mxu1 %v23890_v45 }
 0x36d   : > { %20919 = vmatprep.subr.bf16.mxu1 %v25747_v59  ;;  %19931 = vmatmul.mubr.f32.vlgmr.msra.gmra.mrb[32].mxu0 %v25738_v11 }
 0x36e   : > { %20941 = vmatpush3.bf16.msra.mxu0 %v25745_v40  ;;  %19937 = vmatprep.mubr.f32.mxu0 %v24080_v60 }
 0x36f   : > { %20943 = vmatprep.subr.bf16.mxu0 %v25748_v55 }
 0x373   : > { %19896 = vmatmul.mubr.f32.vlgmr.msra.gmra.mrb[30].mxu1 %v24102_v15 }
 0x374   : > { %20921 = vmatpush3.bf16.msra.mxu1 %v25747_v59  ;;  %19902 = vmatprep.mubr.f32.mxu1 %v23900_v8 }
 0x375   : > { %20923 = vmatprep.subr.bf16.mxu1 %v25741_v12  ;;  %19938 = vmatmul.mubr.f32.vlgmr.msra.gmra.mrb[32].mxu0 %v24104_v2 }
 0x376   : > { %20945 = vmatpush3.bf16.msra.mxu0 %v25748_v55  ;;  %19944 = vmatprep.mubr.f32.mxu0 %v24085_v33 }
 0x377   : > { %20947 = vmatprep.subr.bf16.mxu0 %v25742_v22 }
 0x37b   : > { %19903 = vmatmul.mubr.f32.vlgmr.msra.gmra.mrb[30].mxu1 %v24107_v37 }
 0x37c   : > { %20925 = vmatpush3.bf16.msra.mxu1 %v25741_v12  ;;  %19909 = vmatprep.mubr.f32.mxu1 %v23910_v4 }
 0x37d   : > { %20927 = vmatprep.subr.bf16.mxu1 %v25749_v32  ;;  %19945 = vmatmul.mubr.f32.vlgmr.msra.gmra.mrb[32].mxu0 %v24110_v61 }
 0x37e   : > { %20949 = vmatpush3.bf16.msra.mxu0 %v25742_v22  ;;  %19951 = vmatprep.mubr.f32.mxu0 %v24089_v44 }
 0x37f   : > { %20951 = vmatprep.subr.bf16.mxu0 %v25750_v6 }
 0x383   : > { %19910 = vmatmul.mubr.f32.vlgmr.msra.gmra.mrb[30].mxu1 %v24113_v34 }
 0x384   : > { %20929 = vmatpush3.bf16.msra.mxu1 %v25749_v32  ;;  %19916 = vmatprep.mubr.f32.mxu1 %v23890_v45 }
 0x385   : > { %20931 = vmatprep.subr.bf16.mxu1 %v25741_v12  ;;  %19952 = vmatmul.mubr.f32.vlgmr.msra.gmra.mrb[32].mxu0 %v24116_v3 }
 0x386   : > { %20953 = vmatpush3.bf16.msra.mxu0 %v25750_v6  ;;  %19958 = vmatprep.mubr.f32.mxu0 %v24080_v60 }
 0x387   : > { %20955 = vmatprep.subr.bf16.mxu0 %v25742_v22 }
 0x38b   : > { %19917 = vmatmul.mubr.f32.vlgmr.msra.gmra.mrb[30].mxu1 %v24102_v15 }
 0x38c   : > { %20933 = vmatpush3.bf16.msra.mxu1 %v25741_v12  ;;  %19923 = vmatprep.mubr.f32.mxu1 %v23890_v45  ;;  %v21957_v12 = vld [vmem:[%s22746_s8] sm:$0xff] }
 0x38d   : > { %20959 = vmatprep.subr.bf16.mxu1 %v25751_v0  ;;  %19959 = vmatmul.mubr.f32.vlgmr.msra.gmra.mrb[32].mxu0 %v24104_v2 }
 0x38e   : > { %20957 = vmatpush3.bf16.msra.mxu0 %v25742_v22  ;;  %19965 = vmatprep.mubr.f32.mxu0 %v24080_v60 }
 0x38f   : > { %20983 = vmatprep.subr.bf16.mxu0 %v25752_v27 }
 0x393   : > { %19924 = vmatmul.mubr.f32.vlgmr.msra.gmra.mrb[30].mxu1 %v24102_v15 }
 0x394   : > { %20961 = vmatpush3.bf16.msra.mxu1 %v25751_v0  ;;  %19972 = vmatprep.mubr.f32.mxu1 %v23923_v54 }
 0x395   : > { %20963 = vmatprep.subr.bf16.mxu1 %v24489_v52  ;;  %19966 = vmatmul.mubr.f32.vlgmr.msra.gmra.mrb[32].mxu0 %v24104_v2 }
 0x396   : > { %20985 = vmatpush3.bf16.msra.mxu0 %v25752_v27  ;;  %20014 = vmatprep.mubr.f32.mxu0 %v25743_v23 }
 0x397   : > { %20987 = vmatprep.subr.bf16.mxu0 %v24499_v63  ;;  %19973 = vmatmul.mubr.f32.vlgmr.msra.gmra.mrb[32].mxu1 %v23995_v19 }
 0x398   : > { %20965 = vmatpush3.bf16.msra.mxu1 %v24489_v52  ;;  %19979 = vmatprep.mubr.f32.mxu1 %v23887_v20 }
 0x399   : > { %20967 = vmatprep.subr.bf16.mxu1 %v24474_v58  ;;  %20015 = vmatmul.mubr.f32.vlgmr.msra.gmra.mrb[34].mxu0 %v25746_v46 }
 0x39a   : > { %20989 = vmatpush3.bf16.msra.mxu0 %v24499_v63  ;;  %20021 = vmatprep.mubr.f32.mxu0 %v23890_v45  ;;  %v24729_v63 = vstv %s522_s27  ;;  %s22332_s27 = smov [#allocation13]  }
 0x39b   : > { %20991 = vmatprep.subr.bf16.mxu0 %v24478_v13  ;;  %v6955_v39 = vmul.f32 %v21955_v48, %v24729_v63  ;;  %v6954_v22 = vmul.f32 %v21957_v12, %v24729_v63 }
 0x39f   : > { %19980 = vmatmul.mubr.f32.vlgmr.msra.gmra.mrb[32].mxu1 %v23930_v24 }
 0x3a0   : > { %20969 = vmatpush3.bf16.msra.mxu1 %v24474_v58  ;;  %19986 = vmatprep.mubr.f32.mxu1 %v23896_v62 }
 0x3a1   : > { %20971 = vmatprep.subr.bf16.mxu1 %v25751_v0  ;;  %20022 = vmatmul.mubr.f32.vlgmr.msra.gmra.mrb[34].mxu0 %v24102_v15 }
 0x3a2   : > { %20993 = vmatpush3.bf16.msra.mxu0 %v24478_v13  ;;  %20028 = vmatprep.mubr.f32.mxu0 %v23900_v8  ;;  %v24736_v13 = vstv %s18027_s10  ;;  %s22156_s10 = sshll.u32 %s22332_s27, 4  ;;  %s22157_s10 = int_to_ptr.vmem [resolvable:$false] %s22156_s10 }
 0x3a3   : > { %20995 = vmatprep.subr.bf16.mxu0 %v25752_v27  ;;  %p22159_p1 = scmp.lt.s32.totalorder %s25276_s3, %s22157_s10 }
 0x3a7   : > { %19987 = vmatmul.mubr.f32.vlgmr.msra.gmra.mrb[32].mxu1 %v25728_v7  ;;  %v19673_v52 = vpop.f32.mrb[24].mxu1 }
 0x3a8   : > { %20973 = vmatpush3.bf16.msra.mxu1 %v25751_v0  ;;  %19993 = vmatprep.mubr.f32.mxu1 %v25730_v41  ;;  %v6948_v58 = vsub.f32 %v24613_v51, %v19673_v52  ;;  %v6427_v56 = vpop.f32.mrb[25].mxu1 }
 0x3a9   : > { %20975 = vmatprep.subr.bf16.mxu1 %v24480_v35  ;;  %20029 = vmatmul.mubr.f32.vlgmr.msra.gmra.mrb[34].mxu0 %v24107_v37  ;;  %v6947_v25 = vsub.f32 %v24617_v26, %v6427_v56 }
 0x3aa   : > { %20997 = vmatpush3.bf16.msra.mxu0 %v25752_v27  ;;  %20035 = vmatprep.mubr.f32.mxu0 %v23910_v4  ;;  %v6957_v42 = vmul.f32 %v24744_v53, %v6948_v58 }
 0x3ab   : > { %20999 = vmatprep.subr.bf16.mxu0 %v24485_v18  ;;  %v6956_v21 = vmul.f32 %v24744_v53, %v6947_v25  ;;  %v21959_v25 = vld [vmem:[%s22746_s8 + $0x40] sm:$0xff] }
 0x3ac   : > { %v6960_v40 = vmul.f32 %v24736_v13, %v6957_v42  ;;  %v19715_v59 = vpop.f32.mrb[26].mxu0 }
 0x3ad   : > { %v6950_v55 = vsub.f32 %v19715_v59, %v24613_v51  ;;  %v6959_v32 = vmul.f32 %v24736_v13, %v6956_v21  ;;  %v6937_v6 = vpop.f32.mrb[27].mxu0  ;;  %v25761_v59 = vld [vmem:[#allocation69_spill] sm:$0xff] }
 0x3ae   : > { %v6962_v48 = vadd.f32 %v6960_v40, %v6955_v39  ;;  %v6949_v58 = vsub.f32 %v6937_v6, %v24617_v26  ;;  %v21958_v26 = vld [vmem:[%s22746_s8 + $0x48] sm:$0xff]  ;;  %v25760_v40 = vld [vmem:[#allocation56_spill] sm:$0xff]  ;;  %v25764_v6 = vld [vmem:[#allocation66_spill] sm:$0xff] }
 0x3af   : > { %19994 = vmatmul.mubr.f32.vlgmr.msra.gmra.mrb[32].mxu1 %v25733_v17  ;;  %v6952_v47 = vsub.f32 %v6950_v55, %v19673_v52  ;;  %v6961_v50 = vadd.f32 %v6959_v32, %v6954_v22  ;;  %v6966_v52 = vmul.f32 %v21958_v26, %v24729_v63  ;;  %v25762_v55 = vld [vmem:[#allocation72_spill] sm:$0xff] }
 0x3b0   : > { %20977 = vmatpush3.bf16.msra.mxu1 %v24480_v35  ;;  %20000 = vmatprep.mubr.f32.mxu1 %v23887_v20  ;;  %6964 = vst.msk [vmem:[%s24760_s5 + $0x8] sm:$0xff] %vm636_vm0, %v6962_v48  ;;  %v6951_v51 = vsub.f32 %v6949_v58, %v6427_v56  ;;  %v6965_v56 = vmul.f32 %v21959_v25, %v24729_v63  ;;  %v25763_v32 = vld [vmem:[#allocation64_spill] sm:$0xff]  ;;  %v25765_v48 = vld [vmem:[#allocation67_spill] sm:$0xff] }
 0x3b1   : > { %20979 = vmatprep.subr.bf16.mxu1 %v25751_v0  ;;  %20036 = vmatmul.mubr.f32.vlgmr.msra.gmra.mrb[34].mxu0 %v24113_v34  ;;  %v6968_v35 = vmul.f32 %v24744_v53, %v6952_v47  ;;  %6963 = vst.msk [vmem:[%s24760_s5] sm:$0xff] %vm636_vm0, %v6961_v50  ;;  %v25754_v50 = vld [vmem:[#allocation38_spill] sm:$0xff]  ;;  %v25755_v47 = vld [vmem:[#allocation47_spill] sm:$0xff]  ;;  %v25766_v58 = vld [vmem:[#allocation68_spill] sm:$0xff] }
 0x3b2   : > { %21001 = vmatpush3.bf16.msra.mxu0 %v24485_v18  ;;  %20042 = vmatprep.mubr.f32.mxu0 %v23890_v45  ;;  %v6967_v39 = vmul.f32 %v24744_v53, %v6951_v51  ;;  %v25753_v18 = vld [vmem:[#allocation80_spill] sm:$0xff] }
 0x3b3   : > { %21003 = vmatprep.subr.bf16.mxu0 %v25752_v27  ;;  %v6970_v42 = vmul.f32 %v6968_v35, %v24736_v13 }
 0x3b4   : > { %v6969_v12 = vmul.f32 %v6967_v39, %v24736_v13 }
 0x3b5   : > { %v6972_v22 = vadd.f32 %v6970_v42, %v6966_v52 }
 0x3b6   : > { %v6971_v21 = vadd.f32 %v6969_v12, %v6965_v56  ;;  %v25767_v56 = vld [vmem:[#allocation79_spill] sm:$0xff] }
 0x3b7   : > { %20001 = vmatmul.mubr.f32.vlgmr.msra.gmra.mrb[32].mxu1 %v23930_v24  ;;  %18050 = vst.msk [vmem:[%s24760_s5 + $0x48] sm:$0xff] %vm636_vm0, %v6972_v22  ;;  %v25768_v22 = vld [vmem:[#allocation81_spill] sm:$0xff] }
 0x3b8   : > { %20981 = vmatpush3.bf16.msra.mxu1 %v25751_v0  ;;  %18049 = vst.msk [vmem:[%s24760_s5 + $0x40] sm:$0xff] %vm636_vm0, %v6971_v21  ;;  %20007 = vmatprep.mubr.f32.mxu1 %v23887_v20  ;;  %v25756_v0 = vld [vmem:[#allocation40_spill] sm:$0xff] }
 0x3b9   : > { %21007 = vmatprep.subr.bf16.mxu1 %v25753_v18  ;;  %20043 = vmatmul.mubr.f32.vlgmr.msra.gmra.mrb[34].mxu0 %v24102_v15 }
 0x3ba   : > { %21005 = vmatpush3.bf16.msra.mxu0 %v25752_v27  ;;  %20049 = vmatprep.mubr.f32.mxu0 %v23890_v45  ;;  %v25759_v27 = vld [vmem:[#allocation55_spill] sm:$0xff] }
 0x3bb   : > { %21031 = vmatprep.subr.bf16.mxu0 %v25754_v50 }
 0x3bf   : > { %20008 = vmatmul.mubr.f32.vlgmr.msra.gmra.mrb[32].mxu1 %v23930_v24 }
 0x3c0   : > { %21009 = vmatpush3.bf16.msra.mxu1 %v25753_v18  ;;  %20056 = vmatprep.mubr.f32.mxu1 %v25736_v16 }
 0x3c1   : > { %21011 = vmatprep.subr.bf16.mxu1 %v24526_v28  ;;  %20050 = vmatmul.mubr.f32.vlgmr.msra.gmra.mrb[34].mxu0 %v24102_v15 }
 0x3c2   : > { %21033 = vmatpush3.bf16.msra.mxu0 %v25754_v50  ;;  %20098 = vmatprep.mubr.f32.mxu0 %v23923_v54 }
 0x3c3   : > { %21035 = vmatprep.subr.bf16.mxu0 %v25755_v47  ;;  %20057 = vmatmul.mubr.f32.vlgmr.msra.gmra.mrb[34].mxu1 %v25738_v11 }
 0x3c4   : > { %21013 = vmatpush3.bf16.msra.mxu1 %v24526_v28  ;;  %20063 = vmatprep.mubr.f32.mxu1 %v24080_v60  ;;  %v25757_v28 = vld [vmem:[#allocation86_spill] sm:$0xff] }
 0x3c5   : > { %21015 = vmatprep.subr.bf16.mxu1 %v24494_v43  ;;  %20099 = vmatmul.mubr.f32.vlgmr.msra.gmra.mrb[36].mxu0 %v23995_v19 }
 0x3c6   : > { %21037 = vmatpush3.bf16.msra.mxu0 %v25755_v47  ;;  %20105 = vmatprep.mubr.f32.mxu0 %v23887_v20  ;;  %v21961_v47 = vld [vmem:[%s22748_s19 + $0x48] sm:$0xff] }
 0x3c7   : > { %21039 = vmatprep.subr.bf16.mxu0 %v25756_v0 }
 0x3cb   : > { %20064 = vmatmul.mubr.f32.vlgmr.msra.gmra.mrb[34].mxu1 %v24104_v2 }
 0x3cc   : > { %21017 = vmatpush3.bf16.msra.mxu1 %v24494_v43  ;;  %20070 = vmatprep.mubr.f32.mxu1 %v24085_v33  ;;  %v25758_v43 = vld [vmem:[#allocation45_spill] sm:$0xff] }
 0x3cd   : > { %21019 = vmatprep.subr.bf16.mxu1 %v25753_v18  ;;  %20106 = vmatmul.mubr.f32.vlgmr.msra.gmra.mrb[36].mxu0 %v23930_v24 }
 0x3ce   : > { %21041 = vmatpush3.bf16.msra.mxu0 %v25756_v0  ;;  %20112 = vmatprep.mubr.f32.mxu0 %v23896_v62 }
 0x3cf   : > { %21043 = vmatprep.subr.bf16.mxu0 %v25754_v50 }
 0x3d3   : > { %20071 = vmatmul.mubr.f32.vlgmr.msra.gmra.mrb[34].mxu1 %v24110_v61 }
 0x3d4   : > { %21021 = vmatpush3.bf16.msra.mxu1 %v25753_v18  ;;  %20077 = vmatprep.mubr.f32.mxu1 %v24089_v44 }
 0x3d5   : > { %21023 = vmatprep.subr.bf16.mxu1 %v25757_v28  ;;  %20113 = vmatmul.mubr.f32.vlgmr.msra.gmra.mrb[36].mxu0 %v25728_v7 }
 0x3d6   : > { %21045 = vmatpush3.bf16.msra.mxu0 %v25754_v50  ;;  %20119 = vmatprep.mubr.f32.mxu0 %v25730_v41 }
 0x3d7   : > { %21047 = vmatprep.subr.bf16.mxu0 %v25758_v43 }
 0x3db   : > { %20078 = vmatmul.mubr.f32.vlgmr.msra.gmra.mrb[34].mxu1 %v24116_v3 }
 0x3dc   : > { %21025 = vmatpush3.bf16.msra.mxu1 %v25757_v28  ;;  %20084 = vmatprep.mubr.f32.mxu1 %v24080_v60 }
 0x3dd   : > { %21027 = vmatprep.subr.bf16.mxu1 %v25753_v18  ;;  %20120 = vmatmul.mubr.f32.vlgmr.msra.gmra.mrb[36].mxu0 %v25733_v17 }
 0x3de   : > { %21049 = vmatpush3.bf16.msra.mxu0 %v25758_v43  ;;  %20126 = vmatprep.mubr.f32.mxu0 %v23887_v20 }
 0x3df   : > { %21051 = vmatprep.subr.bf16.mxu0 %v25754_v50 }
 0x3e3   : > { %20085 = vmatmul.mubr.f32.vlgmr.msra.gmra.mrb[34].mxu1 %v24104_v2 }
 0x3e4   : > { %21029 = vmatpush3.bf16.msra.mxu1 %v25753_v18  ;;  %20091 = vmatprep.mubr.f32.mxu1 %v24080_v60  ;;  %v21960_v18 = vld [vmem:[%s22748_s19 + $0x8] sm:$0xff] }
 0x3e5   : > { %21055 = vmatprep.subr.bf16.mxu1 %v25759_v27  ;;  %20127 = vmatmul.mubr.f32.vlgmr.msra.gmra.mrb[36].mxu0 %v23930_v24 }
 0x3e6   : > { %21053 = vmatpush3.bf16.msra.mxu0 %v25754_v50  ;;  %20133 = vmatprep.mubr.f32.mxu0 %v23887_v20 }
 0x3e7   : > { %21079 = vmatprep.subr.bf16.mxu0 %v25760_v40 }
 0x3eb   : > { %20092 = vmatmul.mubr.f32.vlgmr.msra.gmra.mrb[34].mxu1 %v24104_v2 }
 0x3ec   : > { %21057 = vmatpush3.bf16.msra.mxu1 %v25759_v27  ;;  %20140 = vmatprep.mubr.f32.mxu1 %v25743_v23 }
 0x3ed   : > { %21059 = vmatprep.subr.bf16.mxu1 %v25761_v59  ;;  %20134 = vmatmul.mubr.f32.vlgmr.msra.gmra.mrb[36].mxu0 %v23930_v24 }
 0x3ee   : > { %21081 = vmatpush3.bf16.msra.mxu0 %v25760_v40  ;;  %20182 = vmatprep.mubr.f32.mxu0 %v25736_v16 }
 0x3ef   : > { %21083 = vmatprep.subr.bf16.mxu0 %v25762_v55  ;;  %20141 = vmatmul.mubr.f32.vlgmr.msra.gmra.mrb[36].mxu1 %v25746_v46 }
 0x3f0   : > { %21061 = vmatpush3.bf16.msra.mxu1 %v25761_v59  ;;  %20147 = vmatprep.mubr.f32.mxu1 %v23890_v45 }
 0x3f1   : > { %21063 = vmatprep.subr.bf16.mxu1 %v25763_v32  ;;  %20183 = vmatmul.mubr.f32.vlgmr.msra.gmra.mrb[38].mxu0 %v25738_v11 }
 0x3f2   : > { %21085 = vmatpush3.bf16.msra.mxu0 %v25762_v55  ;;  %20189 = vmatprep.mubr.f32.mxu0 %v24080_v60 }
 0x3f3   : > { %21087 = vmatprep.subr.bf16.mxu0 %v25764_v6 }
 0x3f7   : > { %20148 = vmatmul.mubr.f32.vlgmr.msra.gmra.mrb[36].mxu1 %v24102_v15 }
 0x3f8   : > { %21065 = vmatpush3.bf16.msra.mxu1 %v25763_v32  ;;  %20154 = vmatprep.mubr.f32.mxu1 %v23900_v8  ;;  %v25771_v32 = vld [vmem:[#allocation83_spill] sm:$0xff] }
 0x3f9   : > { %21067 = vmatprep.subr.bf16.mxu1 %v25759_v27  ;;  %20190 = vmatmul.mubr.f32.vlgmr.msra.gmra.mrb[38].mxu0 %v24104_v2 }
 0x3fa   : > { %21089 = vmatpush3.bf16.msra.mxu0 %v25764_v6  ;;  %20196 = vmatprep.mubr.f32.mxu0 %v24085_v33 }
 0x3fb   : > { %21091 = vmatprep.subr.bf16.mxu0 %v25760_v40 }
 0x3ff   : > { %20155 = vmatmul.mubr.f32.vlgmr.msra.gmra.mrb[36].mxu1 %v24107_v37 }
 0x400   : > { %21069 = vmatpush3.bf16.msra.mxu1 %v25759_v27  ;;  %20161 = vmatprep.mubr.f32.mxu1 %v23910_v4 }
 0x401   : > { %21071 = vmatprep.subr.bf16.mxu1 %v25765_v48  ;;  %20197 = vmatmul.mubr.f32.vlgmr.msra.gmra.mrb[38].mxu0 %v24110_v61 }
 0x402   : > { %21093 = vmatpush3.bf16.msra.mxu0 %v25760_v40  ;;  %20203 = vmatprep.mubr.f32.mxu0 %v24089_v44 }
 0x403   : > { %21095 = vmatprep.subr.bf16.mxu0 %v25766_v58 }
 0x407   : > { %20162 = vmatmul.mubr.f32.vlgmr.msra.gmra.mrb[36].mxu1 %v24113_v34 }
 0x408   : > { %21073 = vmatpush3.bf16.msra.mxu1 %v25765_v48  ;;  %20168 = vmatprep.mubr.f32.mxu1 %v23890_v45  ;;  %v21963_v48 = vld [vmem:[%s22748_s19 + $0x40] sm:$0xff] }
 0x409   : > { %21075 = vmatprep.subr.bf16.mxu1 %v25759_v27  ;;  %20204 = vmatmul.mubr.f32.vlgmr.msra.gmra.mrb[38].mxu0 %v24116_v3 }
 0x40a   : > { %21097 = vmatpush3.bf16.msra.mxu0 %v25766_v58  ;;  %20210 = vmatprep.mubr.f32.mxu0 %v24080_v60 }
 0x40b   : > { %21099 = vmatprep.subr.bf16.mxu0 %v25760_v40 }
 0x40e   : > { %v19757_v51 = vpop.f32.mrb[26].mxu1 }
 0x40f   : > { %v24879_v26 = vpop.f32.mrb[27].mxu1  ;;  %20169 = vmatmul.mubr.f32.vlgmr.msra.gmra.mrb[36].mxu1 %v24102_v15 }
 0x410   : > { %21077 = vmatpush3.bf16.msra.mxu1 %v25759_v27  ;;  %v19799_v52 = vpop.f32.mrb[28].mxu0  ;;  %20175 = vmatprep.mubr.f32.mxu1 %v23890_v45  ;;  %v21962_v27 = vld [vmem:[%s22748_s19] sm:$0xff] }
 0x411   : > { %v8485_v35 = vadd.f32 %v19799_v52, %v19757_v51  ;;  %v8487_v25 = vsub.f32 %v19757_v51, %v19799_v52  ;;  %21103 = vmatprep.subr.bf16.mxu1 %v25767_v56  ;;  %v7970_v39 = vpop.f32.mrb[29].mxu0  ;;  %20211 = vmatmul.mubr.f32.vlgmr.msra.gmra.mrb[38].mxu0 %v24104_v2 }
 0x412   : > { %v24887_v42 = vadd.f32 %v7970_v39, %v24879_v26  ;;  %v8486_v12 = vsub.f32 %v24879_v26, %v7970_v39  ;;  %21101 = vmatpush3.bf16.msra.mxu0 %v25760_v40  ;;  %20217 = vmatprep.mubr.f32.mxu0 %v24080_v60 }
 0x413   : > { %21127 = vmatprep.subr.bf16.mxu0 %v25768_v22  ;;  %v8491_v50 = vmul.f32 %v21960_v18, %v8485_v35  ;;  %v24936_v0 = vmul.f32 %v21961_v47, %v8485_v35 }
 0x414   : > { %v8490_v40 = vmul.f32 %v21962_v27, %v24887_v42  ;;  %v24952_v58 = vmul.f32 %v21963_v48, %v24887_v42  ;;  %v25773_v42 = vld [vmem:[#allocation49_spill] sm:$0xff] }
 0x417   : > { %20176 = vmatmul.mubr.f32.vlgmr.msra.gmra.mrb[36].mxu1 %v24102_v15 }
 0x418   : > { %21105 = vmatpush3.bf16.msra.mxu1 %v25767_v56  ;;  %20224 = vmatprep.mubr.f32.mxu1 %v23923_v54 }
 0x419   : > { %21107 = vmatprep.subr.bf16.mxu1 %v24531_v57  ;;  %20218 = vmatmul.mubr.f32.vlgmr.msra.gmra.mrb[38].mxu0 %v24104_v2 }
 0x41a   : > { %21129 = vmatpush3.bf16.msra.mxu0 %v25768_v22  ;;  %20266 = vmatprep.mubr.f32.mxu0 %v25743_v23 }
 0x41b   : > { %21131 = vmatprep.subr.bf16.mxu0 %v24541_v10  ;;  %20225 = vmatmul.mubr.f32.vlgmr.msra.gmra.mrb[38].mxu1 %v23995_v19 }
 0x41c   : > { %21109 = vmatpush3.bf16.msra.mxu1 %v24531_v57  ;;  %20231 = vmatprep.mubr.f32.mxu1 %v23887_v20  ;;  %v25769_v57 = vld [vmem:[#allocation87_spill] sm:$0xff] }
 0x41d   : > { %21111 = vmatprep.subr.bf16.mxu1 %v24515_v31  ;;  %20267 = vmatmul.mubr.f32.vlgmr.msra.gmra.mrb[40].mxu0 %v25746_v46 }
 0x41e   : > { %21133 = vmatpush3.bf16.msra.mxu0 %v24541_v10  ;;  %20273 = vmatprep.mubr.f32.mxu0 %v23890_v45 }
 0x41f   : > { %21135 = vmatprep.subr.bf16.mxu0 %v24520_v30 }
 0x423   : > { %20232 = vmatmul.mubr.f32.vlgmr.msra.gmra.mrb[38].mxu1 %v23930_v24 }
 0x424   : > { %21113 = vmatpush3.bf16.msra.mxu1 %v24515_v31  ;;  %20238 = vmatprep.mubr.f32.mxu1 %v23896_v62  ;;  %v25770_v31 = vld [vmem:[#allocation88_spill] sm:$0xff] }
 0x425   : > { %21115 = vmatprep.subr.bf16.mxu1 %v25767_v56  ;;  %20274 = vmatmul.mubr.f32.vlgmr.msra.gmra.mrb[40].mxu0 %v24102_v15 }
 0x426   : > { %21137 = vmatpush3.bf16.msra.mxu0 %v24520_v30  ;;  %20280 = vmatprep.mubr.f32.mxu0 %v23900_v8 }
 0x427   : > { %21139 = vmatprep.subr.bf16.mxu0 %v25768_v22 }
 0x42b   : > { %20239 = vmatmul.mubr.f32.vlgmr.msra.gmra.mrb[38].mxu1 %v25728_v7 }
 0x42c   : > { %21117 = vmatpush3.bf16.msra.mxu1 %v25767_v56  ;;  %20245 = vmatprep.mubr.f32.mxu1 %v25730_v41 }
 0x42d   : > { %21119 = vmatprep.subr.bf16.mxu1 %v25769_v57  ;;  %20281 = vmatmul.mubr.f32.vlgmr.msra.gmra.mrb[40].mxu0 %v24107_v37 }
 0x42e   : > { %21141 = vmatpush3.bf16.msra.mxu0 %v25768_v22  ;;  %20287 = vmatprep.mubr.f32.mxu0 %v23910_v4 }
 0x42f   : > { %21143 = vmatprep.subr.bf16.mxu0 %v25770_v31 }
 0x433   : > { %20246 = vmatmul.mubr.f32.vlgmr.msra.gmra.mrb[38].mxu1 %v25733_v17 }
 0x434   : > { %21121 = vmatpush3.bf16.msra.mxu1 %v25769_v57  ;;  %20252 = vmatprep.mubr.f32.mxu1 %v23887_v20  ;;  %v25777_v57 = vld [vmem:[#allocation48_spill] sm:$0xff] }
 0x435   : > { %21123 = vmatprep.subr.bf16.mxu1 %v25767_v56  ;;  %20288 = vmatmul.mubr.f32.vlgmr.msra.gmra.mrb[40].mxu0 %v24113_v34 }
 0x436   : > { %21145 = vmatpush3.bf16.msra.mxu0 %v25770_v31  ;;  %20294 = vmatprep.mubr.f32.mxu0 %v23890_v45 }
 0x437   : > { %21147 = vmatprep.subr.bf16.mxu0 %v25768_v22 }
 0x43a   : > { %v19841_v30 = vpop.f32.mrb[28].mxu1 }
 0x43b   : > { %v8489_v10 = vsub.f32 %v8487_v25, %v19841_v30  ;;  %v8474_v21 = vpop.f32.mrb[29].mxu1  ;;  %20253 = vmatmul.mubr.f32.vlgmr.msra.gmra.mrb[38].mxu1 %v23930_v24  ;;  %v25772_v25 = vld [vmem:[#allocation43_spill] sm:$0xff] }
 0x43c   : > { %v8488_v28 = vsub.f32 %v8486_v12, %v8474_v21  ;;  %21125 = vmatpush3.bf16.msra.mxu1 %v25767_v56  ;;  %v24939_v43 = vpop.f32.mrb[30].mxu0  ;;  %20259 = vmatprep.mubr.f32.mxu1 %v23887_v20  ;;  %v25774_v12 = vld [vmem:[#allocation34_spill] sm:$0xff] }
 0x43d   : > { %v8493_v59 = vmul.f32 %v21961_v47, %v8489_v10  ;;  %v24944_v55 = vmul.f32 %v21960_v18, %v8489_v10  ;;  %21151 = vmatprep.subr.bf16.mxu1 %v25771_v32  ;;  %20295 = vmatmul.mubr.f32.vlgmr.msra.gmra.mrb[40].mxu0 %v24102_v15  ;;  %v24948_v6 = vpop.f32.mrb[31].mxu0 }
 0x43e   : > { %v8492_v51 = vmul.f32 %v21963_v48, %v8488_v28  ;;  %v24954_v26 = vmul.f32 %v21962_v27, %v8488_v28  ;;  %21149 = vmatpush3.bf16.msra.mxu0 %v25768_v22  ;;  %20301 = vmatprep.mubr.f32.mxu0 %v23890_v45  ;;  %v25775_v22 = vld [vmem:[#allocation46_spill] sm:$0xff]  ;;  %v21965_v48 = vld [vmem:[%s22746_s8 + $0x10] sm:$0xff] }
 0x43f   : > { %v24958_v52 = vadd.f32 %v8493_v59, %v8491_v50  ;;  %v8503_v35 = vsub.f32 %v24944_v55, %v24936_v0  ;;  %21175 = vmatprep.subr.bf16.mxu0 %v25772_v25  ;;  %v21964_v50 = vld [vmem:[%s22746_s8 + $0x18] sm:$0xff] }
 0x440   : > { %v24963_v56 = vadd.f32 %v8492_v51, %v8490_v40  ;;  %v8502_v39 = vsub.f32 %v24954_v26, %v24952_v58  ;;  %v10021_v47 = vmul.f32 %v21964_v50, %v24729_v63  ;;  %v25778_v40 = vld [vmem:[#allocation57_spill] sm:$0xff]  ;;  %v21973_v58 = vld [vmem:[%s22746_s8 + $0x20] sm:$0xff] }
 0x441   : > { %v13086_v26 = vmul.f32 %v21973_v58, %v24729_v63 }
 0x443   : > { %20260 = vmatmul.mubr.f32.vlgmr.msra.gmra.mrb[38].mxu1 %v23930_v24 }
 0x444   : > { %21153 = vmatpush3.bf16.msra.mxu1 %v25771_v32  ;;  %20308 = vmatprep.mubr.f32.mxu1 %v25736_v16 }
 0x445   : > { %21155 = vmatprep.subr.bf16.mxu1 %v24566_v29  ;;  %20302 = vmatmul.mubr.f32.vlgmr.msra.gmra.mrb[40].mxu0 %v24102_v15 }
 0x446   : > { %21177 = vmatpush3.bf16.msra.mxu0 %v25772_v25  ;;  %20350 = vmatprep.mubr.f32.mxu0 %v23923_v54 }
 0x447   : > { %21179 = vmatprep.subr.bf16.mxu0 %v25773_v42  ;;  %20309 = vmatmul.mubr.f32.vlgmr.msra.gmra.mrb[40].mxu1 %v25738_v11 }
 0x448   : > { %21157 = vmatpush3.bf16.msra.mxu1 %v24566_v29  ;;  %20315 = vmatprep.mubr.f32.mxu1 %v24080_v60  ;;  %v25776_v29 = vld [vmem:[#allocation36_spill] sm:$0xff] }
 0x449   : > { %21159 = vmatprep.subr.bf16.mxu1 %v25774_v12  ;;  %20351 = vmatmul.mubr.f32.vlgmr.msra.gmra.mrb[42].mxu0 %v23995_v19 }
 0x44a   : > { %21181 = vmatpush3.bf16.msra.mxu0 %v25773_v42  ;;  %20357 = vmatprep.mubr.f32.mxu0 %v23887_v20 }
 0x44b   : > { %21183 = vmatprep.subr.bf16.mxu0 %v25775_v22 }
 0x44f   : > { %20316 = vmatmul.mubr.f32.vlgmr.msra.gmra.mrb[40].mxu1 %v24104_v2 }
 0x450   : > { %21161 = vmatpush3.bf16.msra.mxu1 %v25774_v12  ;;  %20322 = vmatprep.mubr.f32.mxu1 %v24085_v33 }
 0x451   : > { %21163 = vmatprep.subr.bf16.mxu1 %v25771_v32  ;;  %20358 = vmatmul.mubr.f32.vlgmr.msra.gmra.mrb[42].mxu0 %v23930_v24 }
 0x452   : > { %21185 = vmatpush3.bf16.msra.mxu0 %v25775_v22  ;;  %20364 = vmatprep.mubr.f32.mxu0 %v23896_v62  ;;  %v25779_v22 = vld [vmem:[#allocation58_spill] sm:$0xff] }
 0x453   : > { %21187 = vmatprep.subr.bf16.mxu0 %v25772_v25 }
 0x457   : > { %20323 = vmatmul.mubr.f32.vlgmr.msra.gmra.mrb[40].mxu1 %v24110_v61 }
 0x458   : > { %21165 = vmatpush3.bf16.msra.mxu1 %v25771_v32  ;;  %20329 = vmatprep.mubr.f32.mxu1 %v24089_v44 }
 0x459   : > { %21167 = vmatprep.subr.bf16.mxu1 %v25776_v29  ;;  %20365 = vmatmul.mubr.f32.vlgmr.msra.gmra.mrb[42].mxu0 %v25728_v7 }
 0x45a   : > { %21189 = vmatpush3.bf16.msra.mxu0 %v25772_v25  ;;  %20371 = vmatprep.mubr.f32.mxu0 %v25730_v41 }
 0x45b   : > { %21191 = vmatprep.subr.bf16.mxu0 %v25777_v57 }
 0x45f   : > { %20330 = vmatmul.mubr.f32.vlgmr.msra.gmra.mrb[40].mxu1 %v24116_v3 }
 0x460   : > { %21169 = vmatpush3.bf16.msra.mxu1 %v25776_v29  ;;  %20336 = vmatprep.mubr.f32.mxu1 %v24080_v60 }
 0x461   : > { %21171 = vmatprep.subr.bf16.mxu1 %v25771_v32  ;;  %20372 = vmatmul.mubr.f32.vlgmr.msra.gmra.mrb[42].mxu0 %v25733_v17 }
 0x462   : > { %21193 = vmatpush3.bf16.msra.mxu0 %v25777_v57  ;;  %20378 = vmatprep.mubr.f32.mxu0 %v23887_v20 }
 0x463   : > { %21195 = vmatprep.subr.bf16.mxu0 %v25772_v25 }
 0x466   : > { %v19925_v31 = vpop.f32.mrb[30].mxu1 }
 0x467   : > { %v10015_v30 = vsub.f32 %v24939_v43, %v19925_v31  ;;  %v9500_v10 = vpop.f32.mrb[31].mxu1  ;;  %20337 = vmatmul.mubr.f32.vlgmr.msra.gmra.mrb[40].mxu1 %v24104_v2 }
 0x468   : > { %v10014_v21 = vsub.f32 %v24948_v6, %v9500_v10  ;;  %21173 = vmatpush3.bf16.msra.mxu1 %v25771_v32  ;;  %v19967_v18 = vpop.f32.mrb[32].mxu0  ;;  %20343 = vmatprep.mubr.f32.mxu1 %v24080_v60  ;;  %v10020_v32 = vmul.f32 %v21965_v48, %v24729_v63 }
 0x469   : > { %v10023_v28 = vmul.f32 %v24744_v53, %v10015_v30  ;;  %v10017_v27 = vsub.f32 %v19967_v18, %v24939_v43  ;;  %21199 = vmatprep.subr.bf16.mxu1 %v25778_v40  ;;  %v10004_v59 = vpop.f32.mrb[33].mxu0  ;;  %20379 = vmatmul.mubr.f32.vlgmr.msra.gmra.mrb[42].mxu0 %v23930_v24  ;;  %v21966_v18 = vld [vmem:[%s22746_s8 + $0x58] sm:$0xff] }
 0x46a   : > { %v10022_v51 = vmul.f32 %v24744_v53, %v10014_v21  ;;  %v10016_v42 = vsub.f32 %v10004_v59, %v24948_v6  ;;  %21197 = vmatpush3.bf16.msra.mxu0 %v25772_v25  ;;  %20385 = vmatprep.mubr.f32.mxu0 %v23887_v20  ;;  %v10032_v21 = vmul.f32 %v21966_v18, %v24729_v63  ;;  %v21967_v59 = vld [vmem:[%s22746_s8 + $0x50] sm:$0xff] }
 0x46b   : > { %v10025_v43 = vmul.f32 %v10023_v28, %v24736_v13  ;;  %v10019_v12 = vsub.f32 %v10017_v27, %v19925_v31  ;;  %21223 = vmatprep.subr.bf16.mxu0 %v25779_v22  ;;  %v10031_v25 = vmul.f32 %v21967_v59, %v24729_v63  ;;  %v25780_v27 = vld [vmem:[#allocation75_spill] sm:$0xff] }
 0x46c   : > { %v10024_v29 = vmul.f32 %v10022_v51, %v24736_v13  ;;  %v10018_v57 = vsub.f32 %v10016_v42, %v9500_v10  ;;  %v25782_v51 = vld [vmem:[#allocation70_spill] sm:$0xff]  ;;  %v25783_v42 = vld [vmem:[#allocation71_spill] sm:$0xff] }
 0x46d   : > { %v10027_v30 = vadd.f32 %v10025_v43, %v10021_v47  ;;  %v10034_v6 = vmul.f32 %v24744_v53, %v10019_v12  ;;  %v25784_v43 = vld [vmem:[#allocation73_spill] sm:$0xff]  ;;  %v25785_v12 = vld [vmem:[#allocation74_spill] sm:$0xff] }
 0x46e   : > { %v10026_v50 = vadd.f32 %v10024_v29, %v10020_v32  ;;  %v10033_v28 = vmul.f32 %v24744_v53, %v10018_v57  ;;  %v25781_v32 = vld [vmem:[#allocation76_spill] sm:$0xff] }
 0x46f   : > { %18052 = vst.msk [vmem:[%s24760_s5 + $0x18] sm:$0xff] %vm636_vm0, %v10027_v30  ;;  %v10036_v31 = vmul.f32 %v10034_v6, %v24736_v13  ;;  %20344 = vmatmul.mubr.f32.vlgmr.msra.gmra.mrb[40].mxu1 %v24104_v2  ;;  %v25786_v6 = vld [vmem:[#allocation82_spill] sm:$0xff] }
 0x470   : > { %18051 = vst.msk [vmem:[%s24760_s5 + $0x10] sm:$0xff] %vm636_vm0, %v10026_v50  ;;  %v10035_v10 = vmul.f32 %v10033_v28, %v24736_v13  ;;  %21201 = vmatpush3.bf16.msra.mxu1 %v25778_v40  ;;  %20392 = vmatprep.mubr.f32.mxu1 %v25743_v23 }
 0x471   : > { %v10038_v47 = vadd.f32 %v10036_v31, %v10032_v21  ;;  %21203 = vmatprep.subr.bf16.mxu1 %v25780_v27  ;;  %20386 = vmatmul.mubr.f32.vlgmr.msra.gmra.mrb[42].mxu0 %v23930_v24 }
 0x472   : > { %v10037_v48 = vadd.f32 %v10035_v10, %v10031_v25  ;;  %21225 = vmatpush3.bf16.msra.mxu0 %v25779_v22  ;;  %20434 = vmatprep.mubr.f32.mxu0 %v25736_v16 }
 0x473   : > { %18054 = vst.msk [vmem:[%s24760_s5 + $0x58] sm:$0xff] %vm636_vm0, %v10038_v47  ;;  %21227 = vmatprep.subr.bf16.mxu0 %v25781_v32  ;;  %20393 = vmatmul.mubr.f32.vlgmr.msra.gmra.mrb[42].mxu1 %v25746_v46 }
 0x474   : > { %18053 = vst.msk [vmem:[%s24760_s5 + $0x50] sm:$0xff] %vm636_vm0, %v10037_v48  ;;  %21205 = vmatpush3.bf16.msra.mxu1 %v25780_v27  ;;  %20399 = vmatprep.mubr.f32.mxu1 %v23890_v45 }
 0x475   : > { %21207 = vmatprep.subr.bf16.mxu1 %v25782_v51  ;;  %20435 = vmatmul.mubr.f32.vlgmr.msra.gmra.mrb[44].mxu0 %v25738_v11 }
 0x476   : > { %21229 = vmatpush3.bf16.msra.mxu0 %v25781_v32  ;;  %20441 = vmatprep.mubr.f32.mxu0 %v24080_v60 }
 0x477   : > { %21231 = vmatprep.subr.bf16.mxu0 %v25783_v42 }
 0x47b   : > { %20400 = vmatmul.mubr.f32.vlgmr.msra.gmra.mrb[42].mxu1 %v24102_v15 }
 0x47c   : > { %21209 = vmatpush3.bf16.msra.mxu1 %v25782_v51  ;;  %20406 = vmatprep.mubr.f32.mxu1 %v23900_v8 }
 0x47d   : > { %21211 = vmatprep.subr.bf16.mxu1 %v25778_v40  ;;  %20442 = vmatmul.mubr.f32.vlgmr.msra.gmra.mrb[44].mxu0 %v24104_v2 }
 0x47e   : > { %21233 = vmatpush3.bf16.msra.mxu0 %v25783_v42  ;;  %20448 = vmatprep.mubr.f32.mxu0 %v24085_v33 }
 0x47f   : > { %21235 = vmatprep.subr.bf16.mxu0 %v25779_v22 }
 0x483   : > { %20407 = vmatmul.mubr.f32.vlgmr.msra.gmra.mrb[42].mxu1 %v24107_v37 }
 0x484   : > { %21213 = vmatpush3.bf16.msra.mxu1 %v25778_v40  ;;  %20413 = vmatprep.mubr.f32.mxu1 %v23910_v4 }
 0x485   : > { %21215 = vmatprep.subr.bf16.mxu1 %v25784_v43  ;;  %20449 = vmatmul.mubr.f32.vlgmr.msra.gmra.mrb[44].mxu0 %v24110_v61 }
 0x486   : > { %21237 = vmatpush3.bf16.msra.mxu0 %v25779_v22  ;;  %20455 = vmatprep.mubr.f32.mxu0 %v24089_v44 }
 0x487   : > { %21239 = vmatprep.subr.bf16.mxu0 %v25785_v12 }
 0x48b   : > { %20414 = vmatmul.mubr.f32.vlgmr.msra.gmra.mrb[42].mxu1 %v24113_v34 }
 0x48c   : > { %21217 = vmatpush3.bf16.msra.mxu1 %v25784_v43  ;;  %20420 = vmatprep.mubr.f32.mxu1 %v23890_v45  ;;  %v21974_v43 = vld [vmem:[%s22746_s8 + $0x68] sm:$0xff] }
 0x48d   : > { %21219 = vmatprep.subr.bf16.mxu1 %v25778_v40  ;;  %20456 = vmatmul.mubr.f32.vlgmr.msra.gmra.mrb[44].mxu0 %v24116_v3 }
 0x48e   : > { %21241 = vmatpush3.bf16.msra.mxu0 %v25785_v12  ;;  %20462 = vmatprep.mubr.f32.mxu0 %v24080_v60  ;;  %v13098_v12 = vmul.f32 %v21974_v43, %v24729_v63 }
 0x48f   : > { %21243 = vmatprep.subr.bf16.mxu0 %v25779_v22 }
 0x492   : > { %v20009_v29 = vpop.f32.mrb[32].mxu1 }
 0x493   : > { %v25083_v57 = vpop.f32.mrb[33].mxu1  ;;  %20421 = vmatmul.mubr.f32.vlgmr.msra.gmra.mrb[42].mxu1 %v24102_v15 }
 0x494   : > { %21221 = vmatpush3.bf16.msra.mxu1 %v25778_v40  ;;  %v20051_v30 = vpop.f32.mrb[34].mxu0  ;;  %20427 = vmatprep.mubr.f32.mxu1 %v23890_v45  ;;  %v25787_v40 = vld [vmem:[#allocation84_spill] sm:$0xff] }
 0x495   : > { %v11551_v18 = vadd.f32 %v20051_v30, %v20009_v29  ;;  %v11553_v21 = vsub.f32 %v20009_v29, %v20051_v30  ;;  %21247 = vmatprep.subr.bf16.mxu1 %v25786_v6  ;;  %v11036_v50 = vpop.f32.mrb[35].mxu0  ;;  %20463 = vmatmul.mubr.f32.vlgmr.msra.gmra.mrb[44].mxu0 %v24104_v2  ;;  %v21975_v30 = vld [vmem:[%s22746_s8 + $0x60] sm:$0xff] }
 0x496   : > { %v25091_v59 = vadd.f32 %v11036_v50, %v25083_v57  ;;  %v11552_v25 = vsub.f32 %v25083_v57, %v11036_v50  ;;  %21245 = vmatpush3.bf16.msra.mxu0 %v25779_v22  ;;  %20469 = vmatprep.mubr.f32.mxu0 %v24080_v60 }
 0x497   : > { %21271 = vmatprep.subr.bf16.mxu0 %v25787_v40 }
 0x49b   : > { %20428 = vmatmul.mubr.f32.vlgmr.msra.gmra.mrb[42].mxu1 %v24102_v15 }
 0x49c   : > { %21249 = vmatpush3.bf16.msra.mxu1 %v25786_v6  ;;  %20476 = vmatprep.mubr.f32.mxu1 %v23923_v54  ;;  %v21968_v54 = vld [vmem:[%s22748_s19 + $0x18] sm:$0xff] }
 0x49d   : > { %21251 = vmatprep.subr.bf16.mxu1 %v24572_v9  ;;  %20470 = vmatmul.mubr.f32.vlgmr.msra.gmra.mrb[44].mxu0 %v24104_v2 }
 0x49e   : > { %21273 = vmatpush3.bf16.msra.mxu0 %v25787_v40  ;;  %20518 = vmatprep.mubr.f32.mxu0 %v25743_v23 }
 0x49f   : > { %21275 = vmatprep.subr.bf16.mxu0 %v24581_v5  ;;  %20477 = vmatmul.mubr.f32.vlgmr.msra.gmra.mrb[44].mxu1 %v23995_v19  ;;  %v11557_v19 = vmul.f32 %v21968_v54, %v11551_v18 }
 0x4a0   : > { %21253 = vmatpush3.bf16.msra.mxu1 %v24572_v9  ;;  %20483 = vmatprep.mubr.f32.mxu1 %v23887_v20 }
 0x4a1   : > { %21255 = vmatprep.subr.bf16.mxu1 %v24558_v49  ;;  %20519 = vmatmul.mubr.f32.vlgmr.msra.gmra.mrb[46].mxu0 %v25746_v46 }
 0x4a2   : > { %21277 = vmatpush3.bf16.msra.mxu0 %v24581_v5  ;;  %20525 = vmatprep.mubr.f32.mxu0 %v23890_v45  ;;  %v21971_v5 = vld [vmem:[%s22748_s19 + $0x50] sm:$0xff] }
 0x4a3   : > { %21279 = vmatprep.subr.bf16.mxu0 %v24564_v38  ;;  %v11566_v23 = vmul.f32 %v21971_v5, %v25091_v59 }
 0x4a7   : > { %20484 = vmatmul.mubr.f32.vlgmr.msra.gmra.mrb[44].mxu1 %v23930_v24 }
 0x4a8   : > { %21257 = vmatpush3.bf16.msra.mxu1 %v24558_v49  ;;  %20490 = vmatprep.mubr.f32.mxu1 %v23896_v62 }
 0x4a9   : > { %21259 = vmatprep.subr.bf16.mxu1 %v25786_v6  ;;  %20526 = vmatmul.mubr.f32.vlgmr.msra.gmra.mrb[46].mxu0 %v24102_v15 }
 0x4aa   : > { %21281 = vmatpush3.bf16.msra.mxu0 %v24564_v38  ;;  %20532 = vmatprep.mubr.f32.mxu0 %v23900_v8 }
 0x4ab   : > { %21283 = vmatprep.subr.bf16.mxu0 %v25787_v40 }
 0x4af   : > { %20491 = vmatmul.mubr.f32.vlgmr.msra.gmra.mrb[44].mxu1 %v25728_v7 }
 0x4b0   : > { %21261 = vmatpush3.bf16.msra.mxu1 %v25786_v6  ;;  %20497 = vmatprep.mubr.f32.mxu1 %v25730_v41 }
 0x4b1   : > { %21263 = vmatprep.subr.bf16.mxu1 %v24568_v36  ;;  %20533 = vmatmul.mubr.f32.vlgmr.msra.gmra.mrb[46].mxu0 %v24107_v37  ;;  %v21969_v37 = vld [vmem:[%s22748_s19 + $0x58] sm:$0xff] }
 0x4b2   : > { %21285 = vmatpush3.bf16.msra.mxu0 %v25787_v40  ;;  %20539 = vmatprep.mubr.f32.mxu0 %v23910_v4  ;;  %v11567_v9 = vmul.f32 %v21969_v37, %v11551_v18  ;;  %v13097_v18 = vmul.f32 %v21975_v30, %v24729_v63 }
 0x4b3   : > { %21287 = vmatprep.subr.bf16.mxu0 %v24570_v1 }
 0x4b7   : > { %20498 = vmatmul.mubr.f32.vlgmr.msra.gmra.mrb[44].mxu1 %v25733_v17 }
 0x4b8   : > { %21265 = vmatpush3.bf16.msra.mxu1 %v24568_v36  ;;  %20504 = vmatprep.mubr.f32.mxu1 %v23887_v20  ;;  %v25788_v36 = vld [vmem:[#allocation85_spill] sm:$0xff] }
 0x4b9   : > { %21267 = vmatprep.subr.bf16.mxu1 %v25786_v6  ;;  %20540 = vmatmul.mubr.f32.vlgmr.msra.gmra.mrb[46].mxu0 %v24113_v34 }
 0x4ba   : > { %21289 = vmatpush3.bf16.msra.mxu0 %v24570_v1  ;;  %20546 = vmatprep.mubr.f32.mxu0 %v23890_v45  ;;  %v21970_v1 = vld [vmem:[%s22748_s19 + $0x10] sm:$0xff] }
 0x4bb   : > { %21291 = vmatprep.subr.bf16.mxu0 %v25787_v40  ;;  %v11556_v41 = vmul.f32 %v21970_v1, %v25091_v59 }
 0x4be   : > { %v20093_v62 = vpop.f32.mrb[34].mxu1 }
 0x4bf   : > { %v11555_v8 = vsub.f32 %v11553_v21, %v20093_v62  ;;  %v11540_v4 = vpop.f32.mrb[35].mxu1  ;;  %20505 = vmatmul.mubr.f32.vlgmr.msra.gmra.mrb[44].mxu1 %v23930_v24 }
 0x4c0   : > { %v11554_v7 = vsub.f32 %v11552_v25, %v11540_v4  ;;  %21269 = vmatpush3.bf16.msra.mxu1 %v25786_v6  ;;  %v25141_v34 = vpop.f32.mrb[36].mxu0  ;;  %20511 = vmatprep.mubr.f32.mxu1 %v23887_v20 }
 0x4c1   : > { %v11559_v38 = vmul.f32 %v21969_v37, %v11555_v8  ;;  %v11565_v49 = vmul.f32 %v21968_v54, %v11555_v8  ;;  %21295 = vmatprep.subr.bf16.mxu1 %v25788_v36  ;;  %20547 = vmatmul.mubr.f32.vlgmr.msra.gmra.mrb[46].mxu0 %v24102_v15  ;;  %v12064_v17 = vpop.f32.mrb[37].mxu0 }
 0x4c2   : > { %v11558_v46 = vmul.f32 %v21971_v5, %v11554_v7  ;;  %v11564_v22 = vmul.f32 %v21970_v1, %v11554_v7  ;;  %21293 = vmatpush3.bf16.msra.mxu0 %v25787_v40  ;;  %20553 = vmatprep.mubr.f32.mxu0 %v23890_v45  ;;  %v25789_v45 = vld [vmem:[#allocation89_spill] sm:$0xff] }
 0x4c3   : > { %v11561_v20 = vadd.f32 %v11559_v38, %v11557_v19  ;;  %v11569_v28 = vsub.f32 %v11565_v49, %v11567_v9  ;;  %v21977_v49 = vld [vmem:[%s22748_s19 + $0x68] sm:$0xff] }
 0x4c4   : > { %v11560_v31 = vadd.f32 %v11558_v46, %v11556_v41  ;;  %v11568_v10 = vsub.f32 %v11564_v22, %v11566_v23  ;;  %v21976_v41 = vld [vmem:[%s22748_s19 + $0x28] sm:$0xff]  ;;  %v21978_v46 = vld [vmem:[%s22748_s19 + $0x20] sm:$0xff] }
 0x4c5   : > { %v25153_v47 = vadd.f32 %v11561_v20, %v24958_v52  ;;  %v25158_v27 = vadd.f32 %v11569_v28, %v8503_v35  ;;  %v21979_v20 = vld [vmem:[%s22748_s19 + $0x60] sm:$0xff] }
 0x4c6   : > { %v25161_v48 = vadd.f32 %v11560_v31, %v24963_v56  ;;  %v25166_v32 = vadd.f32 %v11568_v10, %v8502_v39 }
 0x4c7   : > { %20512 = vmatmul.mubr.f32.vlgmr.msra.gmra.mrb[44].mxu1 %v23930_v24  ;;  %v25790_v24 = vld [vmem:[#allocation35_spill] sm:$0xff] }
 0x4c8   : > { %21297 = vmatpush3.bf16.msra.mxu1 %v25788_v36  ;;  %20560 = vmatprep.mubr.f32.mxu1 %v25736_v16 }
 0x4c9   : > { %21299 = vmatprep.subr.bf16.mxu1 %v24594_v14  ;;  %20554 = vmatmul.mubr.f32.vlgmr.msra.gmra.mrb[46].mxu0 %v24102_v15 }
 0x4cb   : > { %20561 = vmatmul.mubr.f32.vlgmr.msra.gmra.mrb[46].mxu1 %v25738_v11 }
 0x4cc   : > { %21301 = vmatpush3.bf16.msra.mxu1 %v24594_v14  ;;  %20567 = vmatprep.mubr.f32.mxu1 %v24080_v60 }
 0x4cd   : > { %21303 = vmatprep.subr.bf16.mxu1 %v25789_v45 }
 0x4d3   : > { %20568 = vmatmul.mubr.f32.vlgmr.msra.gmra.mrb[46].mxu1 %v24104_v2 }
 0x4d4   : > { %21305 = vmatpush3.bf16.msra.mxu1 %v25789_v45  ;;  %20574 = vmatprep.mubr.f32.mxu1 %v24085_v33 }
 0x4d5   : > { %21307 = vmatprep.subr.bf16.mxu1 %v25788_v36 }
 0x4db   : > { %20575 = vmatmul.mubr.f32.vlgmr.msra.gmra.mrb[46].mxu1 %v24110_v61 }
 0x4dc   : > { %21309 = vmatpush3.bf16.msra.mxu1 %v25788_v36  ;;  %20581 = vmatprep.mubr.f32.mxu1 %v24089_v44 }
 0x4dd   : > { %21311 = vmatprep.subr.bf16.mxu1 %v25790_v24 }
 0x4e3   : > { %20582 = vmatmul.mubr.f32.vlgmr.msra.gmra.mrb[46].mxu1 %v24116_v3  ;;  %v21972_v3 = vld [vmem:[%s22746_s8 + $0x28] sm:$0xff] }
 0x4e4   : > { %21313 = vmatpush3.bf16.msra.mxu1 %v25790_v24  ;;  %20588 = vmatprep.mubr.f32.mxu1 %v24080_v60  ;;  %v13087_v16 = vmul.f32 %v21972_v3, %v24729_v63 }
 0x4e5   : > { %21315 = vmatprep.subr.bf16.mxu1 %v25788_v36 }
 0x4ea   : > { %v20177_v33 = vpop.f32.mrb[36].mxu1 }
 0x4eb   : > { %v13081_v15 = vsub.f32 %v25141_v34, %v20177_v33  ;;  %v12566_v61 = vpop.f32.mrb[37].mxu1  ;;  %20589 = vmatmul.mubr.f32.vlgmr.msra.gmra.mrb[46].mxu1 %v24104_v2 }
 0x4ec   : > { %v13080_v14 = vsub.f32 %v12064_v17, %v12566_v61  ;;  %21317 = vmatpush3.bf16.msra.mxu1 %v25788_v36  ;;  %v20219_v44 = vpop.f32.mrb[38].mxu0  ;;  %20595 = vmatprep.mubr.f32.mxu1 %v24080_v60 }
 0x4ed   : > { %v13089_v11 = vmul.f32 %v24744_v53, %v13081_v15  ;;  %v13083_v0 = vsub.f32 %v20219_v44, %v25141_v34  ;;  %v13070_v55 = vpop.f32.mrb[39].mxu0 }
 0x4ee   : > { %v13088_v52 = vmul.f32 %v24744_v53, %v13080_v14  ;;  %v13082_v35 = vsub.f32 %v13070_v55, %v12064_v17  ;;  %v21981_v55 = vld [vmem:[%s22736_s25 + $0x18] sm:$0xff] }
 0x4ef   : > { %v13091_v56 = vmul.f32 %v13089_v11, %v24736_v13  ;;  %v13085_v60 = vsub.f32 %v13083_v0, %v20177_v33  ;;  %v21980_v11 = vld [vmem:[%s22736_s25 + $0x8] sm:$0xff] }
 0x4f0   : > { %v13090_v39 = vmul.f32 %v13088_v52, %v24736_v13  ;;  %v13084_v51 = vsub.f32 %v13082_v35, %v12566_v61 }
 0x4f1   : > { %v13093_v42 = vadd.f32 %v13091_v56, %v13087_v16  ;;  %v13100_v29 = vmul.f32 %v24744_v53, %v13085_v60  ;;  %v17708_v16 = vstv %s18028_s26  ;;  %s22158_s26 = scalar_lea.vmem %s22157_s10, 4096 }
 0x4f2   : > { %v13092_v57 = vadd.f32 %v13090_v39, %v13086_v26  ;;  %v13099_v21 = vmul.f32 %v24744_v53, %v13084_v51  ;;  %v17710_v0 = vmul.f32 %v21980_v11, %v17708_v16  ;;  %v17714_v58 = vmul.f32 %v21981_v55, %v17708_v16  ;;  %v21984_v39 = vld [vmem:[%s22746_s8 + $0x38] sm:$0xff] }
 0x4f3   : > { %18056 = vst.msk [vmem:[%s24760_s5 + $0x28] sm:$0xff] %vm636_vm0, %v13093_v42  ;;  %v13102_v6 = vmul.f32 %v13100_v29, %v24736_v13  ;;  %20596 = vmatmul.mubr.f32.vlgmr.msra.gmra.mrb[46].mxu1 %v24104_v2  ;;  %v16153_v51 = vmul.f32 %v21984_v39, %v24729_v63  ;;  %v21985_v42 = vld [vmem:[%s23203_s12] ss:$0 sm:$0xff]  ;;  %s22152_s12 = scalar_lea.vmem %s25276_s3, 2048 }
 0x4f4   : > { %18055 = vst.msk [vmem:[%s24760_s5 + $0x20] sm:$0xff] %vm636_vm0, %v13092_v57  ;;  %v13101_v50 = vmul.f32 %v13099_v21, %v24736_v13  ;;  %17712 = vst.msk [vmem:[%s25239_s16 + $0x8] sm:$0xff] %vm636_vm0, %v17710_v0  ;;  %v21986_v57 = vld [vmem:[%s22746_s8 + $0x30] sm:$0xff]  ;;  %p22153_p7 = scmp.ne.s32.totalorder %s25276_s3, %s22152_s12  ;;  %p22160_p3 = scmp.lt.s32.totalorder %s22158_s26, %s22152_s12 }
 0x4f5   : > { %v13104_v59 = vadd.f32 %v13102_v6, %v13098_v12  ;;  %18064 = vst.msk [vmem:[%s25239_s16 + $0x18] sm:$0xff] %vm636_vm0, %v17714_v58  ;;  %v16152_v30 = vmul.f32 %v21986_v57, %v24729_v63 }
 0x4f6   : > { %v13103_v25 = vadd.f32 %v13101_v50, %v13097_v18  ;;  %p22154_p11 = pnand %p22153_p7, %p25793_p10  ;;  %p22161_p8 = por %p22160_p3, %p22159_p1 }
 0x4f7   : > { %18058 = vst.msk [vmem:[%s24760_s5 + $0x68] sm:$0xff] %vm636_vm0, %v13104_v59 }
 0x4f8   : > { %18057 = vst.msk [vmem:[%s24760_s5 + $0x60] sm:$0xff] %vm636_vm0, %v13103_v25  ;;  %p22155_p6 = pneg %p22154_p11 }
 0x4fa   : > { %p22162_p0 = pnand %p22161_p8, %p22155_p6 }
 0x516   : > { %v20261_v40 = vpop.f32.mrb[38].mxu1 }
 0x517   : > { %v13600_v53 = vpop.f32.mrb[39].mxu1 }
 0x518   : > { %v20303_v62 = vpop.f32.mrb[40].mxu0 }
 0x519   : > { %v14617_v8 = vadd.f32 %v20303_v62, %v20261_v40  ;;  %v14619_v4 = vsub.f32 %v20261_v40, %v20303_v62  ;;  %v14102_v54 = vpop.f32.mrb[41].mxu0 }
 0x51a   : > { %v14616_v2 = vadd.f32 %v14102_v54, %v13600_v53  ;;  %v14618_v19 = vsub.f32 %v13600_v53, %v14102_v54  ;;  %v21987_v53 = vld [vmem:[%s22746_s8 + $0x78] sm:$0xff]  ;;  %v21988_v54 = vld [vmem:[%s22746_s8 + $0x70] sm:$0xff] }
 0x51b   : > { %v14623_v38 = vmul.f32 %v21976_v41, %v14617_v8  ;;  %v14633_v36 = vmul.f32 %v21977_v49, %v14617_v8  ;;  %v16164_v62 = vmul.f32 %v21987_v53, %v24729_v63 }
 0x51c   : > { %v14622_v22 = vmul.f32 %v21978_v46, %v14616_v2  ;;  %v14632_v28 = vmul.f32 %v21979_v20, %v14616_v2  ;;  %v16163_v2 = vmul.f32 %v21988_v54, %v24729_v63 }
 0x542   : > { %v20345_v37 = vpop.f32.mrb[40].mxu1 }
 0x543   : > { %v14621_v9 = vsub.f32 %v14619_v4, %v20345_v37  ;;  %v14606_v7 = vpop.f32.mrb[41].mxu1 }
 0x544   : > { %v14620_v34 = vsub.f32 %v14618_v19, %v14606_v7  ;;  %v20387_v1 = vpop.f32.mrb[42].mxu0 }
 0x545   : > { %v14625_v17 = vmul.f32 %v21977_v49, %v14621_v9  ;;  %v14631_v5 = vmul.f32 %v21976_v41, %v14621_v9  ;;  %v15130_v23 = vpop.f32.mrb[43].mxu0 }
 0x546   : > { %v14624_v31 = vmul.f32 %v21979_v20, %v14620_v34  ;;  %v14630_v10 = vmul.f32 %v21978_v46, %v14620_v34 }
 0x547   : > { %v14627_v45 = vadd.f32 %v14625_v17, %v14623_v38  ;;  %v14635_v24 = vsub.f32 %v14631_v5, %v14633_v36 }
 0x548   : > { %v14626_v33 = vadd.f32 %v14624_v31, %v14622_v22  ;;  %v14634_v15 = vsub.f32 %v14630_v10, %v14632_v28 }
 0x549   : > { %v25224_v61 = vadd.f32 %v14627_v45, %v25153_v47  ;;  %v25227_v14 = vadd.f32 %v14635_v24, %v25158_v27  ;;  %v21982_v47 = vld [vmem:[%s22736_s25] sm:$0xff] }
 0x54a   : > { %v25230_v44 = vadd.f32 %v14626_v33, %v25161_v48  ;;  %v25233_v3 = vadd.f32 %v14634_v15, %v25166_v32  ;;  %v17709_v27 = vmul.f32 %v21982_v47, %v17708_v16  ;;  %v21983_v48 = vld [vmem:[%s22736_s25 + $0x10] sm:$0xff]  ;;  %s18073_s25 = sshll.u32 %s25610_s18, 4 }
 0x54b   : > { %v17713_v32 = vmul.f32 %v21983_v48, %v17708_v16  ;;  %s17775_s7 = sadd.s32 %s21802_s1, %s18073_s25 }
 0x54c   : > { %17711 = vst.msk [vmem:[%s25239_s16] sm:$0xff] %vm636_vm0, %v17709_v27  ;;  %s18074_s9 = sshll.u32 %s17775_s7, 7 }
 0x54d   : > { %18063 = vst.msk [vmem:[%s25239_s16 + $0x10] sm:$0xff] %vm636_vm0, %v17713_v32  ;;  %s25274_s8 = scalar_lea.hbm %s25792_s23, %s18074_s9 }
 0x56e   : > { %v20429_v26 = vpop.f32.mrb[42].mxu1 }
 0x56f   : > { %v16147_v52 = vsub.f32 %v20387_v1, %v20429_v26  ;;  %v15632_v35 = vpop.f32.mrb[43].mxu1 }
 0x570   : > { %v16146_v56 = vsub.f32 %v15130_v23, %v15632_v35  ;;  %v20471_v60 = vpop.f32.mrb[44].mxu0 }
 0x571   : > { %v16155_v43 = vmul.f32 %v21985_v42, %v16147_v52  ;;  %v16149_v12 = vsub.f32 %v20471_v60, %v20387_v1  ;;  %v16136_v29 = vpop.f32.mrb[45].mxu0 }
 0x572   : > { %v16154_v18 = vmul.f32 %v21985_v42, %v16146_v56  ;;  %v16148_v21 = vsub.f32 %v16136_v29, %v15130_v23 }
 0x573   : > { %v16157_v6 = vmul.f32 %v16155_v43, %v24736_v13  ;;  %v16151_v50 = vsub.f32 %v16149_v12, %v20429_v26 }
 0x574   : > { %v16156_v59 = vmul.f32 %v16154_v18, %v24736_v13  ;;  %v16150_v25 = vsub.f32 %v16148_v21, %v15632_v35 }
 0x575   : > { %v16159_v40 = vadd.f32 %v16157_v6, %v16153_v51  ;;  %v16166_v8 = vmul.f32 %v21985_v42, %v16151_v50 }
 0x576   : > { %v16158_v4 = vadd.f32 %v16156_v59, %v16152_v30  ;;  %v16165_v19 = vmul.f32 %v21985_v42, %v16150_v25 }
 0x577   : > { %18060 = vst.msk [vmem:[%s24760_s5 + $0x38] sm:$0xff] %vm636_vm0, %v16159_v40  ;;  %v16168_v37 = vmul.f32 %v16166_v8, %v24736_v13 }
 0x578   : > { %18059 = vst.msk [vmem:[%s24760_s5 + $0x30] sm:$0xff] %vm636_vm0, %v16158_v4  ;;  %v16167_v9 = vmul.f32 %v16165_v19, %v24736_v13 }
 0x579   : > { %v16170_v7 = vadd.f32 %v16168_v37, %v16164_v62 }
 0x57a   : > { %v16169_v34 = vadd.f32 %v16167_v9, %v16163_v2 }
 0x57b   : > { %18062 = vst.msk [vmem:[%s24760_s5 + $0x78] sm:$0xff] %vm636_vm0, %v16170_v7 }
 0x57c   : > { %18061 = vst.msk [vmem:[%s24760_s5 + $0x70] sm:$0xff] %vm636_vm0, %v16169_v34 }
 0x57d   : > { %22165 = shalt.err (!%p22162_p0)
}
 0x57e   : > { %s22166_s5 = scalar_lea.hbm %s25274_s8, 2048  ;;  %s22170_s7 = scalar_lea.hbm %s25792_s23, 12288 }
 0x57f   : > { %p22167_p13 = scmp.ne.s32.totalorder %s25274_s8, %s22166_s5  ;;  %p22171_p12 = scmp.lt.u32.totalorder %s25274_s8, %s25792_s23 }
 0x580   : > { %p22172_p9 = scmp.lt.u32.totalorder %s22170_s7, %s22166_s5  ;;  %p22174_p7 = scmp.lt.u32.totalorder %s22166_s5, %s25274_s8 }
 0x581   : > { %p22168_p4 = pnand %p22167_p13, %p25793_p10 }
 0x582   : > { %p22173_p5 = por %p22172_p9, %p22171_p12 }
 0x583   : > { %p22169_p2 = pneg %p22168_p4 }
 0x584   : > { %p22175_p11 = por %p22174_p7, %p22173_p5 }
 0x586   : > { %p22176_p6 = pnand %p22175_p11, %p22169_p2 }
 0x588   : > { %22179 = shalt.err (!%p22176_p6)
}
 0x589   : > { %s22333_s30 = smov 128   ;;  %s22334_s12 = smov 8   ;;  %v21989_v20 = vld [vmem:[%s22748_s19 + $0x38] sm:$0xff]  ;;  %v21991_v33 = vld [vmem:[%s22748_s19 + $0x30] sm:$0xff]  ;;  %v17719_v35 = vld [vmem:[%s25239_s16 + $0x8] sm:$0xff] }
 0x58a   : > { %21822 = dma.vmem_to_hbm [thread:$0]  (%p25793_p10), %s25276_s3, 2048, %s25274_s8, %s17742_s21, %s22333_s30, %s22333_s30, %s22334_s12  }
 0x58b   : > { %s18029_s27 = sld [smem:[#allocation2 + $0x3]]  ;;  %s21801_s10 = smul.u32 12, %s25609_s17  ;;  %v21990_v31 = vld [vmem:[%s22748_s19 + $0x78] sm:$0xff]  ;;  %v21992_v16 = vld [vmem:[%s22748_s19 + $0x70] sm:$0xff]  ;;  %v17718_v43 = vld [vmem:[%s25239_s16] sm:$0xff] }
 0x58c   : > { %s18071_s3 = sshll.u32 %s25610_s18, 2  ;;  %v18066_v56 = vld [vmem:[%s25239_s16 + $0x18] sm:$0xff]  ;;  %v18065_v12 = vld [vmem:[%s25239_s16 + $0x10] sm:$0xff]  ;;  %s17757_s18 = sshll.u32 %s25239_s16, 4  ;;  %s25329_s18 = int_to_ptr.vmem [resolvable:$true] %s17757_s18 }
 0x58d   : > { %s17754_s17 = sadd.s32 %s21801_s10, %s18071_s3  ;;  %s25794_s26 = sld [smem:[#allocation93_spill]] }
 0x58e   : > { %s18072_s19 = sshll.u32 %s17754_s17, 7  ;;  %s17737_s1 = scalar_lea.sflag [#allocation4], %s22731_s11 }
 0x58f   : > { %s22180_s25 = scalar_lea.vmem %s25329_s18, 512  ;;  %s22335_s7 = smov [#allocation12]  }
 0x590   : > { %p22181_p1 = scmp.ne.s32.totalorder %s25329_s18, %s22180_s25  ;;  %s22184_s9 = sshll.u32 %s22335_s7, 4  ;;  %s22185_s9 = int_to_ptr.vmem [resolvable:$false] %s22184_s9 }
 0x591   : > { %v17720_v27 = vstv %s18029_s27  ;;  %s22186_s24 = scalar_lea.vmem %s22185_s9, 1024  ;;  %p22187_p0 = scmp.lt.s32.totalorder %s25329_s18, %s22185_s9 }
 0x592   : > { %p22182_p3 = pnand %p22181_p1, %p25793_p10  ;;  %p22188_p13 = scmp.lt.s32.totalorder %s22186_s24, %s22180_s25 }
 0x593   : > { %s25327_s5 = scalar_lea.hbm %s25794_s26, %s18072_s19 }
 0x594   : > { %p22183_p8 = pneg %p22182_p3  ;;  %p22189_p4 = por %p22188_p13, %p22187_p0 }
 0x596   : > { %p22190_p2 = pnand %p22189_p4, %p22183_p8 }
 0x59a   : > { %v20513_v63 = vpop.f32.mrb[44].mxu1 }
 0x59b   : > { %v16666_v13 = vpop.f32.mrb[45].mxu1 }
 0x59c   : > { %v20555_v1 = vpop.f32.mrb[46].mxu0 }
 0x59d   : > { %v17683_v41 = vadd.f32 %v20555_v1, %v20513_v63  ;;  %v17685_v38 = vsub.f32 %v20513_v63, %v20555_v1  ;;  %v17168_v49 = vpop.f32.mrb[47].mxu0 }
 0x59e   : > { %v17682_v36 = vadd.f32 %v17168_v49, %v16666_v13  ;;  %v17684_v17 = vsub.f32 %v16666_v13, %v17168_v49 }
 0x59f   : > { %v17689_v28 = vmul.f32 %v21989_v20, %v17683_v41  ;;  %v17699_v10 = vmul.f32 %v21990_v31, %v17683_v41 }
 0x5a0   : > { %v17688_v15 = vmul.f32 %v21991_v33, %v17682_v36  ;;  %v17698_v11 = vmul.f32 %v21992_v16, %v17682_v36 }
 0x5c6   : > { %v20597_v5 = vpop.f32.mrb[46].mxu1 }
 0x5c7   : > { %v17687_v23 = vsub.f32 %v17685_v38, %v20597_v5  ;;  %v17672_v46 = vpop.f32.mrb[47].mxu1 }
 0x5c8   : > { %v17686_v22 = vsub.f32 %v17684_v17, %v17672_v46 }
 0x5c9   : > { %v17691_v45 = vmul.f32 %v21990_v31, %v17687_v23  ;;  %v17697_v24 = vmul.f32 %v21989_v20, %v17687_v23 }
 0x5ca   : > { %v17690_v0 = vmul.f32 %v21992_v16, %v17686_v22  ;;  %v17696_v55 = vmul.f32 %v21991_v33, %v17686_v22 }
 0x5cb   : > { %v17693_v58 = vadd.f32 %v17691_v45, %v17689_v28  ;;  %v17701_v47 = vsub.f32 %v17697_v24, %v17699_v10 }
 0x5cc   : > { %v17692_v48 = vadd.f32 %v17690_v0, %v17688_v15  ;;  %v17700_v32 = vsub.f32 %v17696_v55, %v17698_v11 }
 0x5cd   : > { %v17695_v26 = vadd.f32 %v17693_v58, %v25224_v61  ;;  %v17703_v52 = vadd.f32 %v17701_v47, %v25227_v14 }
 0x5ce   : > { %v17694_v60 = vadd.f32 %v17692_v48, %v25230_v44  ;;  %v17702_v39 = vadd.f32 %v17700_v32, %v25233_v3 }
 0x5cf   : > { %v17722_v51 = vmul.f32 %v17720_v27, %v17695_v26  ;;  %v17731_v42 = vmul.f32 %v17720_v27, %v17703_v52 }
 0x5d0   : > { %v17721_v61 = vmul.f32 %v17720_v27, %v17694_v60  ;;  %v17730_v14 = vmul.f32 %v17720_v27, %v17702_v39 }
 0x5d1   : > { %v17724_v29 = vadd.f32 %v17722_v51, %v17719_v35  ;;  %v17733_v57 = vadd.f32 %v18066_v56, %v17731_v42 }
 0x5d2   : > { %v17723_v30 = vadd.f32 %v17721_v61, %v17718_v43  ;;  %v17732_v44 = vadd.f32 %v18065_v12, %v17730_v14 }
 0x5d3   : > { %17726 = vst.msk [vmem:[%s25239_s16 + $0x8] sm:$0xff] %vm636_vm0, %v17724_v29  ;;  %18068 = vst.msk [vmem:[%s25239_s16 + $0x18] sm:$0xff] %vm636_vm0, %v17733_v57 }
 0x5d4   : > { %17725 = vst.msk [vmem:[%s25239_s16] sm:$0xff] %vm636_vm0, %v17723_v30  ;;  %18067 = vst.msk [vmem:[%s25239_s16 + $0x10] sm:$0xff] %vm636_vm0, %v17732_v44 }
 0x5d5   : > { %22193 = shalt.err (!%p22190_p2)
}
 0x5d6   : > { %s22194_s16 = scalar_lea.hbm %s25327_s5, 512  ;;  %s22198_s3 = scalar_lea.hbm %s25794_s26, 3072 }
 0x5d7   : > { %p22195_p12 = scmp.ne.s32.totalorder %s25327_s5, %s22194_s16  ;;  %p22199_p7 = scmp.lt.u32.totalorder %s25327_s5, %s25794_s26 }
 0x5d8   : > { %p22200_p11 = scmp.lt.u32.totalorder %s22198_s3, %s22194_s16  ;;  %p22202_p1 = scmp.lt.u32.totalorder %s22194_s16, %s25327_s5 }
 0x5d9   : > { %p22196_p9 = pnand %p22195_p12, %p25793_p10 }
 0x5da   : > { %p22201_p6 = por %p22200_p11, %p22199_p7 }
 0x5db   : > { %p22197_p5 = pneg %p22196_p9 }
 0x5dc   : > { %p22203_p3 = por %p22202_p1, %p22201_p6 }
 0x5de   : > { %p22204_p8 = pnand %p22203_p3, %p22197_p5 }
 0x5e0   : > { %22207 = shalt.err (!%p22204_p8)
}
 0x5e1   : > { %21821 = dma.vmem_to_hbm [thread:$0]  (%p25793_p10), %s25329_s18, 512, %s25327_s5, %s17737_s1, %s22333_s30, %s22333_s30, %s22334_s12  }
 0x5e2 PF: > { %s25795_s8 = sld [smem:[#allocation22_spill]]  ;;  %s25796_s21 = sld [smem:[#allocation29_spill]] }
 0x5e3   : > { %p21859_p0 = scmp.ge.s32.totalorder %s22322_s15, 2 }
 0x5e8   : > { %s17793_s25 = sand.u32 1, %s25795_s8   ;;  %p25797_p13 = scmp.ne.s32.totalorder %s25796_s21, 0 }
 0x5e9   : > { %s17794_s7 = scalar_lea.sflag [#allocation4], %s17793_s25 }
 0x5ea   : > { %p21846_p4 = pnand %p21859_p0, %p25797_p13 }
 0x5ec   : > { %22273 = dma.done.wait (!%p21846_p4), %s17794_s7, 512  }
 0x5ed   : > { %22275 = vsyncadd (!%p21846_p4), %s17794_s7, 4294966784  ;;  %s17803_s20 = scalar_lea.sflag [#allocation14], %s17793_s25 }
 0x5ee   : > { %22277 = dma.done.wait (!%p21846_p4), %s17803_s20, 2048  }
 0x5ef   : > { %22279 = vsyncadd (!%p21846_p4), %s17803_s20, 4294965248  ;;  %s28_s15 = sadd.s32 1, %s22322_s15   ;;  %s25798_s30 = sld [smem:[#allocation23_spill]] }
 0x5f0   : > { %p25_p2 = scmp.ge.s32.totalorder %s28_s15, 8   ;;  %s25799_s9 = sld [smem:[#allocation24_spill]] }
 0x5f1   : > { %s25800_s10 = sld [smem:[#allocation33_spill]]  ;;  %s25801_s18 = sld [smem:[#allocation30_spill]] }
 0x5f2   : > { %s25802_s5 = sld [smem:[#allocation32_spill]]  ;;  %s25803_s27 = smov %s22286_s28 }
 0x5f3   : > { %s25804_s28 = smov %s22290_s29  ;;  %s25805_s29 = smov %s22665_s22 }
 0x5f4   : > { %s25806_s11 = smov %s22314_s13  ;;  %s25807_s12 = smov %s22318_s14 }
 0x5f5   :  { %27 = sbr.rel (!%p25_p2) target bundleno = 18 (0x12), region = 167 }
 0x5f7   : > { %s25808_s13 = smov %s25801_s18 }
 0x5f8   : > { %s25809_s14 = smov %s25802_s5 }
 0x5fc   :  { %17808 = vsyncpa [#allocation3], 1 }
 0x5fd   :  { %17810 = vsyncpa [#allocation3 + $0x1], 1 }
 0x5fe   :  { %17811 = vsyncpa [#allocation8], 1 }
 0x5ff   :  { %17812 = vsyncpa [#allocation4], 1 }
 0x600   :  { %17814 = vsyncpa [#allocation4 + $0x1], 1 }
 0x601   :  { %17815 = vsyncpa [#allocation14], 1 }
 0x602   :  { %17817 = vsyncpa [#allocation14 + $0x1], 1 }
 0x603   :  { %17818 = vsyncpa [#allocation5], 1 }
 0x604   :  { %17820 = vsyncpa [#allocation5 + $0x1], 1 }

// kernel: tpu_custom_call.1
= control target key start
LH: loop header
LB: loop body
LE: loop exit
PB: predicated region body
PF: predicated region fallthrough
CT: control target
= control target key end

     0   :  { %s6217_s0 = inlined_call_operand.hbm [shape: f32[4], index: 0, kind: input, shape index: {}]   ;;  %s6218_s1 = inlined_call_operand.hbm [shape: f32[3,16,16], index: 1, kind: input, shape index: {}]   ;;  %s6219_s2 = inlined_call_operand.hbm [shape: f32[3,16,16], index: 2, kind: input, shape index: {}]   ;;  %s6220_s3 = inlined_call_operand.hbm [shape: f32[2,3,2,16,16], index: 3, kind: input, shape index: {}]   ;;  %s6221_s4 = inlined_call_operand.hbm [shape: f32[2,3,2,4,16,16], index: 4, kind: input, shape index: {}]   ;;  %s6222_s5 = inlined_call_operand.vmem [shape: f32[2,3,1,16], index: 5, kind: input, shape index: {}]   ;;  %s6223_s6 = inlined_call_operand.hbm [shape: f32[2,2,4,16,16], index: 6, kind: input, shape index: {}]   ;;  %s6224_s7 = inlined_call_operand.hbm [shape: f32[2,3,2,16,16], index: 7, kind: output, shape index: {0}]   ;;  %s6225_s8 = inlined_call_operand.hbm [shape: f32[2,3,2,4,16,16], index: 8, kind: output, shape index: {1}]  }
   0x1   :  { %6268 = sst [smem:[#allocation46_spill]] %s6218_s1 }
   0x2   :  { %6269 = sst [smem:[#allocation47_spill]] %s6220_s3 }
   0x3   :  { %6270 = sst [smem:[#allocation48_spill]] %s6222_s5 }
   0x4   :  { %6271 = sst [smem:[#allocation49_spill]] %s6224_s7 }
   0x5   :  { %6272 = sst [smem:[#allocation50_spill]] %s6225_s8 }
   0x6   :  { %14 = vsyncpa [#allocation5], 0 }
   0x7   :  { %15 = vsyncpa [#allocation3], 0 }
   0x8   :  { %16 = vsyncpa [#allocation8], 0 }
   0x9   :  { %17 = vsyncpa [#allocation4], 0 }
   0xa   :  { %19 = vsyncpa [#allocation4 + $0x1], 0 }
   0xb   :  { %20 = vsyncpa [#allocation14], 0 }
   0xc   :  { %22 = vsyncpa [#allocation14 + $0x1], 0  ;;  %s5093_s27 = smov 0   ;;  %s5095_s28 = smov 0  }
   0xd   :  { %s5097_s29 = smov 0   ;;  %s5099_s30 = smov 0  }
   0xe   :  { %s5101_s9 = smov 0   ;;  %s5103_s10 = smov 0  }
   0xf   :  { %s5105_s11 = smov 0   ;;  %s5107_s12 = smov 0  }
  0x10   :  { %s5109_s13 = smov 0   ;;  %s5111_s14 = smov 0  }
  0x11   :  { %s5113_s15 = smov 0  }
  0x12 LB: > { %6273 = sst [smem:[#allocation22_spill]] %s5006_s30  ;;  %s5147_s16 = sadd.s32 4294967295, %s5034_s15   ;;  %s5034_s15 = sphi %s5113_s15, %s28_s15   ;;  %s5030_s14 = sphi %s5111_s14, %s6361_s14   ;;  %s5026_s13 = sphi %s5109_s13, %s6360_s13   ;;  %s5022_s12 = sphi %s5107_s12, %s6359_s12   ;;  %s5018_s11 = sphi %s5105_s11, %s6358_s11   ;;  %s5014_s10 = sphi %s5103_s10, %s6352_s10   ;;  %s5010_s9 = sphi %s5101_s9, %s6351_s9   ;;  %s5006_s30 = sphi %s5099_s30, %s6350_s30   ;;  %s5002_s29 = sphi %s5097_s29, %s6357_s29   ;;  %s4998_s28 = sphi %s5095_s28, %s6356_s28   ;;  %s4994_s27 = sphi %s5093_s27, %s6355_s27  }
  0x13   : > { %6274 = sst [smem:[#allocation23_spill]] %s5010_s9  ;;  %s3825_s17 = sadd.s32 4294967294, %s5034_s15  }
  0x14   : > { %6275 = sst [smem:[#allocation24_spill]] %s5014_s10  ;;  %p132_p0 = scmp.ne.s32.totalorder %s5010_s9, %s5006_s30 }
  0x15   : > { %6276 = sst [smem:[#allocation25_spill]] %s5018_s11  ;;  %p6229_p1 = scmp.eq.s32.totalorder %s5147_s16, 0 }
  0x16   : > { %6277 = sst [smem:[#allocation26_spill]] %s5022_s12  ;;  %p218_p2 = scmp.ne.s32.totalorder %s4998_s28, %s4994_s27 }
  0x17   : > { %p5157_p4 = por %p6229_p1, %p132_p0  ;;  %p250_p5 = scmp.eq.s32.totalorder %s3825_s17, 5 }
  0x18   : > { %p5163_p6 = por %p218_p2, %p6229_p1  ;;  %p3826_p7 = scmp.ge.s32.totalorder %s5034_s15, 1 }
  0x19   : > { %s6278_s18 = scalar_select %p5157_p4, 1, 0 }
  0x1a   : > { %s6280_s19 = scalar_select %p5163_p6, 1, 0 }
  0x1b   : > { %6279 = sst [smem:[#allocation27_spill]] %s6278_s18  ;;  %p5168_p8 = por %p250_p5, %p132_p0 }
  0x1c   : > { %6281 = sst [smem:[#allocation28_spill]] %s6280_s19  ;;  %p287_p9 = scmp.lt.s32.totalorder %s5034_s15, 7 }
  0x1d   : > { %s6282_s20 = scalar_select %p5168_p8, 1, 0 }
  0x1e   : > { %p5173_p10 = pnand %p3826_p7, %p287_p9  ;;  %s5036_s22 = smov [#allocation6]  }
  0x1f   : > { %6283 = sst [smem:[#allocation29_spill]] %s6282_s20  ;;  %s308_s23 = sshll.u32 %s5036_s22, 4  ;;  %s309_s23 = int_to_ptr.vmem [resolvable:$true] %s308_s23 }
  0x20   : > { %s6284_s21 = scalar_select %p5173_p10, 1, 0 }
  0x21   : > { %p4563_p11 = pneg %p5173_p10  ;;  %s6286_s1 = sld [smem:[#allocation46_spill]] }
  0x23   : > { %p5181_p12 = pnand %p4563_p11, %p6229_p1 }
  0x25   : > { %s6285_s24 = scalar_select %p5181_p12, 1, 0 }
  0x26   : > { %p5193_p0 = pneg %p5181_p12 }
  0x27   : > { %s4705_s27 = scalar_lea.hbm %s6286_s1, 768 }
  0x28   : > { %p4706_p13 = scmp.ne.s32.totalorder %s6286_s1, %s4705_s27  ;;  %p4712_p7 = scmp.lt.u32.totalorder %s4705_s27, %s6286_s1 }
  0x2a   : > { %p4708_p2 = pnand %p5193_p0, %p4706_p13 }
  0x2c   : > { %p4709_p5 = pneg %p4708_p2 }
  0x2e   : > { %p4714_p9 = pnand %p4712_p7, %p4709_p5 }
  0x30   : > { %4717 = shalt.err (!%p4714_p9)
}
  0x31   : > { %s4718_s25 = scalar_lea.vmem %s309_s23, 768  ;;  %p4726_p8 = scmp.lt.s32.totalorder %s309_s23, %s309_s23 }
  0x32   : > { %p4719_p11 = scmp.ne.s32.totalorder %s309_s23, %s4718_s25  ;;  %p4727_p6 = scmp.lt.s32.totalorder %s4718_s25, %s4718_s25 }
  0x34   : > { %p4721_p1 = pnand %p4719_p11, %p5193_p0  ;;  %p4728_p4 = por %p4727_p6, %p4726_p8 }
  0x36   : > { %p4722_p3 = pneg %p4721_p1 }
  0x38   : > { %p4729_p10 = pnand %p4728_p4, %p4722_p3 }
  0x3a   : > { %4732 = shalt.err (!%p4729_p10)
}
  0x3b   : > { %s6234_s20 = smov 128   ;;  %s6236_s7 = smov 8  }
  0x3c   : > { %4569 = dma.hbm_to_vmem [thread:$0]  (!%p5181_p12), %s6286_s1, 768, %s309_s23, [#allocation3], %s6234_s20, %s6234_s20, %s6236_s7  }
  0x3d   : > { %s43_s27 = sadd.s32 1, %s5026_s13  ;;  %s47_s17 = sadd.s32 1, %s5030_s14 }
  0x3e   : > { %p45_p1 = scmp.ge.s32.totalorder %s43_s27, 3  ;;  %s119_s25 = sadd.s32 1, %s5014_s10 }
  0x3f   : > { %p126_p3 = scmp.ne.s32.totalorder %s5014_s10, %s5010_s9  ;;  %p6250_p4 = scmp.eq.s32.totalorder %s5034_s15, 0 }
  0x40   : > { %s6363_s27 = smov (%p45_p1, %s43_s27), 0  ;;  %s6365_s17 = smov (!%p45_p1, %s47_s17), %s5030_s14 }
  0x41   : > { %6288 = sst [smem:[#allocation30_spill]] %s6363_s27  ;;  %s115_s8 = ssub.s32 %s5026_s13, %s6363_s27 }
  0x42   : > { %p49_p6 = scmp.ge.s32.totalorder %s6365_s17, 2  ;;  %p6289_p8 = scmp.eq.s32.totalorder %s5147_s16, 5 }
  0x43   : > { %p5231_p13 = por %p6250_p4, %p126_p3  ;;  %p6249_p2 = scmp.lt.s32.totalorder %s5034_s15, 6 }
  0x44   : > { %p5225_p10 = por %p6289_p8, %p126_p3  ;;  %s6367_s17 = smov (%p49_p6, %s6365_s17), 0 }
  0x45   : > { %6293 = sst [smem:[#allocation32_spill]] %s6367_s17  ;;  %s335_s26 = sand.u32 1, %s5034_s15  }
  0x46   : > { %s6290_s23 = scalar_select %p5225_p10, 1, 0 }
  0x47   : > { %s337_s20 = sand.u32 1, %s5014_s10   ;;  %s5242_s7 = ssub.s32 %s5030_s14, %s6367_s17 }
  0x48   : > { %6291 = sst [smem:[#allocation31_spill]] %s6290_s23  ;;  %s116_s1 = sor.u32 %s115_s8, %s5242_s7 }
  0x49   : > { %p117_p7 = scmp.eq.s32.totalorder %s116_s1, 0  ;;  %s3831_s27 = sshll.u32 %s337_s20, 5 }
  0x4a   : > { %s3832_s23 = sshll.u32 %s5026_s13, 2  ;;  %s4536_s11 = smul.u32 12, %s5030_s14 }
  0x4b   : > { %s5248_s5 = scalar_select %p117_p7, %s5014_s10, %s119_s25  }
  0x4c   : > { %s339_s12 = scalar_lea.vmem [#allocation9], %s3831_s27  ;;  %p5257_p9 = pnand %p6249_p2, %p5231_p13 }
  0x4d   : > { %6294 = sst [smem:[#allocation33_spill]] %s5248_s5  ;;  %s348_s19 = sshll.u32 %s339_s12, 4  ;;  %s5251_s19 = int_to_ptr.vmem [resolvable:$true] %s348_s19 }
  0x4e   : > { %s345_s8 = sadd.s32 %s4536_s11, %s3832_s23  ;;  %s5261_s17 = sshll.u32 %s337_s20, 7 }
  0x4f   : > { %s3833_s1 = sshll.u32 %s345_s8, 7  ;;  %s6296_s3 = sld [smem:[#allocation47_spill]] }
  0x50   : > { %s5268_s12 = scalar_lea.sflag [#allocation3], %s335_s26  ;;  %p4735_p1 = pneg %p5257_p9 }
  0x55   : > { %s5266_s5 = scalar_lea.hbm %s6296_s3, %s3833_s1  ;;  %s4738_s9 = scalar_lea.hbm %s6296_s3, 3072 }
  0x56   : > { %s4733_s27 = scalar_lea.hbm %s5266_s5, 512  ;;  %p4739_p8 = scmp.lt.u32.totalorder %s5266_s5, %s6296_s3 }
  0x57   : > { %p4734_p11 = scmp.ne.s32.totalorder %s5266_s5, %s4733_s27  ;;  %p4740_p13 = scmp.lt.u32.totalorder %s4738_s9, %s4733_s27 }
  0x58   : > { %p4742_p2 = scmp.lt.u32.totalorder %s4733_s27, %s5266_s5 }
  0x59   : > { %p4736_p3 = pnand %p4735_p1, %p4734_p11  ;;  %p4741_p7 = por %p4740_p13, %p4739_p8 }
  0x5b   : > { %p4737_p6 = pneg %p4736_p3  ;;  %p4743_p4 = por %p4742_p2, %p4741_p7 }
  0x5d   : > { %p4744_p5 = pnand %p4743_p4, %p4737_p6 }
  0x5f   : > { %4747 = shalt.err (!%p4744_p5)
}
  0x60   : > { %s4748_s26 = scalar_lea.vmem %s5251_s19, 512  ;;  %s5039_s8 = smov [#allocation9]  }
  0x61   : > { %p4749_p11 = scmp.ne.s32.totalorder %s5251_s19, %s4748_s26  ;;  %s4753_s1 = sshll.u32 %s5039_s8, 4  ;;  %s4754_s1 = int_to_ptr.vmem [resolvable:$false] %s4753_s1 }
  0x62   : > { %s4755_s25 = scalar_lea.vmem %s4754_s1, 1024  ;;  %p4756_p12 = scmp.lt.s32.totalorder %s5251_s19, %s4754_s1 }
  0x63   : > { %p4751_p3 = pnand %p4749_p11, %p4735_p1  ;;  %p4757_p8 = scmp.lt.s32.totalorder %s4755_s25, %s4748_s26 }
  0x65   : > { %p4752_p10 = pneg %p4751_p3  ;;  %p4758_p13 = por %p4757_p8, %p4756_p12 }
  0x67   : > { %p4759_p2 = pnand %p4758_p13, %p4752_p10 }
  0x69   : > { %4762 = shalt.err (!%p4759_p2)
}
  0x6a   : > { %s6297_s27 = smov 8   ;;  %s6298_s11 = smov 128  }
  0x6b   : > { %4576 = dma.hbm_to_vmem [thread:$0]  (!%p5257_p9), %s5266_s5, 512, %s5251_s19, %s5268_s12, %s6298_s11, %s6298_s11, %s6297_s27  }
  0x6c   : > { %s3835_s20 = sshll.u32 %s5026_s13, 4  ;;  %s4537_s9 = smul.u32 48, %s5030_s14 }
  0x6d   : > { %s362_s23 = scalar_lea.vmem [#allocation10], %s5261_s17  ;;  %s4768_s17 = scalar_lea.hbm %s6221_s4, 12288 }
  0x6e   : > { %s374_s30 = sshll.u32 %s362_s23, 4  ;;  %s371_s26 = sadd.s32 %s4537_s9, %s3835_s20  ;;  %s5302_s30 = int_to_ptr.vmem [resolvable:$true] %s374_s30 }
  0x6f   : > { %s3836_s8 = sshll.u32 %s371_s26, 7 }
  0x70   : > { %s5307_s3 = scalar_lea.hbm %s6221_s4, %s3836_s8 }
  0x71   : > { %s4763_s10 = scalar_lea.hbm %s5307_s3, 2048  ;;  %p4769_p5 = scmp.lt.u32.totalorder %s5307_s3, %s6221_s4 }
  0x72   : > { %p4764_p12 = scmp.ne.s32.totalorder %s5307_s3, %s4763_s10  ;;  %p4770_p6 = scmp.lt.u32.totalorder %s4768_s17, %s4763_s10 }
  0x73   : > { %p4772_p11 = scmp.lt.u32.totalorder %s4763_s10, %s5307_s3 }
  0x74   : > { %p4766_p4 = pnand %p4764_p12, %p4735_p1  ;;  %p4771_p7 = por %p4770_p6, %p4769_p5 }
  0x76   : > { %p4767_p10 = pneg %p4766_p4  ;;  %p4773_p3 = por %p4772_p11, %p4771_p7 }
  0x78   : > { %p4774_p8 = pnand %p4773_p3, %p4767_p10 }
  0x7a   : > { %4777 = shalt.err (!%p4774_p8)
}
  0x7b   : > { %s4778_s23 = scalar_lea.vmem %s5302_s30, 2048  ;;  %s5040_s26 = smov [#allocation10]  }
  0x7c   : > { %p4779_p13 = scmp.ne.s32.totalorder %s5302_s30, %s4778_s23  ;;  %s4783_s8 = sshll.u32 %s5040_s26, 4  ;;  %s4784_s8 = int_to_ptr.vmem [resolvable:$false] %s4783_s8 }
  0x7d   : > { %s4785_s1 = scalar_lea.vmem %s4784_s8, 4096  ;;  %p4786_p4 = scmp.lt.s32.totalorder %s5302_s30, %s4784_s8 }
  0x7e   : > { %p4781_p2 = pnand %p4779_p13, %p4735_p1  ;;  %p4787_p5 = scmp.lt.s32.totalorder %s4785_s1, %s4778_s23 }
  0x80   : > { %p4782_p12 = pneg %p4781_p2  ;;  %p4788_p6 = por %p4787_p5, %p4786_p4 }
  0x82   : > { %p4789_p7 = pnand %p4788_p6, %p4782_p12 }
  0x84   : > { %4792 = shalt.err (!%p4789_p7)
}
  0x85   : > { %4579 = dma.hbm_to_vmem [thread:$0]  (!%p5257_p9), %s5307_s3, 2048, %s5302_s30, %s5268_s12, %s6298_s11, %s6298_s11, %s6297_s27  }
  0x86   : > { %s4793_s5 = scalar_lea.hbm %s6217_s0, 16 }
  0x87   : > { %p4794_p1 = scmp.ne.s32.totalorder %s6217_s0, %s4793_s5  ;;  %p4800_p3 = scmp.lt.u32.totalorder %s4793_s5, %s6217_s0 }
  0x89   : > { %p4796_p10 = pnand %p4794_p1, %p5193_p0 }
  0x8b   : > { %p4797_p11 = pneg %p4796_p10 }
  0x8d   : > { %p4802_p8 = pnand %p4800_p3, %p4797_p11 }
  0x8f   : > { %4805 = shalt.err (!%p4802_p8)
}
  0x90   : > { %s5041_s9 = smov [#allocation2]   ;;  %p6299_p9 = scmp.ne.s32.totalorder %s6285_s24, 0 }
  0x91   : > { %s5042_s23 = smov [#allocation7]   ;;  %s205_s8 = sadd.s32 1, %s5002_s29 }
  0x92   : > { %4566 = dma.hbm_to_smem (!%p6299_p9), %s6217_s0, 16, %s5041_s9, [#allocation5]  }
  0x93   : > { %s321_s26 = sshll.u32 %s5042_s23, 4  ;;  %s4806_s25 = scalar_lea.hbm %s6219_s2, 768  ;;  %s322_s26 = int_to_ptr.vmem [resolvable:$true] %s321_s26 }
  0x94   : > { %p4807_p13 = scmp.ne.s32.totalorder %s6219_s2, %s4806_s25  ;;  %p4813_p4 = scmp.lt.u32.totalorder %s4806_s25, %s6219_s2 }
  0x96   : > { %p4809_p2 = pnand %p4807_p13, %p5193_p0 }
  0x98   : > { %p4810_p12 = pneg %p4809_p2 }
  0x9a   : > { %p4815_p5 = pnand %p4813_p4, %p4810_p12 }
  0x9c   : > { %4818 = shalt.err (!%p4815_p5)
}
  0x9d   : > { %s4819_s20 = scalar_lea.vmem %s322_s26, 768  ;;  %p4827_p10 = scmp.lt.s32.totalorder %s322_s26, %s322_s26 }
  0x9e   : > { %p4820_p6 = scmp.ne.s32.totalorder %s322_s26, %s4819_s20  ;;  %p4828_p11 = scmp.lt.s32.totalorder %s4819_s20, %s4819_s20 }
  0xa0   : > { %p4822_p7 = pnand %p4820_p6, %p5193_p0  ;;  %p4829_p3 = por %p4828_p11, %p4827_p10 }
  0xa2   : > { %p4823_p1 = pneg %p4822_p7 }
  0xa4   : > { %p4830_p8 = pnand %p4829_p3, %p4823_p1 }
  0xa6   : > { %4833 = shalt.err (!%p4830_p8)
}
  0xa7   : > { %4572 = dma.hbm_to_vmem [thread:$0]  (!%p6299_p9), %s6219_s2, 768, %s322_s26, [#allocation8], %s6298_s11, %s6298_s11, %s6297_s27  }
  0xa8   : > { %p6300_p0 = scmp.eq.s32.totalorder %s5242_s7, 0  ;;  %p212_p13 = scmp.ne.s32.totalorder %s5002_s29, %s4998_s28 }
  0xa9   : > { %s396_s24 = sand.u32 1, %s5002_s29   ;;  %s3995_s23 = sshll.u32 %s5030_s14, 11 }
  0xaa   : > { %s5377_s22 = scalar_select %p6300_p0, %s5002_s29, %s205_s8  }
  0xab   : > { %s3837_s30 = sshll.u32 %s396_s24, 7  ;;  %p6301_p2 = scmp.eq.s32.totalorder %s5034_s15, 0 }
  0xac   : > { %s5388_s25 = scalar_lea.hbm %s6223_s6, %s3995_s23  ;;  %s398_s5 = scalar_lea.vmem [#allocation11], %s3837_s30 }
  0xad   : > { %p214_p12 = por %p212_p13, %p6301_p2  ;;  %s408_s26 = sshll.u32 %s398_s5, 4  ;;  %s5390_s26 = int_to_ptr.vmem [resolvable:$true] %s408_s26 }
  0xae   : > { %p6302_p9 = scmp.lt.s32.totalorder %s5034_s15, 6  ;;  %s4834_s8 = scalar_lea.hbm %s5388_s25, 2048 }
  0xaf   : > { %p4835_p5 = scmp.ne.s32.totalorder %s5388_s25, %s4834_s8  ;;  %s4839_s18 = scalar_lea.hbm %s6223_s6, 4096 }
  0xb0   : > { %p5394_p4 = pnand %p6302_p9, %p214_p12  ;;  %p4840_p10 = scmp.lt.u32.totalorder %s5388_s25, %s6223_s6 }
  0xb1   : > { %p4841_p11 = scmp.lt.u32.totalorder %s4839_s18, %s4834_s8  ;;  %p4843_p8 = scmp.lt.u32.totalorder %s4834_s8, %s5388_s25 }
  0xb2   : > { %p4836_p6 = pneg %p5394_p4 }
  0xb3   : > { %p4842_p3 = por %p4841_p11, %p4840_p10 }
  0xb4   : > { %p4837_p7 = pnand %p4836_p6, %p4835_p5 }
  0xb5   : > { %p4844_p0 = por %p4843_p8, %p4842_p3 }
  0xb6   : > { %p4838_p1 = pneg %p4837_p7 }
  0xb8   : > { %p4845_p13 = pnand %p4844_p0, %p4838_p1 }
  0xba   : > { %4848 = shalt.err (!%p4845_p13)
}
  0xbb   : > { %s4849_s3 = scalar_lea.vmem %s5390_s26, 2048  ;;  %s5043_s24 = smov [#allocation11]  }
  0xbc   : > { %p4850_p2 = scmp.ne.s32.totalorder %s5390_s26, %s4849_s3  ;;  %s4854_s30 = sshll.u32 %s5043_s24, 4  ;;  %s4855_s30 = int_to_ptr.vmem [resolvable:$false] %s4854_s30 }
  0xbd   : > { %s4856_s23 = scalar_lea.vmem %s4855_s30, 4096  ;;  %p4857_p5 = scmp.lt.s32.totalorder %s5390_s26, %s4855_s30 }
  0xbe   : > { %p4852_p12 = pnand %p4850_p2, %p4836_p6  ;;  %p4858_p7 = scmp.lt.s32.totalorder %s4856_s23, %s4849_s3 }
  0xc0   : > { %p4853_p9 = pneg %p4852_p12  ;;  %p4859_p10 = por %p4858_p7, %p4857_p5 }
  0xc2   : > { %p4860_p11 = pnand %p4859_p10, %p4853_p9 }
  0xc4   : > { %4863 = shalt.err (!%p4860_p11)
}
  0xc5   : > { %4582 = dma.hbm_to_vmem [thread:$0]  (!%p5394_p4), %s5388_s25, 2048, %s5390_s26, %s5268_s12, %s6298_s11, %s6298_s11, %s6297_s27  }
  0xc6   : > { %p6304_p6 = scmp.ne.s32.totalorder %s6284_s21, 0 }
  0xc8   : > { %420 = sbr.rel (%p6304_p6) target bundleno = 804 (0x324), region = 48 }
  0xcf   : > { %p6305_p1 = scmp.eq.s32.totalorder %s5147_s16, 0 }
  0xd1   : > { %4965 = dma.done.wait (%p6305_p1), [#allocation5], 16   ;;  %p6306_p3 = pmov %p6305_p1 }
  0xd2   : > { %p6307_p8 = pmov %p6305_p1 }
  0xd3   : > { %4967 = vsyncadd (%p6306_p3), [#allocation5], 4294967280 }
  0xd4   : > { %4969 = dma.done.wait (%p6307_p8), [#allocation3], 768   ;;  %p6308_p0 = pmov %p6305_p1 }
  0xd6   : > { %4971 = vsyncadd (%p6308_p0), [#allocation3], 4294966528  ;;  %p6309_p13 = pmov %p6308_p0 }
  0xd7   : > { %p6310_p4 = pmov %p6308_p0 }
  0xd8   : > { %4973 = dma.done.wait (%p6309_p13), [#allocation8], 768  }
  0xd9   : > { %4975 = vsyncadd (%p6310_p4), [#allocation8], 4294966528  ;;  %s6311_s21 = sld [smem:[#allocation23_spill]]  ;;  %s434_s27 = sand.u32 1, %s5147_s16  }
  0xda   : > { %s6312_s12 = sld [smem:[#allocation27_spill]]  ;;  %s435_s10 = scalar_lea.sflag [#allocation3], %s434_s27 }
  0xdf   : > { %s5443_s11 = sand.u32 1, %s6311_s21  }
  0xe0   : > { %s3844_s1 = sshll.u32 %s5443_s11, 5  ;;  %p6313_p2 = scmp.ne.s32.totalorder %s6312_s12, 0 }
  0xe1   : > { %s438_s25 = scalar_lea.vmem [#allocation9], %s3844_s1 }
  0xe2   : > { %4977 = dma.done.wait (%p6313_p2), %s435_s10, 2560  }
  0xe3   : > { %4979 = vsyncadd (%p6313_p2), %s435_s10, 4294964736  ;;  %s6314_s5 = sld [smem:[#allocation28_spill]]  ;;  %s3845_s26 = sshll.u32 %s5443_s11, 7 }
  0xe4   : > { %s454_s7 = sand.u32 1, %s4998_s28   ;;  %s5456_s8 = scalar_lea.vmem [#allocation10], %s3845_s26 }
  0xe5   : > { %s3846_s16 = sshll.u32 %s454_s7, 7 }
  0xe6   : > { %s5458_s19 = scalar_lea.vmem [#allocation11], %s3846_s16 }
  0xe9   : > { %p6315_p12 = scmp.ne.s32.totalorder %s6314_s5, 0 }
  0xeb   : > { %4981 = dma.done.wait (%p6315_p12), %s435_s10, 2048  }
  0xec   : > { %4983 = vsyncadd (%p6315_p12), %s435_s10, 4294965248 }
  0xed   : > { %461 = sfence }
  0xee   : > { %v546_v0 = vld [vmem:[#allocation7] sm:$0xff]  ;;  %s6316_s17 = sld [smem:[#allocation26_spill]]  ;;  %s6317_s18 = sld [smem:[#allocation25_spill]]  ;;  %v547_v1 = vld [vmem:[#allocation7 + $0x8] sm:$0xff]  ;;  %v549_v2 = vld [vmem:[#allocation7 + $0x10] sm:$0xff]  ;;  %vm636_vm0 = vcmask 130048  }
  0xef   : > { %v4416_v3 = vpack.c.bf16 %v547_v1, %v546_v0  ;;  %v550_v4 = vld [vmem:[#allocation7 + $0x18] sm:$0xff]  ;;  %v5465_v5 = vld [vmem:[%s438_s25] sm:$0xff]  ;;  %v5467_v6 = vld [vmem:[%s438_s25 + $0x10] sm:$0xff]  ;;  %s6320_s21 = sld [smem:[#allocation48_spill]]  ;;  %s3850_s27 = sld [smem:[#allocation2 + $0x2]] }
  0xf0   : > { %v5470_v7 = vpack.c.bf16 %v550_v4, %v549_v2  ;;  %v5473_v8 = vld [vmem:[%s5458_s19] sm:$0xff]  ;;  %v5478_v10 = vld [vmem:[%s438_s25 + $0x8] sm:$0xff]  ;;  %v5491_v15 = vld [vmem:[%s438_s25 + $0x18] sm:$0xff]  ;;  %s5902_s10 = scalar_lea.vmem [#allocation12], %s3844_s1  ;;  %s522_s25 = sld [smem:[#allocation2]] }
  0xf1   : > { %v5476_v9 = vld [vmem:[%s5458_s19 + $0x40] sm:$0xff]  ;;  %4417 = vmatprep.subr.bf16.mxu0 %v4416_v3  ;;  %v588_v11 = vmul.f32 %v5473_v8, %v5465_v5  ;;  %v612_v13 = vmul.f32 %v5467_v6, %v5473_v8  ;;  %v5494_v16 = vld [vmem:[%s5458_s19 + $0x8] sm:$0xff]  ;;  %v552_v21 = vld [vmem:[#allocation7 + $0x20] sm:$0xff]  ;;  %s3849_s5 = sld [smem:[#allocation2 + $0x1]]  ;;  %s5932_s1 = scalar_lea.vmem [#allocation13], %s3845_s26 }
  0xf2   : > { %v596_v12 = vmul.f32 %v5476_v9, %v5467_v6  ;;  %v620_v14 = vmul.f32 %v5476_v9, %v5465_v5  ;;  %v5497_v17 = vld [vmem:[%s5458_s19 + $0x48] sm:$0xff]  ;;  %4421 = vmatprep.subr.bf16.mxu1 %v5470_v7  ;;  %4419 = vmatpush3.bf16.msra.mxu0 %v4416_v3  ;;  %v589_v18 = vmul.f32 %v5494_v16, %v5478_v10  ;;  %v553_v22 = vld [vmem:[#allocation7 + $0x28] sm:$0xff]  ;;  %v573_v23 = vld [vmem:[%s5458_s19 + $0x10] sm:$0xff]  ;;  %s6067_s16 = sld [smem:[#allocation2 + $0x3]] }
  0xf3   : > { %v597_v19 = vmul.f32 %v5497_v17, %v5491_v15  ;;  %v613_v20 = vmul.f32 %v5491_v15, %v5494_v16  ;;  %4423 = vmatpush3.bf16.msra.mxu1 %v5470_v7  ;;  %v621_v26 = vmul.f32 %v5497_v17, %v5478_v10  ;;  %v5514_v27 = vpack.c.bf16 %v553_v22, %v552_v21  ;;  %v3865_v28 = vld [vmem:[%s5458_s19 + $0x50] sm:$0xff]  ;;  %v5518_v29 = vld [vmem:[%s5458_s19 + $0x18] sm:$0xff]  ;;  %v575_v37 = vld [vmem:[%s5458_s19 + $0x20] sm:$0xff] }
  0xf4   : > { %p513_p9 = scmp.lt.s32.totalorder %s6316_s17, 1  ;;  %p515_p5 = scmp.lt.s32.totalorder %s6317_s18, 2  ;;  %v5508_v24 = vsub.f32 %v588_v11, %v596_v12  ;;  %v5510_v25 = vadd.f32 %v620_v14, %v612_v13  ;;  %6318 = vst [vmem:[#allocation34_spill] sm:$0xff] %v5518_v29  ;;  %v5521_v30 = vld [vmem:[%s5458_s19 + $0x58] sm:$0xff]  ;;  %v590_v32 = vmul.f32 %v573_v23, %v5465_v5  ;;  %v598_v33 = vmul.f32 %v3865_v28, %v5467_v6  ;;  %v3867_v41 = vld [vmem:[%s5458_s19 + $0x60] sm:$0xff]  ;;  %v576_v42 = vld [vmem:[%s5458_s19 + $0x28] sm:$0xff] }
  0xf5   : > { %6319 = vst [vmem:[#allocation35_spill] sm:$0xff] %v5521_v30  ;;  %v5528_v31 = vsub.f32 %v589_v18, %v597_v19  ;;  %v614_v34 = vmul.f32 %v5467_v6, %v573_v23  ;;  %4429 = vmatprep.subr.bf16.mxu1 %v4416_v3  ;;  %v5538_v35 = vadd.f32 %v621_v26, %v613_v20  ;;  %v3868_v45 = vld [vmem:[%s5458_s19 + $0x68] sm:$0xff]  ;;  %v577_v49 = vld [vmem:[%s5458_s19 + $0x30] sm:$0xff]  ;;  %v578_v59 = vld [vmem:[%s5458_s19 + $0x38] sm:$0xff]  ;;  %s4540_s26 = smul.u32 48, %s6316_s17  ;;  %s3991_s7 = sshll.u32 %s6317_s18, 4 }
  0xf6   : > { %s5481_s20 = scalar_select %p513_p9, %s6316_s17, 1  ;;  %4156 = vmatprep.mubr.msk.f32.mxu0 %vm636_vm0, %v5508_v24  ;;  %4172 = vmatprep.mubr.msk.f32.mxu1 %vm636_vm0, %v5510_v25  ;;  %v622_v36 = vmul.f32 %v3865_v28, %v5465_v5  ;;  %v5545_v38 = vsub.f32 %v590_v32, %v598_v33  ;;  %v591_v39 = vmul.f32 %v5518_v29, %v5478_v10  ;;  %v3869_v50 = vld [vmem:[%s5458_s19 + $0x70] sm:$0xff]  ;;  %v3870_v60 = vld [vmem:[%s5458_s19 + $0x78] sm:$0xff]  ;;  %v5600_v21 = vld [vmem:[%s5456_s8] sm:$0xff] }
  0xf7   : > { %s5526_s9 = scalar_select %p515_p5, %s6317_s18, 2  ;;  %4157 = vmatmul.mubr.msk.f32.vlgmr.msra.gmra.mrb[0].mxu0 %vm636_vm0, %v5528_v31  ;;  %4425 = vmatprep.subr.bf16.mxu0 %v5514_v27  ;;  %v599_v40 = vmul.f32 %v5521_v30, %v5491_v15  ;;  %v615_v44 = vmul.f32 %v5491_v15, %v5518_v29  ;;  %v623_v47 = vmul.f32 %v5521_v30, %v5478_v10  ;;  %v5611_v32 = vld [vmem:[%s5456_s8 + $0x8] sm:$0xff] }
  0xf8   : > { %s4538_s3 = smul.u32 3, %s5481_s20  ;;  %4173 = vmatmul.mubr.msk.f32.vlgmr.msra.gmra.mrb[0].mxu1 %vm636_vm0, %v5538_v35  ;;  %v630_v43 = vadd.f32 %v622_v36, %v614_v34  ;;  %4427 = vmatpush3.bf16.msra.mxu0 %v5514_v27  ;;  %v592_v48 = vmul.f32 %v575_v37, %v5465_v5  ;;  %v600_v51 = vmul.f32 %v3867_v41, %v5467_v6 }
  0xf9   : > { %4159 = vmatprep.mubr.msk.f32.mxu0 %vm636_vm0, %v5545_v38  ;;  %v607_v46 = vsub.f32 %v591_v39, %v599_v40  ;;  %4431 = vmatpush3.bf16.msra.mxu1 %v4416_v3  ;;  %v616_v52 = vmul.f32 %v5467_v6, %v575_v37  ;;  %v624_v53 = vmul.f32 %v3867_v41, %v5465_v5  ;;  %v5632_v37 = vld [vmem:[%s5456_s8 + $0x20] sm:$0xff]  ;;  %v5644_v41 = vld [vmem:[%s5456_s8 + $0x28] sm:$0xff]  ;;  %s4539_s20 = smul.u32 12, %s6316_s17 }
  0xfa   : > { %s518_s24 = sadd.s32 %s4538_s3, %s5526_s9  ;;  %4175 = vmatprep.mubr.msk.f32.mxu1 %vm636_vm0, %v630_v43  ;;  %v593_v54 = vmul.f32 %v576_v42, %v5478_v10  ;;  %v631_v55 = vadd.f32 %v623_v47, %v615_v44  ;;  %v601_v56 = vmul.f32 %v3868_v45, %v5491_v15  ;;  %v617_v57 = vmul.f32 %v5491_v15, %v576_v42  ;;  %v5648_v42 = vld [vmem:[%s5456_s8 + $0x30] sm:$0xff]  ;;  %s3600_s3 = sshll.u32 %s5932_s1, 4  ;;  %s6090_s3 = int_to_ptr.vmem [resolvable:$true] %s3600_s3 }
  0xfb   : > { %4160 = vmatmul.mubr.msk.f32.gmra.mrb[2].mxu0 %vm636_vm0, %v607_v46  ;;  %v625_v58 = vmul.f32 %v3868_v45, %v5478_v10  ;;  %v608_v61 = vsub.f32 %v592_v48, %v600_v51  ;;  %v632_v62 = vadd.f32 %v624_v53, %v616_v52  ;;  %v594_v63 = vmul.f32 %v577_v49, %v5465_v5  ;;  %s5583_s12 = scalar_lea.vmem %s6320_s21, %s518_s24  ;;  %v5666_v48 = vld [vmem:[%s5456_s8 + $0x48] sm:$0xff]  ;;  %s3989_s24 = sshll.u32 %s6317_s18, 2 }
  0xfc   : > { %v602_v0 = vmul.f32 %v3869_v50, %v5467_v6  ;;  %4433 = vmatprep.subr.bf16.mxu0 %v5470_v7  ;;  %4176 = vmatmul.mubr.msk.f32.gmra.mrb[2].mxu1 %vm636_vm0, %v631_v55  ;;  %v609_v1 = vsub.f32 %v593_v54, %v601_v56  ;;  %v618_v3 = vmul.f32 %v5467_v6, %v577_v49  ;;  %v5597_v20 = vld [vmem:[%s5583_s12] ss:$0 sm:$0xff]  ;;  %v5686_v56 = vld [vmem:[%s5456_s8 + $0x60] sm:$0xff]  ;;  %s6343_s21 = sld [smem:[#allocation50_spill]]  ;;  %s3564_s18 = scalar_lea.sflag [#allocation14], %s5443_s11 }
  0xfd   : > { %v633_v2 = vadd.f32 %v625_v58, %v617_v57  ;;  %v626_v4 = vmul.f32 %v3869_v50, %v5465_v5  ;;  %4162 = vmatprep.mubr.msk.f32.mxu0 %vm636_vm0, %v608_v61  ;;  %4178 = vmatprep.mubr.msk.f32.mxu1 %vm636_vm0, %v632_v62  ;;  %v595_v12 = vmul.f32 %v578_v59, %v5478_v10  ;;  %v5670_v50 = vld [vmem:[%s5456_s8 + $0x50] sm:$0xff] }
  0xfe   : > { %v610_v11 = vsub.f32 %v594_v63, %v602_v0  ;;  %v603_v13 = vmul.f32 %v3870_v60, %v5491_v15  ;;  %v619_v18 = vmul.f32 %v5491_v15, %v578_v59  ;;  %v627_v19 = vmul.f32 %v3870_v60, %v5478_v10  ;;  %4437 = vmatprep.subr.bf16.mxu1 %v5514_v27 }
  0xff   : > { %4163 = vmatmul.mubr.msk.f32.gmra.mrb[4].mxu0 %vm636_vm0, %v609_v1  ;;  %v634_v14 = vadd.f32 %v626_v4, %v618_v3  ;;  %v895_v22 = vadd.f32 %v5510_v25, %v5508_v24  ;;  %v1056_v28 = vmul.f32 %v5597_v20, %v5600_v21  ;;  %v896_v24 = vadd.f32 %v5538_v35, %v5528_v31  ;;  %v5617_v25 = vld [vmem:[%s5456_s8 + $0x10] sm:$0xff]  ;;  %v5628_v31 = vld [vmem:[%s5456_s8 + $0x18] sm:$0xff] }
 0x100   : > { %4165 = vmatprep.mubr.msk.f32.mxu0 %vm636_vm0, %v610_v11  ;;  %v611_v23 = vsub.f32 %v595_v12, %v603_v13  ;;  %4179 = vmatmul.mubr.msk.f32.gmra.mrb[4].mxu1 %vm636_vm0, %v633_v2  ;;  %v635_v26 = vadd.f32 %v627_v19, %v619_v18  ;;  %v897_v33 = vadd.f32 %v630_v43, %v5545_v38  ;;  %v5651_v43 = vld [vmem:[%s5456_s8 + $0x40] sm:$0xff]  ;;  %v5710_v3 = vld [vmem:[%s5456_s8 + $0x78] sm:$0xff]  ;;  %v5728_v18 = vld [vmem:[#allocation6 + $0x10] sm:$0xff] }
 0x101   : > { %4181 = vmatprep.mubr.msk.f32.mxu1 %vm636_vm0, %v634_v14  ;;  %v1057_v34 = vmul.f32 %v5597_v20, %v5611_v32  ;;  %v1058_v36 = vmul.f32 %v5597_v20, %v5617_v25  ;;  %v898_v35 = vadd.f32 %v631_v55, %v607_v46  ;;  %6321 = vst [vmem:[#allocation36_spill] sm:$0xff] %v5632_v37  ;;  %6322 = vst [vmem:[#allocation37_spill] sm:$0xff] %v5644_v41  ;;  %v5661_v46 = vld [vmem:[%s5456_s8 + $0x38] sm:$0xff] }
 0x102   : > { %v899_v38 = vadd.f32 %v632_v62, %v608_v61  ;;  %v1059_v39 = vmul.f32 %v5597_v20, %v5628_v31  ;;  %v1060_v40 = vmul.f32 %v5597_v20, %v5632_v37  ;;  %6323 = vst [vmem:[#allocation38_spill] sm:$0xff] %v5648_v42  ;;  %v901_v44 = vadd.f32 %v634_v14, %v610_v11  ;;  %v5682_v55 = vld [vmem:[%s5456_s8 + $0x58] sm:$0xff]  ;;  %v5696_v61 = vld [vmem:[%s5456_s8 + $0x68] sm:$0xff]  ;;  %v5700_v62 = vld [vmem:[%s5456_s8 + $0x70] sm:$0xff]  ;;  %s6069_s8 = sadd.s32 %s4540_s26, %s3991_s7 }
 0x103   : > { %4166 = vmatmul.mubr.msk.f32.gmra.mrb[6].mxu0 %vm636_vm0, %v611_v23  ;;  %v1062_v45 = vmul.f32 %v5597_v20, %v5648_v42  ;;  %6324 = vst [vmem:[#allocation39_spill] sm:$0xff] %v5661_v46  ;;  %v1064_v47 = vmul.f32 %v5651_v43, %v5597_v20  ;;  %v902_v49 = vadd.f32 %v635_v26, %v611_v23  ;;  %6325 = vst [vmem:[#allocation40_spill] sm:$0xff] %v5670_v50  ;;  %v5724_v14 = vld [vmem:[#allocation6] sm:$0xff]  ;;  %s3992_s9 = sshll.u32 %s6069_s8, 7 }
 0x104   : > { %4188 = vmatprep.mubr.msk.f32.mxu0 %vm636_vm0, %v895_v22  ;;  %4182 = vmatmul.mubr.msk.f32.gmra.mrb[6].mxu1 %vm636_vm0, %v635_v26  ;;  %v1063_v51 = vmul.f32 %v5597_v20, %v5661_v46  ;;  %v1065_v52 = vmul.f32 %v5666_v48, %v5597_v20  ;;  %v1066_v54 = vmul.f32 %v5670_v50, %v5597_v20 }
 0x105   : > { %4204 = vmatprep.mubr.msk.f32.mxu1 %vm636_vm0, %v1056_v28  ;;  %v1330_v53 = vsub.f32 %v1056_v28, %v1064_v47  ;;  %6326 = vst [vmem:[#allocation41_spill] sm:$0xff] %v5682_v55  ;;  %6327 = vst [vmem:[#allocation42_spill] sm:$0xff] %v5686_v56  ;;  %v1067_v58 = vmul.f32 %v5682_v55, %v5597_v20  ;;  %v1068_v60 = vmul.f32 %v5686_v56, %v5597_v20 }
 0x106   : > { %v1331_v57 = vsub.f32 %v1057_v34, %v1065_v52  ;;  %v1332_v59 = vsub.f32 %v1058_v36, %v1066_v54  ;;  %6328 = vst [vmem:[#allocation43_spill] sm:$0xff] %v5696_v61  ;;  %6329 = vst [vmem:[#allocation44_spill] sm:$0xff] %v5700_v62  ;;  %v1069_v0 = vmul.f32 %v5696_v61, %v5597_v20 }
 0x107   : > { %4189 = vmatmul.mubr.msk.f32.vlgmr.msra.gmra.mrb[8].mxu0 %vm636_vm0, %v896_v24  ;;  %v1333_v63 = vsub.f32 %v1059_v39, %v1067_v58  ;;  %6330 = vst [vmem:[#allocation45_spill] sm:$0xff] %v5710_v3  ;;  %v1071_v11 = vmul.f32 %v5710_v3, %v5597_v20 }
 0x108   : > { %4191 = vmatprep.mubr.msk.f32.mxu0 %vm636_vm0, %v897_v33  ;;  %4435 = vmatpush3.bf16.msra.mxu0 %v5470_v7  ;;  %v900_v7 = vadd.f32 %v633_v2, %v609_v1  ;;  %v1334_v1 = vsub.f32 %v1060_v40, %v1068_v60  ;;  %v1070_v2 = vmul.f32 %v5700_v62, %v5597_v20 }
 0x109   : > { %4205 = vmatmul.mubr.msk.f32.vlgmr.msra.gmra.mrb[8].mxu1 %vm636_vm0, %v1057_v34  ;;  %v1337_v13 = vsub.f32 %v1063_v51, %v1071_v11 }
 0x10a   : > { %4207 = vmatprep.mubr.msk.f32.mxu1 %vm636_vm0, %v1058_v36  ;;  %4439 = vmatpush3.bf16.msra.mxu1 %v5514_v27  ;;  %v1061_v27 = vmul.f32 %v5597_v20, %v5644_v41  ;;  %v1336_v12 = vsub.f32 %v1062_v45, %v1070_v2 }
 0x10b   : > { %4192 = vmatmul.mubr.msk.f32.gmra.mrb[10].mxu0 %vm636_vm0, %v898_v35 }
 0x10c   : > { %4194 = vmatprep.mubr.msk.f32.mxu0 %vm636_vm0, %v899_v38  ;;  %v1335_v4 = vsub.f32 %v1061_v27, %v1069_v0 }
 0x10d   : > { %4208 = vmatmul.mubr.msk.f32.gmra.mrb[10].mxu1 %vm636_vm0, %v1059_v39 }
 0x10e   : > { %4210 = vmatprep.mubr.msk.f32.mxu1 %vm636_vm0, %v1060_v40 }
 0x10f   : > { %4195 = vmatmul.mubr.msk.f32.gmra.mrb[12].mxu0 %vm636_vm0, %v900_v7 }
 0x110   : > { %4197 = vmatprep.mubr.msk.f32.mxu0 %vm636_vm0, %v901_v44  ;;  %v5732_v44 = vld [vmem:[#allocation6 + $0x8] sm:$0xff] }
 0x111   : > { %4211 = vmatmul.mubr.msk.f32.gmra.mrb[12].mxu1 %vm636_vm0, %v1061_v27 }
 0x112   : > { %4213 = vmatprep.mubr.msk.f32.mxu1 %vm636_vm0, %v1062_v45  ;;  %v5734_v45 = vld [vmem:[#allocation6 + $0x20] sm:$0xff] }
 0x113   : > { %4198 = vmatmul.mubr.msk.f32.gmra.mrb[14].mxu0 %vm636_vm0, %v902_v49 }
 0x114   : > { %4220 = vmatprep.mubr.msk.f32.mxu0 %vm636_vm0, %v1064_v47 }
 0x115   : > { %4214 = vmatmul.mubr.msk.f32.gmra.mrb[14].mxu1 %vm636_vm0, %v1063_v51 }
 0x116   : > { %4236 = vmatprep.mubr.msk.f32.mxu1 %vm636_vm0, %v1330_v53 }
 0x117   : > { %4221 = vmatmul.mubr.msk.f32.vlgmr.msra.gmra.mrb[16].mxu0 %vm636_vm0, %v1065_v52 }
 0x118   : > { %4223 = vmatprep.mubr.msk.f32.mxu0 %vm636_vm0, %v1066_v54 }
 0x119   : > { %4237 = vmatmul.mubr.msk.f32.vlgmr.msra.gmra.mrb[16].mxu1 %vm636_vm0, %v1331_v57 }
 0x11a   : > { %4239 = vmatprep.mubr.msk.f32.mxu1 %vm636_vm0, %v1332_v59 }
 0x11b   : > { %4224 = vmatmul.mubr.msk.f32.gmra.mrb[18].mxu0 %vm636_vm0, %v1067_v58 }
 0x11c   : > { %4226 = vmatprep.mubr.msk.f32.mxu0 %vm636_vm0, %v1068_v60 }
 0x11d   : > { %4240 = vmatmul.mubr.msk.f32.gmra.mrb[18].mxu1 %vm636_vm0, %v1333_v63 }
 0x11e   : > { %4242 = vmatprep.mubr.msk.f32.mxu1 %vm636_vm0, %v1334_v1 }
 0x11f   : > { %4227 = vmatmul.mubr.msk.f32.gmra.mrb[20].mxu0 %vm636_vm0, %v1069_v0 }
 0x120   : > { %4229 = vmatprep.mubr.msk.f32.mxu0 %vm636_vm0, %v1070_v2 }
 0x121   : > { %4243 = vmatmul.mubr.msk.f32.gmra.mrb[20].mxu1 %vm636_vm0, %v1335_v4 }
 0x122   : > { %4245 = vmatprep.mubr.msk.f32.mxu1 %vm636_vm0, %v1336_v12 }
 0x123   : > { %4230 = vmatmul.mubr.msk.f32.gmra.mrb[22].mxu0 %vm636_vm0, %v1071_v11 }
 0x124   : > { %4252 = vmatprep.mubr.msk.f32.mxu0 %vm636_vm0, %v5724_v14 }
 0x125   : > { %4246 = vmatmul.mubr.msk.f32.gmra.mrb[22].mxu1 %vm636_vm0, %v1337_v13 }
 0x126   : > { %4259 = vmatprep.mubr.msk.f32.mxu1 %vm636_vm0, %v5728_v18 }
 0x1ca   : > { %v4158_v19 = vpop.f32.mrb[0].mxu0 }
 0x1cb   : > { %v4174_v22 = vpop.f32.mrb[0].mxu1  ;;  %v727_v23 = vpop.f32.mrb[1].mxu0 }
 0x1cc   : > { %v1033_v26 = vsub.f32 %v4158_v19, %v4174_v22  ;;  %v856_v28 = vpop.f32.mrb[1].mxu1 }
 0x1cd   : > { %v1032_v24 = vsub.f32 %v727_v23, %v856_v28 }
 0x1ce   : > { %v4161_v33 = vpop.f32.mrb[2].mxu0 }
 0x1cf   : > { %v4440_v34 = vpack.c.bf16 %v1033_v26, %v1032_v24  ;;  %v737_v36 = vpop.f32.mrb[3].mxu0  ;;  %v4177_v35 = vpop.f32.mrb[2].mxu1 }
 0x1d0   : > { %v1035_v38 = vsub.f32 %v4161_v33, %v4177_v35  ;;  %v866_v39 = vpop.f32.mrb[3].mxu1 }
 0x1d1   : > { %4441 = vmatprep.subr.bf16.mxu0 %v4440_v34  ;;  %v1034_v40 = vsub.f32 %v737_v36, %v866_v39 }
 0x1d2   : > { %4443 = vmatpush3.bf16.msra.mxu0 %v4440_v34  ;;  %v4164_v7 = vpop.f32.mrb[4].mxu0 }
 0x1d3   : > { %v747_v27 = vpop.f32.mrb[5].mxu0  ;;  %v5736_v47 = vpack.c.bf16 %v1035_v38, %v1034_v40  ;;  %v4180_v49 = vpop.f32.mrb[4].mxu1 }
 0x1d4   : > { %v1037_v51 = vsub.f32 %v4164_v7, %v4180_v49  ;;  %v876_v52 = vpop.f32.mrb[5].mxu1 }
 0x1d5   : > { %4253 = vmatmul.mubr.msk.f32.vlgmr.msra.gmra.mrb[24].mxu0 %vm636_vm0, %v5732_v44  ;;  %v1036_v53 = vsub.f32 %v747_v27, %v876_v52 }
 0x1d6   : > { %v4167_v54 = vpop.f32.mrb[6].mxu0  ;;  %4266 = vmatprep.mubr.msk.f32.mxu0 %vm636_vm0, %v5734_v45 }
 0x1d7   : > { %v757_v57 = vpop.f32.mrb[7].mxu0  ;;  %v5742_v58 = vpack.c.bf16 %v1037_v51, %v1036_v53  ;;  %v4183_v59 = vpop.f32.mrb[6].mxu1 }
 0x1d8   : > { %v1039_v60 = vsub.f32 %v4167_v54, %v4183_v59  ;;  %v886_v63 = vpop.f32.mrb[7].mxu1 }
 0x1d9   : > { %v1038_v0 = vsub.f32 %v757_v57, %v886_v63 }
 0x1da   : > { %v4190_v1 = vpop.f32.mrb[8].mxu0 }
 0x1db   : > { %v1041_v2 = vsub.f32 %v4190_v1, %v4158_v19  ;;  %v993_v4 = vpop.f32.mrb[9].mxu0  ;;  %v5744_v11 = vpack.c.bf16 %v1039_v60, %v1038_v0 }
 0x1dc   : > { %v1040_v12 = vsub.f32 %v993_v4, %v727_v23  ;;  %v4206_v13 = vpop.f32.mrb[8].mxu1 }
 0x1dd   : > { %v1049_v34 = vsub.f32 %v1041_v2, %v4174_v22  ;;  %v1162_v3 = vpop.f32.mrb[9].mxu1 }
 0x1de   : > { %v1048_v62 = vsub.f32 %v1040_v12, %v856_v28  ;;  %v4193_v46 = vpop.f32.mrb[10].mxu0  ;;  %v5750_v28 = vld [vmem:[#allocation6 + $0x18] sm:$0xff] }
 0x1df   : > { %v1654_v42 = vadd.f32 %v1049_v34, %v1033_v26  ;;  %v1043_v61 = vsub.f32 %v4193_v46, %v4161_v33  ;;  %v1003_v56 = vpop.f32.mrb[11].mxu0 }
 0x1e0   : > { %v1653_v41 = vadd.f32 %v1048_v62, %v1032_v24  ;;  %v1042_v37 = vsub.f32 %v1003_v56, %v737_v36  ;;  %v5746_v30 = vpop.f32.mrb[10].mxu1  ;;  %v4444_v29 = vpack.c.bf16 %v1049_v34, %v1048_v62 }
 0x1e1   : > { %v1051_v55 = vsub.f32 %v1043_v61, %v4177_v35  ;;  %v5748_v50 = vpop.f32.mrb[11].mxu1 }
 0x1e2   : > { %v1050_v19 = vsub.f32 %v1042_v37, %v866_v39  ;;  %v4196_v1 = vpop.f32.mrb[12].mxu0  ;;  %4445 = vmatprep.subr.bf16.mxu1 %v4444_v29  ;;  %v4448_v23 = vpack.c.bf16 %v1654_v42, %v1653_v41  ;;  %v5758_v37 = vld [vmem:[#allocation6 + $0x28] sm:$0xff] }
 0x1e3   : > { %v2165_v4 = vadd.f32 %v1051_v55, %v1035_v38  ;;  %v1045_v22 = vsub.f32 %v4196_v1, %v4164_v7  ;;  %v1013_v2 = vpop.f32.mrb[13].mxu0  ;;  %4447 = vmatpush3.bf16.msra.mxu1 %v4444_v29 }
 0x1e4   : > { %v2164_v46 = vadd.f32 %v1050_v19, %v1034_v40  ;;  %v1044_v26 = vsub.f32 %v1013_v2, %v747_v27  ;;  %4449 = vmatprep.subr.bf16.mxu0 %v4448_v23  ;;  %v5752_v56 = vpop.f32.mrb[12].mxu1  ;;  %v5754_v24 = vpack.c.bf16 %v1051_v55, %v1050_v19 }
 0x1e5   : > { %v1053_v61 = vsub.f32 %v1045_v22, %v4180_v49  ;;  %4451 = vmatpush3.bf16.msra.mxu0 %v4448_v23  ;;  %v5756_v62 = vpop.f32.mrb[13].mxu1 }
 0x1e6   : > { %v1052_v41 = vsub.f32 %v1044_v26, %v876_v52  ;;  %v4199_v42 = vpop.f32.mrb[14].mxu0  ;;  %4260 = vmatmul.mubr.msk.f32.vlgmr.msra.gmra.mrb[24].mxu1 %vm636_vm0, %v5750_v28  ;;  %v5762_v29 = vpack.c.bf16 %v2165_v4, %v2164_v46 }
 0x1e7   : > { %v2669_v33 = vadd.f32 %v1053_v61, %v1037_v51  ;;  %v1047_v36 = vsub.f32 %v4199_v42, %v4167_v54  ;;  %v1023_v35 = vpop.f32.mrb[15].mxu0  ;;  %4273 = vmatprep.mubr.msk.f32.mxu1 %vm636_vm0, %v5724_v14 }
 0x1e8   : > { %v2668_v55 = vadd.f32 %v1052_v41, %v1036_v53  ;;  %v1046_v38 = vsub.f32 %v1023_v35, %v757_v57  ;;  %v5766_v39 = vpop.f32.mrb[14].mxu1  ;;  %4267 = vmatmul.mubr.msk.f32.vlgmr.msra.gmra.mrb[26].mxu0 %vm636_vm0, %v5758_v37  ;;  %v5770_v40 = vpack.c.bf16 %v1053_v61, %v1052_v41 }
 0x1e9   : > { %v1055_v7 = vsub.f32 %v1047_v36, %v4183_v59  ;;  %v5772_v27 = vpop.f32.mrb[15].mxu1  ;;  %4280 = vmatprep.mubr.msk.f32.mxu0 %vm636_vm0, %v5728_v18 }
 0x1ea   : > { %v1054_v49 = vsub.f32 %v1046_v38, %v886_v63  ;;  %v4222_v51 = vpop.f32.mrb[16].mxu0  ;;  %v5776_v52 = vpack.c.bf16 %v2669_v33, %v2668_v55 }
 0x1eb   : > { %v3173_v54 = vadd.f32 %v1055_v7, %v1039_v60  ;;  %v1468_v53 = vadd.f32 %v4222_v51, %v4206_v13  ;;  %v1476_v57 = vsub.f32 %v4206_v13, %v4222_v51  ;;  %v1291_v12 = vpop.f32.mrb[17].mxu0 }
 0x1ec   : > { %v3172_v34 = vadd.f32 %v1054_v49, %v1038_v0  ;;  %v1467_v19 = vadd.f32 %v1291_v12, %v1162_v3  ;;  %v1475_v1 = vsub.f32 %v1162_v3, %v1291_v12  ;;  %v4238_v23 = vpop.f32.mrb[16].mxu1  ;;  %v5778_v4 = vpack.c.bf16 %v1055_v7, %v1054_v49 }
 0x1ed   : > { %v1484_v59 = vsub.f32 %v1476_v57, %v4238_v23  ;;  %v1428_v22 = vpop.f32.mrb[17].mxu1 }
 0x1ee   : > { %v4452_v2 = vpack.c.bf16 %v1468_v53, %v1467_v19  ;;  %v1483_v46 = vsub.f32 %v1475_v1, %v1428_v22  ;;  %v4225_v26 = vpop.f32.mrb[18].mxu0  ;;  %v5780_v61 = vpack.c.bf16 %v3173_v54, %v3172_v34 }
 0x1ef   : > { %v1916_v63 = vsub.f32 %v1468_v53, %v1484_v59  ;;  %v1470_v41 = vadd.f32 %v4225_v26, %v5746_v30  ;;  %v1478_v60 = vsub.f32 %v5746_v30, %v4225_v26  ;;  %v1301_v13 = vpop.f32.mrb[19].mxu0 }
 0x1f0   : > { %v4456_v42 = vpack.c.bf16 %v1484_v59, %v1483_v46  ;;  %v1915_v0 = vsub.f32 %v1467_v19, %v1483_v46  ;;  %v1469_v3 = vadd.f32 %v1301_v13, %v5748_v50  ;;  %v1477_v33 = vsub.f32 %v5748_v50, %v1301_v13  ;;  %v4241_v36 = vpop.f32.mrb[18].mxu1  ;;  %4453 = vmatprep.subr.bf16.mxu1 %v4452_v2 }
 0x1f1   : > { %v1486_v35 = vsub.f32 %v1478_v60, %v4241_v36  ;;  %v1438_v55 = vpop.f32.mrb[19].mxu1  ;;  %4455 = vmatpush3.bf16.msra.mxu1 %v4452_v2 }
 0x1f2   : > { %v4476_v38 = vpack.c.bf16 %v1470_v41, %v1469_v3  ;;  %v1485_v7 = vsub.f32 %v1477_v33, %v1438_v55  ;;  %v4228_v49 = vpop.f32.mrb[20].mxu0  ;;  %4457 = vmatprep.subr.bf16.mxu0 %v4456_v42  ;;  %v4460_v51 = vpack.c.bf16 %v1916_v63, %v1915_v0 }
 0x1f3   : > { %v2420_v54 = vsub.f32 %v1470_v41, %v1486_v35  ;;  %v1472_v30 = vadd.f32 %v4228_v49, %v5752_v56  ;;  %v1480_v53 = vsub.f32 %v5752_v56, %v4228_v49  ;;  %v1311_v57 = vpop.f32.mrb[21].mxu0  ;;  %4459 = vmatpush3.bf16.msra.mxu0 %v4456_v42 }
 0x1f4   : > { %v4480_v12 = vpack.c.bf16 %v1486_v35, %v1485_v7  ;;  %v2419_v34 = vsub.f32 %v1469_v3, %v1485_v7  ;;  %v1471_v50 = vadd.f32 %v1311_v57, %v5756_v62  ;;  %v1479_v19 = vsub.f32 %v5756_v62, %v1311_v57  ;;  %v4244_v1 = vpop.f32.mrb[20].mxu1  ;;  %4274 = vmatmul.mubr.msk.f32.vlgmr.msra.gmra.mrb[26].mxu1 %vm636_vm0, %v5732_v44 }
 0x1f5   : > { %v1488_v23 = vsub.f32 %v1480_v53, %v4244_v1  ;;  %4461 = vmatprep.subr.bf16.mxu1 %v4460_v51  ;;  %4465 = vmatprep.subr.bf16.mxu0 %v5736_v47  ;;  %v1448_v59 = vpop.f32.mrb[21].mxu1 }
 0x1f6   : > { %v4500_v22 = vpack.c.bf16 %v1472_v30, %v1471_v50  ;;  %v1487_v2 = vsub.f32 %v1479_v19, %v1448_v59  ;;  %4463 = vmatpush3.bf16.msra.mxu1 %v4460_v51  ;;  %v4231_v56 = vpop.f32.mrb[22].mxu0  ;;  %4281 = vmatmul.mubr.msk.f32.vlgmr.msra.gmra.mrb[28].mxu0 %vm636_vm0, %v5750_v28  ;;  %v4484_v46 = vpack.c.bf16 %v2420_v54, %v2419_v34 }
 0x1f7   : > { %v2924_v26 = vsub.f32 %v1472_v30, %v1488_v23  ;;  %v1474_v62 = vadd.f32 %v4231_v56, %v5766_v39  ;;  %v1482_v63 = vsub.f32 %v5766_v39, %v4231_v56  ;;  %4469 = vmatprep.subr.bf16.mxu1 %v5754_v24  ;;  %v1321_v41 = vpop.f32.mrb[23].mxu0  ;;  %4287 = vmatprep.mubr.msk.f32.mxu1 %vm636_vm0, %v5734_v45 }
 0x1f8   : > { %v4504_v60 = vpack.c.bf16 %v1488_v23, %v1487_v2  ;;  %v2923_v13 = vsub.f32 %v1471_v50, %v1487_v2  ;;  %v1473_v42 = vadd.f32 %v1321_v41, %v5772_v27  ;;  %v1481_v0 = vsub.f32 %v5772_v27, %v1321_v41  ;;  %4467 = vmatpush3.bf16.msra.mxu0 %v5736_v47  ;;  %v4247_v3 = vpop.f32.mrb[22].mxu1 }
 0x1f9   : > { %v1490_v33 = vsub.f32 %v1482_v63, %v4247_v3  ;;  %4288 = vmatmul.mubr.msk.f32.vlgmr.msra.gmra.mrb[28].mxu1 %vm636_vm0, %v5758_v37  ;;  %4473 = vmatprep.subr.bf16.mxu0 %v5762_v29  ;;  %v1458_v39 = vpop.f32.mrb[23].mxu1 }
 0x1fa   : > { %v5806_v36 = vpack.c.bf16 %v1474_v62, %v1473_v42  ;;  %v1489_v35 = vsub.f32 %v1481_v0, %v1458_v39  ;;  %4294 = vmatprep.mubr.msk.f32.mxu0 %vm636_vm0, %v5724_v14  ;;  %4471 = vmatpush3.bf16.msra.mxu1 %v5754_v24  ;;  %v4508_v55 = vpack.c.bf16 %v2924_v26, %v2923_v13 }
 0x1fb   : > { %v3428_v27 = vsub.f32 %v1474_v62, %v1490_v33  ;;  %4295 = vmatmul.mubr.msk.f32.vlgmr.msra.gmra.mrb[30].mxu0 %vm636_vm0, %v5732_v44  ;;  %4477 = vmatprep.subr.bf16.mxu1 %v4476_v38 }
 0x1fc   : > { %v4528_v47 = vpack.c.bf16 %v1490_v33, %v1489_v35  ;;  %v3427_v7 = vsub.f32 %v1473_v42, %v1489_v35  ;;  %4301 = vmatprep.mubr.msk.f32.mxu1 %vm636_vm0, %v5728_v18  ;;  %4475 = vmatpush3.bf16.msra.mxu0 %v5762_v29 }
 0x1fd   : > { %4302 = vmatmul.mubr.msk.f32.vlgmr.msra.gmra.mrb[30].mxu1 %vm636_vm0, %v5750_v28  ;;  %4481 = vmatprep.subr.bf16.mxu0 %v4480_v12 }
 0x1fe   : > { %4308 = vmatprep.mubr.msk.f32.mxu0 %vm636_vm0, %v5734_v45  ;;  %4479 = vmatpush3.bf16.msra.mxu1 %v4476_v38  ;;  %v4532_v24 = vpack.c.bf16 %v3428_v27, %v3427_v7 }
 0x1ff   : > { %4309 = vmatmul.mubr.msk.f32.vlgmr.msra.gmra.mrb[32].mxu0 %vm636_vm0, %v5758_v37  ;;  %4485 = vmatprep.subr.bf16.mxu1 %v4484_v46 }
 0x200   : > { %4315 = vmatprep.mubr.msk.f32.mxu1 %vm636_vm0, %v5724_v14  ;;  %4483 = vmatpush3.bf16.msra.mxu0 %v4480_v12 }
 0x201   : > { %4316 = vmatmul.mubr.msk.f32.vlgmr.msra.gmra.mrb[32].mxu1 %vm636_vm0, %v5732_v44  ;;  %4489 = vmatprep.subr.bf16.mxu0 %v5742_v58 }
 0x202   : > { %4322 = vmatprep.mubr.msk.f32.mxu0 %vm636_vm0, %v5728_v18  ;;  %4487 = vmatpush3.bf16.msra.mxu1 %v4484_v46 }
 0x203   : > { %4323 = vmatmul.mubr.msk.f32.vlgmr.msra.gmra.mrb[34].mxu0 %vm636_vm0, %v5750_v28  ;;  %4493 = vmatprep.subr.bf16.mxu1 %v5770_v40 }
 0x204   : > { %4329 = vmatprep.mubr.msk.f32.mxu1 %vm636_vm0, %v5734_v45  ;;  %4491 = vmatpush3.bf16.msra.mxu0 %v5742_v58  ;;  %v3530_v58 = vstv %s3850_s27  ;;  %s6088_s27 = scalar_lea.hbm %s6343_s21, %s3992_s9 }
 0x205   : > { %4330 = vmatmul.mubr.msk.f32.vlgmr.msra.gmra.mrb[34].mxu1 %vm636_vm0, %v5758_v37  ;;  %4497 = vmatprep.subr.bf16.mxu0 %v5776_v52 }
 0x206   : > { %4336 = vmatprep.mubr.msk.f32.mxu0 %vm636_vm0, %v5724_v14  ;;  %4495 = vmatpush3.bf16.msra.mxu1 %v5770_v40 }
 0x207   : > { %4337 = vmatmul.mubr.msk.f32.vlgmr.msra.gmra.mrb[36].mxu0 %vm636_vm0, %v5732_v44  ;;  %4501 = vmatprep.subr.bf16.mxu1 %v4500_v22 }
 0x208   : > { %4343 = vmatprep.mubr.msk.f32.mxu1 %vm636_vm0, %v5728_v18  ;;  %4499 = vmatpush3.bf16.msra.mxu0 %v5776_v52 }
 0x209   : > { %4344 = vmatmul.mubr.msk.f32.vlgmr.msra.gmra.mrb[36].mxu1 %vm636_vm0, %v5750_v28  ;;  %4505 = vmatprep.subr.bf16.mxu0 %v4504_v60 }
 0x20a   : > { %4350 = vmatprep.mubr.msk.f32.mxu0 %vm636_vm0, %v5734_v45  ;;  %4503 = vmatpush3.bf16.msra.mxu1 %v4500_v22 }
 0x20b   : > { %4351 = vmatmul.mubr.msk.f32.vlgmr.msra.gmra.mrb[38].mxu0 %vm636_vm0, %v5758_v37  ;;  %4509 = vmatprep.subr.bf16.mxu1 %v4508_v55 }
 0x20c   : > { %4357 = vmatprep.mubr.msk.f32.mxu1 %vm636_vm0, %v5724_v14  ;;  %4507 = vmatpush3.bf16.msra.mxu0 %v4504_v60 }
 0x20d   : > { %4358 = vmatmul.mubr.msk.f32.vlgmr.msra.gmra.mrb[38].mxu1 %vm636_vm0, %v5732_v44  ;;  %4513 = vmatprep.subr.bf16.mxu0 %v5744_v11 }
 0x20e   : > { %4364 = vmatprep.mubr.msk.f32.mxu0 %vm636_vm0, %v5728_v18  ;;  %4511 = vmatpush3.bf16.msra.mxu1 %v4508_v55 }
 0x20f   : > { %4365 = vmatmul.mubr.msk.f32.vlgmr.msra.gmra.mrb[40].mxu0 %vm636_vm0, %v5750_v28  ;;  %4517 = vmatprep.subr.bf16.mxu1 %v5778_v4 }
 0x210   : > { %4371 = vmatprep.mubr.msk.f32.mxu1 %vm636_vm0, %v5734_v45  ;;  %4515 = vmatpush3.bf16.msra.mxu0 %v5744_v11  ;;  %v3536_v11 = vmul.f32 %v5491_v15, %v3530_v58 }
 0x211   : > { %4372 = vmatmul.mubr.msk.f32.vlgmr.msra.gmra.mrb[40].mxu1 %vm636_vm0, %v5758_v37  ;;  %4521 = vmatprep.subr.bf16.mxu0 %v5780_v61 }
 0x212   : > { %4378 = vmatprep.mubr.msk.f32.mxu0 %vm636_vm0, %v5724_v14  ;;  %4519 = vmatpush3.bf16.msra.mxu1 %v5778_v4  ;;  %3982 = vst.msk [vmem:[%s5902_s10 + $0x18] sm:$0xff] %vm636_vm0, %v3536_v11 }
 0x213   : > { %4379 = vmatmul.mubr.msk.f32.vlgmr.msra.gmra.mrb[42].mxu0 %vm636_vm0, %v5732_v44  ;;  %4525 = vmatprep.subr.bf16.mxu1 %v5806_v36 }
 0x214   : > { %4385 = vmatprep.mubr.msk.f32.mxu1 %vm636_vm0, %v5728_v18  ;;  %4523 = vmatpush3.bf16.msra.mxu0 %v5780_v61 }
 0x215   : > { %4386 = vmatmul.mubr.msk.f32.vlgmr.msra.gmra.mrb[42].mxu1 %vm636_vm0, %v5750_v28  ;;  %4529 = vmatprep.subr.bf16.mxu0 %v4528_v47 }
 0x216   : > { %4392 = vmatprep.mubr.msk.f32.mxu0 %vm636_vm0, %v5734_v45  ;;  %4527 = vmatpush3.bf16.msra.mxu1 %v5806_v36 }
 0x217   : > { %4393 = vmatmul.mubr.msk.f32.vlgmr.msra.gmra.mrb[44].mxu0 %vm636_vm0, %v5758_v37  ;;  %4533 = vmatprep.subr.bf16.mxu1 %v4532_v24 }
 0x218   : > { %4399 = vmatprep.mubr.msk.f32.mxu1 %vm636_vm0, %v5724_v14  ;;  %4531 = vmatpush3.bf16.msra.mxu0 %v4528_v47  ;;  %v3532_v14 = vmul.f32 %v3530_v58, %v5478_v10 }
 0x219   : > { %4400 = vmatmul.mubr.msk.f32.vlgmr.msra.gmra.mrb[44].mxu1 %vm636_vm0, %v5732_v44  ;;  %4406 = vmatprep.mubr.msk.f32.mxu0 %vm636_vm0, %v5728_v18  ;;  %v3531_v44 = vmul.f32 %v3530_v58, %v5465_v5  ;;  %v3535_v18 = vmul.f32 %v5467_v6, %v3530_v58  ;;  %v5912_v5 = vstv %s522_s25  ;;  %s4864_s25 = scalar_lea.vmem %s6090_s3, 2048 }
 0x21a   : > { %4535 = vmatpush3.bf16.msra.mxu1 %v4532_v24  ;;  %4413 = vmatprep.mubr.msk.f32.mxu1 %vm636_vm0, %v5734_v45  ;;  %3534 = vst.msk [vmem:[%s5902_s10 + $0x8] sm:$0xff] %vm636_vm0, %v3532_v14  ;;  %v1744_v52 = vmul.f32 %v5912_v5, %v5611_v32  ;;  %v1743_v49 = vmul.f32 %v5912_v5, %v5600_v21  ;;  %p4865_p7 = scmp.ne.s32.totalorder %s6090_s3, %s4864_s25 }
 0x21b   : > { %4407 = vmatmul.mubr.msk.f32.vlgmr.msra.gmra.mrb[46].mxu0 %vm636_vm0, %v5750_v28  ;;  %3533 = vst.msk [vmem:[%s5902_s10] sm:$0xff] %vm636_vm0, %v3531_v44  ;;  %3981 = vst.msk [vmem:[%s5902_s10 + $0x10] sm:$0xff] %vm636_vm0, %v3535_v18  ;;  %v1755_v32 = vmul.f32 %v5666_v48, %v5912_v5  ;;  %v1754_v19 = vmul.f32 %v5651_v43, %v5912_v5 }
 0x21d   : > { %4414 = vmatmul.mubr.msk.f32.vlgmr.msra.gmra.mrb[46].mxu1 %vm636_vm0, %v5758_v37  ;;  %v5914_v37 = vstv %s3849_s5  ;;  %s5044_s5 = smov [#allocation13]  }
 0x21e   : > { %s4868_s26 = sshll.u32 %s5044_s5, 4  ;;  %s4869_s26 = int_to_ptr.vmem [resolvable:$false] %s4868_s26 }
 0x21f   : > { %p4871_p1 = scmp.lt.s32.totalorder %s6090_s3, %s4869_s26 }
 0x2a8   : > { %v4254_v10 = vpop.f32.mrb[24].mxu0 }
 0x2a9   : > { %v1563_v15 = vpop.f32.mrb[25].mxu0 }
 0x2b9   : > { %v4261_v6 = vpop.f32.mrb[24].mxu1 }
 0x2ba   : > { %v1737_v45 = vsub.f32 %v4254_v10, %v4261_v6  ;;  %v1644_v28 = vpop.f32.mrb[25].mxu1 }
 0x2bb   : > { %v4268_v29 = vpop.f32.mrb[26].mxu0  ;;  %v1736_v40 = vsub.f32 %v1563_v15, %v1644_v28 }
 0x2bc   : > { %v1746_v4 = vmul.f32 %v5597_v20, %v1737_v45  ;;  %v1739_v61 = vsub.f32 %v4268_v29, %v4254_v10  ;;  %v1727_v38 = vpop.f32.mrb[27].mxu0 }
 0x2bd   : > { %v1745_v51 = vmul.f32 %v5597_v20, %v1736_v40  ;;  %v1738_v54 = vsub.f32 %v1727_v38, %v1563_v15 }
 0x2be   : > { %v1749_v30 = vmul.f32 %v5914_v37, %v1746_v4  ;;  %v1741_v53 = vsub.f32 %v1739_v61, %v4261_v6 }
 0x2bf   : > { %v1748_v57 = vmul.f32 %v5914_v37, %v1745_v51  ;;  %v1740_v12 = vsub.f32 %v1738_v54, %v1644_v28  ;;  %v2247_v28 = vmul.f32 %v5912_v5, %v5617_v25 }
 0x2c0   : > { %v1751_v34 = vadd.f32 %v1749_v30, %v1744_v52  ;;  %v1757_v50 = vmul.f32 %v5597_v20, %v1741_v53 }
 0x2c1   : > { %v1750_v1 = vadd.f32 %v1748_v57, %v1743_v49  ;;  %v1756_v21 = vmul.f32 %v5597_v20, %v1740_v12  ;;  %v6331_v49 = vld [vmem:[#allocation40_spill] sm:$0xff] }
 0x2c2   : > { %1753 = vst.msk [vmem:[%s5932_s1 + $0x8] sm:$0xff] %vm636_vm0, %v1751_v34  ;;  %v1759_v23 = vmul.f32 %v1757_v50, %v5914_v37  ;;  %v2258_v51 = vmul.f32 %v6331_v49, %v5912_v5 }
 0x2c3   : > { %1752 = vst.msk [vmem:[%s5932_s1] sm:$0xff] %vm636_vm0, %v1750_v1  ;;  %v1758_v48 = vmul.f32 %v1756_v21, %v5914_v37 }
 0x2c4   : > { %v1761_v59 = vadd.f32 %v1759_v23, %v1755_v32 }
 0x2c5   : > { %v1760_v43 = vadd.f32 %v1758_v48, %v1754_v19 }
 0x2c6   : > { %3926 = vst.msk [vmem:[%s5932_s1 + $0x48] sm:$0xff] %vm636_vm0, %v1761_v59 }
 0x2c7   : > { %3925 = vst.msk [vmem:[%s5932_s1 + $0x40] sm:$0xff] %vm636_vm0, %v1760_v43  ;;  %v4275_v22 = vpop.f32.mrb[26].mxu1 }
 0x2c8   : > { %v1831_v2 = vpop.f32.mrb[27].mxu1 }
 0x2c9   : > { %v4282_v56 = vpop.f32.mrb[28].mxu0 }
 0x2ca   : > { %v1993_v46 = vadd.f32 %v4282_v56, %v4275_v22  ;;  %v1995_v26 = vsub.f32 %v4275_v22, %v4282_v56  ;;  %v1906_v62 = vpop.f32.mrb[29].mxu0  ;;  %v6333_v56 = vld [vmem:[#allocation34_spill] sm:$0xff] }
 0x2cb   : > { %v1992_v63 = vadd.f32 %v1906_v62, %v1831_v2  ;;  %v1994_v41 = vsub.f32 %v1831_v2, %v1906_v62 }
 0x2cc   : > { %v4289_v60 = vpop.f32.mrb[28].mxu1  ;;  %v1999_v33 = vmul.f32 %v1993_v46, %v5494_v16  ;;  %v5946_v39 = vmul.f32 %v5497_v17, %v1993_v46 }
 0x2cd   : > { %v1997_v13 = vsub.f32 %v1995_v26, %v4289_v60  ;;  %v1983_v42 = vpop.f32.mrb[29].mxu1  ;;  %v1998_v27 = vmul.f32 %v1992_v63, %v5473_v8  ;;  %v5954_v47 = vmul.f32 %v5476_v9, %v1992_v63  ;;  %v6334_v26 = vld [vmem:[#allocation35_spill] sm:$0xff] }
 0x2ce   : > { %v1996_v0 = vsub.f32 %v1994_v41, %v1983_v42  ;;  %v4296_v3 = vpop.f32.mrb[30].mxu0 }
 0x2cf   : > { %v2001_v36 = vmul.f32 %v5497_v17, %v1997_v13  ;;  %v5950_v35 = vmul.f32 %v1997_v13, %v5494_v16  ;;  %v2080_v55 = vpop.f32.mrb[31].mxu0  ;;  %v4693_v13 = vld [vmem:[%s5458_s19 + $0x10] sm:$0xff] }
 0x2d0   : > { %v2000_v7 = vmul.f32 %v5476_v9, %v1996_v0  ;;  %v5958_v24 = vmul.f32 %v1996_v0, %v5473_v8  ;;  %v4303_v58 = vpop.f32.mrb[30].mxu1  ;;  %v2248_v9 = vmul.f32 %v5912_v5, %v5628_v31  ;;  %v6332_v31 = vld [vmem:[#allocation41_spill] sm:$0xff] }
 0x2d1   : > { %v5960_v14 = vadd.f32 %v2001_v36, %v1999_v33  ;;  %v2011_v17 = vsub.f32 %v5950_v35, %v5946_v39  ;;  %v2242_v11 = vsub.f32 %v4296_v3, %v4303_v58  ;;  %v2155_v16 = vpop.f32.mrb[31].mxu1  ;;  %v2259_v54 = vmul.f32 %v6332_v31, %v5912_v5 }
 0x2d2   : > { %v5964_v44 = vadd.f32 %v2000_v7, %v1998_v27  ;;  %v2010_v18 = vsub.f32 %v5958_v24, %v5954_v47  ;;  %v2241_v10 = vsub.f32 %v2080_v55, %v2155_v16  ;;  %v4310_v15 = vpop.f32.mrb[32].mxu0  ;;  %v4695_v27 = vld [vmem:[%s5458_s19 + $0x50] sm:$0xff] }
 0x2d3   : > { %v2250_v8 = vmul.f32 %v5597_v20, %v2242_v11  ;;  %v2244_v6 = vsub.f32 %v4310_v15, %v4296_v3  ;;  %v2232_v45 = vpop.f32.mrb[33].mxu0  ;;  %v4694_v3 = vld [vmem:[%s5458_s19 + $0x18] sm:$0xff] }
 0x2d4   : > { %v2249_v29 = vmul.f32 %v5597_v20, %v2241_v10  ;;  %v2243_v40 = vsub.f32 %v2232_v45, %v2080_v55  ;;  %v4317_v52 = vpop.f32.mrb[32].mxu1  ;;  %v6335_v10 = vld [vmem:[#allocation36_spill] sm:$0xff] }
 0x2d5   : > { %v2252_v4 = vmul.f32 %v2250_v8, %v5914_v37  ;;  %v2246_v61 = vsub.f32 %v2244_v6, %v4303_v58  ;;  %v2335_v38 = vpop.f32.mrb[33].mxu1  ;;  %v2751_v15 = vmul.f32 %v5912_v5, %v6335_v10 }
 0x2d6   : > { %v2251_v30 = vmul.f32 %v2249_v29, %v5914_v37  ;;  %v2245_v53 = vsub.f32 %v2243_v40, %v2155_v16  ;;  %v4324_v25 = vpop.f32.mrb[34].mxu0 }
 0x2d7   : > { %v2254_v57 = vadd.f32 %v2252_v4, %v2248_v9  ;;  %v2261_v12 = vmul.f32 %v5597_v20, %v2246_v61  ;;  %v2497_v34 = vadd.f32 %v4324_v25, %v4317_v52  ;;  %v2499_v32 = vsub.f32 %v4317_v52, %v4324_v25  ;;  %v2410_v50 = vpop.f32.mrb[35].mxu0 }
 0x2d8   : > { %v2253_v19 = vadd.f32 %v2251_v30, %v2247_v28  ;;  %v2260_v1 = vmul.f32 %v5597_v20, %v2245_v53  ;;  %v2496_v21 = vadd.f32 %v2410_v50, %v2335_v38  ;;  %v2498_v23 = vsub.f32 %v2335_v38, %v2410_v50  ;;  %v4331_v48 = vpop.f32.mrb[34].mxu1  ;;  %v6336_v28 = vld [vmem:[#allocation37_spill] sm:$0xff] }
 0x2d9   : > { %3940 = vst.msk [vmem:[%s5932_s1 + $0x18] sm:$0xff] %vm636_vm0, %v2254_v57  ;;  %v2263_v59 = vmul.f32 %v2261_v12, %v5914_v37  ;;  %v2501_v43 = vsub.f32 %v2499_v32, %v4331_v48  ;;  %v2487_v22 = vpop.f32.mrb[35].mxu1  ;;  %v2503_v46 = vmul.f32 %v2497_v34, %v6333_v56  ;;  %v2513_v62 = vmul.f32 %v6334_v26, %v2497_v34  ;;  %v6337_v12 = vld [vmem:[#allocation42_spill] sm:$0xff] }
 0x2da   : > { %3939 = vst.msk [vmem:[%s5932_s1 + $0x10] sm:$0xff] %vm636_vm0, %v2253_v19  ;;  %v2262_v2 = vmul.f32 %v2260_v1, %v5914_v37  ;;  %v2500_v63 = vsub.f32 %v2498_v23, %v2487_v22  ;;  %v4338_v41 = vpop.f32.mrb[36].mxu0  ;;  %v2502_v42 = vmul.f32 %v4693_v13, %v2496_v21  ;;  %v2512_v7 = vmul.f32 %v4695_v27, %v2496_v21 }
 0x2db   : > { %v2265_v60 = vadd.f32 %v2263_v59, %v2259_v54  ;;  %v2505_v0 = vmul.f32 %v6334_v26, %v2501_v43  ;;  %v2511_v33 = vmul.f32 %v4694_v3, %v2501_v43  ;;  %v2584_v36 = vpop.f32.mrb[37].mxu0  ;;  %v2752_v29 = vmul.f32 %v5912_v5, %v6336_v28  ;;  %v4698_v3 = vld [vmem:[%s5458_s19 + $0x20] sm:$0xff] }
 0x2dc   : > { %v2264_v55 = vadd.f32 %v2262_v2, %v2258_v51  ;;  %v2504_v58 = vmul.f32 %v4695_v27, %v2500_v63  ;;  %v2510_v11 = vmul.f32 %v4693_v13, %v2500_v63  ;;  %v4345_v16 = vpop.f32.mrb[36].mxu1  ;;  %v2762_v34 = vmul.f32 %v6337_v12, %v5912_v5  ;;  %v4696_v63 = vld [vmem:[%s5458_s19 + $0x28] sm:$0xff] }
 0x2dd   : > { %3942 = vst.msk [vmem:[%s5932_s1 + $0x58] sm:$0xff] %vm636_vm0, %v2265_v60  ;;  %v2507_v9 = vadd.f32 %v2505_v0, %v2503_v46  ;;  %v2515_v8 = vsub.f32 %v2511_v33, %v2513_v62  ;;  %v2746_v6 = vsub.f32 %v4338_v41, %v4345_v16  ;;  %v2659_v45 = vpop.f32.mrb[37].mxu1  ;;  %v4697_v60 = vld [vmem:[%s5458_s19 + $0x68] sm:$0xff] }
 0x2de   : > { %3941 = vst.msk [vmem:[%s5932_s1 + $0x50] sm:$0xff] %vm636_vm0, %v2264_v55  ;;  %v2506_v40 = vadd.f32 %v2504_v58, %v2502_v42  ;;  %v2514_v52 = vsub.f32 %v2510_v11, %v2512_v7  ;;  %v2745_v4 = vsub.f32 %v2584_v36, %v2659_v45  ;;  %v4352_v61 = vpop.f32.mrb[38].mxu0  ;;  %v4699_v58 = vld [vmem:[%s5458_s19 + $0x60] sm:$0xff] }
 0x2df   : > { %v6003_v38 = vadd.f32 %v2507_v9, %v5960_v14  ;;  %v6008_v49 = vadd.f32 %v2515_v8, %v2011_v17  ;;  %v2754_v51 = vmul.f32 %v5597_v20, %v2746_v6  ;;  %v2748_v31 = vsub.f32 %v4352_v61, %v4338_v41  ;;  %v2736_v54 = vpop.f32.mrb[39].mxu0  ;;  %v6339_v9 = vld [vmem:[#allocation38_spill] sm:$0xff] }
 0x2e0   : > { %v6012_v30 = vadd.f32 %v2506_v40, %v5964_v44  ;;  %v6017_v53 = vadd.f32 %v2514_v52, %v2010_v18  ;;  %v2753_v14 = vmul.f32 %v5597_v20, %v2745_v4  ;;  %v2747_v25 = vsub.f32 %v2736_v54, %v2584_v36  ;;  %v4359_v57 = vpop.f32.mrb[38].mxu1  ;;  %v6338_v44 = vld [vmem:[#allocation43_spill] sm:$0xff] }
 0x2e1   : > { %v2756_v39 = vmul.f32 %v2754_v51, %v5914_v37  ;;  %v2750_v35 = vsub.f32 %v2748_v31, %v4345_v16  ;;  %v2839_v17 = vpop.f32.mrb[39].mxu1  ;;  %v2763_v32 = vmul.f32 %v6338_v44, %v5912_v5  ;;  %v3255_v8 = vmul.f32 %v5912_v5, %v6339_v9  ;;  %v6340_v40 = vld [vmem:[#allocation39_spill] sm:$0xff] }
 0x2e2   : > { %v2755_v50 = vmul.f32 %v2753_v14, %v5914_v37  ;;  %v2749_v47 = vsub.f32 %v2747_v25, %v2659_v45  ;;  %v4366_v24 = vpop.f32.mrb[40].mxu0  ;;  %v3256_v52 = vmul.f32 %v5912_v5, %v6340_v40  ;;  %v4700_v25 = vld [vmem:[%s5583_s12] ss:$0 sm:$0xff]  ;;  %s6344_s12 = sld [smem:[#allocation31_spill]]  ;;  %v3542_v9 = vstv %s6067_s16 }
 0x2e3   : > { %v2758_v18 = vadd.f32 %v2756_v39, %v2752_v29  ;;  %v2765_v19 = vmul.f32 %v5597_v20, %v2750_v35  ;;  %v3001_v1 = vadd.f32 %v4366_v24, %v4359_v57  ;;  %v3003_v21 = vsub.f32 %v4359_v57, %v4366_v24  ;;  %v2914_v23 = vpop.f32.mrb[41].mxu0 }
 0x2e4   : > { %v2757_v48 = vadd.f32 %v2755_v50, %v2751_v15  ;;  %v2764_v59 = vmul.f32 %v5597_v20, %v2749_v47  ;;  %v3000_v43 = vadd.f32 %v2914_v23, %v2839_v17  ;;  %v3002_v22 = vsub.f32 %v2839_v17, %v2914_v23  ;;  %v4373_v2 = vpop.f32.mrb[40].mxu1 }
 0x2e5   : > { %3956 = vst.msk [vmem:[%s5932_s1 + $0x28] sm:$0xff] %vm636_vm0, %v2758_v18  ;;  %v2767_v56 = vmul.f32 %v2765_v19, %v5914_v37  ;;  %v3005_v46 = vsub.f32 %v3003_v21, %v4373_v2  ;;  %v2991_v26 = vpop.f32.mrb[41].mxu1  ;;  %v3007_v41 = vmul.f32 %v4696_v63, %v3001_v1  ;;  %v3017_v13 = vmul.f32 %v4697_v60, %v3001_v1  ;;  %v6342_v18 = vld [vmem:[#allocation45_spill] sm:$0xff] }
 0x2e6   : > { %3955 = vst.msk [vmem:[%s5932_s1 + $0x20] sm:$0xff] %vm636_vm0, %v2757_v48  ;;  %v2766_v62 = vmul.f32 %v2764_v59, %v5914_v37  ;;  %v3004_v20 = vsub.f32 %v3002_v22, %v2991_v26  ;;  %v4380_v42 = vpop.f32.mrb[42].mxu0  ;;  %v3006_v33 = vmul.f32 %v4698_v3, %v3000_v43  ;;  %v3016_v11 = vmul.f32 %v4699_v58, %v3000_v43 }
 0x2e7   : > { %v2769_v0 = vadd.f32 %v2767_v56, %v2763_v32  ;;  %v3009_v36 = vmul.f32 %v4697_v60, %v3005_v46  ;;  %v3015_v55 = vmul.f32 %v4696_v63, %v3005_v46  ;;  %v3088_v27 = vpop.f32.mrb[43].mxu0  ;;  %v3267_v19 = vmul.f32 %v6342_v18, %v5912_v5  ;;  %v4701_v60 = vld [vmem:[%s5458_s19 + $0x38] sm:$0xff] }
 0x2e8   : > { %v2768_v7 = vadd.f32 %v2766_v62, %v2762_v34  ;;  %v3008_v16 = vmul.f32 %v4699_v58, %v3004_v20  ;;  %v3014_v10 = vmul.f32 %v4698_v3, %v3004_v20  ;;  %v4387_v15 = vpop.f32.mrb[42].mxu1  ;;  %v4702_v20 = vld [vmem:[%s5458_s19 + $0x78] sm:$0xff]  ;;  %v4704_v58 = vld [vmem:[%s5458_s19 + $0x70] sm:$0xff]  ;;  %p6345_p10 = scmp.ne.s32.totalorder %s6344_s12, 0 }
 0x2e9   : > { %3958 = vst.msk [vmem:[%s5932_s1 + $0x68] sm:$0xff] %vm636_vm0, %v2769_v0  ;;  %v3011_v6 = vadd.f32 %v3009_v36, %v3007_v41  ;;  %v3019_v45 = vsub.f32 %v3015_v55, %v3017_v13  ;;  %v3250_v28 = vsub.f32 %v4380_v42, %v4387_v15  ;;  %v3163_v29 = vpop.f32.mrb[43].mxu1 }
 0x2ea   : > { %3957 = vst.msk [vmem:[%s5932_s1 + $0x60] sm:$0xff] %vm636_vm0, %v2768_v7  ;;  %v3010_v4 = vadd.f32 %v3008_v16, %v3006_v33  ;;  %v3018_v61 = vsub.f32 %v3014_v10, %v3016_v11  ;;  %v3249_v51 = vsub.f32 %v3088_v27, %v3163_v29  ;;  %v4394_v31 = vpop.f32.mrb[44].mxu0  ;;  %v4703_v33 = vld [vmem:[%s5458_s19 + $0x30] sm:$0xff]  ;;  %s6099_s19 = sadd.s32 %s4539_s20, %s3989_s24  ;;  %p4866_p11 = pnand %p4865_p7, %p6345_p10 }
 0x2eb   : > { %v6048_v54 = vadd.f32 %v3011_v6, %v6003_v38  ;;  %v6051_v14 = vadd.f32 %v3019_v45, %v6008_v49  ;;  %v3258_v57 = vmul.f32 %v4700_v25, %v3250_v28  ;;  %v3252_v39 = vsub.f32 %v4394_v31, %v4380_v42  ;;  %v3240_v35 = vpop.f32.mrb[45].mxu0  ;;  %v6341_v49 = vld [vmem:[#allocation44_spill] sm:$0xff] }
 0x2ec   : > { %v6056_v17 = vadd.f32 %v3010_v4, %v6012_v30  ;;  %v6059_v12 = vadd.f32 %v3018_v61, %v6017_v53  ;;  %v3257_v34 = vmul.f32 %v4700_v25, %v3249_v51  ;;  %v3251_v44 = vsub.f32 %v3240_v35, %v3088_v27  ;;  %v4401_v32 = vpop.f32.mrb[44].mxu1  ;;  %p4867_p6 = pneg %p4866_p11 }
 0x2ed   : > { %v3260_v38 = vmul.f32 %v3258_v57, %v5914_v37  ;;  %v3254_v50 = vsub.f32 %v3252_v39, %v4387_v15  ;;  %v3343_v47 = vpop.f32.mrb[45].mxu1  ;;  %v3266_v24 = vmul.f32 %v6341_v49, %v5912_v5 }
 0x2ee   : > { %v3259_v30 = vmul.f32 %v3257_v34, %v5914_v37  ;;  %v3253_v1 = vsub.f32 %v3251_v44, %v3163_v29  ;;  %v4408_v53 = vpop.f32.mrb[46].mxu0 }
 0x2ef   : > { %v3262_v21 = vadd.f32 %v3260_v38, %v3256_v52  ;;  %v3269_v23 = vmul.f32 %v4700_v25, %v3254_v50  ;;  %v3505_v48 = vadd.f32 %v4408_v53, %v4401_v32  ;;  %v3507_v59 = vsub.f32 %v4401_v32, %v4408_v53  ;;  %v3418_v43 = vpop.f32.mrb[47].mxu0 }
 0x2f0   : > { %v3261_v5 = vadd.f32 %v3259_v30, %v3255_v8  ;;  %v3268_v22 = vmul.f32 %v4700_v25, %v3253_v1  ;;  %v3504_v2 = vadd.f32 %v3418_v43, %v3343_v47  ;;  %v3506_v56 = vsub.f32 %v3343_v47, %v3418_v43  ;;  %v4415_v46 = vpop.f32.mrb[46].mxu1 }
 0x2f1   : > { %3972 = vst.msk [vmem:[%s5932_s1 + $0x38] sm:$0xff] %vm636_vm0, %v3262_v21  ;;  %v3271_v26 = vmul.f32 %v3269_v23, %v5914_v37  ;;  %v3509_v62 = vsub.f32 %v3507_v59, %v4415_v46  ;;  %v3495_v63 = vpop.f32.mrb[47].mxu1  ;;  %v3511_v13 = vmul.f32 %v4701_v60, %v3505_v48  ;;  %v3521_v42 = vmul.f32 %v4702_v20, %v3505_v48 }
 0x2f2   : > { %3971 = vst.msk [vmem:[%s5932_s1 + $0x30] sm:$0xff] %vm636_vm0, %v3261_v5  ;;  %v3270_v41 = vmul.f32 %v3268_v22, %v5914_v37  ;;  %v3508_v0 = vsub.f32 %v3506_v56, %v3495_v63  ;;  %v3510_v36 = vmul.f32 %v4703_v33, %v3504_v2  ;;  %v3520_v11 = vmul.f32 %v4704_v58, %v3504_v2 }
 0x2f3   : > { %v3273_v3 = vadd.f32 %v3271_v26, %v3267_v19  ;;  %v3513_v55 = vmul.f32 %v4702_v20, %v3509_v62  ;;  %v3519_v27 = vmul.f32 %v4701_v60, %v3509_v62 }
 0x2f4   : > { %v3272_v7 = vadd.f32 %v3270_v41, %v3266_v24  ;;  %v3512_v37 = vmul.f32 %v4704_v58, %v3508_v0  ;;  %v3518_v16 = vmul.f32 %v4703_v33, %v3508_v0 }
 0x2f5   : > { %3974 = vst.msk [vmem:[%s5932_s1 + $0x78] sm:$0xff] %vm636_vm0, %v3273_v3  ;;  %v3515_v10 = vadd.f32 %v3513_v55, %v3511_v13  ;;  %v3523_v15 = vsub.f32 %v3519_v27, %v3521_v42 }
 0x2f6   : > { %3973 = vst.msk [vmem:[%s5932_s1 + $0x70] sm:$0xff] %vm636_vm0, %v3272_v7  ;;  %v3514_v8 = vadd.f32 %v3512_v37, %v3510_v36  ;;  %v3522_v6 = vsub.f32 %v3518_v16, %v3520_v11  ;;  %s4870_s1 = scalar_lea.vmem %s4869_s26, 4096 }
 0x2f7   : > { %v3517_v45 = vadd.f32 %v3515_v10, %v6048_v54  ;;  %v3525_v28 = vadd.f32 %v3523_v15, %v6051_v14  ;;  %p4872_p3 = scmp.lt.s32.totalorder %s4870_s1, %s4864_s25 }
 0x2f9   : > { %p4873_p8 = por %p4872_p3, %p4871_p1 }
 0x2fb   : > { %p4874_p0 = pnand %p4873_p8, %p4867_p6 }
 0x2fd   : > { %4877 = shalt.err (!%p4874_p0)
}
 0x2fe   : > { %s4878_s17 = scalar_lea.hbm %s6088_s27, 2048  ;;  %s4882_s8 = scalar_lea.hbm %s6343_s21, 12288 }
 0x2ff   : > { %p4879_p13 = scmp.ne.s32.totalorder %s6088_s27, %s4878_s17  ;;  %p4883_p12 = scmp.lt.u32.totalorder %s6088_s27, %s6343_s21 }
 0x300   : > { %p4884_p9 = scmp.lt.u32.totalorder %s4882_s8, %s4878_s17  ;;  %p4886_p7 = scmp.lt.u32.totalorder %s4878_s17, %s6088_s27 }
 0x301   : > { %p4880_p4 = pnand %p4879_p13, %p6345_p10 }
 0x302   : > { %p4885_p5 = por %p4884_p9, %p4883_p12 }
 0x303   : > { %p4881_p2 = pneg %p4880_p4 }
 0x304   : > { %p4887_p11 = por %p4886_p7, %p4885_p5 }
 0x306   : > { %p4888_p6 = pnand %p4887_p11, %p4881_p2 }
 0x308   : > { %4891 = shalt.err (!%p4888_p6)
}
 0x309   : > { %s5045_s24 = smov 128   ;;  %s5046_s30 = smov 8   ;;  %v3541_v29 = vld [vmem:[%s5902_s10 + $0x8] sm:$0xff]  ;;  %v3984_v40 = vld [vmem:[%s5902_s10 + $0x18] sm:$0xff]  ;;  %v3516_v52 = vadd.f32 %v3514_v8, %v6056_v17  ;;  %v3524_v4 = vadd.f32 %v3522_v6, %v6059_v12  ;;  %v3544_v61 = vmul.f32 %v3542_v9, %v3517_v45  ;;  %v3553_v51 = vmul.f32 %v3542_v9, %v3525_v28  ;;  %v3540_v31 = vld [vmem:[%s5902_s10] sm:$0xff] }
 0x30a   : > { %4560 = dma.vmem_to_hbm [thread:$0]  (%p6345_p10), %s6090_s3, 2048, %s6088_s27, %s3564_s18, %s5045_s24, %s5045_s24, %s5046_s30  }
 0x30b   : > { %v3983_v54 = vld [vmem:[%s5902_s10 + $0x10] sm:$0xff]  ;;  %s3990_s23 = sshll.u32 %s6099_s19, 7  ;;  %s3579_s25 = sshll.u32 %s5902_s10, 4  ;;  %v3543_v14 = vmul.f32 %v3542_v9, %v3516_v52  ;;  %v3552_v25 = vmul.f32 %v3542_v9, %v3524_v4  ;;  %v3546_v57 = vadd.f32 %v3544_v61, %v3541_v29  ;;  %v3555_v39 = vadd.f32 %v3984_v40, %v3553_v51  ;;  %s6143_s25 = int_to_ptr.vmem [resolvable:$true] %s3579_s25 }
 0x30c   : > { %s6346_s18 = sld [smem:[#allocation49_spill]]  ;;  %s3559_s19 = scalar_lea.sflag [#allocation4], %s5443_s11 }
 0x30d   : > { %v3545_v35 = vadd.f32 %v3543_v14, %v3540_v31  ;;  %v3554_v17 = vadd.f32 %v3983_v54, %v3552_v25  ;;  %3548 = vst.msk [vmem:[%s5902_s10 + $0x8] sm:$0xff] %vm636_vm0, %v3546_v57  ;;  %3986 = vst.msk [vmem:[%s5902_s10 + $0x18] sm:$0xff] %vm636_vm0, %v3555_v39  ;;  %s4892_s26 = scalar_lea.vmem %s6143_s25, 512  ;;  %s5047_s1 = smov [#allocation12]  }
 0x30e   : > { %p4893_p1 = scmp.ne.s32.totalorder %s6143_s25, %s4892_s26  ;;  %s4896_s17 = sshll.u32 %s5047_s1, 4  ;;  %s4897_s17 = int_to_ptr.vmem [resolvable:$false] %s4896_s17 }
 0x30f   : > { %3547 = vst.msk [vmem:[%s5902_s10] sm:$0xff] %vm636_vm0, %v3545_v35  ;;  %3985 = vst.msk [vmem:[%s5902_s10 + $0x10] sm:$0xff] %vm636_vm0, %v3554_v17  ;;  %s4898_s7 = scalar_lea.vmem %s4897_s17, 1024  ;;  %p4899_p0 = scmp.lt.s32.totalorder %s6143_s25, %s4897_s17 }
 0x310   : > { %p4894_p3 = pnand %p4893_p1, %p6345_p10  ;;  %p4900_p13 = scmp.lt.s32.totalorder %s4898_s7, %s4892_s26 }
 0x312   : > { %s6141_s5 = scalar_lea.hbm %s6346_s18, %s3990_s23  ;;  %p4895_p8 = pneg %p4894_p3 }
 0x313   : > { %p4901_p4 = por %p4900_p13, %p4899_p0 }
 0x315   : > { %p4902_p2 = pnand %p4901_p4, %p4895_p8 }
 0x317   : > { %4905 = shalt.err (!%p4902_p2)
}
 0x318   : > { %s4906_s10 = scalar_lea.hbm %s6141_s5, 512  ;;  %s4910_s20 = scalar_lea.hbm %s6346_s18, 3072 }
 0x319   : > { %p4907_p12 = scmp.ne.s32.totalorder %s6141_s5, %s4906_s10  ;;  %p4911_p7 = scmp.lt.u32.totalorder %s6141_s5, %s6346_s18 }
 0x31a   : > { %p4912_p11 = scmp.lt.u32.totalorder %s4910_s20, %s4906_s10  ;;  %p4914_p1 = scmp.lt.u32.totalorder %s4906_s10, %s6141_s5 }
 0x31b   : > { %p4908_p9 = pnand %p4907_p12, %p6345_p10 }
 0x31c   : > { %p4913_p6 = por %p4912_p11, %p4911_p7 }
 0x31d   : > { %p4909_p5 = pneg %p4908_p9 }
 0x31e   : > { %p4915_p3 = por %p4914_p1, %p4913_p6 }
 0x320   : > { %p4916_p8 = pnand %p4915_p3, %p4909_p5 }
 0x322   : > { %4919 = shalt.err (!%p4916_p8)
}
 0x323   : > { %4559 = dma.vmem_to_hbm [thread:$0]  (%p6345_p10), %s6143_s25, 512, %s6141_s5, %s3559_s19, %s5045_s24, %s5045_s24, %s5046_s30  }
 0x324 PF: > { %s6347_s3 = sld [smem:[#allocation22_spill]]  ;;  %s6348_s27 = sld [smem:[#allocation29_spill]] }
 0x325   : > { %p4597_p0 = scmp.ge.s32.totalorder %s5034_s15, 2 }
 0x32a   : > { %s3615_s26 = sand.u32 1, %s6347_s3   ;;  %p6349_p13 = scmp.ne.s32.totalorder %s6348_s27, 0 }
 0x32b   : > { %s3616_s1 = scalar_lea.sflag [#allocation4], %s3615_s26 }
 0x32c   : > { %p4584_p4 = pnand %p4597_p0, %p6349_p13 }
 0x32e   : > { %4985 = dma.done.wait (!%p4584_p4), %s3616_s1, 512  }
 0x32f   : > { %4987 = vsyncadd (!%p4584_p4), %s3616_s1, 4294966784  ;;  %s3625_s12 = scalar_lea.sflag [#allocation14], %s3615_s26 }
 0x330   : > { %4989 = dma.done.wait (!%p4584_p4), %s3625_s12, 2048  }
 0x331   : > { %4991 = vsyncadd (!%p4584_p4), %s3625_s12, 4294965248  ;;  %s28_s15 = sadd.s32 1, %s5034_s15   ;;  %s6350_s30 = sld [smem:[#allocation23_spill]] }
 0x332   : > { %p25_p2 = scmp.ge.s32.totalorder %s28_s15, 8   ;;  %s6351_s9 = sld [smem:[#allocation24_spill]] }
 0x333   : > { %s6352_s10 = sld [smem:[#allocation33_spill]]  ;;  %s6353_s24 = sld [smem:[#allocation30_spill]] }
 0x334   : > { %s6354_s25 = sld [smem:[#allocation32_spill]]  ;;  %s6355_s27 = smov %s4998_s28 }
 0x335   : > { %s6356_s28 = smov %s5002_s29  ;;  %s6357_s29 = smov %s5377_s22 }
 0x336   : > { %s6358_s11 = smov %s5026_s13  ;;  %s6359_s12 = smov %s5030_s14 }
 0x337   :  { %27 = sbr.rel (!%p25_p2) target bundleno = 18 (0x12), region = 167 }
 0x339   : > { %s6360_s13 = smov %s6353_s24 }
 0x33a   : > { %s6361_s14 = smov %s6354_s25 }
 0x33e   :  { %3630 = vsyncpa [#allocation3], 1 }
 0x33f   :  { %3632 = vsyncpa [#allocation3 + $0x1], 1 }
 0x340   :  { %3633 = vsyncpa [#allocation8], 1 }
 0x341   :  { %3634 = vsyncpa [#allocation4], 1 }
 0x342   :  { %3636 = vsyncpa [#allocation4 + $0x1], 1 }
 0x343   :  { %3637 = vsyncpa [#allocation14], 1 }
 0x344   :  { %3639 = vsyncpa [#allocation14 + $0x1], 1 }
 0x345   :  { %3640 = vsyncpa [#allocation5], 1 }
 0x346   :  { %3642 = vsyncpa [#allocation5 + $0x1], 1 }

</bundles_post_ra>
